<compile_context>
chip_gen: v7x
topology: tpu7x:2x2x1
jax: 0.10.0
libtpu: 0.0.40
codegen_flags: <defaults>
</compile_context>

<pallas_src>
import functools

import numpy as np

import jax
import jax.numpy as jnp
from jax.experimental import pallas as pl
from jax.experimental.pallas import tpu as pltpu


# ---------------------------------------------------------------------------
# helpers
# ---------------------------------------------------------------------------
def _round_up(x, m):
    return (x + m - 1) // m * m


def _pick_tm(m):
    """>=2 parallel M tiles when possible so v7x's second TensorCore has work."""
    for tm in (256, 128):
        if m % tm == 0 and m // tm >= 2:
            return tm
    return m


# ---------------------------------------------------------------------------
# Pallas kernel: single-K-step conv GEMM with fused epilogue (conv1..conv4)
# ---------------------------------------------------------------------------
def _conv_gemm_kernel(*refs, epilogue, n_seg, seg_rows, negative_slope, eps):
    if epilogue == "leaky":
        a_ref, w_ref, b_ref, o_ref = refs
    else:  # "in_leaky"
        a_ref, w_ref, o_ref = refs

    # MXU: bf16 x bf16 inputs, f32 accumulation; whole K contraction in one step.
    acc = jnp.dot(a_ref[...], w_ref[...], preferred_element_type=jnp.float32)

    if epilogue == "in_leaky":
        # InstanceNorm2d(affine=False, eps=1e-5) + LeakyReLU(0.2).  Batch is
        # folded into M, so per-(n, c) stats are a static segmented reduction
        # over each sample's seg_rows (= full Ho*Wo) spatial rows.
        segs = []
        for s in range(n_seg):
            seg = acc[s * seg_rows:(s + 1) * seg_rows, :]
            mu = jnp.mean(seg, axis=0, keepdims=True)
            c = seg - mu
            var = jnp.mean(c * c, axis=0, keepdims=True)   # biased var (PyTorch IN)
            z = c * jax.lax.rsqrt(var + eps)
            segs.append(jnp.where(z >= 0.0, z, negative_slope * z))
        y = segs[0] if n_seg == 1 else jnp.concatenate(segs, axis=0)
    else:  # "leaky": conv bias + LeakyReLU(0.2)
        y = acc + b_ref[...]
        y = jnp.where(y >= 0.0, y, negative_slope * y)

    o_ref[...] = y.astype(o_ref.dtype)


def _conv_gemm(a, w, bias, *, tm, tn, epilogue, n_seg, seg_rows):
    m, k_pad = a.shape
    _, cout_pad = w.shape
    if epilogue == "in_leaky":
        # Segmented InstanceNorm needs the full batch-folded M in one block.
        assert tm == m
    grid = (m // tm, cout_pad // tn)

    kernel = functools.partial(_conv_gemm_kernel, epilogue=epilogue, n_seg=n_seg,
                               seg_rows=seg_rows, negative_slope=0.2, eps=1e-5)

    in_specs = [
        pl.BlockSpec((tm, k_pad), lambda i, j: (i, 0)),   # patches, single K step
        pl.BlockSpec((k_pad, tn), lambda i, j: (0, j)),   # weight
    ]
    args = [a, w]
    if epilogue == "leaky":                               # bias only when IN absent
        in_specs.append(pl.BlockSpec((1, tn), lambda i, j: (0, j)))
        args.append(bias)

    return pl.pallas_call(
        kernel,
        out_shape=jax.ShapeDtypeStruct((m, cout_pad), jnp.bfloat16),
        grid_spec=pltpu.PrefetchScalarGridSpec(
            num_scalar_prefetch=0,
            grid=grid,
            in_specs=in_specs,
            out_specs=pl.BlockSpec((tm, tn), lambda i, j: (i, j)),
        ),
        compiler_params=pltpu.CompilerParams(
            dimension_semantics=("parallel", "parallel"),
            vmem_limit_bytes=64 * 1024 * 1024,
        ),
    )(*args)


# ---------------------------------------------------------------------------
# Pallas kernel: fused conv5 (IN + LeakyReLU) + conv6 (bias + sigmoid)
# ---------------------------------------------------------------------------
def _conv56_kernel(a_ref, w5_ref, w6_ref, sel_ref, b6_ref, o_ref, *,
                   n_seg, seg_rows, c5, negative_slope, eps):
    m = n_seg * seg_rows

    # conv5 GEMM, f32 accumulation.
    acc5 = jnp.dot(a_ref[...], w5_ref[...], preferred_element_type=jnp.float32)

    # Per-sample InstanceNorm + LeakyReLU (static segmented reduction).
    segs = []
    for s in range(n_seg):
        seg = acc5[s * seg_rows:(s + 1) * seg_rows, :]
        mu = jnp.mean(seg, axis=0, keepdims=True)
        c = seg - mu
        var = jnp.mean(c * c, axis=0, keepdims=True)
        z = c * jax.lax.rsqrt(var + eps)
        segs.append(jnp.where(z >= 0.0, z, negative_slope * z))
    y5 = (segs[0] if n_seg == 1 else jnp.concatenate(segs, axis=0)).astype(jnp.bfloat16)

    # conv6 (3x3, stride 1, pad 1) without re-materializing im2col:
    #   out = b6 + sum_t Sel_t @ (y5 @ W6_t)
    # where W6_t is the 512-row slab of tap t and Sel_t is the constant 0/1
    # spatial-neighbour selection matrix (built on the host, tiny).
    acc6 = jnp.zeros((m, o_ref.shape[1]), jnp.float32)
    for t in range(9):
        part = jnp.dot(y5, w6_ref[t * c5:(t + 1) * c5, :],
                       preferred_element_type=jnp.float32)          # (m, cout_pad)
        sel_t = sel_ref[t * m:(t + 1) * m, :]                        # (m, m) f32
        acc6 = acc6 + jnp.dot(sel_t, part, preferred_element_type=jnp.float32)
    acc6 = acc6 + b6_ref[...]
    o_ref[...] = jax.nn.sigmoid(acc6).astype(o_ref.dtype)


def _build_conv6_selector(n, ho, wo):
    """Sel[t*M + p, s] = 1 iff spatial tap t of output p reads row s (same sample)."""
    hw = ho * wo
    m = n * hw
    sel = np.zeros((9, m, m), np.float32)
    for b in range(n):
        for i in range(ho):
            for j in range(wo):
                p = b * hw + i * wo + j
                for di in (-1, 0, 1):
                    for dj in (-1, 0, 1):
                        t = (di + 1) * 3 + (dj + 1)
                        ii, jj = i + di, j + dj
                        if 0 <= ii < ho and 0 <= jj < wo:
                            sel[t, p, b * hw + ii * wo + jj] = 1.0
    return jnp.asarray(sel.reshape(9 * m, m))


def _conv56_fused(a5, w5, w6, b6, *, n, ho, wo):
    m, k5 = a5.shape
    c5 = w5.shape[1]
    k6, cout_pad = w6.shape
    sel = _build_conv6_selector(n, ho, wo)

    kernel = functools.partial(_conv56_kernel, n_seg=n, seg_rows=ho * wo, c5=c5,
                               negative_slope=0.2, eps=1e-5)
    return pl.pallas_call(
        kernel,
        out_shape=jax.ShapeDtypeStruct((m, cout_pad), jnp.bfloat16),
        grid_spec=pltpu.PrefetchScalarGridSpec(
            num_scalar_prefetch=0,
            grid=(1,),
            in_specs=[pl.BlockSpec((m, k5), lambda i: (0, 0)),
                      pl.BlockSpec((k5, c5), lambda i: (0, 0)),
                      pl.BlockSpec((k6, cout_pad), lambda i: (0, 0)),
                      pl.BlockSpec((9 * m, m), lambda i: (0, 0)),
                      pl.BlockSpec((1, cout_pad), lambda i: (0, 0))],
            out_specs=pl.BlockSpec((m, cout_pad), lambda i: (0, 0)),
        ),
        compiler_params=pltpu.CompilerParams(
            dimension_semantics=("arbitrary",),
            vmem_limit_bytes=64 * 1024 * 1024,
        ),
    )(a5, w5, w6, sel, b6)


# ---------------------------------------------------------------------------
# im2col glue (plain JAX) and per-layer wrapper
# ---------------------------------------------------------------------------
def _im2col(x, ksize, stride, pad, k_pad):
    """NHWC -> (N*Ho*Wo, k_pad) patch matrix, tap-major / channel-fastest."""
    n, h, w, c = x.shape
    xp = jnp.pad(x, ((0, 0), (pad, pad), (pad, pad), (0, 0)))
    ho = (h + 2 * pad - ksize) // stride + 1
    wo = (w + 2 * pad - ksize) // stride + 1
    cols = [xp[:, i:i + stride * ho:stride, j:j + stride * wo:stride, :]
            for i in range(ksize) for j in range(ksize)]
    k = ksize * ksize * c
    a = jnp.concatenate(cols, axis=-1).reshape(n * ho * wo, k)
    if k_pad > k:
        a = jnp.pad(a, ((0, 0), (0, k_pad - k)))
    return a, ho, wo


def conv_layer(x, layer, p, n_batch):
    a, ho, wo = _im2col(x, 3, layer["stride"], 1, layer["k_pad"])
    m = n_batch * ho * wo
    tm = m if layer["epi"] == "in_leaky" else _pick_tm(m)
    y = _conv_gemm(a, p["w"], p.get("b"), tm=tm, tn=layer["tn"],
                   epilogue=layer["epi"], n_seg=n_batch, seg_rows=ho * wo)
    return y[:, :layer["cout"]].reshape(n_batch, ho, wo, layer["cout"])


# ---------------------------------------------------------------------------
# Discriminator: plan, params, forward
# ---------------------------------------------------------------------------
_LAYER_CFG = [
    # name,   stride, cin,  cout, epilogue
    ("conv1", 2, None, 64, "leaky"),        # conv + LeakyReLU(0.2)
    ("conv2", 2, 64, 128, "in_leaky"),      # conv + InstanceNorm + LeakyReLU
    ("conv3", 2, 128, 256, "in_leaky"),
    ("conv4", 2, 256, 512, "in_leaky"),
    ("conv5", 1, 512, 512, "in_leaky"),
    ("conv6", 1, 512, 1, "sigmoid"),        # conv + Sigmoid
]


def build_plan(in_channels):
    plan = []
    for name, stride, cin, cout, epi in _LAYER_CFG:
        cin = in_channels if cin is None else cin
        k = 9 * cin
        k_pad = _round_up(k, 32)                        # conv1: 27 -> 32 (not 128)
        cout_pad = _round_up(cout, 128)                 # lane-dense output stores
        tn = 256 if cout_pad % 256 == 0 else cout_pad   # conv4: 2 parallel Cout tiles
        plan.append(dict(name=name, stride=stride, cin=cin, cout=cout, K=k,
                         k_pad=k_pad, cout_pad=cout_pad, tn=tn, epi=epi))
    return plan


def init_params(key, plan):
    """Deterministic synthetic init (PyTorch-default-like uniform), pre-padded."""
    params = {}
    keys = jax.random.split(key, len(plan))
    for kk, layer in zip(keys, plan):
        kw_, kb_ = jax.random.split(kk)
        cin, cout = layer["cin"], layer["cout"]
        fan_in = cin * 9
        bound = 1.0 / float(fan_in) ** 0.5
        w = jax.random.uniform(kw_, (3, 3, cin, cout), jnp.float32, -bound, bound)
        w = w.reshape(9 * cin, cout)
        w = jnp.pad(w, ((0, layer["k_pad"] - 9 * cin),
                        (0, layer["cout_pad"] - cout))).astype(jnp.bfloat16)
        entry = {"w": w}
        if layer["epi"] != "in_leaky":      # IN cancels the conv bias exactly
            b = jax.random.uniform(kb_, (cout,), jnp.float32, -bound, bound)
            entry["b"] = jnp.pad(b, (0, layer["cout_pad"] - cout)).reshape(
                1, layer["cout_pad"])
        params[layer["name"]] = entry
    return params


def discriminator_forward(plan, params, img_nchw):
    # NCHW (PyTorch) -> NHWC internally -> NCHW output.  bf16 activations,
    # f32 accumulation/epilogues (deliberate precision tradeoff vs the f32 ref).
    n = img_nchw.shape[0]
    x = jnp.transpose(img_nchw, (0, 2, 3, 1)).astype(jnp.bfloat16)
    for layer in plan[:4]:                               # conv1 .. conv4
        x = conv_layer(x, layer, params[layer["name"]], n)
    # conv5 (+IN+LeakyReLU) and conv6 (+bias+sigmoid) fused in one kernel.
    l5 = plan[4]
    a5, ho, wo = _im2col(x, 3, l5["stride"], 1, l5["k_pad"])
    out = _conv56_fused(a5, params["conv5"]["w"], params["conv6"]["w"],
                        params["conv6"]["b"], n=n, ho=ho, wo=wo)
    out = out[:, :1].reshape(n, ho, wo, 1)
    return jnp.transpose(out.astype(jnp.float32), (0, 3, 1, 2))


# ---------------------------------------------------------------------------
if __name__ == "__main__":
    key = jax.random.PRNGKey(0)
    kp, kx = jax.random.split(key)

    batch = 2
    in_channels = 3
    patch = 32                       # patch_size=(32, 32) -> out_size=(2, 2)

    plan = build_plan(in_channels)
    params = init_params(kp, plan)
    img = jax.random.normal(kx, (batch, in_channels, patch, patch), jnp.float32)

    fwd = jax.jit(functools.partial(discriminator_forward, plan))
    out = fwd(params, img)
    jax.block_until_ready(out)

    assert out.shape == (batch, 1, patch // 16, patch // 16), out.shape
    assert bool(jnp.all(jnp.isfinite(out)))
    assert bool(jnp.all((out >= 0.0) & (out <= 1.0)))    # sigmoid range
    print("KERNEL_OK")
</pallas_src>

<mosaic_0001>
module attributes {stable_mosaic.version = 11 : i64} {
  func.func @_conv_gemm_kernel(%arg0: i32, %arg1: i32, %arg2: memref<256x32xbf16, #tpu.memory_space<vmem>>, %arg3: memref<32x128xbf16, #tpu.memory_space<vmem>>, %arg4: memref<1x128xf32, #tpu.memory_space<vmem>>, %arg5: memref<256x128xbf16, #tpu.memory_space<vmem>>) attributes {dimension_semantics = [#tpu.dimension_semantics<parallel>, #tpu.dimension_semantics<parallel>], iteration_bounds = array<i64: 2, 1>, scalar_prefetch = 0 : i64, scratch_operands = 0 : i64, tpu.core_type = #tpu.core_type<tc>, window_params = [{transform_indices = @transform_0, window_bounds = array<i64: 256, 32>}, {transform_indices = @transform_1, window_bounds = array<i64: 32, 128>}, {transform_indices = @transform_2, window_bounds = array<i64: 1, 128>}, {transform_indices = @transform_3, window_bounds = array<i64: 256, 128>}]} {
    %c0 = arith.constant 0 : index
    %c0_0 = arith.constant 0 : index
    %0 = vector.load %arg2[%c0, %c0_0] : memref<256x32xbf16, #tpu.memory_space<vmem>>, vector<256x32xbf16>
    %c0_1 = arith.constant 0 : index
    %c0_2 = arith.constant 0 : index
    %1 = vector.load %arg3[%c0_1, %c0_2] : memref<32x128xbf16, #tpu.memory_space<vmem>>, vector<32x128xbf16>
    %cst = arith.constant dense<0.000000e+00> : vector<256x128xf32>
    %2 = tpu.matmul %0, %1, %cst {dimension_numbers = #tpu.dot_dimension_numbers<[1], [0], [0], [1], [0, 0, 1, 1], [], []>} : vector<256x32xbf16>, vector<32x128xbf16>, vector<256x128xf32> -> vector<256x128xf32>
    %c0_3 = arith.constant 0 : index
    %c0_4 = arith.constant 0 : index
    %3 = vector.load %arg4[%c0_3, %c0_4] : memref<1x128xf32, #tpu.memory_space<vmem>>, vector<1x128xf32>
    %4 = vector.broadcast %3 : vector<1x128xf32> to vector<256x128xf32>
    %5 = arith.addf %2, %4 : vector<256x128xf32>
    %cst_5 = arith.constant 0.000000e+00 : f32
    %6 = vector.broadcast %cst_5 : f32 to vector<256x128xf32>
    %7 = arith.cmpf oge, %5, %6 : vector<256x128xf32>
    %cst_6 = arith.constant 2.000000e-01 : f32
    %8 = vector.broadcast %cst_6 : f32 to vector<256x128xf32>
    %9 = arith.mulf %8, %5 : vector<256x128xf32>
    %10 = arith.select %7, %5, %9 : vector<256x128xi1>, vector<256x128xf32>
    %11 = arith.truncf %10 : vector<256x128xf32> to vector<256x128xbf16>
    %c0_7 = arith.constant 0 : index
    %c0_8 = arith.constant 0 : index
    %12 = vector.load %arg5[%c0_7, %c0_8] : memref<256x128xbf16, #tpu.memory_space<vmem>>, vector<256x128xbf16>
    tpu.vector_store %arg5[%c0_7, %c0_8], %11 {strides = array<i32>} : memref<256x128xbf16, #tpu.memory_space<vmem>>, vector<256x128xbf16>,
    return
  }
  func.func @transform_0(%arg0: i32, %arg1: i32) -> (i32, i32) {
    %c0_i32 = arith.constant 0 : i32
    %c0_i32_0 = arith.constant 0 : i32
    return %arg0, %c0_i32 : i32, i32
  }
  func.func @transform_1(%arg0: i32, %arg1: i32) -> (i32, i32) {
    %c0_i32 = arith.constant 0 : i32
    %c0_i32_0 = arith.constant 0 : i32
    return %c0_i32, %arg1 : i32, i32
  }
  func.func @transform_2(%arg0: i32, %arg1: i32) -> (i32, i32) {
    %c0_i32 = arith.constant 0 : i32
    %c0_i32_0 = arith.constant 0 : i32
    return %c0_i32, %arg1 : i32, i32
  }
  func.func @transform_3(%arg0: i32, %arg1: i32) -> (i32, i32) {
    %c0_i32 = arith.constant 0 : i32
    return %arg0, %arg1 : i32, i32
  }
}

module attributes {stable_mosaic.version = 11 : i64} {
  func.func @_conv_gemm_kernel(%arg0: i32, %arg1: i32, %arg2: memref<128x576xbf16, #tpu.memory_space<vmem>>, %arg3: memref<576x128xbf16, #tpu.memory_space<vmem>>, %arg4: memref<128x128xbf16, #tpu.memory_space<vmem>>) attributes {dimension_semantics = [#tpu.dimension_semantics<parallel>, #tpu.dimension_semantics<parallel>], iteration_bounds = array<i64: 1, 1>, scalar_prefetch = 0 : i64, scratch_operands = 0 : i64, tpu.core_type = #tpu.core_type<tc>, window_params = [{transform_indices = @transform_0, window_bounds = array<i64: 128, 576>}, {transform_indices = @transform_1, window_bounds = array<i64: 576, 128>}, {transform_indices = @transform_2, window_bounds = array<i64: 128, 128>}]} {
    %c0 = arith.constant 0 : index
    %c0_0 = arith.constant 0 : index
    %0 = vector.load %arg2[%c0, %c0_0] : memref<128x576xbf16, #tpu.memory_space<vmem>>, vector<128x576xbf16>
    %c0_1 = arith.constant 0 : index
    %c0_2 = arith.constant 0 : index
    %1 = vector.load %arg3[%c0_1, %c0_2] : memref<576x128xbf16, #tpu.memory_space<vmem>>, vector<576x128xbf16>
    %cst = arith.constant dense<0.000000e+00> : vector<128x128xf32>
    %2 = tpu.matmul %0, %1, %cst {dimension_numbers = #tpu.dot_dimension_numbers<[1], [0], [0], [1], [0, 0, 1, 1], [], []>} : vector<128x576xbf16>, vector<576x128xbf16>, vector<128x128xf32> -> vector<128x128xf32>
    %3 = vector.extract_strided_slice %2 {offsets = [0, 0], sizes = [64, 128], strides = [1, 1]} : vector<128x128xf32> to vector<64x128xf32>
    %cst_3 = arith.constant dense<0.000000e+00> : vector<128xf32>
    %4 = vector.multi_reduction <add>, %3, %cst_3 [0] : vector<64x128xf32> to vector<128xf32>
    %5 = vector.shape_cast %4 : vector<128xf32> to vector<1x128xf32>
    %cst_4 = arith.constant 6.400000e+01 : f32
    %6 = vector.broadcast %cst_4 : f32 to vector<1x128xf32>
    %7 = arith.divf %5, %6 : vector<1x128xf32>
    %8 = vector.broadcast %7 : vector<1x128xf32> to vector<64x128xf32>
    %9 = arith.subf %3, %8 : vector<64x128xf32>
    %10 = arith.mulf %9, %9 : vector<64x128xf32>
    %cst_5 = arith.constant dense<0.000000e+00> : vector<128xf32>
    %11 = vector.multi_reduction <add>, %10, %cst_5 [0] : vector<64x128xf32> to vector<128xf32>
    %12 = vector.shape_cast %11 : vector<128xf32> to vector<1x128xf32>
    %cst_6 = arith.constant 6.400000e+01 : f32
    %13 = vector.broadcast %cst_6 : f32 to vector<1x128xf32>
    %14 = arith.divf %12, %13 : vector<1x128xf32>
    %cst_7 = arith.constant 9.99999974E-6 : f32
    %15 = vector.broadcast %cst_7 : f32 to vector<1x128xf32>
    %16 = arith.addf %14, %15 : vector<1x128xf32>
    %17 = math.rsqrt %16 : vector<1x128xf32>
    %18 = vector.broadcast %17 : vector<1x128xf32> to vector<64x128xf32>
    %19 = arith.mulf %9, %18 : vector<64x128xf32>
    %cst_8 = arith.constant 0.000000e+00 : f32
    %20 = vector.broadcast %cst_8 : f32 to vector<64x128xf32>
    %21 = arith.cmpf oge, %19, %20 : vector<64x128xf32>
    %cst_9 = arith.constant 2.000000e-01 : f32
    %22 = vector.broadcast %cst_9 : f32 to vector<64x128xf32>
    %23 = arith.mulf %22, %19 : vector<64x128xf32>
    %24 = arith.select %21, %19, %23 : vector<64x128xi1>, vector<64x128xf32>
    %25 = vector.extract_strided_slice %2 {offsets = [64, 0], sizes = [64, 128], strides = [1, 1]} : vector<128x128xf32> to vector<64x128xf32>
    %cst_10 = arith.constant dense<0.000000e+00> : vector<128xf32>
    %26 = vector.multi_reduction <add>, %25, %cst_10 [0] : vector<64x128xf32> to vector<128xf32>
    %27 = vector.shape_cast %26 : vector<128xf32> to vector<1x128xf32>
    %cst_11 = arith.constant 6.400000e+01 : f32
    %28 = vector.broadcast %cst_11 : f32 to vector<1x128xf32>
    %29 = arith.divf %27, %28 : vector<1x128xf32>
    %30 = vector.broadcast %29 : vector<1x128xf32> to vector<64x128xf32>
    %31 = arith.subf %25, %30 : vector<64x128xf32>
    %32 = arith.mulf %31, %31 : vector<64x128xf32>
    %cst_12 = arith.constant dense<0.000000e+00> : vector<128xf32>
    %33 = vector.multi_reduction <add>, %32, %cst_12 [0] : vector<64x128xf32> to vector<128xf32>
    %34 = vector.shape_cast %33 : vector<128xf32> to vector<1x128xf32>
    %cst_13 = arith.constant 6.400000e+01 : f32
    %35 = vector.broadcast %cst_13 : f32 to vector<1x128xf32>
    %36 = arith.divf %34, %35 : vector<1x128xf32>
    %cst_14 = arith.constant 9.99999974E-6 : f32
    %37 = vector.broadcast %cst_14 : f32 to vector<1x128xf32>
    %38 = arith.addf %36, %37 : vector<1x128xf32>
    %39 = math.rsqrt %38 : vector<1x128xf32>
    %40 = vector.broadcast %39 : vector<1x128xf32> to vector<64x128xf32>
    %41 = arith.mulf %31, %40 : vector<64x128xf32>
    %cst_15 = arith.constant 0.000000e+00 : f32
    %42 = vector.broadcast %cst_15 : f32 to vector<64x128xf32>
    %43 = arith.cmpf oge, %41, %42 : vector<64x128xf32>
    %cst_16 = arith.constant 2.000000e-01 : f32
    %44 = vector.broadcast %cst_16 : f32 to vector<64x128xf32>
    %45 = arith.mulf %44, %41 : vector<64x128xf32>
    %46 = arith.select %43, %41, %45 : vector<64x128xi1>, vector<64x128xf32>
    %47 = tpu.concatenate %24, %46 in 0 : vector<64x128xf32>, vector<64x128xf32> -> vector<128x128xf32>
    %48 = arith.truncf %47 : vector<128x128xf32> to vector<128x128xbf16>
    %c0_17 = arith.constant 0 : index
    %c0_18 = arith.constant 0 : index
    %49 = vector.load %arg4[%c0_17, %c0_18] : memref<128x128xbf16, #tpu.memory_space<vmem>>, vector<128x128xbf16>
    tpu.vector_store %arg4[%c0_17, %c0_18], %48 {strides = array<i32>} : memref<128x128xbf16, #tpu.memory_space<vmem>>, vector<128x128xbf16>,
    return
  }
  func.func @transform_0(%arg0: i32, %arg1: i32) -> (i32, i32) {
    %c0_i32 = arith.constant 0 : i32
    %c0_i32_0 = arith.constant 0 : i32
    return %arg0, %c0_i32 : i32, i32
  }
  func.func @transform_1(%arg0: i32, %arg1: i32) -> (i32, i32) {
    %c0_i32 = arith.constant 0 : i32
    %c0_i32_0 = arith.constant 0 : i32
    return %c0_i32, %arg1 : i32, i32
  }
  func.func @transform_2(%arg0: i32, %arg1: i32) -> (i32, i32) {
    %c0_i32 = arith.constant 0 : i32
    return %arg0, %arg1 : i32, i32
  }
}

module attributes {stable_mosaic.version = 11 : i64} {
  func.func @_conv_gemm_kernel(%arg0: i32, %arg1: i32, %arg2: memref<32x1152xbf16, #tpu.memory_space<vmem>>, %arg3: memref<1152x256xbf16, #tpu.memory_space<vmem>>, %arg4: memref<32x256xbf16, #tpu.memory_space<vmem>>) attributes {dimension_semantics = [#tpu.dimension_semantics<parallel>, #tpu.dimension_semantics<parallel>], iteration_bounds = array<i64: 1, 1>, scalar_prefetch = 0 : i64, scratch_operands = 0 : i64, tpu.core_type = #tpu.core_type<tc>, window_params = [{transform_indices = @transform_0, window_bounds = array<i64: 32, 1152>}, {transform_indices = @transform_1, window_bounds = array<i64: 1152, 256>}, {transform_indices = @transform_2, window_bounds = array<i64: 32, 256>}]} {
    %c0 = arith.constant 0 : index
    %c0_0 = arith.constant 0 : index
    %0 = vector.load %arg2[%c0, %c0_0] : memref<32x1152xbf16, #tpu.memory_space<vmem>>, vector<32x1152xbf16>
    %c0_1 = arith.constant 0 : index
    %c0_2 = arith.constant 0 : index
    %1 = vector.load %arg3[%c0_1, %c0_2] : memref<1152x256xbf16, #tpu.memory_space<vmem>>, vector<1152x256xbf16>
    %cst = arith.constant dense<0.000000e+00> : vector<32x256xf32>
    %2 = tpu.matmul %0, %1, %cst {dimension_numbers = #tpu.dot_dimension_numbers<[1], [0], [0], [1], [0, 0, 1, 1], [], []>} : vector<32x1152xbf16>, vector<1152x256xbf16>, vector<32x256xf32> -> vector<32x256xf32>
    %3 = vector.extract_strided_slice %2 {offsets = [0, 0], sizes = [16, 256], strides = [1, 1]} : vector<32x256xf32> to vector<16x256xf32>
    %cst_3 = arith.constant dense<0.000000e+00> : vector<256xf32>
    %4 = vector.multi_reduction <add>, %3, %cst_3 [0] : vector<16x256xf32> to vector<256xf32>
    %5 = vector.shape_cast %4 : vector<256xf32> to vector<1x256xf32>
    %cst_4 = arith.constant 1.600000e+01 : f32
    %6 = vector.broadcast %cst_4 : f32 to vector<1x256xf32>
    %7 = arith.divf %5, %6 : vector<1x256xf32>
    %8 = vector.broadcast %7 : vector<1x256xf32> to vector<16x256xf32>
    %9 = arith.subf %3, %8 : vector<16x256xf32>
    %10 = arith.mulf %9, %9 : vector<16x256xf32>
    %cst_5 = arith.constant dense<0.000000e+00> : vector<256xf32>
    %11 = vector.multi_reduction <add>, %10, %cst_5 [0] : vector<16x256xf32> to vector<256xf32>
    %12 = vector.shape_cast %11 : vector<256xf32> to vector<1x256xf32>
    %cst_6 = arith.constant 1.600000e+01 : f32
    %13 = vector.broadcast %cst_6 : f32 to vector<1x256xf32>
    %14 = arith.divf %12, %13 : vector<1x256xf32>
    %cst_7 = arith.constant 9.99999974E-6 : f32
    %15 = vector.broadcast %cst_7 : f32 to vector<1x256xf32>
    %16 = arith.addf %14, %15 : vector<1x256xf32>
    %17 = math.rsqrt %16 : vector<1x256xf32>
    %18 = vector.broadcast %17 : vector<1x256xf32> to vector<16x256xf32>
    %19 = arith.mulf %9, %18 : vector<16x256xf32>
    %cst_8 = arith.constant 0.000000e+00 : f32
    %20 = vector.broadcast %cst_8 : f32 to vector<16x256xf32>
    %21 = arith.cmpf oge, %19, %20 : vector<16x256xf32>
    %cst_9 = arith.constant 2.000000e-01 : f32
    %22 = vector.broadcast %cst_9 : f32 to vector<16x256xf32>
    %23 = arith.mulf %22, %19 : vector<16x256xf32>
    %24 = arith.select %21, %19, %23 : vector<16x256xi1>, vector<16x256xf32>
    %25 = vector.extract_strided_slice %2 {offsets = [16, 0], sizes = [16, 256], strides = [1, 1]} : vector<32x256xf32> to vector<16x256xf32>
    %cst_10 = arith.constant dense<0.000000e+00> : vector<256xf32>
    %26 = vector.multi_reduction <add>, %25, %cst_10 [0] : vector<16x256xf32> to vector<256xf32>
    %27 = vector.shape_cast %26 : vector<256xf32> to vector<1x256xf32>
    %cst_11 = arith.constant 1.600000e+01 : f32
    %28 = vector.broadcast %cst_11 : f32 to vector<1x256xf32>
    %29 = arith.divf %27, %28 : vector<1x256xf32>
    %30 = vector.broadcast %29 : vector<1x256xf32> to vector<16x256xf32>
    %31 = arith.subf %25, %30 : vector<16x256xf32>
    %32 = arith.mulf %31, %31 : vector<16x256xf32>
    %cst_12 = arith.constant dense<0.000000e+00> : vector<256xf32>
    %33 = vector.multi_reduction <add>, %32, %cst_12 [0] : vector<16x256xf32> to vector<256xf32>
    %34 = vector.shape_cast %33 : vector<256xf32> to vector<1x256xf32>
    %cst_13 = arith.constant 1.600000e+01 : f32
    %35 = vector.broadcast %cst_13 : f32 to vector<1x256xf32>
    %36 = arith.divf %34, %35 : vector<1x256xf32>
    %cst_14 = arith.constant 9.99999974E-6 : f32
    %37 = vector.broadcast %cst_14 : f32 to vector<1x256xf32>
    %38 = arith.addf %36, %37 : vector<1x256xf32>
    %39 = math.rsqrt %38 : vector<1x256xf32>
    %40 = vector.broadcast %39 : vector<1x256xf32> to vector<16x256xf32>
    %41 = arith.mulf %31, %40 : vector<16x256xf32>
    %cst_15 = arith.constant 0.000000e+00 : f32
    %42 = vector.broadcast %cst_15 : f32 to vector<16x256xf32>
    %43 = arith.cmpf oge, %41, %42 : vector<16x256xf32>
    %cst_16 = arith.constant 2.000000e-01 : f32
    %44 = vector.broadcast %cst_16 : f32 to vector<16x256xf32>
    %45 = arith.mulf %44, %41 : vector<16x256xf32>
    %46 = arith.select %43, %41, %45 : vector<16x256xi1>, vector<16x256xf32>
    %47 = tpu.concatenate %24, %46 in 0 : vector<16x256xf32>, vector<16x256xf32> -> vector<32x256xf32>
    %48 = arith.truncf %47 : vector<32x256xf32> to vector<32x256xbf16>
    %c0_17 = arith.constant 0 : index
    %c0_18 = arith.constant 0 : index
    %49 = vector.load %arg4[%c0_17, %c0_18] : memref<32x256xbf16, #tpu.memory_space<vmem>>, vector<32x256xbf16>
    tpu.vector_store %arg4[%c0_17, %c0_18], %48 {strides = array<i32>} : memref<32x256xbf16, #tpu.memory_space<vmem>>, vector<32x256xbf16>,
    return
  }
  func.func @transform_0(%arg0: i32, %arg1: i32) -> (i32, i32) {
    %c0_i32 = arith.constant 0 : i32
    %c0_i32_0 = arith.constant 0 : i32
    return %arg0, %c0_i32 : i32, i32
  }
  func.func @transform_1(%arg0: i32, %arg1: i32) -> (i32, i32) {
    %c0_i32 = arith.constant 0 : i32
    %c0_i32_0 = arith.constant 0 : i32
    return %c0_i32, %arg1 : i32, i32
  }
  func.func @transform_2(%arg0: i32, %arg1: i32) -> (i32, i32) {
    %c0_i32 = arith.constant 0 : i32
    return %arg0, %arg1 : i32, i32
  }
}

module attributes {stable_mosaic.version = 11 : i64} {
  func.func @_conv_gemm_kernel(%arg0: i32, %arg1: i32, %arg2: memref<8x2304xbf16, #tpu.memory_space<vmem>>, %arg3: memref<2304x256xbf16, #tpu.memory_space<vmem>>, %arg4: memref<8x256xbf16, #tpu.memory_space<vmem>>) attributes {dimension_semantics = [#tpu.dimension_semantics<parallel>, #tpu.dimension_semantics<parallel>], iteration_bounds = array<i64: 1, 2>, scalar_prefetch = 0 : i64, scratch_operands = 0 : i64, tpu.core_type = #tpu.core_type<tc>, window_params = [{transform_indices = @transform_0, window_bounds = array<i64: 8, 2304>}, {transform_indices = @transform_1, window_bounds = array<i64: 2304, 256>}, {transform_indices = @transform_2, window_bounds = array<i64: 8, 256>}]} {
    %c0 = arith.constant 0 : index
    %c0_0 = arith.constant 0 : index
    %0 = vector.load %arg2[%c0, %c0_0] : memref<8x2304xbf16, #tpu.memory_space<vmem>>, vector<8x2304xbf16>
    %c0_1 = arith.constant 0 : index
    %c0_2 = arith.constant 0 : index
    %1 = vector.load %arg3[%c0_1, %c0_2] : memref<2304x256xbf16, #tpu.memory_space<vmem>>, vector<2304x256xbf16>
    %cst = arith.constant dense<0.000000e+00> : vector<8x256xf32>
    %2 = tpu.matmul %0, %1, %cst {dimension_numbers = #tpu.dot_dimension_numbers<[1], [0], [0], [1], [0, 0, 1, 1], [], []>} : vector<8x2304xbf16>, vector<2304x256xbf16>, vector<8x256xf32> -> vector<8x256xf32>
    %3 = vector.extract_strided_slice %2 {offsets = [0, 0], sizes = [4, 256], strides = [1, 1]} : vector<8x256xf32> to vector<4x256xf32>
    %cst_3 = arith.constant dense<0.000000e+00> : vector<256xf32>
    %4 = vector.multi_reduction <add>, %3, %cst_3 [0] : vector<4x256xf32> to vector<256xf32>
    %5 = vector.shape_cast %4 : vector<256xf32> to vector<1x256xf32>
    %cst_4 = arith.constant 4.000000e+00 : f32
    %6 = vector.broadcast %cst_4 : f32 to vector<1x256xf32>
    %7 = arith.divf %5, %6 : vector<1x256xf32>
    %8 = vector.broadcast %7 : vector<1x256xf32> to vector<4x256xf32>
    %9 = arith.subf %3, %8 : vector<4x256xf32>
    %10 = arith.mulf %9, %9 : vector<4x256xf32>
    %cst_5 = arith.constant dense<0.000000e+00> : vector<256xf32>
    %11 = vector.multi_reduction <add>, %10, %cst_5 [0] : vector<4x256xf32> to vector<256xf32>
    %12 = vector.shape_cast %11 : vector<256xf32> to vector<1x256xf32>
    %cst_6 = arith.constant 4.000000e+00 : f32
    %13 = vector.broadcast %cst_6 : f32 to vector<1x256xf32>
    %14 = arith.divf %12, %13 : vector<1x256xf32>
    %cst_7 = arith.constant 9.99999974E-6 : f32
    %15 = vector.broadcast %cst_7 : f32 to vector<1x256xf32>
    %16 = arith.addf %14, %15 : vector<1x256xf32>
    %17 = math.rsqrt %16 : vector<1x256xf32>
    %18 = vector.broadcast %17 : vector<1x256xf32> to vector<4x256xf32>
    %19 = arith.mulf %9, %18 : vector<4x256xf32>
    %cst_8 = arith.constant 0.000000e+00 : f32
    %20 = vector.broadcast %cst_8 : f32 to vector<4x256xf32>
    %21 = arith.cmpf oge, %19, %20 : vector<4x256xf32>
    %cst_9 = arith.constant 2.000000e-01 : f32
    %22 = vector.broadcast %cst_9 : f32 to vector<4x256xf32>
    %23 = arith.mulf %22, %19 : vector<4x256xf32>
    %24 = arith.select %21, %19, %23 : vector<4x256xi1>, vector<4x256xf32>
    %25 = vector.extract_strided_slice %2 {offsets = [4, 0], sizes = [4, 256], strides = [1, 1]} : vector<8x256xf32> to vector<4x256xf32>
    %cst_10 = arith.constant dense<0.000000e+00> : vector<256xf32>
    %26 = vector.multi_reduction <add>, %25, %cst_10 [0] : vector<4x256xf32> to vector<256xf32>
    %27 = vector.shape_cast %26 : vector<256xf32> to vector<1x256xf32>
    %cst_11 = arith.constant 4.000000e+00 : f32
    %28 = vector.broadcast %cst_11 : f32 to vector<1x256xf32>
    %29 = arith.divf %27, %28 : vector<1x256xf32>
    %30 = vector.broadcast %29 : vector<1x256xf32> to vector<4x256xf32>
    %31 = arith.subf %25, %30 : vector<4x256xf32>
    %32 = arith.mulf %31, %31 : vector<4x256xf32>
    %cst_12 = arith.constant dense<0.000000e+00> : vector<256xf32>
    %33 = vector.multi_reduction <add>, %32, %cst_12 [0] : vector<4x256xf32> to vector<256xf32>
    %34 = vector.shape_cast %33 : vector<256xf32> to vector<1x256xf32>
    %cst_13 = arith.constant 4.000000e+00 : f32
    %35 = vector.broadcast %cst_13 : f32 to vector<1x256xf32>
    %36 = arith.divf %34, %35 : vector<1x256xf32>
    %cst_14 = arith.constant 9.99999974E-6 : f32
    %37 = vector.broadcast %cst_14 : f32 to vector<1x256xf32>
    %38 = arith.addf %36, %37 : vector<1x256xf32>
    %39 = math.rsqrt %38 : vector<1x256xf32>
    %40 = vector.broadcast %39 : vector<1x256xf32> to vector<4x256xf32>
    %41 = arith.mulf %31, %40 : vector<4x256xf32>
    %cst_15 = arith.constant 0.000000e+00 : f32
    %42 = vector.broadcast %cst_15 : f32 to vector<4x256xf32>
    %43 = arith.cmpf oge, %41, %42 : vector<4x256xf32>
    %cst_16 = arith.constant 2.000000e-01 : f32
    %44 = vector.broadcast %cst_16 : f32 to vector<4x256xf32>
    %45 = arith.mulf %44, %41 : vector<4x256xf32>
    %46 = arith.select %43, %41, %45 : vector<4x256xi1>, vector<4x256xf32>
    %47 = tpu.concatenate %24, %46 in 0 : vector<4x256xf32>, vector<4x256xf32> -> vector<8x256xf32>
    %48 = arith.truncf %47 : vector<8x256xf32> to vector<8x256xbf16>
    %c0_17 = arith.constant 0 : index
    %c0_18 = arith.constant 0 : index
    %49 = vector.load %arg4[%c0_17, %c0_18] : memref<8x256xbf16, #tpu.memory_space<vmem>>, vector<8x256xbf16>
    tpu.vector_store %arg4[%c0_17, %c0_18], %48 {strides = array<i32>} : memref<8x256xbf16, #tpu.memory_space<vmem>>, vector<8x256xbf16>,
    return
  }
  func.func @transform_0(%arg0: i32, %arg1: i32) -> (i32, i32) {
    %c0_i32 = arith.constant 0 : i32
    %c0_i32_0 = arith.constant 0 : i32
    return %arg0, %c0_i32 : i32, i32
  }
  func.func @transform_1(%arg0: i32, %arg1: i32) -> (i32, i32) {
    %c0_i32 = arith.constant 0 : i32
    %c0_i32_0 = arith.constant 0 : i32
    return %c0_i32, %arg1 : i32, i32
  }
  func.func @transform_2(%arg0: i32, %arg1: i32) -> (i32, i32) {
    %c0_i32 = arith.constant 0 : i32
    return %arg0, %arg1 : i32, i32
  }
}

module attributes {stable_mosaic.version = 11 : i64} {
  func.func @_conv56_kernel(%arg0: i32, %arg1: memref<8x4608xbf16, #tpu.memory_space<vmem>>, %arg2: memref<4608x512xbf16, #tpu.memory_space<vmem>>, %arg3: memref<4608x128xbf16, #tpu.memory_space<vmem>>, %arg4: memref<72x8xf32, #tpu.memory_space<vmem>>, %arg5: memref<1x128xf32, #tpu.memory_space<vmem>>, %arg6: memref<8x128xbf16, #tpu.memory_space<vmem>>) attributes {dimension_semantics = [#tpu.dimension_semantics<arbitrary>], iteration_bounds = array<i64: 1>, scalar_prefetch = 0 : i64, scratch_operands = 0 : i64, tpu.core_type = #tpu.core_type<tc>, window_params = [{pipeline_mode = #tpu.pipeline_mode<synchronous>, transform_indices = @transform_0, window_bounds = array<i64: 8, 4608>}, {pipeline_mode = #tpu.pipeline_mode<synchronous>, transform_indices = @transform_1, window_bounds = array<i64: 4608, 512>}, {pipeline_mode = #tpu.pipeline_mode<synchronous>, transform_indices = @transform_2, window_bounds = array<i64: 4608, 128>}, {pipeline_mode = #tpu.pipeline_mode<synchronous>, transform_indices = @transform_3, window_bounds = array<i64: 72, 8>}, {pipeline_mode = #tpu.pipeline_mode<synchronous>, transform_indices = @transform_4, window_bounds = array<i64: 1, 128>}, {pipeline_mode = #tpu.pipeline_mode<synchronous>, transform_indices = @transform_5, window_bounds = array<i64: 8, 128>}]} {
    %c0 = arith.constant 0 : index
    %c0_0 = arith.constant 0 : index
    %0 = vector.load %arg1[%c0, %c0_0] : memref<8x4608xbf16, #tpu.memory_space<vmem>>, vector<8x4608xbf16>
    %c0_1 = arith.constant 0 : index
    %c0_2 = arith.constant 0 : index
    %1 = vector.load %arg2[%c0_1, %c0_2] : memref<4608x512xbf16, #tpu.memory_space<vmem>>, vector<4608x512xbf16>
    %cst = arith.constant dense<0.000000e+00> : vector<8x512xf32>
    %2 = tpu.matmul %0, %1, %cst {dimension_numbers = #tpu.dot_dimension_numbers<[1], [0], [0], [1], [0, 0, 1, 1], [], []>} : vector<8x4608xbf16>, vector<4608x512xbf16>, vector<8x512xf32> -> vector<8x512xf32>
    %3 = vector.extract_strided_slice %2 {offsets = [0, 0], sizes = [4, 512], strides = [1, 1]} : vector<8x512xf32> to vector<4x512xf32>
    %cst_3 = arith.constant dense<0.000000e+00> : vector<512xf32>
    %4 = vector.multi_reduction <add>, %3, %cst_3 [0] : vector<4x512xf32> to vector<512xf32>
    %5 = vector.shape_cast %4 : vector<512xf32> to vector<1x512xf32>
    %cst_4 = arith.constant 4.000000e+00 : f32
    %6 = vector.broadcast %cst_4 : f32 to vector<1x512xf32>
    %7 = arith.divf %5, %6 : vector<1x512xf32>
    %8 = vector.broadcast %7 : vector<1x512xf32> to vector<4x512xf32>
    %9 = arith.subf %3, %8 : vector<4x512xf32>
    %10 = arith.mulf %9, %9 : vector<4x512xf32>
    %cst_5 = arith.constant dense<0.000000e+00> : vector<512xf32>
    %11 = vector.multi_reduction <add>, %10, %cst_5 [0] : vector<4x512xf32> to vector<512xf32>
    %12 = vector.shape_cast %11 : vector<512xf32> to vector<1x512xf32>
    %cst_6 = arith.constant 4.000000e+00 : f32
    %13 = vector.broadcast %cst_6 : f32 to vector<1x512xf32>
    %14 = arith.divf %12, %13 : vector<1x512xf32>
    %cst_7 = arith.constant 9.99999974E-6 : f32
    %15 = vector.broadcast %cst_7 : f32 to vector<1x512xf32>
    %16 = arith.addf %14, %15 : vector<1x512xf32>
    %17 = math.rsqrt %16 : vector<1x512xf32>
    %18 = vector.broadcast %17 : vector<1x512xf32> to vector<4x512xf32>
    %19 = arith.mulf %9, %18 : vector<4x512xf32>
    %cst_8 = arith.constant 0.000000e+00 : f32
    %20 = vector.broadcast %cst_8 : f32 to vector<4x512xf32>
    %21 = arith.cmpf oge, %19, %20 : vector<4x512xf32>
    %cst_9 = arith.constant 2.000000e-01 : f32
    %22 = vector.broadcast %cst_9 : f32 to vector<4x512xf32>
    %23 = arith.mulf %22, %19 : vector<4x512xf32>
    %24 = arith.select %21, %19, %23 : vector<4x512xi1>, vector<4x512xf32>
    %25 = vector.extract_strided_slice %2 {offsets = [4, 0], sizes = [4, 512], strides = [1, 1]} : vector<8x512xf32> to vector<4x512xf32>
    %cst_10 = arith.constant dense<0.000000e+00> : vector<512xf32>
    %26 = vector.multi_reduction <add>, %25, %cst_10 [0] : vector<4x512xf32> to vector<512xf32>
    %27 = vector.shape_cast %26 : vector<512xf32> to vector<1x512xf32>
    %cst_11 = arith.constant 4.000000e+00 : f32
    %28 = vector.broadcast %cst_11 : f32 to vector<1x512xf32>
    %29 = arith.divf %27, %28 : vector<1x512xf32>
    %30 = vector.broadcast %29 : vector<1x512xf32> to vector<4x512xf32>
    %31 = arith.subf %25, %30 : vector<4x512xf32>
    %32 = arith.mulf %31, %31 : vector<4x512xf32>
    %cst_12 = arith.constant dense<0.000000e+00> : vector<512xf32>
    %33 = vector.multi_reduction <add>, %32, %cst_12 [0] : vector<4x512xf32> to vector<512xf32>
    %34 = vector.shape_cast %33 : vector<512xf32> to vector<1x512xf32>
    %cst_13 = arith.constant 4.000000e+00 : f32
    %35 = vector.broadcast %cst_13 : f32 to vector<1x512xf32>
    %36 = arith.divf %34, %35 : vector<1x512xf32>
    %cst_14 = arith.constant 9.99999974E-6 : f32
    %37 = vector.broadcast %cst_14 : f32 to vector<1x512xf32>
    %38 = arith.addf %36, %37 : vector<1x512xf32>
    %39 = math.rsqrt %38 : vector<1x512xf32>
    %40 = vector.broadcast %39 : vector<1x512xf32> to vector<4x512xf32>
    %41 = arith.mulf %31, %40 : vector<4x512xf32>
    %cst_15 = arith.constant 0.000000e+00 : f32
    %42 = vector.broadcast %cst_15 : f32 to vector<4x512xf32>
    %43 = arith.cmpf oge, %41, %42 : vector<4x512xf32>
    %cst_16 = arith.constant 2.000000e-01 : f32
    %44 = vector.broadcast %cst_16 : f32 to vector<4x512xf32>
    %45 = arith.mulf %44, %41 : vector<4x512xf32>
    %46 = arith.select %43, %41, %45 : vector<4x512xi1>, vector<4x512xf32>
    %47 = tpu.concatenate %24, %46 in 0 : vector<4x512xf32>, vector<4x512xf32> -> vector<8x512xf32>
    %48 = arith.truncf %47 : vector<8x512xf32> to vector<8x512xbf16>
    %cst_17 = arith.constant 0.000000e+00 : f32
    %49 = vector.broadcast %cst_17 : f32 to vector<8x128xf32>
    %c0_18 = arith.constant 0 : index
    %c0_19 = arith.constant 0 : index
    %50 = vector.load %arg3[%c0_18, %c0_19] : memref<4608x128xbf16, #tpu.memory_space<vmem>>, vector<512x128xbf16>
    %cst_20 = arith.constant dense<0.000000e+00> : vector<8x128xf32>
    %51 = tpu.matmul %48, %50, %cst_20 {dimension_numbers = #tpu.dot_dimension_numbers<[1], [0], [0], [1], [0, 0, 1, 1], [], []>} : vector<8x512xbf16>, vector<512x128xbf16>, vector<8x128xf32> -> vector<8x128xf32>
    %c0_21 = arith.constant 0 : index
    %c0_22 = arith.constant 0 : index
    %52 = vector.load %arg4[%c0_21, %c0_22] : memref<72x8xf32, #tpu.memory_space<vmem>>, vector<8x8xf32>
    %cst_23 = arith.constant dense<0.000000e+00> : vector<8x128xf32>
    %53 = tpu.matmul %52, %51, %cst_23 {dimension_numbers = #tpu.dot_dimension_numbers<[1], [0], [0], [1], [0, 0, 1, 1], [], []>} : vector<8x8xf32>, vector<8x128xf32>, vector<8x128xf32> -> vector<8x128xf32>
    %54 = arith.addf %49, %53 : vector<8x128xf32>
    %c512 = arith.constant 512 : index
    %c0_24 = arith.constant 0 : index
    %55 = vector.load %arg3[%c512, %c0_24] : memref<4608x128xbf16, #tpu.memory_space<vmem>>, vector<512x128xbf16>
    %cst_25 = arith.constant dense<0.000000e+00> : vector<8x128xf32>
    %56 = tpu.matmul %48, %55, %cst_25 {dimension_numbers = #tpu.dot_dimension_numbers<[1], [0], [0], [1], [0, 0, 1, 1], [], []>} : vector<8x512xbf16>, vector<512x128xbf16>, vector<8x128xf32> -> vector<8x128xf32>
    %c8 = arith.constant 8 : index
    %c0_26 = arith.constant 0 : index
    %57 = vector.load %arg4[%c8, %c0_26] : memref<72x8xf32, #tpu.memory_space<vmem>>, vector<8x8xf32>
    %cst_27 = arith.constant dense<0.000000e+00> : vector<8x128xf32>
    %58 = tpu.matmul %57, %56, %cst_27 {dimension_numbers = #tpu.dot_dimension_numbers<[1], [0], [0], [1], [0, 0, 1, 1], [], []>} : vector<8x8xf32>, vector<8x128xf32>, vector<8x128xf32> -> vector<8x128xf32>
    %59 = arith.addf %54, %58 : vector<8x128xf32>
    %c1024 = arith.constant 1024 : index
    %c0_28 = arith.constant 0 : index
    %60 = vector.load %arg3[%c1024, %c0_28] : memref<4608x128xbf16, #tpu.memory_space<vmem>>, vector<512x128xbf16>
    %cst_29 = arith.constant dense<0.000000e+00> : vector<8x128xf32>
    %61 = tpu.matmul %48, %60, %cst_29 {dimension_numbers = #tpu.dot_dimension_numbers<[1], [0], [0], [1], [0, 0, 1, 1], [], []>} : vector<8x512xbf16>, vector<512x128xbf16>, vector<8x128xf32> -> vector<8x128xf32>
    %c16 = arith.constant 16 : index
    %c0_30 = arith.constant 0 : index
    %62 = vector.load %arg4[%c16, %c0_30] : memref<72x8xf32, #tpu.memory_space<vmem>>, vector<8x8xf32>
    %cst_31 = arith.constant dense<0.000000e+00> : vector<8x128xf32>
    %63 = tpu.matmul %62, %61, %cst_31 {dimension_numbers = #tpu.dot_dimension_numbers<[1], [0], [0], [1], [0, 0, 1, 1], [], []>} : vector<8x8xf32>, vector<8x128xf32>, vector<8x128xf32> -> vector<8x128xf32>
    %64 = arith.addf %59, %63 : vector<8x128xf32>
    %c1536 = arith.constant 1536 : index
    %c0_32 = arith.constant 0 : index
    %65 = vector.load %arg3[%c1536, %c0_32] : memref<4608x128xbf16, #tpu.memory_space<vmem>>, vector<512x128xbf16>
    %cst_33 = arith.constant dense<0.000000e+00> : vector<8x128xf32>
    %66 = tpu.matmul %48, %65, %cst_33 {dimension_numbers = #tpu.dot_dimension_numbers<[1], [0], [0], [1], [0, 0, 1, 1], [], []>} : vector<8x512xbf16>, vector<512x128xbf16>, vector<8x128xf32> -> vector<8x128xf32>
    %c24 = arith.constant 24 : index
    %c0_34 = arith.constant 0 : index
    %67 = vector.load %arg4[%c24, %c0_34] : memref<72x8xf32, #tpu.memory_space<vmem>>, vector<8x8xf32>
    %cst_35 = arith.constant dense<0.000000e+00> : vector<8x128xf32>
    %68 = tpu.matmul %67, %66, %cst_35 {dimension_numbers = #tpu.dot_dimension_numbers<[1], [0], [0], [1], [0, 0, 1, 1], [], []>} : vector<8x8xf32>, vector<8x128xf32>, vector<8x128xf32> -> vector<8x128xf32>
    %69 = arith.addf %64, %68 : vector<8x128xf32>
    %c2048 = arith.constant 2048 : index
    %c0_36 = arith.constant 0 : index
    %70 = vector.load %arg3[%c2048, %c0_36] : memref<4608x128xbf16, #tpu.memory_space<vmem>>, vector<512x128xbf16>
    %cst_37 = arith.constant dense<0.000000e+00> : vector<8x128xf32>
    %71 = tpu.matmul %48, %70, %cst_37 {dimension_numbers = #tpu.dot_dimension_numbers<[1], [0], [0], [1], [0, 0, 1, 1], [], []>} : vector<8x512xbf16>, vector<512x128xbf16>, vector<8x128xf32> -> vector<8x128xf32>
    %c32 = arith.constant 32 : index
    %c0_38 = arith.constant 0 : index
    %72 = vector.load %arg4[%c32, %c0_38] : memref<72x8xf32, #tpu.memory_space<vmem>>, vector<8x8xf32>
    %cst_39 = arith.constant dense<0.000000e+00> : vector<8x128xf32>
    %73 = tpu.matmul %72, %71, %cst_39 {dimension_numbers = #tpu.dot_dimension_numbers<[1], [0], [0], [1], [0, 0, 1, 1], [], []>} : vector<8x8xf32>, vector<8x128xf32>, vector<8x128xf32> -> vector<8x128xf32>
    %74 = arith.addf %69, %73 : vector<8x128xf32>
    %c2560 = arith.constant 2560 : index
    %c0_40 = arith.constant 0 : index
    %75 = vector.load %arg3[%c2560, %c0_40] : memref<4608x128xbf16, #tpu.memory_space<vmem>>, vector<512x128xbf16>
    %cst_41 = arith.constant dense<0.000000e+00> : vector<8x128xf32>
    %76 = tpu.matmul %48, %75, %cst_41 {dimension_numbers = #tpu.dot_dimension_numbers<[1], [0], [0], [1], [0, 0, 1, 1], [], []>} : vector<8x512xbf16>, vector<512x128xbf16>, vector<8x128xf32> -> vector<8x128xf32>
    %c40 = arith.constant 40 : index
    %c0_42 = arith.constant 0 : index
    %77 = vector.load %arg4[%c40, %c0_42] : memref<72x8xf32, #tpu.memory_space<vmem>>, vector<8x8xf32>
    %cst_43 = arith.constant dense<0.000000e+00> : vector<8x128xf32>
    %78 = tpu.matmul %77, %76, %cst_43 {dimension_numbers = #tpu.dot_dimension_numbers<[1], [0], [0], [1], [0, 0, 1, 1], [], []>} : vector<8x8xf32>, vector<8x128xf32>, vector<8x128xf32> -> vector<8x128xf32>
    %79 = arith.addf %74, %78 : vector<8x128xf32>
    %c3072 = arith.constant 3072 : index
    %c0_44 = arith.constant 0 : index
    %80 = vector.load %arg3[%c3072, %c0_44] : memref<4608x128xbf16, #tpu.memory_space<vmem>>, vector<512x128xbf16>
    %cst_45 = arith.constant dense<0.000000e+00> : vector<8x128xf32>
    %81 = tpu.matmul %48, %80, %cst_45 {dimension_numbers = #tpu.dot_dimension_numbers<[1], [0], [0], [1], [0, 0, 1, 1], [], []>} : vector<8x512xbf16>, vector<512x128xbf16>, vector<8x128xf32> -> vector<8x128xf32>
    %c48 = arith.constant 48 : index
    %c0_46 = arith.constant 0 : index
    %82 = vector.load %arg4[%c48, %c0_46] : memref<72x8xf32, #tpu.memory_space<vmem>>, vector<8x8xf32>
    %cst_47 = arith.constant dense<0.000000e+00> : vector<8x128xf32>
    %83 = tpu.matmul %82, %81, %cst_47 {dimension_numbers = #tpu.dot_dimension_numbers<[1], [0], [0], [1], [0, 0, 1, 1], [], []>} : vector<8x8xf32>, vector<8x128xf32>, vector<8x128xf32> -> vector<8x128xf32>
    %84 = arith.addf %79, %83 : vector<8x128xf32>
    %c3584 = arith.constant 3584 : index
    %c0_48 = arith.constant 0 : index
    %85 = vector.load %arg3[%c3584, %c0_48] : memref<4608x128xbf16, #tpu.memory_space<vmem>>, vector<512x128xbf16>
    %cst_49 = arith.constant dense<0.000000e+00> : vector<8x128xf32>
    %86 = tpu.matmul %48, %85, %cst_49 {dimension_numbers = #tpu.dot_dimension_numbers<[1], [0], [0], [1], [0, 0, 1, 1], [], []>} : vector<8x512xbf16>, vector<512x128xbf16>, vector<8x128xf32> -> vector<8x128xf32>
    %c56 = arith.constant 56 : index
    %c0_50 = arith.constant 0 : index
    %87 = vector.load %arg4[%c56, %c0_50] : memref<72x8xf32, #tpu.memory_space<vmem>>, vector<8x8xf32>
    %cst_51 = arith.constant dense<0.000000e+00> : vector<8x128xf32>
    %88 = tpu.matmul %87, %86, %cst_51 {dimension_numbers = #tpu.dot_dimension_numbers<[1], [0], [0], [1], [0, 0, 1, 1], [], []>} : vector<8x8xf32>, vector<8x128xf32>, vector<8x128xf32> -> vector<8x128xf32>
    %89 = arith.addf %84, %88 : vector<8x128xf32>
    %c4096 = arith.constant 4096 : index
    %c0_52 = arith.constant 0 : index
    %90 = vector.load %arg3[%c4096, %c0_52] : memref<4608x128xbf16, #tpu.memory_space<vmem>>, vector<512x128xbf16>
    %cst_53 = arith.constant dense<0.000000e+00> : vector<8x128xf32>
    %91 = tpu.matmul %48, %90, %cst_53 {dimension_numbers = #tpu.dot_dimension_numbers<[1], [0], [0], [1], [0, 0, 1, 1], [], []>} : vector<8x512xbf16>, vector<512x128xbf16>, vector<8x128xf32> -> vector<8x128xf32>
    %c64 = arith.constant 64 : index
    %c0_54 = arith.constant 0 : index
    %92 = vector.load %arg4[%c64, %c0_54] : memref<72x8xf32, #tpu.memory_space<vmem>>, vector<8x8xf32>
    %cst_55 = arith.constant dense<0.000000e+00> : vector<8x128xf32>
    %93 = tpu.matmul %92, %91, %cst_55 {dimension_numbers = #tpu.dot_dimension_numbers<[1], [0], [0], [1], [0, 0, 1, 1], [], []>} : vector<8x8xf32>, vector<8x128xf32>, vector<8x128xf32> -> vector<8x128xf32>
    %94 = arith.addf %89, %93 : vector<8x128xf32>
    %c0_56 = arith.constant 0 : index
    %c0_57 = arith.constant 0 : index
    %95 = vector.load %arg5[%c0_56, %c0_57] : memref<1x128xf32, #tpu.memory_space<vmem>>, vector<1x128xf32>
    %96 = vector.broadcast %95 : vector<1x128xf32> to vector<8x128xf32>
    %97 = arith.addf %94, %96 : vector<8x128xf32>
    %98 = arith.negf %97 : vector<8x128xf32>
    %99 = math.exp %98 : vector<8x128xf32>
    %cst_58 = arith.constant 1.000000e+00 : f32
    %100 = vector.broadcast %cst_58 : f32 to vector<8x128xf32>
    %101 = arith.addf %100, %99 : vector<8x128xf32>
    %102 = arith.divf %100, %101 : vector<8x128xf32>
    %103 = arith.truncf %102 : vector<8x128xf32> to vector<8x128xbf16>
    %c0_59 = arith.constant 0 : index
    %c0_60 = arith.constant 0 : index
    %104 = vector.load %arg6[%c0_59, %c0_60] : memref<8x128xbf16, #tpu.memory_space<vmem>>, vector<8x128xbf16>
    tpu.vector_store %arg6[%c0_59, %c0_60], %103 {strides = array<i32>} : memref<8x128xbf16, #tpu.memory_space<vmem>>, vector<8x128xbf16>,
    return
  }
  func.func @transform_0(%arg0: i32) -> (i32, i32) {
    %c0_i32 = arith.constant 0 : i32
    %c0_i32_0 = arith.constant 0 : i32
    %c0_i32_1 = arith.constant 0 : i32
    return %c0_i32, %c0_i32_0 : i32, i32
  }
  func.func @transform_1(%arg0: i32) -> (i32, i32) {
    %c0_i32 = arith.constant 0 : i32
    %c0_i32_0 = arith.constant 0 : i32
    %c0_i32_1 = arith.constant 0 : i32
    return %c0_i32, %c0_i32_0 : i32, i32
  }
  func.func @transform_2(%arg0: i32) -> (i32, i32) {
    %c0_i32 = arith.constant 0 : i32
    %c0_i32_0 = arith.constant 0 : i32
    %c0_i32_1 = arith.constant 0 : i32
    return %c0_i32, %c0_i32_0 : i32, i32
  }
  func.func @transform_3(%arg0: i32) -> (i32, i32) {
    %c0_i32 = arith.constant 0 : i32
    %c0_i32_0 = arith.constant 0 : i32
    %c0_i32_1 = arith.constant 0 : i32
    return %c0_i32, %c0_i32_0 : i32, i32
  }
  func.func @transform_4(%arg0: i32) -> (i32, i32) {
    %c0_i32 = arith.constant 0 : i32
    %c0_i32_0 = arith.constant 0 : i32
    %c0_i32_1 = arith.constant 0 : i32
    return %c0_i32, %c0_i32_0 : i32, i32
  }
  func.func @transform_5(%arg0: i32) -> (i32, i32) {
    %c0_i32 = arith.constant 0 : i32
    %c0_i32_0 = arith.constant 0 : i32
    %c0_i32_1 = arith.constant 0 : i32
    return %c0_i32, %c0_i32_0 : i32, i32
  }
}

</mosaic_0001>

<bundles_post_ra>
// kernel: discriminator_forward.5
= control target key start
LH: loop header
LB: loop body
LE: loop exit
PB: predicated region body
PF: predicated region fallthrough
CT: control target
= control target key end

     0   :  { %8 = vsyncpa [#allocation3], 0  ;;  %s1908_s0 = inlined_call_operand.hbm [shape: bf16[512,32], index: 0, kind: input, shape index: {}]   ;;  %s1909_s1 = inlined_call_operand.hbm [shape: bf16[32,128], index: 1, kind: input, shape index: {}]   ;;  %s1910_s2 = inlined_call_operand.hbm [shape: f32[1,128], index: 2, kind: input, shape index: {}]   ;;  %s1911_s3 = inlined_call_operand.hbm [shape: bf16[512,128], index: 3, kind: output, shape index: {}]  }
   0x1   :  { %10 = vsyncpa [#allocation3 + $0x1], 0 }
   0x2   :  { %11 = vsyncpa [#allocation6], 0 }
   0x3   :  { %12 = vsyncpa [#allocation4], 0 }
   0x4   :  { %14 = vsyncpa [#allocation4 + $0x1], 0  ;;  %s1549_s12 = smov 0   ;;  %s1551_s13 = smov 0  }
   0x5   :  { %s1553_s14 = smov 0   ;;  %s1555_s15 = smov 0  }
   0x6   :  { %s1557_s16 = smov 0   ;;  %s1559_s17 = smov 0  }
   0x7 LB: > { %s969_s18 = sadd.s32 4294967295, %s1519_s17   ;;  %s970_s19 = sadd.s32 4294967294, %s1519_s17   ;;  %s1519_s17 = sphi %s1559_s17, %s20_s17   ;;  %s1515_s16 = sphi %s1557_s16, %s1933_s16   ;;  %s1511_s15 = sphi %s1555_s15, %s1932_s15   ;;  %s1507_s14 = sphi %s1553_s14, %s1931_s14   ;;  %s1503_s13 = sphi %s1551_s13, %s1930_s13   ;;  %s1499_s12 = sphi %s1549_s12, %s1929_s12  }
   0x8   : > { %p52_p0 = scmp.ne.s32.totalorder %s1503_s13, %s1499_s12  ;;  %p1583_p1 = scmp.eq.s32.totalorder %s969_s18, 0 }
   0x9   : > { %p1587_p2 = scmp.eq.s32.totalorder %s969_s18, 1  ;;  %p136_p3 = scmp.eq.s32.totalorder %s970_s19, 1 }
   0xa   : > { %s1916_s20 = scalar_select %p1583_p1, 1, 0 }
   0xb   : > { %p1593_p4 = por %p1583_p1, %p52_p0  ;;  %p971_p5 = scmp.ge.s32.totalorder %s1519_s17, 1 }
   0xc   : > { %p1598_p6 = por %p136_p3, %p52_p0  ;;  %p143_p7 = scmp.lt.s32.totalorder %s1519_s17, 3 }
   0xd   : > { %s1918_s22 = scalar_select %p1593_p4, 1, 0 }
   0xe   : > { %s1919_s23 = scalar_select %p1598_p6, 1, 0 }
   0xf   : > { %p1603_p8 = pnand %p971_p5, %p143_p7  ;;  %s1521_s25 = smov [#allocation5]  }
  0x10   : > { %s157_s26 = sshll.u32 %s1521_s25, 4  ;;  %s1522_s28 = smov [#allocation7]   ;;  %s1607_s26 = int_to_ptr.vmem [resolvable:$true] %s157_s26 }
  0x11   : > { %p1254_p9 = pneg %p1603_p8  ;;  %s173_s29 = sshll.u32 %s1522_s28, 4  ;;  %s1618_s29 = int_to_ptr.vmem [resolvable:$true] %s173_s29 }
  0x12   : > { %s1347_s5 = scalar_lea.hbm %s1909_s1, 256 }
  0x13   : > { %p1614_p11 = pnand %p1254_p9, %p1583_p1  ;;  %p1348_p12 = scmp.ne.s32.totalorder %s1909_s1, %s1347_s5 }
  0x14   : > { %p1354_p5 = scmp.lt.u32.totalorder %s1347_s5, %s1909_s1 }
  0x15   : > { %p1349_p13 = pneg %p1614_p11 }
  0x17   : > { %p1350_p0 = pnand %p1349_p13, %p1348_p12 }
  0x19   : > { %p1351_p3 = pneg %p1350_p0 }
  0x1b   : > { %p1356_p7 = pnand %p1354_p5, %p1351_p3 }
  0x1d   : > { %1359 = shalt.err (!%p1356_p7)
}
  0x1e   : > { %s1360_s10 = scalar_lea.vmem %s1607_s26, 256  ;;  %p1368_p1 = scmp.lt.s32.totalorder %s1607_s26, %s1607_s26 }
  0x1f   : > { %p1361_p9 = scmp.ne.s32.totalorder %s1607_s26, %s1360_s10  ;;  %p1369_p12 = scmp.lt.s32.totalorder %s1360_s10, %s1360_s10 }
  0x21   : > { %p1363_p10 = pnand %p1361_p9, %p1349_p13  ;;  %p1370_p0 = por %p1369_p12, %p1368_p1 }
  0x23   : > { %p1364_p6 = pneg %p1363_p10 }
  0x25   : > { %p1371_p4 = pnand %p1370_p0, %p1364_p6 }
  0x27   : > { %1374 = shalt.err (!%p1371_p4)
}
  0x28   : > { %s1523_s11 = smov 64   ;;  %s1524_s18 = smov 4  }
  0x29   : > { %1257 = dma.hbm_to_vmem [thread:$0]  (!%p1614_p11), %s1909_s1, 256, %s1607_s26, [#allocation6], %s1523_s11, %s1523_s11, %s1524_s18  }
  0x2a   : > { %s1375_s4 = scalar_lea.hbm %s1910_s2, 16 }
  0x2b   : > { %p1376_p1 = scmp.ne.s32.totalorder %s1910_s2, %s1375_s4  ;;  %p1382_p10 = scmp.lt.u32.totalorder %s1375_s4, %s1910_s2 }
  0x2d   : > { %p1378_p4 = pnand %p1376_p1, %p1349_p13 }
  0x2f   : > { %p1379_p6 = pneg %p1378_p4 }
  0x31   : > { %p1384_p3 = pnand %p1382_p10, %p1379_p6 }
  0x33   : > { %1387 = shalt.err (!%p1384_p3)
}
  0x34   : > { %s1388_s26 = scalar_lea.vmem %s1618_s29, 16  ;;  %s1395_s9 = scalar_lea.vmem %s1618_s29, 32 }
  0x35   : > { %p1389_p5 = scmp.ne.s32.totalorder %s1618_s29, %s1388_s26  ;;  %p1396_p12 = scmp.lt.s32.totalorder %s1618_s29, %s1618_s29 }
  0x36   : > { %p1397_p0 = scmp.lt.s32.totalorder %s1395_s9, %s1388_s26 }
  0x37   : > { %p1391_p7 = pnand %p1389_p5, %p1349_p13 }
  0x38   : > { %p1398_p1 = por %p1397_p0, %p1396_p12 }
  0x39   : > { %p1392_p9 = pneg %p1391_p7 }
  0x3b   : > { %p1399_p4 = pnand %p1398_p1, %p1392_p9 }
  0x3d   : > { %1402 = shalt.err (!%p1399_p4)
}
  0x3e   : > { %1260 = dma.hbm_to_vmem [thread:$0]  (!%p1614_p11), %s1910_s2, 16, %s1618_s29, [#allocation6]  }
  0x3f   : > { %s32_s25 = sadd.s32 1, %s1515_s16  ;;  %s39_s28 = sadd.s32 1, %s1507_s14 }
  0x40   : > { %p34_p13 = scmp.ge.s32.totalorder %s32_s25, 2  ;;  %p46_p6 = scmp.ne.s32.totalorder %s1507_s14, %s1503_s13 }
  0x41   : > { %p47_p10 = scmp.eq.s32.totalorder %s1519_s17, 0  ;;  %p1271_p3 = scmp.lt.s32.totalorder %s1519_s17, 2 }
  0x42   : > { %s1935_s25 = smov (%p34_p13, %s32_s25), 0  ;;  %p1686_p7 = por %p1587_p2, %p46_p6 }
  0x43   : > { %p48_p5 = por %p47_p10, %p46_p6  ;;  %s36_s30 = ssub.s32 %s1515_s16, %s1935_s25 }
  0x44   : > { %s1922_s27 = scalar_select %p1686_p7, 1, 0 }
  0x45   : > { %s184_s4 = sand.u32 1, %s1507_s14   ;;  %p37_p9 = scmp.eq.s32.totalorder %s36_s30, 0 }
  0x46   : > { %s975_s29 = sshll.u32 %s184_s4, 7  ;;  %s1055_s5 = sshll.u32 %s1515_s16, 11 }
  0x47   : > { %s1695_s6 = scalar_select %p37_p9, %s1507_s14, %s39_s28  }
  0x48   : > { %s1700_s26 = scalar_lea.hbm %s1908_s0, %s1055_s5  ;;  %s188_s21 = scalar_lea.vmem [#allocation2], %s975_s29 }
  0x49   : > { %s195_s9 = sshll.u32 %s188_s21, 4  ;;  %p1704_p2 = pnand %p1271_p3, %p48_p5  ;;  %s1708_s9 = int_to_ptr.vmem [resolvable:$true] %s195_s9 }
  0x4a   : > { %s1710_s19 = scalar_lea.sflag [#allocation3], %s184_s4  ;;  %s1403_s28 = scalar_lea.hbm %s1700_s26, 2048 }
  0x4b   : > { %p1404_p11 = scmp.ne.s32.totalorder %s1700_s26, %s1403_s28  ;;  %p1405_p12 = pneg %p1704_p2 }
  0x4c   : > { %s1408_s5 = scalar_lea.hbm %s1908_s0, 4096  ;;  %p1409_p4 = scmp.lt.u32.totalorder %s1700_s26, %s1908_s0 }
  0x4d   : > { %p1406_p0 = pnand %p1405_p12, %p1404_p11  ;;  %p1410_p13 = scmp.lt.u32.totalorder %s1408_s5, %s1403_s28 }
  0x4e   : > { %p1412_p10 = scmp.lt.u32.totalorder %s1403_s28, %s1700_s26 }
  0x4f   : > { %p1407_p1 = pneg %p1406_p0  ;;  %p1411_p6 = por %p1410_p13, %p1409_p4 }
  0x51   : > { %p1413_p3 = por %p1412_p10, %p1411_p6 }
  0x53   : > { %p1414_p5 = pnand %p1413_p3, %p1407_p1 }
  0x55   : > { %1417 = shalt.err (!%p1414_p5)
}
  0x56   : > { %s1418_s4 = scalar_lea.vmem %s1708_s9, 2048  ;;  %s1525_s21 = smov [#allocation2]  }
  0x57   : > { %p1419_p9 = scmp.ne.s32.totalorder %s1708_s9, %s1418_s4  ;;  %s1423_s30 = sshll.u32 %s1525_s21, 4  ;;  %s1424_s30 = int_to_ptr.vmem [resolvable:$false] %s1423_s30 }
  0x58   : > { %s1425_s29 = scalar_lea.vmem %s1424_s30, 4096  ;;  %p1426_p7 = scmp.lt.s32.totalorder %s1708_s9, %s1424_s30 }
  0x59   : > { %p1421_p11 = pnand %p1419_p9, %p1405_p12  ;;  %p1427_p4 = scmp.lt.s32.totalorder %s1425_s29, %s1418_s4 }
  0x5b   : > { %p1422_p0 = pneg %p1421_p11  ;;  %p1428_p13 = por %p1427_p4, %p1426_p7 }
  0x5d   : > { %p1429_p6 = pnand %p1428_p13, %p1422_p0 }
  0x5f   : > { %1432 = shalt.err (!%p1429_p6)
}
  0x60   : > { %1264 = dma.hbm_to_vmem [thread:$0]  (!%p1704_p2), %s1700_s26, 2048, %s1708_s9, %s1710_s19, %s1523_s11, %s1523_s11, %s1524_s18  }
  0x61   : > { %207 = sbr.rel (%p1603_p8) target bundleno = 386 (0x182), region = 32  ;;  %s1744_s28 = sand.u32 (!%p1603_p8), 1, %s1503_s13  }
  0x62   : > { %s979_s5 = sshll.u32 (!%p1603_p8), %s1744_s28, 7  ;;  %s210_s7 = scalar_lea.sflag (!%p1603_p8), [#allocation3], %s1744_s28 }
  0x63   : > { %s1750_s10 = scalar_lea.vmem (!%p1603_p8), [#allocation2], %s979_s5  ;;  %p1924_p7 = scmp.ne.s32.totalorder (!%p1603_p8), %s1918_s22, 0 }
  0x68   : > { %1486 = dma.done.wait (%p1924_p7), %s210_s7, 2048  }
  0x69   : > { %1488 = vsyncadd (%p1924_p7), %s210_s7, 4294965248  ;;  %p1925_p2 = scmp.ne.s32.totalorder %s1916_s20, 0 }
  0x6b   : > { %1490 = dma.done.wait (%p1925_p2), [#allocation6], 272  }
  0x6c   : > { %1492 = vsyncadd (%p1925_p2), [#allocation6], 4294967024  ;;  %v1329_v0 = vld [vmem:[#allocation5] sm:$0xff]   ;;  %v1330_v1 = vld [vmem:[#allocation5 + $0x8] sm:$0xff]   ;;  %vm382_vm0 = vcmask 261120   ;;  %s1808_s20 = scalar_lea.vmem [#allocation8], %s979_s5 }
  0x6d   : > { %1202 = vmatprep.subr.bf16.mxu0 %v1329_v0  ;;  %1238 = vmatprep.subr.bf16.mxu1 %v1329_v0  ;;  %v1331_v2 = vld [vmem:[%s1750_s10] sm:$0xff]   ;;  %v1333_v4 = vld [vmem:[%s1750_s10 + $0x8] sm:$0xff]   ;;  %v1335_v6 = vld [vmem:[%s1750_s10 + $0x10] sm:$0xff]   ;;  %s1088_s22 = sshll.u32 %s1511_s15, 11  ;;  %s863_s24 = sshll.u32 %s1808_s20, 4  ;;  %s1858_s24 = int_to_ptr.vmem [resolvable:$true] %s863_s24 }
  0x6e   : > { %1203 = vmatpush3.bf16.msra.mxu0 %v1329_v0  ;;  %1240 = vmatpush3.bf16.msra.mxu1 %v1329_v0  ;;  %v1332_v3 = vld [vmem:[%s1750_s10 + $0x40] sm:$0xff]   ;;  %v1334_v5 = vld [vmem:[%s1750_s10 + $0x48] sm:$0xff]   ;;  %v1336_v7 = vld [vmem:[%s1750_s10 + $0x50] sm:$0xff]   ;;  %s1856_s26 = scalar_lea.hbm %s1911_s3, %s1088_s22  ;;  %s849_s15 = scalar_lea.sflag [#allocation4], %s1744_s28 }
  0x6f   : > { %1204 = vmatprep.subr.bf16.mxu0 %v1330_v1  ;;  %1239 = vmatprep.subr.bf16.mxu1 %v1330_v1  ;;  %v1337_v8 = vld [vmem:[%s1750_s10 + $0x18] sm:$0xff]   ;;  %v1339_v10 = vld [vmem:[%s1750_s10 + $0x20] sm:$0xff]   ;;  %v1341_v12 = vld [vmem:[%s1750_s10 + $0x28] sm:$0xff]   ;;  %s1433_s9 = scalar_lea.vmem %s1858_s24, 2048  ;;  %p1926_p12 = scmp.ne.s32.totalorder %s1922_s27, 0 }
  0x70   : > { %1206 = vmatprep.mubr.msk.bf16.mxu0 %vm382_vm0, %v1331_v2  ;;  %1222 = vmatprep.mubr.msk.bf16.mxu1 %vm382_vm0, %v1332_v3  ;;  %v1338_v9 = vld [vmem:[%s1750_s10 + $0x58] sm:$0xff]   ;;  %v1340_v11 = vld [vmem:[%s1750_s10 + $0x60] sm:$0xff]   ;;  %v1342_v13 = vld [vmem:[%s1750_s10 + $0x68] sm:$0xff]   ;;  %p1434_p8 = scmp.ne.s32.totalorder %s1858_s24, %s1433_s9  ;;  %s1526_s19 = smov [#allocation8]  }
  0x71   : > { %v1343_v14 = vld [vmem:[%s1750_s10 + $0x30] sm:$0xff]   ;;  %v1345_v16 = vld [vmem:[%s1750_s10 + $0x38] sm:$0xff]   ;;  %s1437_s8 = sshll.u32 %s1526_s19, 4  ;;  %s1438_s8 = int_to_ptr.vmem [resolvable:$false] %s1437_s8 }
  0x72   : > { %1205 = vmatpush3.bf16.msra.mxu0 %v1330_v1  ;;  %1241 = vmatpush3.bf16.msra.mxu1 %v1330_v1  ;;  %v1344_v15 = vld [vmem:[%s1750_s10 + $0x70] sm:$0xff]   ;;  %v1346_v17 = vld [vmem:[%s1750_s10 + $0x78] sm:$0xff]   ;;  %p1435_p1 = pnand %p1434_p8, %p1926_p12  ;;  %s1439_s4 = scalar_lea.vmem %s1438_s8, 4096 }
  0x73   : > { %v1792_v18 = vld [vmem:[#allocation7] ss:$0 sm:$0xff]  ;;  %p1440_p3 = scmp.lt.s32.totalorder %s1858_s24, %s1438_s8  ;;  %p1441_p5 = scmp.lt.s32.totalorder %s1439_s4, %s1433_s9 }
  0x74   : > { %p1436_p10 = pneg %p1435_p1 }
  0x75   : > { %1207 = vmatmul.mubr.msk.bf16.vlgmr.msra.gmra.mrb[0].mxu0 %vm382_vm0, %v1333_v4  ;;  %1223 = vmatmul.mubr.msk.bf16.vlgmr.msra.gmra.mrb[0].mxu1 %vm382_vm0, %v1334_v5  ;;  %p1442_p9 = por %p1441_p5, %p1440_p3 }
  0x76   : > { %1210 = vmatprep.mubr.msk.bf16.mxu0 %vm382_vm0, %v1335_v6  ;;  %1226 = vmatprep.mubr.msk.bf16.mxu1 %vm382_vm0, %v1336_v7 }
  0x77   : > { %p1443_p11 = pnand %p1442_p9, %p1436_p10 }
  0x7d   : > { %1211 = vmatmul.mubr.msk.bf16.gmra.mrb[4].mxu0 %vm382_vm0, %v1337_v8  ;;  %1227 = vmatmul.mubr.msk.bf16.gmra.mrb[4].mxu1 %vm382_vm0, %v1338_v9 }
  0x7e   : > { %1214 = vmatprep.mubr.msk.bf16.mxu0 %vm382_vm0, %v1339_v10  ;;  %1230 = vmatprep.mubr.msk.bf16.mxu1 %vm382_vm0, %v1340_v11 }
  0x85   : > { %1215 = vmatmul.mubr.msk.bf16.gmra.mrb[8].mxu0 %vm382_vm0, %v1341_v12  ;;  %1231 = vmatmul.mubr.msk.bf16.gmra.mrb[8].mxu1 %vm382_vm0, %v1342_v13 }
  0x86   : > { %1218 = vmatprep.mubr.msk.bf16.mxu0 %vm382_vm0, %v1343_v14  ;;  %1234 = vmatprep.mubr.msk.bf16.mxu1 %vm382_vm0, %v1344_v15 }
  0x8d   : > { %1219 = vmatmul.mubr.msk.bf16.gmra.mrb[12].mxu0 %vm382_vm0, %v1345_v16  ;;  %1235 = vmatmul.mubr.msk.bf16.gmra.mrb[12].mxu1 %vm382_vm0, %v1346_v17 }
 0x148   : > { %v1208_v19 = vpop.f32.mrb[0].mxu0  ;;  %v1224_v20 = vpop.f32.mrb[0].mxu1 }
 0x149   : > { %v474_v21 = vadd.f32 %v1208_v19, %v1792_v18  ;;  %v538_v22 = vadd.f32 %v1224_v20, %v1792_v18  ;;  %v465_v23 = vpop.f32.mrb[1].mxu0  ;;  %v529_v24 = vpop.f32.mrb[1].mxu1 }
 0x14a   : > { %v466_v25 = vadd.f32 %v1792_v18, %v465_v23  ;;  %v530_v26 = vadd.f32 %v1792_v18, %v529_v24  ;;  %v1209_v27 = vpop.f32.mrb[2].mxu0  ;;  %v1225_v28 = vpop.f32.mrb[2].mxu1 }
 0x14b   : > { %vm594_vm1 = vcmp.ge.f32.partialorder %v474_v21, 0.0  ;;  %v626_v29 = vmul.f32 0.2, %v474_v21  ;;  %vm610_vm2 = vcmp.ge.f32.partialorder %v538_v22, 0.0  ;;  %v642_v30 = vmul.f32 0.2, %v538_v22 }
 0x14c   : > { %vm592_vm3 = vcmp.ge.f32.partialorder %v466_v25, 0.0  ;;  %v624_v31 = vmul.f32 0.2, %v466_v25  ;;  %vm608_vm4 = vcmp.ge.f32.partialorder %v530_v26, 0.0  ;;  %v640_v32 = vmul.f32 0.2, %v530_v26 }
 0x14d   : > { %v477_v33 = vadd.f32 %v1209_v27, %v1792_v18  ;;  %v541_v34 = vadd.f32 %v1225_v28, %v1792_v18  ;;  %v468_v35 = vpop.f32.mrb[3].mxu0  ;;  %v532_v36 = vpop.f32.mrb[3].mxu1  ;;  %v658_v37 = vsel %vm594_vm1, %v474_v21, %v626_v29  ;;  %v674_v38 = vsel %vm610_vm2, %v538_v22, %v642_v30 }
 0x14e   : > { %v469_v39 = vadd.f32 %v1792_v18, %v468_v35  ;;  %v533_v40 = vadd.f32 %v1792_v18, %v532_v36  ;;  %v656_v45 = vsel %vm592_vm3, %v466_v25, %v624_v31  ;;  %v672_v46 = vsel %vm608_vm4, %v530_v26, %v640_v32 }
 0x14f   : > { %vm595_vm5 = vcmp.ge.f32.partialorder %v477_v33, 0.0  ;;  %v627_v41 = vmul.f32 0.2, %v477_v33  ;;  %vm611_vm6 = vcmp.ge.f32.partialorder %v541_v34, 0.0  ;;  %v643_v42 = vmul.f32 0.2, %v541_v34 }
 0x150   : > { %vm593_vm7 = vcmp.ge.f32.partialorder %v469_v39, 0.0  ;;  %v625_v43 = vmul.f32 0.2, %v469_v39  ;;  %vm609_vm8 = vcmp.ge.f32.partialorder %v533_v40, 0.0  ;;  %v641_v44 = vmul.f32 0.2, %v533_v40 }
 0x151   : > { %v659_v47 = vsel %vm595_vm5, %v477_v33, %v627_v41  ;;  %v675_v48 = vsel %vm611_vm6, %v541_v34, %v643_v42  ;;  %v1212_v49 = vpop.f32.mrb[4].mxu0  ;;  %v1228_v50 = vpop.f32.mrb[4].mxu1 }
 0x152   : > { %v1097_v51 = vpack.c.bf16 %v659_v47, %v658_v37  ;;  %v1137_v52 = vpack.c.bf16 %v675_v48, %v674_v38  ;;  %v657_v53 = vsel %vm593_vm7, %v469_v39, %v625_v43  ;;  %v673_v54 = vsel %vm609_vm8, %v533_v40, %v641_v44  ;;  %v481_v55 = vpop.f32.mrb[5].mxu0  ;;  %v545_v56 = vpop.f32.mrb[5].mxu1 }
 0x153   : > { %v1092_v57 = vpack.c.bf16 %v657_v53, %v656_v45  ;;  %v1132_v58 = vpack.c.bf16 %v673_v54, %v672_v46  ;;  %v490_v59 = vadd.f32 %v1212_v49, %v1792_v18  ;;  %v554_v60 = vadd.f32 %v1228_v50, %v1792_v18  ;;  %v1213_v61 = vpop.f32.mrb[6].mxu0  ;;  %v1229_v62 = vpop.f32.mrb[6].mxu1 }
 0x154   : > { %1169 = vst [vmem:[%s1808_s20 + $0x8] sm:$0xff] %v1097_v51   ;;  %1177 = vst [vmem:[%s1808_s20 + $0x48] sm:$0xff] %v1137_v52   ;;  %v482_v63 = vadd.f32 %v1792_v18, %v481_v55  ;;  %v546_v0 = vadd.f32 %v1792_v18, %v545_v56  ;;  %v493_v1 = vadd.f32 %v1213_v61, %v1792_v18  ;;  %v484_v3 = vpop.f32.mrb[7].mxu0  ;;  %v548_v4 = vpop.f32.mrb[7].mxu1 }
 0x155   : > { %v557_v2 = vadd.f32 %v1229_v62, %v1792_v18  ;;  %1093 = vst [vmem:[%s1808_s20] sm:$0xff] %v1092_v57   ;;  %1176 = vst [vmem:[%s1808_s20 + $0x40] sm:$0xff] %v1132_v58   ;;  %vm598_vm9 = vcmp.ge.f32.partialorder %v490_v59, 0.0  ;;  %v630_v5 = vmul.f32 0.2, %v490_v59  ;;  %vm614_vm10 = vcmp.ge.f32.partialorder %v554_v60, 0.0 }
 0x156   : > { %v646_v6 = vmul.f32 0.2, %v554_v60  ;;  %vm596_vm11 = vcmp.ge.f32.partialorder %v482_v63, 0.0  ;;  %v628_v7 = vmul.f32 0.2, %v482_v63  ;;  %vm612_vm12 = vcmp.ge.f32.partialorder %v546_v0, 0.0 }
 0x157   : > { %v662_v8 = vsel %vm598_vm9, %v490_v59, %v630_v5  ;;  %v644_v9 = vmul.f32 0.2, %v546_v0  ;;  %vm599_vm13 = vcmp.ge.f32.partialorder %v493_v1, 0.0  ;;  %v631_v10 = vmul.f32 0.2, %v493_v1 }
 0x158   : > { %v678_v11 = vsel %vm614_vm10, %v554_v60, %v646_v6  ;;  %v660_v12 = vsel %vm596_vm11, %v482_v63, %v628_v7  ;;  %vm615_vm14 = vcmp.ge.f32.partialorder %v557_v2, 0.0  ;;  %v647_v13 = vmul.f32 0.2, %v557_v2  ;;  %v1216_v14 = vpop.f32.mrb[8].mxu0  ;;  %v1232_v15 = vpop.f32.mrb[8].mxu1 }
 0x159   : > { %v663_v16 = vsel %vm599_vm13, %v493_v1, %v631_v10  ;;  %v485_v17 = vadd.f32 %v1792_v18, %v484_v3  ;;  %v549_v19 = vadd.f32 %v1792_v18, %v548_v4  ;;  %v506_v20 = vadd.f32 %v1216_v14, %v1792_v18  ;;  %v497_v21 = vpop.f32.mrb[9].mxu0  ;;  %v561_v22 = vpop.f32.mrb[9].mxu1 }
 0x15a   : > { %v1107_v23 = vpack.c.bf16 %v663_v16, %v662_v8  ;;  %v679_v24 = vsel %vm615_vm14, %v557_v2, %v647_v13  ;;  %v570_v25 = vadd.f32 %v1232_v15, %v1792_v18  ;;  %v498_v26 = vadd.f32 %v1792_v18, %v497_v21  ;;  %v1217_v27 = vpop.f32.mrb[10].mxu0  ;;  %v1233_v28 = vpop.f32.mrb[10].mxu1 }
 0x15b   : > { %v1147_v29 = vpack.c.bf16 %v679_v24, %v678_v11  ;;  %vm597_vm15 = vcmp.ge.f32.partialorder %v485_v17, 0.0  ;;  %v629_v30 = vmul.f32 0.2, %v485_v17  ;;  %vm613_vm0 = vcmp.ge.f32.partialorder %v549_v19, 0.0  ;;  %v500_v31 = vpop.f32.mrb[11].mxu0  ;;  %v564_v32 = vpop.f32.mrb[11].mxu1 }
 0x15c   : > { %1171 = vst [vmem:[%s1808_s20 + $0x18] sm:$0xff] %v1107_v23   ;;  %v645_v33 = vmul.f32 0.2, %v549_v19  ;;  %vm602_vm1 = vcmp.ge.f32.partialorder %v506_v20, 0.0  ;;  %v634_v34 = vmul.f32 0.2, %v506_v20  ;;  %v676_v35 = vsel %vm612_vm12, %v546_v0, %v644_v9 }
 0x15d   : > { %vm618_vm2 = vcmp.ge.f32.partialorder %v570_v25, 0.0  ;;  %1179 = vst [vmem:[%s1808_s20 + $0x58] sm:$0xff] %v1147_v29   ;;  %v661_v36 = vsel %vm597_vm15, %v485_v17, %v629_v30  ;;  %v650_v37 = vmul.f32 0.2, %v570_v25  ;;  %vm600_vm3 = vcmp.ge.f32.partialorder %v498_v26, 0.0 }
 0x15e   : > { %v1102_v38 = vpack.c.bf16 %v661_v36, %v660_v12  ;;  %v677_v39 = vsel %vm613_vm0, %v549_v19, %v645_v33  ;;  %v632_v40 = vmul.f32 0.2, %v498_v26  ;;  %v562_v41 = vadd.f32 %v1792_v18, %v561_v22 }
 0x15f   : > { %v1142_v42 = vpack.c.bf16 %v677_v39, %v676_v35  ;;  %v666_v43 = vsel %vm602_vm1, %v506_v20, %v634_v34  ;;  %v682_v44 = vsel %vm618_vm2, %v570_v25, %v650_v37  ;;  %v509_v45 = vadd.f32 %v1217_v27, %v1792_v18 }
 0x160   : > { %1170 = vst [vmem:[%s1808_s20 + $0x10] sm:$0xff] %v1102_v38   ;;  %vm616_vm4 = vcmp.ge.f32.partialorder %v562_v41, 0.0  ;;  %v648_v46 = vmul.f32 0.2, %v562_v41  ;;  %v573_v47 = vadd.f32 %v1233_v28, %v1792_v18  ;;  %v501_v48 = vadd.f32 %v1792_v18, %v500_v31  ;;  %v1220_v49 = vpop.f32.mrb[12].mxu0  ;;  %v1236_v50 = vpop.f32.mrb[12].mxu1 }
 0x161   : > { %1178 = vst [vmem:[%s1808_s20 + $0x50] sm:$0xff] %v1142_v42   ;;  %vm603_vm5 = vcmp.ge.f32.partialorder %v509_v45, 0.0  ;;  %v635_v51 = vmul.f32 0.2, %v509_v45  ;;  %v565_v52 = vadd.f32 %v1792_v18, %v564_v32  ;;  %v522_v53 = vadd.f32 %v1220_v49, %v1792_v18  ;;  %v513_v54 = vpop.f32.mrb[13].mxu0  ;;  %v577_v55 = vpop.f32.mrb[13].mxu1 }
 0x162   : > { %v664_v56 = vsel %vm600_vm3, %v498_v26, %v632_v40  ;;  %vm619_vm6 = vcmp.ge.f32.partialorder %v573_v47, 0.0  ;;  %v651_v57 = vmul.f32 0.2, %v573_v47  ;;  %vm601_vm7 = vcmp.ge.f32.partialorder %v501_v48, 0.0  ;;  %v1221_v58 = vpop.f32.mrb[14].mxu0  ;;  %v1237_v59 = vpop.f32.mrb[14].mxu1 }
 0x163   : > { %v667_v60 = vsel %vm603_vm5, %v509_v45, %v635_v51  ;;  %v633_v61 = vmul.f32 0.2, %v501_v48  ;;  %vm617_vm8 = vcmp.ge.f32.partialorder %v565_v52, 0.0  ;;  %v649_v62 = vmul.f32 0.2, %v565_v52  ;;  %v516_v63 = vpop.f32.mrb[15].mxu0 }
 0x164   : > { %v680_v0 = vsel %vm616_vm4, %v562_v41, %v648_v46  ;;  %v1117_v1 = vpack.c.bf16 %v667_v60, %v666_v43  ;;  %v683_v2 = vsel %vm619_vm6, %v573_v47, %v651_v57  ;;  %v638_v3 = vmul.f32 0.2, %v522_v53  ;;  %v580_v4 = vpop.f32.mrb[15].mxu1 }
 0x165   : > { %v1157_v5 = vpack.c.bf16 %v683_v2, %v682_v44  ;;  %v665_v6 = vsel %vm601_vm7, %v501_v48, %v633_v61  ;;  %v681_v7 = vsel %vm617_vm8, %v565_v52, %v649_v62  ;;  %v586_v8 = vadd.f32 %v1236_v50, %v1792_v18 }
 0x166   : > { %1173 = vst [vmem:[%s1808_s20 + $0x28] sm:$0xff] %v1117_v1   ;;  %v1112_v9 = vpack.c.bf16 %v665_v6, %v664_v56  ;;  %v1152_v10 = vpack.c.bf16 %v681_v7, %v680_v0  ;;  %vm606_vm9 = vcmp.ge.f32.partialorder %v522_v53, 0.0  ;;  %v514_v11 = vadd.f32 %v1792_v18, %v513_v54 }
 0x167   : > { %1181 = vst [vmem:[%s1808_s20 + $0x68] sm:$0xff] %v1157_v5   ;;  %vm622_vm10 = vcmp.ge.f32.partialorder %v586_v8, 0.0  ;;  %v654_v12 = vmul.f32 0.2, %v586_v8  ;;  %v578_v13 = vadd.f32 %v1792_v18, %v577_v55  ;;  %v525_v14 = vadd.f32 %v1221_v58, %v1792_v18 }
 0x168   : > { %1172 = vst [vmem:[%s1808_s20 + $0x20] sm:$0xff] %v1112_v9   ;;  %1180 = vst [vmem:[%s1808_s20 + $0x60] sm:$0xff] %v1152_v10   ;;  %v636_v15 = vmul.f32 0.2, %v514_v11  ;;  %v589_v16 = vadd.f32 %v1237_v59, %v1792_v18  ;;  %v517_v17 = vadd.f32 %v1792_v18, %v516_v63  ;;  %v670_v19 = vsel %vm606_vm9, %v522_v53, %v638_v3 }
 0x169   : > { %vm604_vm11 = vcmp.ge.f32.partialorder %v514_v11, 0.0  ;;  %vm607_vm12 = vcmp.ge.f32.partialorder %v525_v14, 0.0  ;;  %v686_v20 = vsel %vm622_vm10, %v586_v8, %v654_v12  ;;  %v639_v21 = vmul.f32 0.2, %v525_v14 }
 0x16a   : > { %vm623_vm13 = vcmp.ge.f32.partialorder %v589_v16, 0.0  ;;  %v655_v22 = vmul.f32 0.2, %v589_v16  ;;  %vm620_vm14 = vcmp.ge.f32.partialorder %v578_v13, 0.0  ;;  %vm605_vm15 = vcmp.ge.f32.partialorder %v517_v17, 0.0 }
 0x16b   : > { %v637_v23 = vmul.f32 0.2, %v517_v17  ;;  %v581_v24 = vadd.f32 %v1792_v18, %v580_v4  ;;  %v668_v25 = vsel %vm604_vm11, %v514_v11, %v636_v15  ;;  %v652_v26 = vmul.f32 0.2, %v578_v13 }
 0x16c   : > { %v671_v27 = vsel %vm607_vm12, %v525_v14, %v639_v21  ;;  %v687_v28 = vsel %vm623_vm13, %v589_v16, %v655_v22 }
 0x16d   : > { %v1127_v29 = vpack.c.bf16 %v671_v27, %v670_v19  ;;  %v1167_v30 = vpack.c.bf16 %v687_v28, %v686_v20  ;;  %v669_v31 = vsel %vm605_vm15, %v517_v17, %v637_v23  ;;  %vm621_vm0 = vcmp.ge.f32.partialorder %v581_v24, 0.0 }
 0x16e   : > { %v1122_v32 = vpack.c.bf16 %v669_v31, %v668_v25  ;;  %v653_v33 = vmul.f32 0.2, %v581_v24  ;;  %v684_v18 = vsel %vm620_vm14, %v578_v13, %v652_v26 }
 0x16f   : > { %1175 = vst [vmem:[%s1808_s20 + $0x38] sm:$0xff] %v1127_v29   ;;  %1183 = vst [vmem:[%s1808_s20 + $0x78] sm:$0xff] %v1167_v30  }
 0x170   : > { %1174 = vst [vmem:[%s1808_s20 + $0x30] sm:$0xff] %v1122_v32   ;;  %v685_v34 = vsel %vm621_vm0, %v581_v24, %v653_v33 }
 0x171   : > { %v1162_v35 = vpack.c.bf16 %v685_v34, %v684_v18 }
 0x173   : > { %1182 = vst [vmem:[%s1808_s20 + $0x70] sm:$0xff] %v1162_v35  }
 0x174   : > { %1446 = shalt.err (!%p1443_p11)
}
 0x175   : > { %s1447_s21 = scalar_lea.hbm %s1856_s26, 2048  ;;  %s1451_s5 = scalar_lea.hbm %s1911_s3, 4096 }
 0x176   : > { %p1448_p0 = scmp.ne.s32.totalorder %s1856_s26, %s1447_s21  ;;  %p1452_p6 = scmp.lt.u32.totalorder %s1856_s26, %s1911_s3 }
 0x177   : > { %p1453_p7 = scmp.lt.u32.totalorder %s1451_s5, %s1447_s21  ;;  %p1455_p8 = scmp.lt.u32.totalorder %s1447_s21, %s1856_s26 }
 0x178   : > { %p1449_p4 = pnand %p1448_p0, %p1926_p12 }
 0x179   : > { %p1454_p2 = por %p1453_p7, %p1452_p6 }
 0x17a   : > { %p1450_p13 = pneg %p1449_p4 }
 0x17b   : > { %p1456_p1 = por %p1455_p8, %p1454_p2 }
 0x17d   : > { %p1457_p10 = pnand %p1456_p1, %p1450_p13 }
 0x17f   : > { %1460 = shalt.err (!%p1457_p10)
}
 0x180   : > { %s1527_s20 = smov 64   ;;  %s1528_s22 = smov 4  }
 0x181   : > { %1252 = dma.vmem_to_hbm [thread:$0]  (%p1926_p12), %s1858_s24, 2048, %s1856_s26, %s849_s15, %s1527_s20, %s1527_s20, %s1528_s22  }
 0x182 PF: > { %s878_s11 = sand.u32 1, %s1499_s12   ;;  %p1927_p3 = scmp.ne.s32.totalorder %s1919_s23, 0 }
 0x183   : > { %p1928_p5 = scmp.ge.s32.totalorder %s1519_s17, 2  ;;  %s879_s18 = scalar_lea.sflag [#allocation4], %s878_s11 }
 0x185   : > { %p1266_p9 = pnand %p1928_p5, %p1927_p3 }
 0x187   : > { %1494 = dma.done.wait (!%p1266_p9), %s879_s18, 2048  }
 0x188   : > { %1496 = vsyncadd (!%p1266_p9), %s879_s18, 4294965248  ;;  %s20_s17 = sadd.s32 1, %s1519_s17   ;;  %s1929_s12 = smov %s1503_s13 }
 0x189   : > { %p17_p11 = scmp.ge.s32.totalorder %s20_s17, 4   ;;  %s1930_s13 = smov %s1507_s14 }
 0x18a   : > { %s1931_s14 = smov %s1695_s6  ;;  %s1932_s15 = smov %s1515_s16 }
 0x18b   : > { %s1933_s16 = smov %s1935_s25  ;;  %19 = sbr.rel (!%p17_p11) target bundleno = 7 (0x7), region = 87 }
 0x192   :  { %884 = vsyncpa [#allocation3], 1 }
 0x193   :  { %886 = vsyncpa [#allocation3 + $0x1], 1 }
 0x194   :  { %887 = vsyncpa [#allocation6], 1 }
 0x195   :  { %888 = vsyncpa [#allocation4], 1 }
 0x196   :  { %890 = vsyncpa [#allocation4 + $0x1], 1 }

// kernel: discriminator_forward.6
= control target key start
LH: loop header
LB: loop body
LE: loop exit
PB: predicated region body
PF: predicated region fallthrough
CT: control target
= control target key end

     0   :  { %7 = vsyncpa [#allocation3], 0  ;;  %s1862_s0 = inlined_call_operand.hbm [shape: bf16[128,576], index: 0, kind: input, shape index: {}]   ;;  %s1863_s1 = inlined_call_operand.hbm [shape: bf16[576,128], index: 1, kind: input, shape index: {}]   ;;  %s1864_s2 = inlined_call_operand.hbm [shape: bf16[128,128], index: 2, kind: output, shape index: {}]  }
   0x1   :  { %8 = vsyncpa [#allocation6], 0 }
   0x2   :  { %9 = vsyncpa [#allocation4], 0  ;;  %s1658_s9 = smov [#allocation2]   ;;  %s1586_s13 = scalar_lea.hbm %s1862_s0, 5120 }
   0x3   :  { %s15_s10 = sshll.u32 %s1658_s9, 4  ;;  %p1587_p0 = scmp.ne.s32.totalorder %s1862_s0, %s1586_s13  ;;  %s16_s10 = int_to_ptr.vmem [resolvable:$true] %s15_s10 }
   0x4   :  { %p1590_p1 = scmp.lt.u32.totalorder %s1586_s13, %s1862_s0 }
   0x6   :  { %p1592_p2 = pnand %p1590_p1, %p1587_p0 }
   0x8   :  { %1595 = shalt.err (!%p1592_p2)
}
   0x9   :  { %s1596_s18 = scalar_lea.vmem %s16_s10, 5120  ;;  %p1601_p4 = scmp.lt.s32.totalorder %s16_s10, %s16_s10 }
   0xa   :  { %p1597_p3 = scmp.ne.s32.totalorder %s16_s10, %s1596_s18  ;;  %p1602_p5 = scmp.lt.s32.totalorder %s1596_s18, %s1596_s18 }
   0xc   :  { %p1603_p6 = por %p1602_p5, %p1601_p4 }
   0xe   :  { %p1604_p7 = pnand %p1603_p6, %p1597_p3 }
  0x10   :  { %1607 = shalt.err (!%p1604_p7)
}
  0x11   :  { %s1659_s19 = smov 320   ;;  %s1660_s20 = smov 20  }
  0x12   :  { %21 = dma.hbm_to_vmem [thread:$0]  %s1862_s0, 5120, %s16_s10, [#allocation3], %s1659_s19, %s1659_s19, %s1660_s20  }
  0x13   :  { %s1661_s23 = smov [#allocation5]   ;;  %s1608_s27 = scalar_lea.hbm %s1863_s1, 4608 }
  0x14   :  { %s27_s24 = sshll.u32 %s1661_s23, 4  ;;  %p1609_p8 = scmp.ne.s32.totalorder %s1863_s1, %s1608_s27  ;;  %s28_s24 = int_to_ptr.vmem [resolvable:$true] %s27_s24 }
  0x15   :  { %p1612_p9 = scmp.lt.u32.totalorder %s1608_s27, %s1863_s1 }
  0x17   :  { %p1614_p10 = pnand %p1612_p9, %p1609_p8 }
  0x19   :  { %1617 = shalt.err (!%p1614_p10)
}
  0x1a   :  { %s1618_s4 = scalar_lea.vmem %s28_s24, 4608  ;;  %p1623_p12 = scmp.lt.s32.totalorder %s28_s24, %s28_s24 }
  0x1b   :  { %p1619_p11 = scmp.ne.s32.totalorder %s28_s24, %s1618_s4  ;;  %p1624_p13 = scmp.lt.s32.totalorder %s1618_s4, %s1618_s4 }
  0x1d   :  { %p1625_p0 = por %p1624_p13, %p1623_p12 }
  0x1f   :  { %p1626_p1 = pnand %p1625_p0, %p1619_p11 }
  0x21   :  { %1629 = shalt.err (!%p1626_p1)
}
  0x22   :  { %s1662_s0 = smov 64   ;;  %s1663_s5 = smov 4  }
  0x23   :  { %33 = dma.hbm_to_vmem [thread:$0]  %s1863_s1, 4608, %s28_s24, [#allocation6], %s1662_s0, %s1662_s0, %s1663_s5  }
  0x24   :  { %1652 = dma.done.wait [#allocation3], 5120  }
  0x25   :  { %1653 = vsyncadd [#allocation3], 4294962176 }
  0x26   :  { %1654 = dma.done.wait [#allocation6], 4608  }
  0x27   :  { %1655 = vsyncadd [#allocation6], 4294962688  ;;  %v1490_v0 = vld [vmem:[#allocation5 + $0x40] sm:$0xff]   ;;  %v1494_v4 = vld [vmem:[#allocation5 + $0x48] sm:$0xff]   ;;  %vm577_vm0 = vcmask 523264   ;;  %s1664_s1 = smov [#allocation7]  }
  0x28   :  { %v1491_v1 = vld [vmem:[#allocation5 + $0xc0] sm:$0xff]   ;;  %1311 = vmatprep.subr.bf16.mxu0 %v1490_v0  ;;  %v1495_v5 = vld [vmem:[#allocation5 + $0xc8] sm:$0xff]   ;;  %v1498_v8 = vld [vmem:[#allocation5 + $0x50] sm:$0xff]   ;;  %s1135_s8 = sshll.u32 %s1664_s1, 4  ;;  %s1136_s8 = int_to_ptr.vmem [resolvable:$true] %s1135_s8 }
  0x29   :  { %v1492_v2 = vld [vmem:[#allocation5] sm:$0xff]   ;;  %1375 = vmatprep.subr.bf16.mxu1 %v1491_v1  ;;  %v1496_v6 = vld [vmem:[#allocation5 + $0x8] sm:$0xff]   ;;  %v1499_v9 = vld [vmem:[#allocation5 + $0xd0] sm:$0xff]   ;;  %s1630_s9 = scalar_lea.vmem %s1136_s8, 1024  ;;  %p1635_p3 = scmp.lt.s32.totalorder %s1136_s8, %s1136_s8 }
  0x2a   :  { %v1493_v3 = vld [vmem:[#allocation5 + $0x80] sm:$0xff]   ;;  %1312 = vmatpush3.bf16.msra.mxu0 %v1492_v2  ;;  %v1497_v7 = vld [vmem:[#allocation5 + $0x88] sm:$0xff]   ;;  %v1500_v10 = vld [vmem:[#allocation5 + $0x10] sm:$0xff]   ;;  %p1631_p2 = scmp.ne.s32.totalorder %s1136_s8, %s1630_s9  ;;  %p1636_p4 = scmp.lt.s32.totalorder %s1630_s9, %s1630_s9 }
  0x2b   :  { %1376 = vmatpush3.bf16.msra.mxu1 %v1493_v3  ;;  %1313 = vmatprep.subr.bf16.mxu0 %v1494_v4  ;;  %v1501_v11 = vld [vmem:[#allocation5 + $0x90] sm:$0xff]   ;;  %v1502_v12 = vld [vmem:[#allocation5 + $0x58] sm:$0xff]   ;;  %v1506_v16 = vld [vmem:[#allocation5 + $0x60] sm:$0xff]  }
  0x2c   :  { %1377 = vmatprep.subr.bf16.mxu1 %v1495_v5  ;;  %v1503_v13 = vld [vmem:[#allocation5 + $0xd8] sm:$0xff]   ;;  %v1507_v17 = vld [vmem:[#allocation5 + $0xe0] sm:$0xff]   ;;  %v1510_v20 = vld [vmem:[#allocation5 + $0x68] sm:$0xff]   ;;  %p1637_p5 = por %p1636_p4, %p1635_p3 }
  0x2d   :  { %v1504_v14 = vld [vmem:[#allocation5 + $0x18] sm:$0xff]   ;;  %v1508_v18 = vld [vmem:[#allocation5 + $0x20] sm:$0xff]   ;;  %v1511_v21 = vld [vmem:[#allocation5 + $0xe8] sm:$0xff]  }
  0x2e   :  { %1314 = vmatpush3.bf16.msra.mxu0 %v1496_v6  ;;  %v1505_v15 = vld [vmem:[#allocation5 + $0x98] sm:$0xff]   ;;  %v1509_v19 = vld [vmem:[#allocation5 + $0xa0] sm:$0xff]   ;;  %v1512_v22 = vld [vmem:[#allocation5 + $0x28] sm:$0xff]   ;;  %p1638_p6 = pnand %p1637_p5, %p1631_p2 }
  0x2f   :  { %1378 = vmatpush3.bf16.msra.mxu1 %v1497_v7  ;;  %1315 = vmatprep.subr.bf16.mxu0 %v1498_v8  ;;  %v1513_v23 = vld [vmem:[#allocation5 + $0xa8] sm:$0xff]   ;;  %v1514_v24 = vld [vmem:[#allocation5 + $0x70] sm:$0xff]   ;;  %v1518_v28 = vld [vmem:[#allocation5 + $0x78] sm:$0xff]  }
  0x30   :  { %1379 = vmatprep.subr.bf16.mxu1 %v1499_v9  ;;  %v1515_v25 = vld [vmem:[#allocation5 + $0xf0] sm:$0xff]   ;;  %v1519_v29 = vld [vmem:[#allocation5 + $0xf8] sm:$0xff]   ;;  %v1527_v35 = vld [vmem:[#allocation2 + $0xc] ss:$20 sps:$4 sm:$0xff]  }
  0x31   :  { %v1516_v26 = vld [vmem:[#allocation5 + $0x30] sm:$0xff]   ;;  %v1520_v30 = vld [vmem:[#allocation5 + $0x38] sm:$0xff]   ;;  %v1528_v36 = vld [vmem:[#allocation5 + $0x100] sm:$0xff]   ;;  %731 = vmatprep.mubr.bf16.mxu1 %v1527_v35 }
  0x32   :  { %1316 = vmatpush3.bf16.msra.mxu0 %v1500_v10  ;;  %v1517_v27 = vld [vmem:[#allocation5 + $0xb0] sm:$0xff]   ;;  %v1521_v31 = vld [vmem:[#allocation5 + $0xb8] sm:$0xff]   ;;  %v1529_v37 = vld [vmem:[#allocation2 + $0x2c] ss:$20 sps:$4 sm:$0xff]  }
  0x33   :  { %1380 = vmatpush3.bf16.msra.mxu1 %v1501_v11  ;;  %1317 = vmatprep.subr.bf16.mxu0 %v1502_v12  ;;  %v1522_v32 = vld [vmem:[#allocation2] ss:$20 sps:$4 sm:$0xff]   ;;  %v1524_v33 = vld [vmem:[#allocation2 + $0x4] ss:$20 sps:$4 sm:$0xff]   ;;  %v1525_v34 = vld [vmem:[#allocation2 + $0x8] ss:$20 sps:$4 sm:$0xff]  }
  0x34   :  { %1381 = vmatprep.subr.bf16.mxu1 %v1503_v13  ;;  %634 = vmatprep.mubr.bf16.mxu0 %v1524_v33  ;;  %v1531_v38 = vld [vmem:[#allocation2 + $0x34] ss:$20 sps:$4 sm:$0xff]   ;;  %v1534_v40 = vld [vmem:[#allocation2 + $0x30] ss:$20 sps:$4 sm:$0xff]   ;;  %v1540_v45 = vld [vmem:[#allocation2 + $0x58] ss:$20 sps:$4 sm:$0xff]  }
  0x35   :  { %v1533_v39 = vld [vmem:[#allocation2 + $0x28] ss:$20 sps:$4 sm:$0xff]   ;;  %v1539_v44 = vld [vmem:[#allocation2 + $0x50] ss:$20 sps:$4 sm:$0xff]   ;;  %v1546_v50 = vld [vmem:[#allocation2 + $0x78] ss:$20 sps:$4 sm:$0xff]  }
  0x36   :  { %1318 = vmatpush3.bf16.msra.mxu0 %v1504_v14  ;;  %v1535_v41 = vld [vmem:[#allocation2 + $0x54] ss:$20 sps:$4 sm:$0xff]   ;;  %v1537_v43 = vld [vmem:[#allocation2 + $0x5c] ss:$20 sps:$4 sm:$0xff]   ;;  %v1544_v48 = vld [vmem:[#allocation2 + $0x84] ss:$20 sps:$4 sm:$0xff]  }
  0x37   :  { %1382 = vmatpush3.bf16.msra.mxu1 %v1505_v15  ;;  %1319 = vmatprep.subr.bf16.mxu0 %v1506_v16  ;;  %v1541_v42 = vld [vmem:[#allocation5 + $0x108] sm:$0xff]   ;;  %v1554_v46 = vld [vmem:[#allocation5 + $0x110] sm:$0xff]   ;;  %v1567_v49 = vld [vmem:[#allocation5 + $0x118] sm:$0xff]  }
  0x38   :  { %1383 = vmatprep.subr.bf16.mxu1 %v1507_v17  ;;  %v1542_v47 = vld [vmem:[#allocation2 + $0x7c] ss:$20 sps:$4 sm:$0xff]   ;;  %v1547_v51 = vld [vmem:[#allocation2 + $0x80] ss:$20 sps:$4 sm:$0xff]   ;;  %v1548_v52 = vld [vmem:[#allocation2 + $0xa4] ss:$20 sps:$4 sm:$0xff]  }
  0x39   :  { %v1550_v53 = vld [vmem:[#allocation2 + $0xac] ss:$20 sps:$4 sm:$0xff]   ;;  %v1553_v55 = vld [vmem:[#allocation2 + $0xa8] ss:$20 sps:$4 sm:$0xff]   ;;  %v1560_v59 = vld [vmem:[#allocation2 + $0xd0] ss:$20 sps:$4 sm:$0xff]  }
  0x3a   :  { %1320 = vmatpush3.bf16.msra.mxu0 %v1508_v18  ;;  %v1552_v54 = vld [vmem:[#allocation2 + $0xa0] ss:$20 sps:$4 sm:$0xff]   ;;  %v1559_v58 = vld [vmem:[#allocation2 + $0xc8] ss:$20 sps:$4 sm:$0xff]   ;;  %v1565_v62 = vld [vmem:[#allocation2 + $0xf0] ss:$20 sps:$4 sm:$0xff]  }
  0x3b   :  { %1384 = vmatpush3.bf16.msra.mxu1 %v1509_v19  ;;  %1321 = vmatprep.subr.bf16.mxu0 %v1510_v20  ;;  %v1555_v56 = vld [vmem:[#allocation2 + $0xcc] ss:$20 sps:$4 sm:$0xff]   ;;  %v1557_v57 = vld [vmem:[#allocation2 + $0xd4] ss:$20 sps:$4 sm:$0xff]   ;;  %v1563_v61 = vld [vmem:[#allocation2 + $0xfc] ss:$20 sps:$4 sm:$0xff]  }
  0x3c   :  { %1385 = vmatprep.subr.bf16.mxu1 %v1511_v21  ;;  %v1561_v60 = vld [vmem:[#allocation2 + $0xf4] ss:$20 sps:$4 sm:$0xff]   ;;  %v1566_v63 = vld [vmem:[#allocation2 + $0xf8] ss:$20 sps:$4 sm:$0xff]   ;;  %v1568_v0 = vld [vmem:[#allocation2 + $0x11c] ss:$20 sps:$4 sm:$0xff]  }
  0x3d   :  { %v1570_v1 = vld [vmem:[#allocation2 + $0x124] ss:$20 sps:$4 sm:$0xff]   ;;  %v1573_v3 = vld [vmem:[#allocation2 + $0x120] ss:$20 sps:$4 sm:$0xff]   ;;  %v1580_v10 = vld [vmem:[#allocation2 + $0x88] ss:$20 sps:$4 sm:$0xff]  }
  0x3e   :  { %1322 = vmatpush3.bf16.msra.mxu0 %v1512_v22  ;;  %v1572_v2 = vld [vmem:[#allocation2 + $0x118] ss:$20 sps:$4 sm:$0xff]   ;;  %v1574_v4 = vld [vmem:[#allocation2 + $0x10] ss:$20 sps:$4 sm:$0xff]   ;;  %v1578_v8 = vld [vmem:[#allocation2 + $0x60] ss:$20 sps:$4 sm:$0xff]  }
  0x3f   :  { %1386 = vmatpush3.bf16.msra.mxu1 %v1513_v23  ;;  %1323 = vmatprep.subr.bf16.mxu0 %v1514_v24  ;;  %v1575_v5 = vld [vmem:[#allocation2 + $0xb0] ss:$20 sps:$4 sm:$0xff]   ;;  %v1576_v6 = vld [vmem:[#allocation2 + $0x38] ss:$20 sps:$4 sm:$0xff]   ;;  %v1579_v9 = vld [vmem:[#allocation2 + $0x100] ss:$20 sps:$4 sm:$0xff]  }
  0x40   :  { %1387 = vmatprep.subr.bf16.mxu1 %v1515_v25  ;;  %v1577_v7 = vld [vmem:[#allocation2 + $0xd8] ss:$20 sps:$4 sm:$0xff]   ;;  %v1581_v11 = vld [vmem:[#allocation2 + $0x128] ss:$20 sps:$4 sm:$0xff]  }
  0x42   :  { %1324 = vmatpush3.bf16.msra.mxu0 %v1516_v26 }
  0x43   :  { %1388 = vmatpush3.bf16.msra.mxu1 %v1517_v27  ;;  %1325 = vmatprep.subr.bf16.mxu0 %v1518_v28 }
  0x44   :  { %1389 = vmatprep.subr.bf16.mxu1 %v1519_v29 }
  0x46   :  { %1326 = vmatpush3.bf16.msra.mxu0 %v1520_v30 }
  0x47   :  { %1390 = vmatpush3.bf16.msra.mxu1 %v1521_v31  ;;  %1451 = vmatprep.subr.bf16.mxu0 %v1528_v36 }
  0x48   :  { %1475 = vmatprep.subr.bf16.mxu1 %v1528_v36 }
  0x49   :  { %635 = vmatmul.mubr.bf16.vlgmr.msra.gmra.mrb[0].mxu0 %v1522_v32 }
  0x4a   :  { %732 = vmatmul.mubr.bf16.vlgmr.msra.gmra.mrb[0].mxu1 %v1525_v34  ;;  %1452 = vmatpush3.bf16.msra.mxu0 %v1528_v36 }
  0x4b   :  { %1479 = vmatpush3.bf16.msra.mxu1 %v1528_v36  ;;  %642 = vmatprep.mubr.bf16.mxu0 %v1529_v37 }
  0x4c   :  { %739 = vmatprep.mubr.bf16.mxu1 %v1531_v38  ;;  %1453 = vmatprep.subr.bf16.mxu0 %v1541_v42 }
  0x4d   :  { %1476 = vmatprep.subr.bf16.mxu1 %v1541_v42 }
  0x4e   :  { %1454 = vmatpush3.bf16.msra.mxu0 %v1541_v42 }
  0x4f   :  { %1480 = vmatpush3.bf16.msra.mxu1 %v1541_v42  ;;  %1455 = vmatprep.subr.bf16.mxu0 %v1554_v46 }
  0x50   :  { %1477 = vmatprep.subr.bf16.mxu1 %v1554_v46 }
  0x51   :  { %643 = vmatmul.mubr.bf16.gmra.mrb[4].mxu0 %v1533_v39 }
  0x52   :  { %740 = vmatmul.mubr.bf16.gmra.mrb[4].mxu1 %v1534_v40  ;;  %650 = vmatprep.mubr.bf16.mxu0 %v1535_v41 }
  0x53   :  { %747 = vmatprep.mubr.bf16.mxu1 %v1537_v43  ;;  %1456 = vmatpush3.bf16.msra.mxu0 %v1554_v46 }
  0x54   :  { %1481 = vmatpush3.bf16.msra.mxu1 %v1554_v46  ;;  %1457 = vmatprep.subr.bf16.mxu0 %v1567_v49 }
  0x55   :  { %1478 = vmatprep.subr.bf16.mxu1 %v1567_v49 }
  0x57   :  { %1458 = vmatpush3.bf16.msra.mxu0 %v1567_v49 }
  0x58   :  { %1482 = vmatpush3.bf16.msra.mxu1 %v1567_v49 }
  0x59   :  { %651 = vmatmul.mubr.bf16.gmra.mrb[8].mxu0 %v1539_v44 }
  0x5a   :  { %748 = vmatmul.mubr.bf16.gmra.mrb[8].mxu1 %v1540_v45  ;;  %658 = vmatprep.mubr.bf16.mxu0 %v1542_v47 }
  0x5b   :  { %755 = vmatprep.mubr.bf16.mxu1 %v1544_v48 }
  0x61   :  { %659 = vmatmul.mubr.bf16.gmra.mrb[12].mxu0 %v1546_v50 }
  0x62   :  { %756 = vmatmul.mubr.bf16.gmra.mrb[12].mxu1 %v1547_v51  ;;  %666 = vmatprep.mubr.bf16.mxu0 %v1548_v52 }
  0x63   :  { %763 = vmatprep.mubr.bf16.mxu1 %v1550_v53 }
  0x69   :  { %667 = vmatmul.mubr.bf16.gmra.mrb[16].mxu0 %v1552_v54 }
  0x6a   :  { %764 = vmatmul.mubr.bf16.gmra.mrb[16].mxu1 %v1553_v55  ;;  %674 = vmatprep.mubr.bf16.mxu0 %v1555_v56 }
  0x6b   :  { %771 = vmatprep.mubr.bf16.mxu1 %v1557_v57 }
  0x71   :  { %675 = vmatmul.mubr.bf16.gmra.mrb[20].mxu0 %v1559_v58 }
  0x72   :  { %772 = vmatmul.mubr.bf16.gmra.mrb[20].mxu1 %v1560_v59  ;;  %682 = vmatprep.mubr.bf16.mxu0 %v1561_v60 }
  0x73   :  { %779 = vmatprep.mubr.bf16.mxu1 %v1563_v61 }
  0x79   :  { %683 = vmatmul.mubr.bf16.gmra.mrb[24].mxu0 %v1565_v62 }
  0x7a   :  { %780 = vmatmul.mubr.bf16.gmra.mrb[24].mxu1 %v1566_v63  ;;  %690 = vmatprep.mubr.bf16.mxu0 %v1568_v0 }
  0x7b   :  { %787 = vmatprep.mubr.bf16.mxu1 %v1570_v1 }
  0x81   :  { %691 = vmatmul.mubr.bf16.gmra.mrb[28].mxu0 %v1572_v2 }
  0x82   :  { %788 = vmatmul.mubr.bf16.gmra.mrb[28].mxu1 %v1573_v3  ;;  %1459 = vmatprep.mubr.msk.bf16.mxu0 %vm577_vm0, %v1574_v4 }
  0x83   :  { %1467 = vmatprep.mubr.msk.bf16.mxu1 %vm577_vm0, %v1575_v5 }
  0x89   :  { %1460 = vmatmul.mubr.msk.bf16.vlgmr.msra.gmra.mrb[32].mxu0 %vm577_vm0, %v1576_v6 }
  0x8a   :  { %1468 = vmatmul.mubr.msk.bf16.vlgmr.msra.gmra.mrb[32].mxu1 %vm577_vm0, %v1577_v7  ;;  %1463 = vmatprep.mubr.msk.bf16.mxu0 %vm577_vm0, %v1578_v8 }
  0x8b   :  { %1471 = vmatprep.mubr.msk.bf16.mxu1 %vm577_vm0, %v1579_v9 }
  0x91   :  { %1464 = vmatmul.mubr.msk.bf16.gmra.mrb[36].mxu0 %vm577_vm0, %v1580_v10 }
  0x92   :  { %1472 = vmatmul.mubr.msk.bf16.gmra.mrb[36].mxu1 %vm577_vm0, %v1581_v11 }
 0x11c   :  { %v1327_v12 = vpop.f32.mrb[0].mxu0 }
 0x11d   :  { %v1391_v13 = vpop.f32.mrb[0].mxu1  ;;  %v1328_v14 = vpop.f32.mrb[1].mxu0 }
 0x11e   :  { %v1329_v15 = vadd.f32 %v1328_v14, %v1327_v12  ;;  %v1392_v16 = vpop.f32.mrb[1].mxu1  ;;  %v1330_v17 = vpop.f32.mrb[2].mxu0 }
 0x11f   :  { %v1393_v18 = vadd.f32 %v1392_v16, %v1391_v13  ;;  %v1394_v19 = vpop.f32.mrb[2].mxu1  ;;  %v1331_v20 = vpop.f32.mrb[3].mxu0 }
 0x120   :  { %v1332_v21 = vadd.f32 %v1331_v20, %v1330_v17  ;;  %v1395_v22 = vpop.f32.mrb[3].mxu1 }
 0x121   :  { %v1396_v23 = vadd.f32 %v1395_v22, %v1394_v19  ;;  %v1715_v24 = vadd.f32 %v1393_v18, %v1329_v15 }
 0x123   :  { %v1717_v25 = vadd.f32 %v1396_v23, %v1332_v21 }
 0x124   :  { %v1333_v26 = vpop.f32.mrb[4].mxu0 }
 0x125   :  { %v1397_v27 = vpop.f32.mrb[4].mxu1  ;;  %v1334_v28 = vpop.f32.mrb[5].mxu0 }
 0x126   :  { %v1335_v29 = vadd.f32 %v1334_v28, %v1333_v26  ;;  %v1398_v30 = vpop.f32.mrb[5].mxu1  ;;  %v1336_v31 = vpop.f32.mrb[6].mxu0 }
 0x127   :  { %v1399_v32 = vadd.f32 %v1398_v30, %v1397_v27  ;;  %v1400_v33 = vpop.f32.mrb[6].mxu1  ;;  %v1337_v34 = vpop.f32.mrb[7].mxu0 }
 0x128   :  { %v1338_v35 = vadd.f32 %v1337_v34, %v1336_v31  ;;  %v1401_v36 = vpop.f32.mrb[7].mxu1 }
 0x129   :  { %v1402_v37 = vadd.f32 %v1401_v36, %v1400_v33  ;;  %v1719_v38 = vadd.f32 %v1399_v32, %v1335_v29 }
 0x12b   :  { %v1721_v39 = vadd.f32 %v1402_v37, %v1338_v35 }
 0x12c   :  { %v1339_v40 = vpop.f32.mrb[8].mxu0 }
 0x12d   :  { %v1403_v41 = vpop.f32.mrb[8].mxu1  ;;  %v1340_v42 = vpop.f32.mrb[9].mxu0 }
 0x12e   :  { %v1341_v43 = vadd.f32 %v1340_v42, %v1339_v40  ;;  %v1404_v44 = vpop.f32.mrb[9].mxu1  ;;  %v1342_v45 = vpop.f32.mrb[10].mxu0 }
 0x12f   :  { %v1405_v46 = vadd.f32 %v1404_v44, %v1403_v41  ;;  %v1406_v47 = vpop.f32.mrb[10].mxu1  ;;  %v1343_v48 = vpop.f32.mrb[11].mxu0 }
 0x130   :  { %v1344_v49 = vadd.f32 %v1343_v48, %v1342_v45  ;;  %v1407_v50 = vpop.f32.mrb[11].mxu1 }
 0x131   :  { %v1408_v51 = vadd.f32 %v1407_v50, %v1406_v47  ;;  %v1723_v52 = vadd.f32 %v1405_v46, %v1341_v43 }
 0x133   :  { %v1725_v53 = vadd.f32 %v1408_v51, %v1344_v49 }
 0x134   :  { %v1345_v54 = vpop.f32.mrb[12].mxu0 }
 0x135   :  { %v1409_v55 = vpop.f32.mrb[12].mxu1  ;;  %v1346_v56 = vpop.f32.mrb[13].mxu0 }
 0x136   :  { %v1347_v57 = vadd.f32 %v1346_v56, %v1345_v54  ;;  %v1410_v58 = vpop.f32.mrb[13].mxu1  ;;  %v1348_v59 = vpop.f32.mrb[14].mxu0 }
 0x137   :  { %v1411_v60 = vadd.f32 %v1410_v58, %v1409_v55  ;;  %v1412_v61 = vpop.f32.mrb[14].mxu1  ;;  %v1349_v62 = vpop.f32.mrb[15].mxu0 }
 0x138   :  { %v1350_v63 = vadd.f32 %v1349_v62, %v1348_v59  ;;  %v1413_v0 = vpop.f32.mrb[15].mxu1 }
 0x139   :  { %v1414_v1 = vadd.f32 %v1413_v0, %v1412_v61  ;;  %v1727_v2 = vadd.f32 %v1411_v60, %v1347_v57 }
 0x13b   :  { %v1729_v3 = vadd.f32 %v1414_v1, %v1350_v63 }
 0x13c   :  { %v1351_v4 = vpop.f32.mrb[16].mxu0 }
 0x13d   :  { %v1415_v5 = vpop.f32.mrb[16].mxu1  ;;  %v1352_v6 = vpop.f32.mrb[17].mxu0 }
 0x13e   :  { %v1353_v7 = vadd.f32 %v1352_v6, %v1351_v4  ;;  %v1416_v8 = vpop.f32.mrb[17].mxu1  ;;  %v1354_v9 = vpop.f32.mrb[18].mxu0 }
 0x13f   :  { %v1417_v10 = vadd.f32 %v1416_v8, %v1415_v5  ;;  %v1418_v11 = vpop.f32.mrb[18].mxu1  ;;  %v1355_v12 = vpop.f32.mrb[19].mxu0 }
 0x140   :  { %v1356_v13 = vadd.f32 %v1355_v12, %v1354_v9  ;;  %v1419_v14 = vpop.f32.mrb[19].mxu1 }
 0x141   :  { %v1420_v15 = vadd.f32 %v1419_v14, %v1418_v11  ;;  %v766_v16 = vadd.f32 %v1417_v10, %v1353_v7 }
 0x143   :  { %v769_v17 = vadd.f32 %v1420_v15, %v1356_v13 }
 0x144   :  { %v1357_v18 = vpop.f32.mrb[20].mxu0 }
 0x145   :  { %v1421_v19 = vpop.f32.mrb[20].mxu1  ;;  %v1358_v20 = vpop.f32.mrb[21].mxu0 }
 0x146   :  { %v1359_v21 = vadd.f32 %v1358_v20, %v1357_v18  ;;  %v1422_v22 = vpop.f32.mrb[21].mxu1  ;;  %v1360_v23 = vpop.f32.mrb[22].mxu0 }
 0x147   :  { %v1423_v26 = vadd.f32 %v1422_v22, %v1421_v19  ;;  %v1424_v27 = vpop.f32.mrb[22].mxu1  ;;  %v1361_v28 = vpop.f32.mrb[23].mxu0 }
 0x148   :  { %v1362_v29 = vadd.f32 %v1361_v28, %v1360_v23  ;;  %v1425_v30 = vpop.f32.mrb[23].mxu1 }
 0x149   :  { %v1426_v31 = vadd.f32 %v1425_v30, %v1424_v27  ;;  %v774_v32 = vadd.f32 %v1423_v26, %v1359_v21 }
 0x14b   :  { %v777_v33 = vadd.f32 %v1426_v31, %v1362_v29 }
 0x14c   :  { %v1363_v34 = vpop.f32.mrb[24].mxu0 }
 0x14d   :  { %v1427_v35 = vpop.f32.mrb[24].mxu1  ;;  %v1364_v36 = vpop.f32.mrb[25].mxu0 }
 0x14e   :  { %v1365_v37 = vadd.f32 %v1364_v36, %v1363_v34  ;;  %v1428_v40 = vpop.f32.mrb[25].mxu1  ;;  %v1366_v41 = vpop.f32.mrb[26].mxu0 }
 0x14f   :  { %v1429_v42 = vadd.f32 %v1428_v40, %v1427_v35  ;;  %v1430_v43 = vpop.f32.mrb[26].mxu1  ;;  %v1367_v44 = vpop.f32.mrb[27].mxu0 }
 0x150   :  { %v1368_v45 = vadd.f32 %v1367_v44, %v1366_v41  ;;  %v1431_v46 = vpop.f32.mrb[27].mxu1 }
 0x151   :  { %v1432_v47 = vadd.f32 %v1431_v46, %v1430_v43  ;;  %v782_v48 = vadd.f32 %v1429_v42, %v1365_v37 }
 0x153   :  { %v785_v49 = vadd.f32 %v1432_v47, %v1368_v45 }
 0x154   :  { %v1369_v50 = vpop.f32.mrb[28].mxu0 }
 0x155   :  { %v1433_v51 = vpop.f32.mrb[28].mxu1  ;;  %v1370_v54 = vpop.f32.mrb[29].mxu0 }
 0x156   :  { %v1371_v55 = vadd.f32 %v1370_v54, %v1369_v50  ;;  %v1434_v56 = vpop.f32.mrb[29].mxu1  ;;  %v1372_v57 = vpop.f32.mrb[30].mxu0 }
 0x157   :  { %v1435_v58 = vadd.f32 %v1434_v56, %v1433_v51  ;;  %v1436_v59 = vpop.f32.mrb[30].mxu1  ;;  %v1373_v60 = vpop.f32.mrb[31].mxu0 }
 0x158   :  { %v1374_v61 = vadd.f32 %v1373_v60, %v1372_v57  ;;  %v1437_v62 = vpop.f32.mrb[31].mxu1 }
 0x159   :  { %v1438_v63 = vadd.f32 %v1437_v62, %v1436_v59  ;;  %v790_v0 = vadd.f32 %v1435_v58, %v1371_v55 }
 0x15b   :  { %v793_v1 = vadd.f32 %v1438_v63, %v1374_v61 }
 0x15c   :  { %v1461_v4 = vpop.f32.mrb[32].mxu0 }
 0x15d   :  { %v839_v5 = vadd.f32 %v1461_v4, %v1719_v38  ;;  %v1469_v6 = vpop.f32.mrb[32].mxu1  ;;  %v830_v7 = vpop.f32.mrb[33].mxu0 }
 0x15e   :  { %v1732_v8 = vadd.f32 %v1469_v6, %v774_v32  ;;  %v831_v9 = vadd.f32 %v830_v7, %v1715_v24  ;;  %v862_v10 = vpop.f32.mrb[33].mxu1  ;;  %v1462_v11 = vpop.f32.mrb[34].mxu0 }
 0x15f   :  { %v1735_v12 = vadd.f32 %v862_v10, %v766_v16  ;;  %v842_v13 = vadd.f32 %v1462_v11, %v1721_v39  ;;  %v1470_v14 = vpop.f32.mrb[34].mxu1  ;;  %v833_v15 = vpop.f32.mrb[35].mxu0 }
 0x160   :  { %v1738_v18 = vadd.f32 %v1470_v14, %v777_v33  ;;  %v834_v19 = vadd.f32 %v833_v15, %v1717_v25  ;;  %v865_v20 = vpop.f32.mrb[35].mxu1 }
 0x161   :  { %v866_v38 = vadd.f32 %v865_v20, %v769_v17 }
 0x162   :  { %v893_v21 = vadd.f32 %v834_v19, %v831_v9 }
 0x163   :  { %v972_v22 = vadd.f32 %v866_v38, %v1735_v12 }
 0x164   :  { %v894_v23 = vadd.f32 %v893_v21, %v839_v5  ;;  %v1465_v26 = vpop.f32.mrb[36].mxu0 }
 0x165   :  { %v973_v24 = vadd.f32 %v972_v22, %v1732_v8  ;;  %v855_v16 = vadd.f32 %v1465_v26, %v1727_v2  ;;  %v1473_v27 = vpop.f32.mrb[36].mxu1  ;;  %v846_v28 = vpop.f32.mrb[37].mxu0 }
 0x166   :  { %v887_v39 = vadd.f32 %v1473_v27, %v790_v0  ;;  %v847_v29 = vadd.f32 %v846_v28, %v1723_v52  ;;  %v895_v30 = vadd.f32 %v894_v23, %v842_v13  ;;  %v878_v31 = vpop.f32.mrb[37].mxu1  ;;  %v1466_v32 = vpop.f32.mrb[38].mxu0 }
 0x167   :  { %v879_v25 = vadd.f32 %v878_v31, %v782_v48  ;;  %v974_v17 = vadd.f32 %v973_v24, %v1738_v18  ;;  %v858_v33 = vadd.f32 %v1466_v32, %v1729_v3  ;;  %v1474_v34 = vpop.f32.mrb[38].mxu1  ;;  %v849_v35 = vpop.f32.mrb[39].mxu0 }
 0x168   :  { %v896_v36 = vadd.f32 %v895_v30, %v847_v29  ;;  %v890_v37 = vadd.f32 %v1474_v34, %v793_v1  ;;  %v850_v40 = vadd.f32 %v849_v35, %v1725_v53  ;;  %v881_v2 = vpop.f32.mrb[39].mxu1 }
 0x169   :  { %v975_v41 = vadd.f32 %v974_v17, %v879_v25  ;;  %v882_v42 = vadd.f32 %v881_v2, %v785_v49 }
 0x16a   :  { %v897_v43 = vadd.f32 %v896_v36, %v850_v40 }
 0x16b   :  { %v976_v44 = vadd.f32 %v975_v41, %v882_v42 }
 0x16c   :  { %v898_v52 = vadd.f32 %v897_v43, %v855_v16 }
 0x16d   :  { %v977_v45 = vadd.f32 %v976_v44, %v887_v39 }
 0x16e   :  { %v899_v46 = vadd.f32 %v898_v52, %v858_v33 }
 0x16f   :  { %v978_v47 = vadd.f32 %v977_v45, %v890_v37 }
 0x170   :  { %v900_v48 = vrot.slane %v899_v46, 4 }
 0x171   :  { %v979_v50 = vrot.slane %v978_v47, 4 }
 0x172   :  { %v901_v51 = vadd.f32 %v900_v48, %v899_v46 }
 0x173   :  { %v980_v54 = vadd.f32 %v979_v50, %v978_v47 }
 0x174   :  { %v902_v3 = vrot.slane %v901_v51, 2 }
 0x175   :  { %v981_v55 = vrot.slane %v980_v54, 2 }
 0x176   :  { %v903_v56 = vadd.f32 %v902_v3, %v901_v51 }
 0x177   :  { %v982_v57 = vadd.f32 %v981_v55, %v980_v54 }
 0x178   :  { %v904_v58 = vrot.slane %v903_v56, 1 }
 0x179   :  { %v983_v59 = vrot.slane %v982_v57, 1 }
 0x17a   :  { %v905_v53 = vadd.f32 %v904_v58, %v903_v56 }
 0x17b   :  { %v984_v60 = vadd.f32 %v983_v59, %v982_v57 }
 0x17c   :  { %v907_v61 = vmul.f32 0.015625, %v905_v53 }
 0x17d   :  { %v985_v49 = vmul.f32 0.015625, %v984_v60 }
 0x17e   :  { %v1748_v62 = vsub.f32 %v831_v9, %v907_v61  ;;  %v1750_v63 = vsub.f32 %v834_v19, %v907_v61  ;;  %v1752_v0 = vsub.f32 %v839_v5, %v907_v61  ;;  %v1754_v1 = vsub.f32 %v842_v13, %v907_v61 }
 0x17f   :  { %v1756_v4 = vsub.f32 %v847_v29, %v907_v61  ;;  %v1758_v6 = vsub.f32 %v850_v40, %v907_v61  ;;  %v1760_v7 = vsub.f32 %v855_v16, %v907_v61  ;;  %v1762_v10 = vsub.f32 %v858_v33, %v907_v61 }
 0x180   :  { %v916_v11 = vmul.f32 %v1748_v62, %v1748_v62  ;;  %v917_v9 = vmul.f32 %v1750_v63, %v1750_v63  ;;  %v918_v5 = vmul.f32 %v1752_v0, %v1752_v0  ;;  %v919_v13 = vmul.f32 %v1754_v1, %v1754_v1 }
 0x181   :  { %v1773_v15 = vsub.f32 %v1735_v12, %v985_v49  ;;  %v1775_v19 = vsub.f32 %v866_v38, %v985_v49  ;;  %v1778_v20 = vsub.f32 %v1732_v8, %v985_v49  ;;  %v1781_v21 = vsub.f32 %v1738_v18, %v985_v49 }
 0x182   :  { %v924_v14 = vadd.f32 %v917_v9, %v916_v11  ;;  %v1783_v22 = vsub.f32 %v879_v25, %v985_v49  ;;  %v1785_v23 = vsub.f32 %v882_v42, %v985_v49  ;;  %v1787_v26 = vsub.f32 %v887_v39, %v985_v49 }
 0x183   :  { %v1789_v16 = vsub.f32 %v890_v37, %v985_v49  ;;  %v994_v12 = vmul.f32 %v1773_v15, %v1773_v15  ;;  %v995_v38 = vmul.f32 %v1775_v19, %v1775_v19  ;;  %v920_v8 = vmul.f32 %v1756_v4, %v1756_v4 }
 0x184   :  { %v925_v24 = vadd.f32 %v924_v14, %v918_v5  ;;  %v996_v27 = vmul.f32 %v1778_v20, %v1778_v20  ;;  %v921_v39 = vmul.f32 %v1758_v6, %v1758_v6  ;;  %v997_v30 = vmul.f32 %v1781_v21, %v1781_v21 }
 0x185   :  { %v1002_v28 = vadd.f32 %v995_v38, %v994_v12  ;;  %v922_v32 = vmul.f32 %v1760_v7, %v1760_v7  ;;  %v998_v17 = vmul.f32 %v1783_v22, %v1783_v22  ;;  %v923_v34 = vmul.f32 %v1762_v10, %v1762_v10 }
 0x186   :  { %v926_v18 = vadd.f32 %v925_v24, %v919_v13  ;;  %v999_v36 = vmul.f32 %v1785_v23, %v1785_v23  ;;  %v1000_v2 = vmul.f32 %v1787_v26, %v1787_v26  ;;  %v1001_v43 = vmul.f32 %v1789_v16, %v1789_v16 }
 0x187   :  { %v1003_v31 = vadd.f32 %v1002_v28, %v996_v27 }
 0x188   :  { %v927_v29 = vadd.f32 %v926_v18, %v920_v8 }
 0x189   :  { %v1004_v33 = vadd.f32 %v1003_v31, %v997_v30 }
 0x18a   :  { %v928_v25 = vadd.f32 %v927_v29, %v921_v39 }
 0x18b   :  { %v1005_v37 = vadd.f32 %v1004_v33, %v998_v17 }
 0x18c   :  { %v929_v35 = vadd.f32 %v928_v25, %v922_v32 }
 0x18d   :  { %v1006_v41 = vadd.f32 %v1005_v37, %v999_v36 }
 0x18e   :  { %v930_v40 = vadd.f32 %v929_v35, %v923_v34 }
 0x18f   :  { %v1007_v44 = vadd.f32 %v1006_v41, %v1000_v2 }
 0x190   :  { %v931_v42 = vrot.slane %v930_v40, 4 }
 0x191   :  { %v1008_v45 = vadd.f32 %v1007_v44, %v1001_v43 }
 0x192   :  { %v932_v52 = vadd.f32 %v931_v42, %v930_v40 }
 0x193   :  { %v1009_v47 = vrot.slane %v1008_v45, 4 }
 0x194   :  { %v933_v46 = vrot.slane %v932_v52, 2 }
 0x195   :  { %v1010_v50 = vadd.f32 %v1009_v47, %v1008_v45 }
 0x196   :  { %v934_v48 = vadd.f32 %v933_v46, %v932_v52 }
 0x197   :  { %v1011_v54 = vrot.slane %v1010_v50, 2 }
 0x198   :  { %v935_v51 = vrot.slane %v934_v48, 1 }
 0x199   :  { %v1012_v55 = vadd.f32 %v1011_v54, %v1010_v50 }
 0x19a   :  { %v936_v3 = vadd.f32 %v935_v51, %v934_v48 }
 0x19b   :  { %v1013_v57 = vrot.slane %v1012_v55, 1 }
 0x19c   :  { %v937_v56 = vmul.f32 0.015625, %v936_v3 }
 0x19d   :  { %v1014_v59 = vadd.f32 %v1013_v57, %v1012_v55 }
 0x19e   :  { %v938_v58 = vadd.f32 1e-05, %v937_v56 }
 0x19f   :  { %v1015_v53 = vmul.f32 0.015625, %v1014_v59 }
 0x1a0   :  { %1582 = vrsqrt.f32 %v938_v58 }
 0x1a1   :  { %v1016_v60 = vadd.f32 1e-05, %v1015_v53 }
 0x1a3   :  { %1584 = vrsqrt.f32 %v1016_v60 }
 0x1aa   :  { %v1583_v61 = vpop.eup %1582 }
 0x1ab   :  { %v940_v49 = vmul.f32 %v1583_v61, %v1748_v62  ;;  %v941_v11 = vmul.f32 %v1583_v61, %v1750_v63  ;;  %v942_v9 = vmul.f32 %v1583_v61, %v1752_v0  ;;  %v943_v5 = vmul.f32 %v1583_v61, %v1754_v1 }
 0x1ac   :  { %v944_v13 = vmul.f32 %v1583_v61, %v1756_v4  ;;  %v945_v14 = vmul.f32 %v1583_v61, %v1758_v6  ;;  %v946_v24 = vmul.f32 %v1583_v61, %v1760_v7  ;;  %v947_v12 = vmul.f32 %v1583_v61, %v1762_v10 }
 0x1ad   :  { %vm948_vm1 = vcmp.ge.f32.partialorder %v940_v49, 0.0  ;;  %vm949_vm2 = vcmp.ge.f32.partialorder %v941_v11, 0.0  ;;  %vm950_vm3 = vcmp.ge.f32.partialorder %v942_v9, 0.0  ;;  %vm951_vm4 = vcmp.ge.f32.partialorder %v943_v5, 0.0  ;;  %v1585_v38 = vpop.eup %1584 }
 0x1ae   :  { %vm952_vm5 = vcmp.ge.f32.partialorder %v944_v13, 0.0  ;;  %vm953_vm6 = vcmp.ge.f32.partialorder %v945_v14, 0.0  ;;  %vm954_vm7 = vcmp.ge.f32.partialorder %v946_v24, 0.0  ;;  %vm955_vm8 = vcmp.ge.f32.partialorder %v947_v12, 0.0 }
 0x1af   :  { %v956_v62 = vmul.f32 0.2, %v940_v49  ;;  %v957_v63 = vmul.f32 0.2, %v941_v11  ;;  %v958_v0 = vmul.f32 0.2, %v942_v9  ;;  %v1018_v1 = vmul.f32 %v1585_v38, %v1773_v15 }
 0x1b0   :  { %v959_v4 = vmul.f32 0.2, %v943_v5  ;;  %v960_v6 = vmul.f32 0.2, %v944_v13  ;;  %v961_v8 = vmul.f32 0.2, %v945_v14  ;;  %v1019_v7 = vmul.f32 %v1585_v38, %v1775_v19 }
 0x1b1   :  { %v962_v10 = vmul.f32 0.2, %v946_v24  ;;  %v963_v18 = vmul.f32 0.2, %v947_v12  ;;  %v964_v27 = vsel %vm948_vm1, %v940_v49, %v956_v62  ;;  %v965_v28 = vsel %vm949_vm2, %v941_v11, %v957_v63 }
 0x1b2   :  { %v966_v39 = vsel %vm950_vm3, %v942_v9, %v958_v0  ;;  %v967_v29 = vsel %vm951_vm4, %v943_v5, %v959_v4  ;;  %v968_v30 = vsel %vm952_vm5, %v944_v13, %v960_v6  ;;  %v969_v31 = vsel %vm953_vm6, %v945_v14, %v961_v8 }
 0x1b3   :  { %v970_v15 = vsel %vm954_vm7, %v946_v24, %v962_v10  ;;  %v971_v32 = vsel %vm955_vm8, %v947_v12, %v963_v18  ;;  %v1267_v25 = vpack.c.bf16 %v965_v28, %v964_v27  ;;  %v1272_v19 = vpack.c.bf16 %v967_v29, %v966_v39 }
 0x1b4   :  { %v1277_v17 = vpack.c.bf16 %v969_v31, %v968_v30  ;;  %v1282_v33 = vpack.c.bf16 %v971_v32, %v970_v15  ;;  %v1020_v34 = vmul.f32 %v1585_v38, %v1778_v20  ;;  %v1021_v35 = vmul.f32 %v1585_v38, %v1781_v21 }
 0x1b5   :  { %1304 = vst [vmem:[#allocation7 + $0x8] sm:$0xff] %v1272_v19   ;;  %1268 = vst [vmem:[#allocation7] sm:$0xff] %v1267_v25   ;;  %v1022_v36 = vmul.f32 %v1585_v38, %v1783_v22  ;;  %v1023_v37 = vmul.f32 %v1585_v38, %v1785_v23  ;;  %v1024_v40 = vmul.f32 %v1585_v38, %v1787_v26  ;;  %vm1026_vm9 = vcmp.ge.f32.partialorder %v1018_v1, 0.0 }
 0x1b6   :  { %v1025_v2 = vmul.f32 %v1585_v38, %v1789_v16  ;;  %1305 = vst [vmem:[#allocation7 + $0x10] sm:$0xff] %v1277_v17   ;;  %1306 = vst [vmem:[#allocation7 + $0x18] sm:$0xff] %v1282_v33   ;;  %vm1027_vm10 = vcmp.ge.f32.partialorder %v1019_v7, 0.0  ;;  %vm1028_vm11 = vcmp.ge.f32.partialorder %v1020_v34, 0.0  ;;  %vm1029_vm12 = vcmp.ge.f32.partialorder %v1021_v35, 0.0 }
 0x1b7   :  { %vm1030_vm13 = vcmp.ge.f32.partialorder %v1022_v36, 0.0  ;;  %vm1031_vm14 = vcmp.ge.f32.partialorder %v1023_v37, 0.0  ;;  %vm1032_vm15 = vcmp.ge.f32.partialorder %v1024_v40, 0.0  ;;  %v1034_v20 = vmul.f32 0.2, %v1018_v1 }
 0x1b8   :  { %vm1033_vm0 = vcmp.ge.f32.partialorder %v1025_v2, 0.0  ;;  %v1035_v21 = vmul.f32 0.2, %v1019_v7  ;;  %v1036_v41 = vmul.f32 0.2, %v1020_v34 }
 0x1b9   :  { %v1037_v22 = vmul.f32 0.2, %v1021_v35  ;;  %v1038_v42 = vmul.f32 0.2, %v1022_v36  ;;  %v1039_v23 = vmul.f32 0.2, %v1023_v37  ;;  %v1042_v16 = vsel %vm1026_vm9, %v1018_v1, %v1034_v20 }
 0x1ba   :  { %v1040_v43 = vmul.f32 0.2, %v1024_v40  ;;  %v1041_v26 = vmul.f32 0.2, %v1025_v2  ;;  %v1043_v44 = vsel %vm1027_vm10, %v1019_v7, %v1035_v21  ;;  %v1044_v52 = vsel %vm1028_vm11, %v1020_v34, %v1036_v41 }
 0x1bb   :  { %v1045_v45 = vsel %vm1029_vm12, %v1021_v35, %v1037_v22  ;;  %v1046_v46 = vsel %vm1030_vm13, %v1022_v36, %v1038_v42  ;;  %v1047_v47 = vsel %vm1031_vm14, %v1023_v37, %v1039_v23  ;;  %v1287_v51 = vpack.c.bf16 %v1043_v44, %v1042_v16 }
 0x1bc   :  { %v1048_v48 = vsel %vm1032_vm15, %v1024_v40, %v1040_v43  ;;  %v1049_v50 = vsel %vm1033_vm0, %v1025_v2, %v1041_v26  ;;  %v1292_v54 = vpack.c.bf16 %v1045_v45, %v1044_v52  ;;  %v1297_v3 = vpack.c.bf16 %v1047_v47, %v1046_v46 }
 0x1bd   :  { %v1302_v55 = vpack.c.bf16 %v1049_v50, %v1048_v48  ;;  %1307 = vst [vmem:[#allocation7 + $0x20] sm:$0xff] %v1287_v51  }
 0x1be   :  { %1308 = vst [vmem:[#allocation7 + $0x28] sm:$0xff] %v1292_v54   ;;  %1309 = vst [vmem:[#allocation7 + $0x30] sm:$0xff] %v1297_v3  }
 0x1bf   :  { %1310 = vst [vmem:[#allocation7 + $0x38] sm:$0xff] %v1302_v55  }
 0x1c0   :  { %1641 = shalt.err (!%p1638_p6)
}
 0x1c1   :  { %s1642_s12 = scalar_lea.hbm %s1864_s2, 1024 }
 0x1c2   :  { %p1643_p7 = scmp.ne.s32.totalorder %s1864_s2, %s1642_s12  ;;  %p1646_p8 = scmp.lt.u32.totalorder %s1642_s12, %s1864_s2 }
 0x1c4   :  { %p1648_p9 = pnand %p1646_p8, %p1643_p7 }
 0x1c6   :  { %1651 = shalt.err (!%p1648_p9)
}
 0x1c7   :  { %1141 = dma.vmem_to_hbm [thread:$0]  %s1136_s8, 1024, %s1864_s2, [#allocation4], %s1662_s0, %s1662_s0, %s1663_s5  }
 0x1c8   :  { %1656 = dma.done.wait [#allocation4], 1024  }
 0x1c9   :  { %1657 = vsyncadd [#allocation4], 4294966272 }
 0x1ca   :  { %1145 = vsyncpa [#allocation3], 1 }
 0x1cb   :  { %1146 = vsyncpa [#allocation6], 1 }
 0x1cc   :  { %1147 = vsyncpa [#allocation4], 1 }

// kernel: discriminator_forward.7
= control target key start
LH: loop header
LB: loop body
LE: loop exit
PB: predicated region body
PF: predicated region fallthrough
CT: control target
= control target key end

     0   :  { %7 = vsyncpa [#allocation3], 0  ;;  %s2082_s0 = inlined_call_operand.hbm [shape: bf16[32,1152], index: 0, kind: input, shape index: {}]   ;;  %s2083_s1 = inlined_call_operand.hbm [shape: bf16[1152,256], index: 1, kind: input, shape index: {}]   ;;  %s2084_s2 = inlined_call_operand.hbm [shape: bf16[32,256], index: 2, kind: output, shape index: {}]  }
   0x1   :  { %8 = vsyncpa [#allocation6], 0 }
   0x2   :  { %9 = vsyncpa [#allocation4], 0  ;;  %s1997_s9 = smov [#allocation2]   ;;  %s1925_s13 = scalar_lea.hbm %s2082_s0, 2304 }
   0x3   :  { %s15_s10 = sshll.u32 %s1997_s9, 4  ;;  %p1926_p0 = scmp.ne.s32.totalorder %s2082_s0, %s1925_s13  ;;  %s16_s10 = int_to_ptr.vmem [resolvable:$true] %s15_s10 }
   0x4   :  { %p1929_p1 = scmp.lt.u32.totalorder %s1925_s13, %s2082_s0 }
   0x6   :  { %p1931_p2 = pnand %p1929_p1, %p1926_p0 }
   0x8   :  { %1934 = shalt.err (!%p1931_p2)
}
   0x9   :  { %s1935_s18 = scalar_lea.vmem %s16_s10, 2304  ;;  %p1940_p4 = scmp.lt.s32.totalorder %s16_s10, %s16_s10 }
   0xa   :  { %p1936_p3 = scmp.ne.s32.totalorder %s16_s10, %s1935_s18  ;;  %p1941_p5 = scmp.lt.s32.totalorder %s1935_s18, %s1935_s18 }
   0xc   :  { %p1942_p6 = por %p1941_p5, %p1940_p4 }
   0xe   :  { %p1943_p7 = pnand %p1942_p6, %p1936_p3 }
  0x10   :  { %1946 = shalt.err (!%p1943_p7)
}
  0x11   :  { %s1998_s19 = smov 576   ;;  %s1999_s20 = smov 36  }
  0x12   :  { %21 = dma.hbm_to_vmem [thread:$0]  %s2082_s0, 2304, %s16_s10, [#allocation3], %s1998_s19, %s1998_s19, %s1999_s20  }
  0x13   :  { %s2000_s23 = smov [#allocation5]   ;;  %s1947_s27 = scalar_lea.hbm %s2083_s1, 18432 }
  0x14   :  { %s27_s24 = sshll.u32 %s2000_s23, 4  ;;  %p1948_p8 = scmp.ne.s32.totalorder %s2083_s1, %s1947_s27  ;;  %s28_s24 = int_to_ptr.vmem [resolvable:$true] %s27_s24 }
  0x15   :  { %p1951_p9 = scmp.lt.u32.totalorder %s1947_s27, %s2083_s1 }
  0x17   :  { %p1953_p10 = pnand %p1951_p9, %p1948_p8 }
  0x19   :  { %1956 = shalt.err (!%p1953_p10)
}
  0x1a   :  { %s1957_s4 = scalar_lea.vmem %s28_s24, 18432  ;;  %p1962_p12 = scmp.lt.s32.totalorder %s28_s24, %s28_s24 }
  0x1b   :  { %p1958_p11 = scmp.ne.s32.totalorder %s28_s24, %s1957_s4  ;;  %p1963_p13 = scmp.lt.s32.totalorder %s1957_s4, %s1957_s4 }
  0x1d   :  { %p1964_p0 = por %p1963_p13, %p1962_p12 }
  0x1f   :  { %p1965_p1 = pnand %p1964_p0, %p1958_p11 }
  0x21   :  { %1968 = shalt.err (!%p1965_p1)
}
  0x22   :  { %s2001_s0 = smov 128   ;;  %s2002_s5 = smov 8  }
  0x23   :  { %33 = dma.hbm_to_vmem [thread:$0]  %s2083_s1, 18432, %s28_s24, [#allocation6], %s2001_s0, %s2001_s0, %s2002_s5  }
  0x24   :  { %1991 = dma.done.wait [#allocation3], 2304  }
  0x25   :  { %1992 = vsyncadd [#allocation3], 4294964992 }
  0x26   :  { %1993 = dma.done.wait [#allocation6], 18432  }
  0x27   :  { %1994 = vsyncadd [#allocation6], 4294948864  ;;  %v1675_v0 = vld [vmem:[#allocation5 + $0x4] ss:$8 sps:$4 sm:$0xff]   ;;  %v1679_v2 = vld [vmem:[#allocation5] ss:$8 sps:$4 sm:$0xff]  }
  0x28   :  { %v1677_v1 = vld [vmem:[#allocation5 + $0x204] ss:$8 sps:$4 sm:$0xff]   ;;  %1017 = vmatprep.subr.bf16.mxu1 %v1675_v0  ;;  %v1680_v3 = vld [vmem:[#allocation5 + $0x200] ss:$8 sps:$4 sm:$0xff]   ;;  %v1681_v4 = vld [vmem:[#allocation5 + $0x14] ss:$8 sps:$4 sm:$0xff]  }
  0x29   :  { %1123 = vmatprep.subr.bf16.mxu0 %v1677_v1  ;;  %1018 = vmatpush1.bf16.msra.mxu1 %v1679_v2  ;;  %v1683_v5 = vld [vmem:[#allocation5 + $0x214] ss:$8 sps:$4 sm:$0xff]   ;;  %v1685_v6 = vld [vmem:[#allocation5 + $0x10] ss:$8 sps:$4 sm:$0xff]   ;;  %v1687_v8 = vld [vmem:[#allocation5 + $0x24] ss:$8 sps:$4 sm:$0xff]  }
  0x2a   :  { %1124 = vmatpush1.bf16.msra.mxu0 %v1680_v3  ;;  %1019 = vmatprep.subr.bf16.mxu1 %v1681_v4  ;;  %v1686_v7 = vld [vmem:[#allocation5 + $0x210] ss:$8 sps:$4 sm:$0xff]   ;;  %v1689_v9 = vld [vmem:[#allocation5 + $0x224] ss:$8 sps:$4 sm:$0xff]   ;;  %v1691_v10 = vld [vmem:[#allocation5 + $0x20] ss:$8 sps:$4 sm:$0xff]  }
  0x2b   :  { %1125 = vmatprep.subr.bf16.mxu0 %v1683_v5  ;;  %v1692_v11 = vld [vmem:[#allocation5 + $0x220] ss:$8 sps:$4 sm:$0xff]   ;;  %v1693_v12 = vld [vmem:[#allocation5 + $0x34] ss:$8 sps:$4 sm:$0xff]   ;;  %v1697_v14 = vld [vmem:[#allocation5 + $0x30] ss:$8 sps:$4 sm:$0xff]  }
  0x2c   :  { %v1695_v13 = vld [vmem:[#allocation5 + $0x234] ss:$8 sps:$4 sm:$0xff]   ;;  %v1698_v15 = vld [vmem:[#allocation5 + $0x230] ss:$8 sps:$4 sm:$0xff]   ;;  %v1699_v16 = vld [vmem:[#allocation5 + $0x44] ss:$8 sps:$4 sm:$0xff]  }
  0x2d   :  { %1020 = vmatpush1.bf16.msra.mxu1 %v1685_v6  ;;  %v1701_v17 = vld [vmem:[#allocation5 + $0x244] ss:$8 sps:$4 sm:$0xff]   ;;  %v1703_v18 = vld [vmem:[#allocation5 + $0x40] ss:$8 sps:$4 sm:$0xff]   ;;  %v1705_v20 = vld [vmem:[#allocation5 + $0x54] ss:$8 sps:$4 sm:$0xff]  }
  0x2e   :  { %1126 = vmatpush1.bf16.msra.mxu0 %v1686_v7  ;;  %1021 = vmatprep.subr.bf16.mxu1 %v1687_v8  ;;  %v1704_v19 = vld [vmem:[#allocation5 + $0x240] ss:$8 sps:$4 sm:$0xff]   ;;  %v1707_v21 = vld [vmem:[#allocation5 + $0x254] ss:$8 sps:$4 sm:$0xff]   ;;  %v1709_v22 = vld [vmem:[#allocation5 + $0x50] ss:$8 sps:$4 sm:$0xff]  }
  0x2f   :  { %1127 = vmatprep.subr.bf16.mxu0 %v1689_v9  ;;  %v1710_v23 = vld [vmem:[#allocation5 + $0x250] ss:$8 sps:$4 sm:$0xff]   ;;  %v1711_v24 = vld [vmem:[#allocation5 + $0x64] ss:$8 sps:$4 sm:$0xff]   ;;  %v1715_v26 = vld [vmem:[#allocation5 + $0x60] ss:$8 sps:$4 sm:$0xff]  }
  0x30   :  { %v1713_v25 = vld [vmem:[#allocation5 + $0x264] ss:$8 sps:$4 sm:$0xff]   ;;  %v1716_v27 = vld [vmem:[#allocation5 + $0x260] ss:$8 sps:$4 sm:$0xff]   ;;  %v1717_v28 = vld [vmem:[#allocation5 + $0x74] ss:$8 sps:$4 sm:$0xff]  }
  0x31   :  { %1022 = vmatpush1.bf16.msra.mxu1 %v1691_v10  ;;  %v1719_v29 = vld [vmem:[#allocation5 + $0x274] ss:$8 sps:$4 sm:$0xff]   ;;  %v1721_v30 = vld [vmem:[#allocation5 + $0x70] ss:$8 sps:$4 sm:$0xff]   ;;  %v1723_v32 = vld [vmem:[#allocation5 + $0x84] ss:$8 sps:$4 sm:$0xff]  }
  0x32   :  { %1128 = vmatpush1.bf16.msra.mxu0 %v1692_v11  ;;  %1023 = vmatprep.subr.bf16.mxu1 %v1693_v12  ;;  %v1722_v31 = vld [vmem:[#allocation5 + $0x270] ss:$8 sps:$4 sm:$0xff]   ;;  %v1725_v33 = vld [vmem:[#allocation5 + $0x284] ss:$8 sps:$4 sm:$0xff]   ;;  %v1727_v34 = vld [vmem:[#allocation5 + $0x80] ss:$8 sps:$4 sm:$0xff]  }
  0x33   :  { %1129 = vmatprep.subr.bf16.mxu0 %v1695_v13  ;;  %v1728_v35 = vld [vmem:[#allocation5 + $0x280] ss:$8 sps:$4 sm:$0xff]   ;;  %v1729_v36 = vld [vmem:[#allocation5 + $0x94] ss:$8 sps:$4 sm:$0xff]   ;;  %v1733_v38 = vld [vmem:[#allocation5 + $0x90] ss:$8 sps:$4 sm:$0xff]  }
  0x34   :  { %v1731_v37 = vld [vmem:[#allocation5 + $0x294] ss:$8 sps:$4 sm:$0xff]   ;;  %v1734_v39 = vld [vmem:[#allocation5 + $0x290] ss:$8 sps:$4 sm:$0xff]   ;;  %v1735_v40 = vld [vmem:[#allocation5 + $0xa4] ss:$8 sps:$4 sm:$0xff]  }
  0x35   :  { %1024 = vmatpush1.bf16.msra.mxu1 %v1697_v14  ;;  %v1737_v41 = vld [vmem:[#allocation5 + $0x2a4] ss:$8 sps:$4 sm:$0xff]   ;;  %v1739_v42 = vld [vmem:[#allocation5 + $0xa0] ss:$8 sps:$4 sm:$0xff]   ;;  %v1741_v44 = vld [vmem:[#allocation5 + $0xb4] ss:$8 sps:$4 sm:$0xff]  }
  0x36   :  { %1130 = vmatpush1.bf16.msra.mxu0 %v1698_v15  ;;  %1025 = vmatprep.subr.bf16.mxu1 %v1699_v16  ;;  %v1740_v43 = vld [vmem:[#allocation5 + $0x2a0] ss:$8 sps:$4 sm:$0xff]   ;;  %v1743_v45 = vld [vmem:[#allocation5 + $0x2b4] ss:$8 sps:$4 sm:$0xff]   ;;  %v1745_v46 = vld [vmem:[#allocation5 + $0xb0] ss:$8 sps:$4 sm:$0xff]  }
  0x37   :  { %1131 = vmatprep.subr.bf16.mxu0 %v1701_v17  ;;  %v1746_v47 = vld [vmem:[#allocation5 + $0x2b0] ss:$8 sps:$4 sm:$0xff]   ;;  %v1747_v49 = vld [vmem:[#allocation5 + $0xc4] ss:$8 sps:$4 sm:$0xff]   ;;  %v1751_v52 = vld [vmem:[#allocation5 + $0xc0] ss:$8 sps:$4 sm:$0xff]  }
  0x38   :  { %v1773_v48 = vld [vmem:[#allocation2 + $0x4] ss:$36 sps:$4 sm:$0xff]   ;;  %v1749_v50 = vld [vmem:[#allocation5 + $0x2c4] ss:$8 sps:$4 sm:$0xff]   ;;  %v1752_v53 = vld [vmem:[#allocation5 + $0x2c0] ss:$8 sps:$4 sm:$0xff]  }
  0x39   :  { %1026 = vmatpush1.bf16.msra.mxu1 %v1703_v18  ;;  %1049 = vmatprep.mubr.bf16.mxu1 %v1773_v48  ;;  %v1779_v51 = vld [vmem:[#allocation2 + $0x14] ss:$36 sps:$4 sm:$0xff]   ;;  %v1753_v54 = vld [vmem:[#allocation5 + $0xd4] ss:$8 sps:$4 sm:$0xff]   ;;  %v1757_v56 = vld [vmem:[#allocation5 + $0xd0] ss:$8 sps:$4 sm:$0xff]  }
  0x3a   :  { %1132 = vmatpush1.bf16.msra.mxu0 %v1704_v19  ;;  %1027 = vmatprep.subr.bf16.mxu1 %v1705_v20  ;;  %v1755_v55 = vld [vmem:[#allocation5 + $0x2d4] ss:$8 sps:$4 sm:$0xff]   ;;  %v1758_v57 = vld [vmem:[#allocation5 + $0x2d0] ss:$8 sps:$4 sm:$0xff]   ;;  %v1759_v58 = vld [vmem:[#allocation5 + $0xe4] ss:$8 sps:$4 sm:$0xff]  }
  0x3b   :  { %1133 = vmatprep.subr.bf16.mxu0 %v1707_v21  ;;  %1155 = vmatprep.mubr.bf16.mxu0 %v1779_v51  ;;  %v1761_v59 = vld [vmem:[#allocation5 + $0x2e4] ss:$8 sps:$4 sm:$0xff]   ;;  %v1763_v60 = vld [vmem:[#allocation5 + $0xe0] ss:$8 sps:$4 sm:$0xff]   ;;  %v1765_v62 = vld [vmem:[#allocation5 + $0xf4] ss:$8 sps:$4 sm:$0xff]  }
  0x3c   :  { %v1764_v61 = vld [vmem:[#allocation5 + $0x2e0] ss:$8 sps:$4 sm:$0xff]   ;;  %v1767_v63 = vld [vmem:[#allocation5 + $0x2f4] ss:$8 sps:$4 sm:$0xff]   ;;  %v1769_v0 = vld [vmem:[#allocation5 + $0xf0] ss:$8 sps:$4 sm:$0xff]  }
  0x3d   :  { %1028 = vmatpush1.bf16.msra.mxu1 %v1709_v22  ;;  %v1770_v1 = vld [vmem:[#allocation5 + $0x2f0] ss:$8 sps:$4 sm:$0xff]   ;;  %v1776_v2 = vld [vmem:[#allocation5 + $0x104] ss:$8 sps:$4 sm:$0xff]   ;;  %v1774_v5 = vld [vmem:[#allocation5 + $0x100] ss:$8 sps:$4 sm:$0xff]  }
  0x3e   :  { %1134 = vmatpush1.bf16.msra.mxu0 %v1710_v23  ;;  %1029 = vmatprep.subr.bf16.mxu1 %v1711_v24  ;;  %v1782_v3 = vld [vmem:[#allocation5 + $0x304] ss:$8 sps:$4 sm:$0xff]   ;;  %v1771_v4 = vld [vmem:[#allocation2] ss:$36 sps:$4 sm:$0xff]   ;;  %v1780_v7 = vld [vmem:[#allocation5 + $0x300] ss:$8 sps:$4 sm:$0xff]  }
  0x3f   :  { %1135 = vmatprep.subr.bf16.mxu0 %v1713_v25  ;;  %v1777_v6 = vld [vmem:[#allocation2 + $0x10] ss:$36 sps:$4 sm:$0xff]   ;;  %v1785_v8 = vld [vmem:[#allocation5 + $0x114] ss:$8 sps:$4 sm:$0xff]   ;;  %v1783_v10 = vld [vmem:[#allocation5 + $0x110] ss:$8 sps:$4 sm:$0xff]  }
  0x40   :  { %v1788_v9 = vld [vmem:[#allocation5 + $0x314] ss:$8 sps:$4 sm:$0xff]   ;;  %v1786_v11 = vld [vmem:[#allocation5 + $0x310] ss:$8 sps:$4 sm:$0xff]   ;;  %v1791_v12 = vld [vmem:[#allocation5 + $0x124] ss:$8 sps:$4 sm:$0xff]  }
  0x41   :  { %1030 = vmatpush1.bf16.msra.mxu1 %v1715_v26  ;;  %v1794_v13 = vld [vmem:[#allocation5 + $0x324] ss:$8 sps:$4 sm:$0xff]   ;;  %v1789_v14 = vld [vmem:[#allocation5 + $0x120] ss:$8 sps:$4 sm:$0xff]   ;;  %v1797_v16 = vld [vmem:[#allocation5 + $0x134] ss:$8 sps:$4 sm:$0xff]  }
  0x42   :  { %1136 = vmatpush1.bf16.msra.mxu0 %v1716_v27  ;;  %1031 = vmatprep.subr.bf16.mxu1 %v1717_v28  ;;  %v1792_v15 = vld [vmem:[#allocation5 + $0x320] ss:$8 sps:$4 sm:$0xff]   ;;  %v1800_v17 = vld [vmem:[#allocation5 + $0x334] ss:$8 sps:$4 sm:$0xff]   ;;  %v1795_v18 = vld [vmem:[#allocation5 + $0x130] ss:$8 sps:$4 sm:$0xff]  }
  0x43   :  { %1137 = vmatprep.subr.bf16.mxu0 %v1719_v29  ;;  %v1798_v19 = vld [vmem:[#allocation5 + $0x330] ss:$8 sps:$4 sm:$0xff]   ;;  %v1803_v20 = vld [vmem:[#allocation5 + $0x144] ss:$8 sps:$4 sm:$0xff]   ;;  %v1801_v22 = vld [vmem:[#allocation5 + $0x140] ss:$8 sps:$4 sm:$0xff]  }
  0x44   :  { %v1806_v21 = vld [vmem:[#allocation5 + $0x344] ss:$8 sps:$4 sm:$0xff]   ;;  %v1804_v23 = vld [vmem:[#allocation5 + $0x340] ss:$8 sps:$4 sm:$0xff]   ;;  %v1809_v24 = vld [vmem:[#allocation5 + $0x154] ss:$8 sps:$4 sm:$0xff]  }
  0x45   :  { %1032 = vmatpush1.bf16.msra.mxu1 %v1721_v30  ;;  %v1812_v25 = vld [vmem:[#allocation5 + $0x354] ss:$8 sps:$4 sm:$0xff]   ;;  %v1807_v26 = vld [vmem:[#allocation5 + $0x150] ss:$8 sps:$4 sm:$0xff]   ;;  %v1815_v28 = vld [vmem:[#allocation5 + $0x164] ss:$8 sps:$4 sm:$0xff]  }
  0x46   :  { %1138 = vmatpush1.bf16.msra.mxu0 %v1722_v31  ;;  %1033 = vmatprep.subr.bf16.mxu1 %v1723_v32  ;;  %v1810_v27 = vld [vmem:[#allocation5 + $0x350] ss:$8 sps:$4 sm:$0xff]   ;;  %v1861_v29 = vld [vmem:[#allocation2 + $0x4c] ss:$36 sps:$4 sm:$0xff]   ;;  %v1818_v32 = vld [vmem:[#allocation5 + $0x364] ss:$8 sps:$4 sm:$0xff]  }
  0x47   :  { %1139 = vmatprep.subr.bf16.mxu0 %v1725_v33  ;;  %v1863_v30 = vld [vmem:[#allocation2 + $0x5c] ss:$36 sps:$4 sm:$0xff]   ;;  %v1865_v31 = vld [vmem:[#allocation2 + $0x48] ss:$36 sps:$4 sm:$0xff]   ;;  %s2004_s1 = smov [#allocation7]  }
  0x48   :  { %v1869_v33 = vld [vmem:[#allocation2 + $0x58] ss:$36 sps:$4 sm:$0xff]   ;;  %v1831_v48 = vld [vmem:[#allocation5 + $0x190] ss:$8 sps:$4 sm:$0xff]   ;;  %s1436_s8 = sshll.u32 %s2004_s1, 4  ;;  %s1437_s8 = int_to_ptr.vmem [resolvable:$true] %s1436_s8 }
  0x49   :  { %1034 = vmatpush1.bf16.msra.mxu1 %v1727_v34  ;;  %v1813_v34 = vld [vmem:[#allocation5 + $0x160] ss:$8 sps:$4 sm:$0xff]   ;;  %v1842_v51 = vld [vmem:[#allocation5 + $0x3a4] ss:$8 sps:$4 sm:$0xff]   ;;  %s1969_s9 = scalar_lea.vmem %s1437_s8, 512  ;;  %p1974_p3 = scmp.lt.s32.totalorder %s1437_s8, %s1437_s8 }
  0x4a   :  { %1140 = vmatpush1.bf16.msra.mxu0 %v1728_v35  ;;  %1035 = vmatprep.subr.bf16.mxu1 %v1729_v36  ;;  %v1816_v35 = vld [vmem:[#allocation5 + $0x360] ss:$8 sps:$4 sm:$0xff]   ;;  %v1821_v36 = vld [vmem:[#allocation5 + $0x174] ss:$8 sps:$4 sm:$0xff]   ;;  %p1970_p2 = scmp.ne.s32.totalorder %s1437_s8, %s1969_s9  ;;  %p1975_p4 = scmp.lt.s32.totalorder %s1969_s9, %s1969_s9 }
  0x4b   :  { %1141 = vmatprep.subr.bf16.mxu0 %v1731_v37  ;;  %v1824_v37 = vld [vmem:[#allocation5 + $0x374] ss:$8 sps:$4 sm:$0xff]  }
  0x4c   :  { %p1976_p5 = por %p1975_p4, %p1974_p3 }
  0x4d   :  { %1036 = vmatpush1.bf16.msra.mxu1 %v1733_v38  ;;  %v1819_v38 = vld [vmem:[#allocation5 + $0x170] ss:$8 sps:$4 sm:$0xff]  }
  0x4e   :  { %1142 = vmatpush1.bf16.msra.mxu0 %v1734_v39  ;;  %1037 = vmatprep.subr.bf16.mxu1 %v1735_v40  ;;  %v1822_v39 = vld [vmem:[#allocation5 + $0x370] ss:$8 sps:$4 sm:$0xff]   ;;  %v1827_v40 = vld [vmem:[#allocation5 + $0x184] ss:$8 sps:$4 sm:$0xff]   ;;  %p1977_p6 = pnand %p1976_p5, %p1970_p2 }
  0x4f   :  { %1143 = vmatprep.subr.bf16.mxu0 %v1737_v41  ;;  %v1881_v41 = vld [vmem:[#allocation2 + $0xc] ss:$36 sps:$4 sm:$0xff]  }
  0x51   :  { %1038 = vmatpush1.bf16.msra.mxu1 %v1739_v42  ;;  %v1830_v42 = vld [vmem:[#allocation5 + $0x384] ss:$8 sps:$4 sm:$0xff]  }
  0x52   :  { %1144 = vmatpush1.bf16.msra.mxu0 %v1740_v43  ;;  %1039 = vmatprep.subr.bf16.mxu1 %v1741_v44  ;;  %v1884_v43 = vld [vmem:[#allocation2 + $0x1c] ss:$36 sps:$4 sm:$0xff]   ;;  %v1825_v44 = vld [vmem:[#allocation5 + $0x180] ss:$8 sps:$4 sm:$0xff]  }
  0x53   :  { %1145 = vmatprep.subr.bf16.mxu0 %v1743_v45  ;;  %v1828_v45 = vld [vmem:[#allocation5 + $0x380] ss:$8 sps:$4 sm:$0xff]  }
  0x55   :  { %1040 = vmatpush1.bf16.msra.mxu1 %v1745_v46  ;;  %v1833_v46 = vld [vmem:[#allocation5 + $0x194] ss:$8 sps:$4 sm:$0xff]  }
  0x56   :  { %1146 = vmatpush1.bf16.msra.mxu0 %v1746_v47  ;;  %1041 = vmatprep.subr.bf16.mxu1 %v1747_v49  ;;  %v1836_v47 = vld [vmem:[#allocation5 + $0x394] ss:$8 sps:$4 sm:$0xff]   ;;  %v1834_v49 = vld [vmem:[#allocation5 + $0x390] ss:$8 sps:$4 sm:$0xff]  }
  0x57   :  { %1147 = vmatprep.subr.bf16.mxu0 %v1749_v50  ;;  %v1839_v50 = vld [vmem:[#allocation5 + $0x1a4] ss:$8 sps:$4 sm:$0xff]  }
  0x59   :  { %1042 = vmatpush1.bf16.msra.mxu1 %v1751_v52  ;;  %v1837_v52 = vld [vmem:[#allocation5 + $0x1a0] ss:$8 sps:$4 sm:$0xff]  }
  0x5a   :  { %1148 = vmatpush1.bf16.msra.mxu0 %v1752_v53  ;;  %1043 = vmatprep.subr.bf16.mxu1 %v1753_v54  ;;  %v1840_v53 = vld [vmem:[#allocation5 + $0x3a0] ss:$8 sps:$4 sm:$0xff]   ;;  %v1845_v54 = vld [vmem:[#allocation5 + $0x1b4] ss:$8 sps:$4 sm:$0xff]  }
  0x5b   :  { %1149 = vmatprep.subr.bf16.mxu0 %v1755_v55  ;;  %v1848_v55 = vld [vmem:[#allocation5 + $0x3b4] ss:$8 sps:$4 sm:$0xff]  }
  0x5d   :  { %1044 = vmatpush1.bf16.msra.mxu1 %v1757_v56  ;;  %v1843_v56 = vld [vmem:[#allocation5 + $0x1b0] ss:$8 sps:$4 sm:$0xff]  }
  0x5e   :  { %1150 = vmatpush1.bf16.msra.mxu0 %v1758_v57  ;;  %1045 = vmatprep.subr.bf16.mxu1 %v1759_v58  ;;  %v1846_v57 = vld [vmem:[#allocation5 + $0x3b0] ss:$8 sps:$4 sm:$0xff]   ;;  %v1851_v58 = vld [vmem:[#allocation5 + $0x1c4] ss:$8 sps:$4 sm:$0xff]  }
  0x5f   :  { %1151 = vmatprep.subr.bf16.mxu0 %v1761_v59  ;;  %v1854_v59 = vld [vmem:[#allocation5 + $0x3c4] ss:$8 sps:$4 sm:$0xff]  }
  0x61   :  { %1046 = vmatpush1.bf16.msra.mxu1 %v1763_v60  ;;  %v1849_v60 = vld [vmem:[#allocation5 + $0x1c0] ss:$8 sps:$4 sm:$0xff]  }
  0x62   :  { %1152 = vmatpush1.bf16.msra.mxu0 %v1764_v61  ;;  %1047 = vmatprep.subr.bf16.mxu1 %v1765_v62  ;;  %v1852_v61 = vld [vmem:[#allocation5 + $0x3c0] ss:$8 sps:$4 sm:$0xff]   ;;  %v1857_v62 = vld [vmem:[#allocation5 + $0x1d4] ss:$8 sps:$4 sm:$0xff]  }
  0x63   :  { %1153 = vmatprep.subr.bf16.mxu0 %v1767_v63  ;;  %v1860_v63 = vld [vmem:[#allocation5 + $0x3d4] ss:$8 sps:$4 sm:$0xff]  }
  0x65   :  { %1048 = vmatpush1.bf16.msra.mxu1 %v1769_v0  ;;  %v1855_v0 = vld [vmem:[#allocation5 + $0x1d0] ss:$8 sps:$4 sm:$0xff]  }
  0x66   :  { %1154 = vmatpush1.bf16.msra.mxu0 %v1770_v1  ;;  %1070 = vmatprep.subr.bf16.mxu1 %v1776_v2  ;;  %v1858_v1 = vld [vmem:[#allocation5 + $0x3d0] ss:$8 sps:$4 sm:$0xff]   ;;  %v1868_v2 = vld [vmem:[#allocation5 + $0x1e4] ss:$8 sps:$4 sm:$0xff]  }
  0x67   :  { %1176 = vmatprep.subr.bf16.mxu0 %v1782_v3  ;;  %v1872_v3 = vld [vmem:[#allocation5 + $0x3e4] ss:$8 sps:$4 sm:$0xff]  }
  0x68   :  { %1050 = vmatmul.mubr.bf16.vlgmr.msra.gmra.mrb[0].mxu1 %v1771_v4  ;;  %v1866_v4 = vld [vmem:[#allocation5 + $0x1e0] ss:$8 sps:$4 sm:$0xff]  }
  0x69   :  { %1156 = vmatmul.mubr.bf16.vlgmr.msra.gmra.mrb[0].mxu0 %v1777_v6  ;;  %1071 = vmatpush1.bf16.msra.mxu1 %v1774_v5  ;;  %v1870_v5 = vld [vmem:[#allocation5 + $0x3e0] ss:$8 sps:$4 sm:$0xff]   ;;  %v1875_v6 = vld [vmem:[#allocation5 + $0x1f4] ss:$8 sps:$4 sm:$0xff]  }
  0x6a   :  { %1177 = vmatpush1.bf16.msra.mxu0 %v1780_v7  ;;  %1072 = vmatprep.subr.bf16.mxu1 %v1785_v8  ;;  %v1878_v7 = vld [vmem:[#allocation5 + $0x3f4] ss:$8 sps:$4 sm:$0xff]   ;;  %v1873_v8 = vld [vmem:[#allocation5 + $0x1f0] ss:$8 sps:$4 sm:$0xff]  }
  0x6b   :  { %1178 = vmatprep.subr.bf16.mxu0 %v1788_v9  ;;  %1059 = vmatprep.mubr.bf16.mxu1 %v1861_v29  ;;  %v1876_v9 = vld [vmem:[#allocation5 + $0x3f0] ss:$8 sps:$4 sm:$0xff]   ;;  %v1911_v29 = vld [vmem:[#allocation5 + $0x464] ss:$8 sps:$4 sm:$0xff]  }
  0x6c   :  { %1165 = vmatprep.mubr.bf16.mxu0 %v1863_v30  ;;  %v1909_v30 = vld [vmem:[#allocation5 + $0x460] ss:$8 sps:$4 sm:$0xff]  }
  0x6d   :  { %1073 = vmatpush1.bf16.msra.mxu1 %v1783_v10  ;;  %v1887_v10 = vld [vmem:[#allocation5 + $0x404] ss:$8 sps:$4 sm:$0xff]  }
  0x6e   :  { %1179 = vmatpush1.bf16.msra.mxu0 %v1786_v11  ;;  %1074 = vmatprep.subr.bf16.mxu1 %v1791_v12  ;;  %v1879_v11 = vld [vmem:[#allocation2 + $0x8] ss:$36 sps:$4 sm:$0xff]   ;;  %v1882_v12 = vld [vmem:[#allocation2 + $0x18] ss:$36 sps:$4 sm:$0xff]  }
  0x6f   :  { %1180 = vmatprep.subr.bf16.mxu0 %v1794_v13  ;;  %v1885_v13 = vld [vmem:[#allocation5 + $0x400] ss:$8 sps:$4 sm:$0xff]  }
  0x70   :  { %1060 = vmatmul.mubr.bf16.gmra.mrb[4].mxu1 %v1865_v31  ;;  %v1914_v31 = vld [vmem:[#allocation5 + $0x474] ss:$8 sps:$4 sm:$0xff]  }
  0x71   :  { %1075 = vmatpush1.bf16.msra.mxu1 %v1789_v14  ;;  %1166 = vmatmul.mubr.bf16.gmra.mrb[4].mxu0 %v1869_v33  ;;  %v1890_v14 = vld [vmem:[#allocation5 + $0x414] ss:$8 sps:$4 sm:$0xff]  }
  0x72   :  { %1181 = vmatpush1.bf16.msra.mxu0 %v1792_v15  ;;  %1076 = vmatprep.subr.bf16.mxu1 %v1797_v16  ;;  %v1891_v15 = vld [vmem:[#allocation2 + $0x54] ss:$36 sps:$4 sm:$0xff]   ;;  %v1893_v16 = vld [vmem:[#allocation2 + $0x64] ss:$36 sps:$4 sm:$0xff]  }
  0x73   :  { %1182 = vmatprep.subr.bf16.mxu0 %v1800_v17  ;;  %1102 = vmatprep.mubr.bf16.mxu1 %v1881_v41  ;;  %v1888_v17 = vld [vmem:[#allocation5 + $0x410] ss:$8 sps:$4 sm:$0xff]  }
  0x74   :  { %1208 = vmatprep.mubr.bf16.mxu0 %v1884_v43  ;;  %v1915_v33 = vld [vmem:[#allocation2 + $0x20] ss:$36 sps:$4 sm:$0xff]  }
  0x75   :  { %1077 = vmatpush1.bf16.msra.mxu1 %v1795_v18  ;;  %v1899_v18 = vld [vmem:[#allocation5 + $0x424] ss:$8 sps:$4 sm:$0xff]  }
  0x76   :  { %1183 = vmatpush1.bf16.msra.mxu0 %v1798_v19  ;;  %1078 = vmatprep.subr.bf16.mxu1 %v1803_v20  ;;  %v1895_v19 = vld [vmem:[#allocation2 + $0x50] ss:$36 sps:$4 sm:$0xff]   ;;  %v1896_v20 = vld [vmem:[#allocation2 + $0x60] ss:$36 sps:$4 sm:$0xff]  }
  0x77   :  { %1184 = vmatprep.subr.bf16.mxu0 %v1806_v21  ;;  %v1897_v21 = vld [vmem:[#allocation5 + $0x420] ss:$8 sps:$4 sm:$0xff]  }
  0x79   :  { %1079 = vmatpush1.bf16.msra.mxu1 %v1801_v22  ;;  %v1902_v22 = vld [vmem:[#allocation5 + $0x434] ss:$8 sps:$4 sm:$0xff]  }
  0x7a   :  { %1185 = vmatpush1.bf16.msra.mxu0 %v1804_v23  ;;  %1080 = vmatprep.subr.bf16.mxu1 %v1809_v24  ;;  %v1900_v23 = vld [vmem:[#allocation5 + $0x430] ss:$8 sps:$4 sm:$0xff]   ;;  %v1905_v24 = vld [vmem:[#allocation5 + $0x444] ss:$8 sps:$4 sm:$0xff]  }
  0x7b   :  { %1186 = vmatprep.subr.bf16.mxu0 %v1812_v25  ;;  %v2003_v25 = vmov 0  }
  0x7d   :  { %1081 = vmatpush1.bf16.msra.mxu1 %v1807_v26  ;;  %v1903_v26 = vld [vmem:[#allocation5 + $0x440] ss:$8 sps:$4 sm:$0xff]  }
  0x7e   :  { %1187 = vmatpush1.bf16.msra.mxu0 %v1810_v27  ;;  %1082 = vmatprep.subr.bf16.mxu1 %v1815_v28  ;;  %v1908_v27 = vld [vmem:[#allocation5 + $0x454] ss:$8 sps:$4 sm:$0xff]   ;;  %v1906_v28 = vld [vmem:[#allocation5 + $0x450] ss:$8 sps:$4 sm:$0xff]  }
  0x7f   :  { %1188 = vmatprep.subr.bf16.mxu0 %v1818_v32  ;;  %v1912_v32 = vld [vmem:[#allocation5 + $0x470] ss:$8 sps:$4 sm:$0xff]  }
  0x81   :  { %1083 = vmatpush1.bf16.msra.mxu1 %v1813_v34  ;;  %v1916_v34 = vld [vmem:[#allocation2 + $0x68] ss:$36 sps:$4 sm:$0xff]  }
  0x82   :  { %1189 = vmatpush1.bf16.msra.mxu0 %v1816_v35  ;;  %1084 = vmatprep.subr.bf16.mxu1 %v1821_v36 }
  0x83   :  { %1190 = vmatprep.subr.bf16.mxu0 %v1824_v37 }
  0x85   :  { %1085 = vmatpush1.bf16.msra.mxu1 %v1819_v38 }
  0x86   :  { %1191 = vmatpush1.bf16.msra.mxu0 %v1822_v39  ;;  %1086 = vmatprep.subr.bf16.mxu1 %v1827_v40 }
  0x87   :  { %1192 = vmatprep.subr.bf16.mxu0 %v1830_v42 }
  0x89   :  { %1087 = vmatpush1.bf16.msra.mxu1 %v1825_v44 }
  0x8a   :  { %1193 = vmatpush1.bf16.msra.mxu0 %v1828_v45  ;;  %1088 = vmatprep.subr.bf16.mxu1 %v1833_v46 }
  0x8b   :  { %1194 = vmatprep.subr.bf16.mxu0 %v1836_v47 }
  0x8d   :  { %1089 = vmatpush1.bf16.msra.mxu1 %v1831_v48 }
  0x8e   :  { %1195 = vmatpush1.bf16.msra.mxu0 %v1834_v49  ;;  %1090 = vmatprep.subr.bf16.mxu1 %v1839_v50 }
  0x8f   :  { %1196 = vmatprep.subr.bf16.mxu0 %v1842_v51 }
  0x91   :  { %1091 = vmatpush1.bf16.msra.mxu1 %v1837_v52 }
  0x92   :  { %1197 = vmatpush1.bf16.msra.mxu0 %v1840_v53  ;;  %1092 = vmatprep.subr.bf16.mxu1 %v1845_v54 }
  0x93   :  { %1198 = vmatprep.subr.bf16.mxu0 %v1848_v55 }
  0x95   :  { %1093 = vmatpush1.bf16.msra.mxu1 %v1843_v56 }
  0x96   :  { %1199 = vmatpush1.bf16.msra.mxu0 %v1846_v57  ;;  %1094 = vmatprep.subr.bf16.mxu1 %v1851_v58 }
  0x97   :  { %1200 = vmatprep.subr.bf16.mxu0 %v1854_v59 }
  0x99   :  { %1095 = vmatpush1.bf16.msra.mxu1 %v1849_v60 }
  0x9a   :  { %1201 = vmatpush1.bf16.msra.mxu0 %v1852_v61  ;;  %1096 = vmatprep.subr.bf16.mxu1 %v1857_v62 }
  0x9b   :  { %1202 = vmatprep.subr.bf16.mxu0 %v1860_v63 }
  0x9d   :  { %1097 = vmatpush1.bf16.msra.mxu1 %v1855_v0 }
  0x9e   :  { %1203 = vmatpush1.bf16.msra.mxu0 %v1858_v1  ;;  %1098 = vmatprep.subr.bf16.mxu1 %v1868_v2 }
  0x9f   :  { %1204 = vmatprep.subr.bf16.mxu0 %v1872_v3 }
  0xa1   :  { %1099 = vmatpush1.bf16.msra.mxu1 %v1866_v4 }
  0xa2   :  { %1205 = vmatpush1.bf16.msra.mxu0 %v1870_v5  ;;  %1100 = vmatprep.subr.bf16.mxu1 %v1875_v6 }
  0xa3   :  { %1206 = vmatprep.subr.bf16.mxu0 %v1878_v7 }
  0xa5   :  { %1101 = vmatpush1.bf16.msra.mxu1 %v1873_v8 }
  0xa6   :  { %1207 = vmatpush1.bf16.msra.mxu0 %v1876_v9  ;;  %1619 = vmatprep.subr.bf16.mxu1 %v1887_v10 }
  0xa7   :  { %1229 = vmatprep.subr.bf16.mxu0 %v1887_v10 }
  0xa8   :  { %1103 = vmatmul.mubr.bf16.vlgmr.msra.gmra.mrb[0].mxu1 %v1879_v11 }
  0xa9   :  { %1209 = vmatmul.mubr.bf16.vlgmr.msra.gmra.mrb[0].mxu0 %v1882_v12  ;;  %1627 = vmatpush1.bf16.msra.mxu1 %v1885_v13 }
  0xaa   :  { %1230 = vmatpush1.bf16.msra.mxu0 %v1885_v13  ;;  %1620 = vmatprep.subr.bf16.mxu1 %v1890_v14 }
  0xab   :  { %1231 = vmatprep.subr.bf16.mxu0 %v1890_v14  ;;  %1112 = vmatprep.mubr.bf16.mxu1 %v1891_v15 }
  0xac   :  { %1218 = vmatprep.mubr.bf16.mxu0 %v1893_v16 }
  0xad   :  { %1628 = vmatpush1.bf16.msra.mxu1 %v1888_v17 }
  0xae   :  { %1232 = vmatpush1.bf16.msra.mxu0 %v1888_v17  ;;  %1621 = vmatprep.subr.bf16.mxu1 %v1899_v18 }
  0xaf   :  { %1233 = vmatprep.subr.bf16.mxu0 %v1899_v18 }
  0xb0   :  { %1113 = vmatmul.mubr.bf16.gmra.mrb[4].mxu1 %v1895_v19 }
  0xb1   :  { %1219 = vmatmul.mubr.bf16.gmra.mrb[4].mxu0 %v1896_v20  ;;  %1629 = vmatpush1.bf16.msra.mxu1 %v1897_v21 }
  0xb2   :  { %1234 = vmatpush1.bf16.msra.mxu0 %v1897_v21  ;;  %1622 = vmatprep.subr.bf16.mxu1 %v1902_v22 }
  0xb3   :  { %1235 = vmatprep.subr.bf16.mxu0 %v1902_v22  ;;  %1261 = vmatprep.mubr.bf16.mxu0 %v2003_v25 }
  0xb4   :  { %1271 = vmatprep.mubr.bf16.mxu1 %v2003_v25 }
  0xb5   :  { %1630 = vmatpush1.bf16.msra.mxu1 %v1900_v23 }
  0xb6   :  { %1236 = vmatpush1.bf16.msra.mxu0 %v1900_v23  ;;  %1623 = vmatprep.subr.bf16.mxu1 %v1905_v24 }
  0xb7   :  { %1237 = vmatprep.subr.bf16.mxu0 %v1905_v24 }
  0xb9   :  { %1631 = vmatpush1.bf16.msra.mxu1 %v1903_v26 }
  0xba   :  { %1238 = vmatpush1.bf16.msra.mxu0 %v1903_v26  ;;  %1624 = vmatprep.subr.bf16.mxu1 %v1908_v27 }
  0xbb   :  { %1239 = vmatprep.subr.bf16.mxu0 %v1908_v27 }
  0xbd   :  { %1632 = vmatpush1.bf16.msra.mxu1 %v1906_v28 }
  0xbe   :  { %1240 = vmatpush1.bf16.msra.mxu0 %v1906_v28  ;;  %1625 = vmatprep.subr.bf16.mxu1 %v1911_v29 }
  0xbf   :  { %1241 = vmatprep.subr.bf16.mxu0 %v1911_v29 }
  0xc1   :  { %1633 = vmatpush1.bf16.msra.mxu1 %v1909_v30 }
  0xc2   :  { %1242 = vmatpush1.bf16.msra.mxu0 %v1909_v30  ;;  %1626 = vmatprep.subr.bf16.mxu1 %v1914_v31 }
  0xc3   :  { %1243 = vmatprep.subr.bf16.mxu0 %v1914_v31 }
  0xc5   :  { %1634 = vmatpush1.bf16.msra.mxu1 %v1912_v32 }
  0xc6   :  { %1244 = vmatpush1.bf16.msra.mxu0 %v1912_v32 }
  0xc8   :  { %1272 = vmatmul.mubr.bf16.vlgmr.msra.gmra.mrb[8].mxu1 %v1916_v34 }
  0xc9   :  { %1262 = vmatmul.mubr.bf16.vlgmr.msra.gmra.mrb[0].mxu0 %v1915_v33 }
 0x17b   :  { %v1104_v35 = vpop.f32.mrb[0].mxu1 }
 0x17c   :  { %v1106_v36 = vpop.f32.mrb[1].mxu1 }
 0x17d   :  { %v1108_v37 = vpop.f32.mrb[2].mxu1 }
 0x17e   :  { %v1110_v38 = vpop.f32.mrb[3].mxu1 }
 0x183   :  { %v1114_v39 = vpop.f32.mrb[4].mxu1 }
 0x184   :  { %v1220_v40 = vpop.f32.mrb[4].mxu0  ;;  %v1116_v42 = vpop.f32.mrb[5].mxu1 }
 0x185   :  { %v1639_v41 = vadd.f32 %v1220_v40, %v1114_v39  ;;  %v1222_v43 = vpop.f32.mrb[5].mxu0  ;;  %v1118_v45 = vpop.f32.mrb[6].mxu1 }
 0x186   :  { %v1641_v44 = vadd.f32 %v1222_v43, %v1116_v42  ;;  %v1224_v46 = vpop.f32.mrb[6].mxu0  ;;  %v1120_v48 = vpop.f32.mrb[7].mxu1 }
 0x187   :  { %v1643_v47 = vadd.f32 %v1224_v46, %v1118_v45  ;;  %v1226_v49 = vpop.f32.mrb[7].mxu0 }
 0x188   :  { %v1645_v50 = vadd.f32 %v1226_v49, %v1120_v48 }
 0x19b   :  { %v1273_v52 = vpop.f32.mrb[8].mxu1 }
 0x19c   :  { %v1263_v51 = vpop.f32.mrb[0].mxu0  ;;  %v1640_v54 = vadd.f32 %v1639_v41, %v1273_v52  ;;  %v1275_v56 = vpop.f32.mrb[9].mxu1 }
 0x19d   :  { %v1635_v53 = vadd.f32 %v1263_v51, %v1104_v35  ;;  %v1265_v55 = vpop.f32.mrb[1].mxu0  ;;  %v1642_v58 = vadd.f32 %v1641_v44, %v1275_v56  ;;  %v1277_v60 = vpop.f32.mrb[10].mxu1 }
 0x19e   :  { %v1636_v57 = vadd.f32 %v1265_v55, %v1106_v36  ;;  %v1267_v59 = vpop.f32.mrb[2].mxu0  ;;  %v1644_v62 = vadd.f32 %v1643_v47, %v1277_v60  ;;  %v1279_v0 = vpop.f32.mrb[11].mxu1 }
 0x19f   :  { %v1637_v61 = vadd.f32 %v1267_v59, %v1108_v37  ;;  %v1269_v63 = vpop.f32.mrb[3].mxu0  ;;  %v1646_v2 = vadd.f32 %v1645_v50, %v1279_v0 }
 0x1a0   :  { %v1638_v1 = vadd.f32 %v1269_v63, %v1110_v38  ;;  %v1343_v4 = vadd.f32 %v1644_v62, %v1640_v54 }
 0x1a1   :  { %v1282_v3 = vadd.f32 %v1637_v61, %v1635_v53  ;;  %v1350_v6 = vadd.f32 %v1646_v2, %v1642_v58 }
 0x1a2   :  { %v1289_v5 = vadd.f32 %v1638_v1, %v1636_v57  ;;  %v1344_v8 = vrot.slane %v1343_v4, 4 }
 0x1a3   :  { %v1283_v7 = vrot.slane %v1282_v3, 4  ;;  %v1351_v10 = vrot.slane %v1350_v6, 4 }
 0x1a4   :  { %v1290_v9 = vrot.slane %v1289_v5, 4  ;;  %v1345_v12 = vadd.f32 %v1344_v8, %v1343_v4 }
 0x1a5   :  { %v1284_v11 = vadd.f32 %v1283_v7, %v1282_v3  ;;  %v1352_v14 = vadd.f32 %v1351_v10, %v1350_v6 }
 0x1a6   :  { %v1291_v13 = vadd.f32 %v1290_v9, %v1289_v5  ;;  %v1346_v16 = vrot.slane %v1345_v12, 2 }
 0x1a7   :  { %v1285_v15 = vrot.slane %v1284_v11, 2  ;;  %v1353_v18 = vrot.slane %v1352_v14, 2 }
 0x1a8   :  { %v1292_v17 = vrot.slane %v1291_v13, 2  ;;  %v1347_v20 = vadd.f32 %v1346_v16, %v1345_v12 }
 0x1a9   :  { %v1286_v19 = vadd.f32 %v1285_v15, %v1284_v11  ;;  %v1354_v22 = vadd.f32 %v1353_v18, %v1352_v14 }
 0x1aa   :  { %v1293_v21 = vadd.f32 %v1292_v17, %v1291_v13  ;;  %v1348_v24 = vrot.slane %v1347_v20, 1 }
 0x1ab   :  { %v1287_v23 = vrot.slane %v1286_v19, 1  ;;  %v1355_v26 = vrot.slane %v1354_v22, 1 }
 0x1ac   :  { %v1294_v25 = vrot.slane %v1293_v21, 1  ;;  %v1349_v28 = vadd.f32 %v1348_v24, %v1347_v20 }
 0x1ad   :  { %v1288_v27 = vadd.f32 %v1287_v23, %v1286_v19  ;;  %v1356_v30 = vadd.f32 %v1355_v26, %v1354_v22 }
 0x1ae   :  { %v1295_v29 = vadd.f32 %v1294_v25, %v1293_v21  ;;  %v1357_v32 = vmul.f32 0.0625, %v1349_v28 }
 0x1af   :  { %v1297_v31 = vmul.f32 0.0625, %v1288_v27  ;;  %v1358_v34 = vmul.f32 0.0625, %v1356_v30 }
 0x1b0   :  { %v1298_v33 = vmul.f32 0.0625, %v1295_v29  ;;  %v1359_v37 = vsub.f32 %v1640_v54, %v1357_v32  ;;  %v1361_v38 = vsub.f32 %v1644_v62, %v1357_v32 }
 0x1b1   :  { %v1299_v35 = vsub.f32 %v1635_v53, %v1297_v31  ;;  %v1301_v36 = vsub.f32 %v1637_v61, %v1297_v31  ;;  %v2051_v41 = vsub.f32 %v1642_v58, %v1358_v34  ;;  %v2053_v42 = vsub.f32 %v1646_v2, %v1358_v34 }
 0x1b2   :  { %v2047_v39 = vsub.f32 %v1636_v57, %v1298_v33  ;;  %v2049_v40 = vsub.f32 %v1638_v1, %v1298_v33  ;;  %v1363_v45 = vmul.f32 %v1359_v37, %v1359_v37  ;;  %v1365_v46 = vmul.f32 %v1361_v38, %v1361_v38 }
 0x1b3   :  { %v1303_v43 = vmul.f32 %v1299_v35, %v1299_v35  ;;  %v1305_v44 = vmul.f32 %v1301_v36, %v1301_v36  ;;  %v1364_v49 = vmul.f32 %v2051_v41, %v2051_v41  ;;  %v1366_v50 = vmul.f32 %v2053_v42, %v2053_v42 }
 0x1b4   :  { %v1304_v47 = vmul.f32 %v2047_v39, %v2047_v39  ;;  %v1306_v48 = vmul.f32 %v2049_v40, %v2049_v40  ;;  %v1367_v52 = vadd.f32 %v1365_v46, %v1363_v45 }
 0x1b5   :  { %v1307_v51 = vadd.f32 %v1305_v44, %v1303_v43  ;;  %v1374_v54 = vadd.f32 %v1366_v50, %v1364_v49 }
 0x1b6   :  { %v1314_v53 = vadd.f32 %v1306_v48, %v1304_v47  ;;  %v1368_v56 = vrot.slane %v1367_v52, 4 }
 0x1b7   :  { %v1308_v55 = vrot.slane %v1307_v51, 4  ;;  %v1375_v58 = vrot.slane %v1374_v54, 4 }
 0x1b8   :  { %v1315_v57 = vrot.slane %v1314_v53, 4  ;;  %v1369_v60 = vadd.f32 %v1368_v56, %v1367_v52 }
 0x1b9   :  { %v1309_v59 = vadd.f32 %v1308_v55, %v1307_v51  ;;  %v1376_v62 = vadd.f32 %v1375_v58, %v1374_v54 }
 0x1ba   :  { %v1316_v61 = vadd.f32 %v1315_v57, %v1314_v53  ;;  %v1370_v0 = vrot.slane %v1369_v60, 2 }
 0x1bb   :  { %v1310_v63 = vrot.slane %v1309_v59, 2  ;;  %v1377_v2 = vrot.slane %v1376_v62, 2 }
 0x1bc   :  { %v1317_v1 = vrot.slane %v1316_v61, 2  ;;  %v1371_v4 = vadd.f32 %v1370_v0, %v1369_v60 }
 0x1bd   :  { %v1311_v3 = vadd.f32 %v1310_v63, %v1309_v59  ;;  %v1378_v6 = vadd.f32 %v1377_v2, %v1376_v62 }
 0x1be   :  { %v1318_v5 = vadd.f32 %v1317_v1, %v1316_v61  ;;  %v1372_v8 = vrot.slane %v1371_v4, 1 }
 0x1bf   :  { %v1312_v7 = vrot.slane %v1311_v3, 1  ;;  %v1379_v10 = vrot.slane %v1378_v6, 1 }
 0x1c0   :  { %v1319_v9 = vrot.slane %v1318_v5, 1  ;;  %v1373_v12 = vadd.f32 %v1372_v8, %v1371_v4 }
 0x1c1   :  { %v1313_v11 = vadd.f32 %v1312_v7, %v1311_v3  ;;  %v1380_v14 = vadd.f32 %v1379_v10, %v1378_v6 }
 0x1c2   :  { %v1320_v13 = vadd.f32 %v1319_v9, %v1318_v5  ;;  %v1381_v16 = vmul.f32 0.0625, %v1373_v12 }
 0x1c3   :  { %v1321_v15 = vmul.f32 0.0625, %v1313_v11  ;;  %v1382_v18 = vmul.f32 0.0625, %v1380_v14 }
 0x1c4   :  { %v1322_v17 = vmul.f32 0.0625, %v1320_v13  ;;  %v1383_v20 = vadd.f32 1e-05, %v1381_v16 }
 0x1c5   :  { %v1323_v19 = vadd.f32 1e-05, %v1321_v15  ;;  %v1384_v22 = vadd.f32 1e-05, %v1382_v18 }
 0x1c6   :  { %v1324_v21 = vadd.f32 1e-05, %v1322_v17 }
 0x1c7   :  { %1917 = vrsqrt.f32 %v1323_v19 }
 0x1c8   :  { %1919 = vrsqrt.f32 %v1383_v20 }
 0x1c9   :  { %1921 = vrsqrt.f32 %v1324_v21 }
 0x1ca   :  { %1923 = vrsqrt.f32 %v1384_v22 }
 0x1d1   :  { %v1918_v23 = vpop.eup %1917 }
 0x1d2   :  { %v1920_v24 = vpop.eup %1919  ;;  %v1327_v25 = vmul.f32 %v1918_v23, %v1299_v35  ;;  %v1329_v26 = vmul.f32 %v1918_v23, %v1301_v36 }
 0x1d3   :  { %v1922_v27 = vpop.eup %1921  ;;  %v1387_v28 = vmul.f32 %v1920_v24, %v1359_v37  ;;  %v1389_v29 = vmul.f32 %v1920_v24, %v1361_v38 }
 0x1d4   :  { %v1924_v30 = vpop.eup %1923  ;;  %vm1331_vm0 = vcmp.ge.f32.partialorder %v1327_v25, 0.0  ;;  %vm1333_vm1 = vcmp.ge.f32.partialorder %v1329_v26, 0.0  ;;  %v1335_v31 = vmul.f32 0.2, %v1327_v25  ;;  %v1337_v32 = vmul.f32 0.2, %v1329_v26 }
 0x1d5   :  { %vm1391_vm2 = vcmp.ge.f32.partialorder %v1387_v28, 0.0  ;;  %vm1393_vm3 = vcmp.ge.f32.partialorder %v1389_v29, 0.0  ;;  %v1395_v33 = vmul.f32 0.2, %v1387_v28  ;;  %v1397_v34 = vmul.f32 0.2, %v1389_v29 }
 0x1d6   :  { %v1341_v43 = vsel %vm1333_vm1, %v1329_v26, %v1337_v32  ;;  %v1328_v44 = vmul.f32 %v1922_v27, %v2047_v39  ;;  %v1330_v45 = vmul.f32 %v1922_v27, %v2049_v40  ;;  %v1388_v35 = vmul.f32 %v1924_v30, %v2051_v41 }
 0x1d7   :  { %v1401_v36 = vsel %vm1393_vm3, %v1389_v29, %v1397_v34  ;;  %v1390_v37 = vmul.f32 %v1924_v30, %v2053_v42  ;;  %v1339_v38 = vsel %vm1331_vm0, %v1327_v25, %v1335_v31  ;;  %v1399_v46 = vsel %vm1391_vm2, %v1387_v28, %v1395_v33 }
 0x1d8   :  { %vm1332_vm4 = vcmp.ge.f32.partialorder %v1328_v44, 0.0  ;;  %vm1334_vm5 = vcmp.ge.f32.partialorder %v1330_v45, 0.0  ;;  %v1336_v47 = vmul.f32 0.2, %v1328_v44  ;;  %v1338_v48 = vmul.f32 0.2, %v1330_v45 }
 0x1d9   :  { %vm1392_vm6 = vcmp.ge.f32.partialorder %v1388_v35, 0.0  ;;  %vm1394_vm7 = vcmp.ge.f32.partialorder %v1390_v37, 0.0  ;;  %v1396_v49 = vmul.f32 0.2, %v1388_v35  ;;  %v1398_v50 = vmul.f32 0.2, %v1390_v37 }
 0x1da   :  { %v1342_v39 = vsel %vm1334_vm5, %v1330_v45, %v1338_v48  ;;  %v1340_v51 = vsel %vm1332_vm4, %v1328_v44, %v1336_v47 }
 0x1db   :  { %v1616_v40 = vpack.c.bf16 %v1342_v39, %v1341_v43  ;;  %v1402_v52 = vsel %vm1394_vm7, %v1390_v37, %v1398_v50  ;;  %v1400_v41 = vsel %vm1392_vm6, %v1388_v35, %v1396_v49  ;;  %v1615_v53 = vpack.c.bf16 %v1340_v51, %v1339_v38 }
 0x1dc   :  { %v1618_v54 = vpack.c.bf16 %v1402_v52, %v1401_v36  ;;  %v1617_v42 = vpack.c.bf16 %v1400_v41, %v1399_v46 }
 0x1dd   :  { %1428 = vst [vmem:[#allocation7 + $0x8] sm:$0xff] %v1616_v40  ;;  %1427 = vst [vmem:[#allocation7] sm:$0xff] %v1615_v53 }
 0x1de   :  { %1430 = vst [vmem:[#allocation7 + $0x18] sm:$0xff] %v1618_v54  ;;  %1429 = vst [vmem:[#allocation7 + $0x10] sm:$0xff] %v1617_v42 }
 0x1df   :  { %1980 = shalt.err (!%p1977_p6)
}
 0x1e0   :  { %s1981_s12 = scalar_lea.hbm %s2084_s2, 512 }
 0x1e1   :  { %p1982_p7 = scmp.ne.s32.totalorder %s2084_s2, %s1981_s12  ;;  %p1985_p8 = scmp.lt.u32.totalorder %s1981_s12, %s2084_s2 }
 0x1e3   :  { %p1987_p9 = pnand %p1985_p8, %p1982_p7 }
 0x1e5   :  { %1990 = shalt.err (!%p1987_p9)
}
 0x1e6   :  { %1442 = dma.vmem_to_hbm [thread:$0]  %s1437_s8, 512, %s2084_s2, [#allocation4], %s2001_s0, %s2001_s0, %s2002_s5  }
 0x1e7   :  { %1995 = dma.done.wait [#allocation4], 512  }
 0x1e8   :  { %1996 = vsyncadd [#allocation4], 4294966784 }
 0x1e9   :  { %1446 = vsyncpa [#allocation3], 1 }
 0x1ea   :  { %1447 = vsyncpa [#allocation6], 1 }
 0x1eb   :  { %1448 = vsyncpa [#allocation4], 1 }

// kernel: discriminator_forward.8
= control target key start
LH: loop header
LB: loop body
LE: loop exit
PB: predicated region body
PF: predicated region fallthrough
CT: control target
= control target key end

     0   :  { %7 = vsyncpa [#allocation3], 0  ;;  %s4221_s0 = inlined_call_operand.hbm [shape: bf16[8,2304], index: 0, kind: input, shape index: {}]   ;;  %s4222_s1 = inlined_call_operand.hbm [shape: bf16[2304,512], index: 1, kind: input, shape index: {}]   ;;  %s4223_s2 = inlined_call_operand.hbm [shape: bf16[8,512], index: 2, kind: output, shape index: {}]  }
   0x1   :  { %8 = vsyncpa [#allocation6], 0 }
   0x2   :  { %10 = vsyncpa [#allocation6 + $0x1], 0 }
   0x3   :  { %11 = vsyncpa [#allocation4], 0 }
   0x4   :  { %13 = vsyncpa [#allocation4 + $0x1], 0  ;;  %s3659_s9 = smov 0   ;;  %s3661_s10 = smov 0  }
   0x5   :  { %s3663_s11 = smov 0   ;;  %s3665_s12 = smov 0  }
   0x6   :  { %s3667_s13 = smov 0   ;;  %s3669_s14 = smov 0  }
   0x7 LB: > { %s2601_s15 = sadd.s32 4294967295, %s3636_s14   ;;  %s2602_s16 = sadd.s32 4294967294, %s3636_s14   ;;  %s3636_s14 = sphi %s3669_s14, %s19_s14   ;;  %s3632_s13 = sphi %s3667_s13, %s4251_s13   ;;  %s3628_s12 = sphi %s3665_s12, %s4250_s12   ;;  %s3624_s11 = sphi %s3663_s11, %s4249_s11   ;;  %s3620_s10 = sphi %s3661_s10, %s4248_s10   ;;  %s3616_s9 = sphi %s3659_s9, %s4247_s9  }
   0x8   : > { %s64_s17 = sadd.s32 1, %s3624_s11  ;;  %p71_p0 = scmp.ne.s32.totalorder %s3624_s11, %s3620_s10 }
   0x9   : > { %p72_p1 = scmp.eq.s32.totalorder %s3636_s14, 0  ;;  %p77_p2 = scmp.ne.s32.totalorder %s3620_s10, %s3616_s9 }
   0xa   : > { %p3697_p3 = scmp.eq.s32.totalorder %s2601_s15, 0  ;;  %p103_p4 = scmp.eq.s32.totalorder %s2601_s15, 1 }
   0xb   : > { %p3701_p5 = por %p72_p1, %p71_p0  ;;  %p109_p6 = scmp.eq.s32.totalorder %s2602_s16, 1 }
   0xc   : > { %s4230_s18 = scalar_select %p3697_p3, 1, 0 }
   0xd   : > { %p3707_p7 = por %p3697_p3, %p77_p2  ;;  %p3711_p8 = por %p103_p4, %p71_p0 }
   0xe   : > { %p3715_p9 = por %p109_p6, %p77_p2  ;;  %p2603_p10 = scmp.ge.s32.totalorder %s3636_s14, 1 }
   0xf   : > { %s4232_s20 = scalar_select %p3707_p7, 1, 0 }
  0x10   : > { %s4233_s21 = scalar_select %p3711_p8, 1, 0 }
  0x11   : > { %s4234_s22 = scalar_select %p3715_p9, 1, 0 }
  0x12   : > { %p116_p11 = scmp.lt.s32.totalorder %s3636_s14, 3  ;;  %s3638_s24 = smov [#allocation2]  }
  0x13   : > { %s132_s25 = sshll.u32 %s3638_s24, 4  ;;  %p2979_p1 = scmp.lt.s32.totalorder %s3636_s14, 2  ;;  %s133_s25 = int_to_ptr.vmem [resolvable:$true] %s132_s25 }
  0x14   : > { %p3722_p13 = pnand %p2603_p10, %p116_p11  ;;  %s28_s28 = sadd.s32 1, %s3632_s13 }
  0x15   : > { %p3731_p4 = pnand %p2979_p1, %p3701_p5  ;;  %p3742_p6 = scmp.ge.s32.totalorder %s28_s28, 2 }
  0x16   : > { %s4235_s23 = scalar_select %p3722_p13, 1, 0 }
  0x17   : > { %p2966_p0 = pneg %p3722_p13  ;;  %s143_s30 = sand.u32 1, %s3624_s11  }
  0x18   : > { %s4236_s26 = scalar_select %p3731_p4, 1, 0 }
  0x19   : > { %p3737_p2 = pnand %p2966_p0, %p3697_p3  ;;  %s3492_s5 = scalar_lea.hbm %s4221_s0, 1152 }
  0x1a   : > { %s4238_s29 = scalar_select %p3742_p6, 1, 0 }
  0x1b   : > { %p3493_p5 = scmp.ne.s32.totalorder %s4221_s0, %s3492_s5  ;;  %p3494_p10 = pneg %p3737_p2 }
  0x1c   : > { %p3499_p0 = scmp.lt.u32.totalorder %s3492_s5, %s4221_s0 }
  0x1d   : > { %p3495_p11 = pnand %p3494_p10, %p3493_p5 }
  0x1f   : > { %p3496_p1 = pneg %p3495_p11 }
  0x21   : > { %p3501_p12 = pnand %p3499_p0, %p3496_p1 }
  0x23   : > { %3504 = shalt.err (!%p3501_p12)
}
  0x24   : > { %s3505_s16 = scalar_lea.vmem %s133_s25, 1152  ;;  %p3513_p3 = scmp.lt.s32.totalorder %s133_s25, %s133_s25 }
  0x25   : > { %p3506_p9 = scmp.ne.s32.totalorder %s133_s25, %s3505_s16  ;;  %p3514_p13 = scmp.lt.s32.totalorder %s3505_s16, %s3505_s16 }
  0x27   : > { %p3508_p8 = pnand %p3506_p9, %p3494_p10  ;;  %p3515_p4 = por %p3514_p13, %p3513_p3 }
  0x29   : > { %p3509_p7 = pneg %p3508_p8 }
  0x2b   : > { %p3516_p6 = pnand %p3515_p4, %p3509_p7 }
  0x2d   : > { %3519 = shalt.err (!%p3516_p6)
}
  0x2e   : > { %2969 = dma.hbm_to_vmem [thread:$0]  (!%p3737_p2), %s4221_s0, 1152, %s133_s25, [#allocation3]  }
  0x2f   : > { %p4239_p9 = scmp.ne.s32.totalorder %s4238_s29, 0  ;;  %s2956_s3 = smul.u32 2304, %s143_s30 }
  0x30   : > { %s2923_s5 = sshll.u32 %s3632_s13, 7  ;;  %s3782_s29 = scalar_lea.sflag [#allocation6], %s143_s30 }
  0x31   : > { %s4253_s28 = smov (%p4239_p9, %s28_s28), 0  ;;  %s3773_s7 = scalar_lea.hbm %s4222_s1, %s2923_s5 }
  0x32   : > { %s61_s4 = ssub.s32 %s3632_s13, %s4253_s28  ;;  %s147_s8 = scalar_lea.vmem [#allocation5], %s2956_s3 }
  0x33   : > { %p62_p3 = scmp.eq.s32.totalorder %s61_s4, 0  ;;  %s154_s15 = sshll.u32 %s147_s8, 4  ;;  %s3780_s15 = int_to_ptr.vmem [resolvable:$true] %s154_s15 }
  0x34   : > { %s3520_s16 = scalar_lea.hbm %s3773_s7, 36864  ;;  %p4240_p8 = scmp.ne.s32.totalorder %s4236_s26, 0 }
  0x35   : > { %s3778_s25 = scalar_select %p62_p3, %s3624_s11, %s64_s17  }
  0x36   : > { %p3521_p7 = scmp.ne.s32.totalorder %s3773_s7, %s3520_s16  ;;  %p3522_p12 = pneg %p4240_p8 }
  0x37   : > { %s3525_s3 = scalar_lea.hbm %s4222_s1, 73728  ;;  %p3526_p2 = scmp.lt.u32.totalorder %s3773_s7, %s4222_s1 }
  0x38   : > { %p3523_p13 = pnand %p3522_p12, %p3521_p7  ;;  %p3527_p6 = scmp.lt.u32.totalorder %s3525_s3, %s3520_s16 }
  0x39   : > { %p3529_p10 = scmp.lt.u32.totalorder %s3520_s16, %s3773_s7 }
  0x3a   : > { %p3524_p4 = pneg %p3523_p13  ;;  %p3528_p5 = por %p3527_p6, %p3526_p2 }
  0x3c   : > { %p3530_p11 = por %p3529_p10, %p3528_p5 }
  0x3e   : > { %p3531_p1 = pnand %p3530_p11, %p3524_p4 }
  0x40   : > { %3534 = shalt.err (!%p3531_p1)
}
  0x41   : > { %s3535_s17 = scalar_lea.vmem %s3780_s15, 36864  ;;  %s3639_s30 = smov [#allocation5]  }
  0x42   : > { %p3536_p0 = scmp.ne.s32.totalorder %s3780_s15, %s3535_s17  ;;  %s3540_s27 = sshll.u32 %s3639_s30, 4  ;;  %s3541_s27 = int_to_ptr.vmem [resolvable:$false] %s3540_s27 }
  0x43   : > { %s3542_s6 = scalar_lea.vmem %s3541_s27, 73728  ;;  %p3543_p7 = scmp.lt.s32.totalorder %s3780_s15, %s3541_s27 }
  0x44   : > { %p3538_p9 = pnand %p3536_p0, %p3522_p12  ;;  %p3544_p13 = scmp.lt.s32.totalorder %s3542_s6, %s3535_s17 }
  0x46   : > { %p3539_p3 = pneg %p3538_p9  ;;  %p3545_p2 = por %p3544_p13, %p3543_p7 }
  0x48   : > { %p3546_p6 = pnand %p3545_p2, %p3539_p3 }
  0x4a   : > { %3549 = shalt.err (!%p3546_p6)
}
  0x4b   : > { %s3640_s8 = smov 256   ;;  %s3641_s16 = smov 128  }
  0x4c   : > { %s3642_s19 = smov 8   ;;  %p4241_p12 = scmp.ne.s32.totalorder %s4235_s23, 0 }
  0x4d   : > { %2973 = dma.hbm_to_vmem [thread:$0]  (!%p4240_p8), %s3773_s7, 36864, %s3780_s15, %s3782_s29, %s3640_s8, %s3641_s16, %s3642_s19  }
  0x4e   : > { %166 = sbr.rel (%p4241_p12) target bundleno = 701 (0x2bd), region = 28  ;;  %p4242_p4 = scmp.ne.s32.totalorder (!%p4241_p12), %s4230_s18, 0 }
  0x55   : > { %3603 = dma.done.wait (%p4242_p4), [#allocation3], 1152  }
  0x56   : > { %3605 = vsyncadd (%p4242_p4), [#allocation3], 4294966144  ;;  %s3817_s24 = sand.u32 1, %s3620_s10   ;;  %p4243_p8 = scmp.ne.s32.totalorder %s4232_s20, 0 }
  0x57   : > { %s2957_s3 = smul.u32 2304, %s3817_s24  ;;  %s173_s4 = scalar_lea.sflag [#allocation6], %s3817_s24 }
  0x59   : > { %s3821_s5 = scalar_lea.vmem [#allocation5], %s2957_s3 }
  0x5a   : > { %3607 = dma.done.wait (%p4243_p8), %s173_s4, 36864  }
  0x5b   : > { %3609 = vsyncadd (%p4243_p8), %s173_s4, 4294930432  ;;  %v3034_v0 = vld [vmem:[%s3821_s5 + $0x4] ss:$8 sps:$4 sm:$0xff]   ;;  %v3038_v2 = vld [vmem:[%s3821_s5] ss:$8 sps:$4 sm:$0xff]   ;;  %vm2368_vm0 = vcmask 1043456  }
  0x5c   : > { %v3036_v1 = vld [vmem:[%s3821_s5 + $0x404] ss:$8 sps:$4 sm:$0xff]   ;;  %1999 = vmatprep.subr.bf16.mxu1 %v3034_v0  ;;  %v3039_v3 = vld [vmem:[%s3821_s5 + $0x400] ss:$8 sps:$4 sm:$0xff]   ;;  %v3040_v4 = vld [vmem:[%s3821_s5 + $0x14] ss:$8 sps:$4 sm:$0xff]  }
  0x5d   : > { %2163 = vmatprep.subr.bf16.mxu0 %v3036_v1  ;;  %2000 = vmatpush1.bf16.msra.mxu1 %v3038_v2  ;;  %v3042_v5 = vld [vmem:[%s3821_s5 + $0x414] ss:$8 sps:$4 sm:$0xff]   ;;  %v3044_v6 = vld [vmem:[%s3821_s5 + $0x10] ss:$8 sps:$4 sm:$0xff]   ;;  %v3046_v8 = vld [vmem:[%s3821_s5 + $0x24] ss:$8 sps:$4 sm:$0xff]  }
  0x5e   : > { %2164 = vmatpush1.bf16.msra.mxu0 %v3039_v3  ;;  %2001 = vmatprep.subr.bf16.mxu1 %v3040_v4  ;;  %v3045_v7 = vld [vmem:[%s3821_s5 + $0x410] ss:$8 sps:$4 sm:$0xff]   ;;  %v3048_v9 = vld [vmem:[%s3821_s5 + $0x424] ss:$8 sps:$4 sm:$0xff]   ;;  %v3050_v10 = vld [vmem:[%s3821_s5 + $0x20] ss:$8 sps:$4 sm:$0xff]  }
  0x5f   : > { %2165 = vmatprep.subr.bf16.mxu0 %v3042_v5  ;;  %v3051_v11 = vld [vmem:[%s3821_s5 + $0x420] ss:$8 sps:$4 sm:$0xff]   ;;  %v3052_v12 = vld [vmem:[%s3821_s5 + $0x34] ss:$8 sps:$4 sm:$0xff]   ;;  %v3056_v14 = vld [vmem:[%s3821_s5 + $0x30] ss:$8 sps:$4 sm:$0xff]  }
  0x60   : > { %v3054_v13 = vld [vmem:[%s3821_s5 + $0x434] ss:$8 sps:$4 sm:$0xff]   ;;  %v3057_v15 = vld [vmem:[%s3821_s5 + $0x430] ss:$8 sps:$4 sm:$0xff]   ;;  %v3058_v16 = vld [vmem:[%s3821_s5 + $0x44] ss:$8 sps:$4 sm:$0xff]  }
  0x61   : > { %2002 = vmatpush1.bf16.msra.mxu1 %v3044_v6  ;;  %v3060_v17 = vld [vmem:[%s3821_s5 + $0x444] ss:$8 sps:$4 sm:$0xff]   ;;  %v3062_v18 = vld [vmem:[%s3821_s5 + $0x40] ss:$8 sps:$4 sm:$0xff]   ;;  %v3064_v20 = vld [vmem:[%s3821_s5 + $0x54] ss:$8 sps:$4 sm:$0xff]  }
  0x62   : > { %2166 = vmatpush1.bf16.msra.mxu0 %v3045_v7  ;;  %2003 = vmatprep.subr.bf16.mxu1 %v3046_v8  ;;  %v3063_v19 = vld [vmem:[%s3821_s5 + $0x440] ss:$8 sps:$4 sm:$0xff]   ;;  %v3066_v21 = vld [vmem:[%s3821_s5 + $0x454] ss:$8 sps:$4 sm:$0xff]   ;;  %v3068_v22 = vld [vmem:[%s3821_s5 + $0x50] ss:$8 sps:$4 sm:$0xff]  }
  0x63   : > { %2167 = vmatprep.subr.bf16.mxu0 %v3048_v9  ;;  %v3069_v23 = vld [vmem:[%s3821_s5 + $0x450] ss:$8 sps:$4 sm:$0xff]   ;;  %v3070_v24 = vld [vmem:[%s3821_s5 + $0x64] ss:$8 sps:$4 sm:$0xff]   ;;  %v3074_v26 = vld [vmem:[%s3821_s5 + $0x60] ss:$8 sps:$4 sm:$0xff]  }
  0x64   : > { %v3072_v25 = vld [vmem:[%s3821_s5 + $0x464] ss:$8 sps:$4 sm:$0xff]   ;;  %v3075_v27 = vld [vmem:[%s3821_s5 + $0x460] ss:$8 sps:$4 sm:$0xff]   ;;  %v3076_v28 = vld [vmem:[%s3821_s5 + $0x74] ss:$8 sps:$4 sm:$0xff]  }
  0x65   : > { %2004 = vmatpush1.bf16.msra.mxu1 %v3050_v10  ;;  %v3078_v29 = vld [vmem:[%s3821_s5 + $0x474] ss:$8 sps:$4 sm:$0xff]   ;;  %v3080_v30 = vld [vmem:[%s3821_s5 + $0x70] ss:$8 sps:$4 sm:$0xff]   ;;  %v3082_v32 = vld [vmem:[%s3821_s5 + $0x84] ss:$8 sps:$4 sm:$0xff]  }
  0x66   : > { %2168 = vmatpush1.bf16.msra.mxu0 %v3051_v11  ;;  %2005 = vmatprep.subr.bf16.mxu1 %v3052_v12  ;;  %v3081_v31 = vld [vmem:[%s3821_s5 + $0x470] ss:$8 sps:$4 sm:$0xff]   ;;  %v3084_v33 = vld [vmem:[%s3821_s5 + $0x484] ss:$8 sps:$4 sm:$0xff]   ;;  %v3086_v34 = vld [vmem:[%s3821_s5 + $0x80] ss:$8 sps:$4 sm:$0xff]  }
  0x67   : > { %2169 = vmatprep.subr.bf16.mxu0 %v3054_v13  ;;  %v3087_v35 = vld [vmem:[%s3821_s5 + $0x480] ss:$8 sps:$4 sm:$0xff]   ;;  %v3088_v36 = vld [vmem:[%s3821_s5 + $0x94] ss:$8 sps:$4 sm:$0xff]   ;;  %v3092_v38 = vld [vmem:[%s3821_s5 + $0x90] ss:$8 sps:$4 sm:$0xff]  }
  0x68   : > { %v3090_v37 = vld [vmem:[%s3821_s5 + $0x494] ss:$8 sps:$4 sm:$0xff]   ;;  %v3093_v39 = vld [vmem:[%s3821_s5 + $0x490] ss:$8 sps:$4 sm:$0xff]   ;;  %v3094_v40 = vld [vmem:[%s3821_s5 + $0xa4] ss:$8 sps:$4 sm:$0xff]  }
  0x69   : > { %2006 = vmatpush1.bf16.msra.mxu1 %v3056_v14  ;;  %v3096_v41 = vld [vmem:[%s3821_s5 + $0x4a4] ss:$8 sps:$4 sm:$0xff]   ;;  %v3098_v42 = vld [vmem:[%s3821_s5 + $0xa0] ss:$8 sps:$4 sm:$0xff]   ;;  %v3100_v44 = vld [vmem:[%s3821_s5 + $0xb4] ss:$8 sps:$4 sm:$0xff]  }
  0x6a   : > { %2170 = vmatpush1.bf16.msra.mxu0 %v3057_v15  ;;  %2007 = vmatprep.subr.bf16.mxu1 %v3058_v16  ;;  %v3099_v43 = vld [vmem:[%s3821_s5 + $0x4a0] ss:$8 sps:$4 sm:$0xff]   ;;  %v3102_v45 = vld [vmem:[%s3821_s5 + $0x4b4] ss:$8 sps:$4 sm:$0xff]   ;;  %v3104_v47 = vld [vmem:[%s3821_s5 + $0xb0] ss:$8 sps:$4 sm:$0xff]  }
  0x6b   : > { %2171 = vmatprep.subr.bf16.mxu0 %v3060_v17  ;;  %v199_v46 = vld [vmem:[#allocation2] sm:$0xff]  ;;  %v3106_v51 = vld [vmem:[%s3821_s5 + $0xc4] ss:$8 sps:$4 sm:$0xff]   ;;  %v3110_v54 = vld [vmem:[%s3821_s5 + $0xc0] ss:$8 sps:$4 sm:$0xff]   ;;  %s2610_s18 = sshll.u32 %s3817_s24, 3 }
  0x6c   : > { %v2612_v48 = vcombine.high %v199_v46, %v199_v46  ;;  %v3105_v49 = vld [vmem:[%s3821_s5 + $0x4b0] ss:$8 sps:$4 sm:$0xff]   ;;  %v3108_v52 = vld [vmem:[%s3821_s5 + $0x4c4] ss:$8 sps:$4 sm:$0xff]   ;;  %v3111_v55 = vld [vmem:[%s3821_s5 + $0x4c0] ss:$8 sps:$4 sm:$0xff]   ;;  %v2611_v6 = vcombine.low %v199_v46, %v199_v46 }
  0x6d   : > { %2008 = vmatpush1.bf16.msra.mxu1 %v3062_v18  ;;  %v203_v50 = vld [vmem:[#allocation2 + $0x20] sm:$0xff]  ;;  %v3118_v60 = vld [vmem:[%s3821_s5 + $0xe4] ss:$8 sps:$4 sm:$0xff]   ;;  %v3122_v62 = vld [vmem:[%s3821_s5 + $0xe0] ss:$8 sps:$4 sm:$0xff]   ;;  %s2925_s20 = sshll.u32 %s3628_s12, 7 }
  0x6e   : > { %2172 = vmatpush1.bf16.msra.mxu0 %v3063_v19  ;;  %2009 = vmatprep.subr.bf16.mxu1 %v3064_v20  ;;  %v2620_v53 = vcombine.high %v203_v50, %v203_v50  ;;  %v3112_v56 = vld [vmem:[%s3821_s5 + $0xd4] ss:$8 sps:$4 sm:$0xff]   ;;  %v3116_v58 = vld [vmem:[%s3821_s5 + $0xd0] ss:$8 sps:$4 sm:$0xff]   ;;  %v3120_v61 = vld [vmem:[%s3821_s5 + $0x4e4] ss:$8 sps:$4 sm:$0xff]   ;;  %v2619_v7 = vcombine.low %v203_v50, %v203_v50  ;;  %s4172_s29 = scalar_lea.hbm %s4223_s2, %s2925_s20 }
  0x6f   : > { %2173 = vmatprep.subr.bf16.mxu0 %v3066_v21  ;;  %2031 = vmatprep.mubr.bf16.mxu1 %v2612_v48  ;;  %v3114_v57 = vld [vmem:[%s3821_s5 + $0x4d4] ss:$8 sps:$4 sm:$0xff]   ;;  %v3117_v59 = vld [vmem:[%s3821_s5 + $0x4d0] ss:$8 sps:$4 sm:$0xff]   ;;  %v3123_v63 = vld [vmem:[%s3821_s5 + $0x4e0] ss:$8 sps:$4 sm:$0xff]  }
  0x70   : > { %2195 = vmatprep.mubr.bf16.mxu0 %v2620_v53  ;;  %v3124_v0 = vld [vmem:[%s3821_s5 + $0xf4] ss:$8 sps:$4 sm:$0xff]   ;;  %v3128_v2 = vld [vmem:[%s3821_s5 + $0xf0] ss:$8 sps:$4 sm:$0xff]   ;;  %v3134_v4 = vld [vmem:[%s3821_s5 + $0x104] ss:$8 sps:$4 sm:$0xff]  }
  0x71   : > { %2010 = vmatpush1.bf16.msra.mxu1 %v3068_v22  ;;  %v3126_v1 = vld [vmem:[%s3821_s5 + $0x4f4] ss:$8 sps:$4 sm:$0xff]   ;;  %v3129_v3 = vld [vmem:[%s3821_s5 + $0x4f0] ss:$8 sps:$4 sm:$0xff]   ;;  %v3139_v5 = vld [vmem:[%s3821_s5 + $0x504] ss:$8 sps:$4 sm:$0xff]  }
  0x72   : > { %2174 = vmatpush1.bf16.msra.mxu0 %v3069_v23  ;;  %2011 = vmatprep.subr.bf16.mxu1 %v3070_v24  ;;  %v3132_v8 = vld [vmem:[%s3821_s5 + $0x100] ss:$8 sps:$4 sm:$0xff]   ;;  %v3142_v10 = vld [vmem:[%s3821_s5 + $0x114] ss:$8 sps:$4 sm:$0xff]   ;;  %v3140_v12 = vld [vmem:[%s3821_s5 + $0x110] ss:$8 sps:$4 sm:$0xff]  }
  0x73   : > { %2175 = vmatprep.subr.bf16.mxu0 %v3072_v25  ;;  %v3137_v9 = vld [vmem:[%s3821_s5 + $0x500] ss:$8 sps:$4 sm:$0xff]   ;;  %v3145_v11 = vld [vmem:[%s3821_s5 + $0x514] ss:$8 sps:$4 sm:$0xff]   ;;  %v3143_v13 = vld [vmem:[%s3821_s5 + $0x510] ss:$8 sps:$4 sm:$0xff]  }
  0x74   : > { %v3148_v14 = vld [vmem:[%s3821_s5 + $0x124] ss:$8 sps:$4 sm:$0xff]   ;;  %v3146_v16 = vld [vmem:[%s3821_s5 + $0x120] ss:$8 sps:$4 sm:$0xff]   ;;  %v3154_v18 = vld [vmem:[%s3821_s5 + $0x134] ss:$8 sps:$4 sm:$0xff]  }
  0x75   : > { %2012 = vmatpush1.bf16.msra.mxu1 %v3074_v26  ;;  %v3151_v15 = vld [vmem:[%s3821_s5 + $0x524] ss:$8 sps:$4 sm:$0xff]   ;;  %v3149_v17 = vld [vmem:[%s3821_s5 + $0x520] ss:$8 sps:$4 sm:$0xff]   ;;  %v3157_v19 = vld [vmem:[%s3821_s5 + $0x534] ss:$8 sps:$4 sm:$0xff]  }
  0x76   : > { %2176 = vmatpush1.bf16.msra.mxu0 %v3075_v27  ;;  %2013 = vmatprep.subr.bf16.mxu1 %v3076_v28  ;;  %v3152_v20 = vld [vmem:[%s3821_s5 + $0x130] ss:$8 sps:$4 sm:$0xff]   ;;  %v3160_v22 = vld [vmem:[%s3821_s5 + $0x144] ss:$8 sps:$4 sm:$0xff]   ;;  %v3158_v24 = vld [vmem:[%s3821_s5 + $0x140] ss:$8 sps:$4 sm:$0xff]  }
  0x77   : > { %2177 = vmatprep.subr.bf16.mxu0 %v3078_v29  ;;  %v3155_v21 = vld [vmem:[%s3821_s5 + $0x530] ss:$8 sps:$4 sm:$0xff]   ;;  %v3163_v23 = vld [vmem:[%s3821_s5 + $0x544] ss:$8 sps:$4 sm:$0xff]   ;;  %v3161_v25 = vld [vmem:[%s3821_s5 + $0x540] ss:$8 sps:$4 sm:$0xff]  }
  0x78   : > { %v3166_v26 = vld [vmem:[%s3821_s5 + $0x154] ss:$8 sps:$4 sm:$0xff]   ;;  %v3164_v28 = vld [vmem:[%s3821_s5 + $0x150] ss:$8 sps:$4 sm:$0xff]   ;;  %v3196_v50 = vld [vmem:[%s3821_s5 + $0x1a4] ss:$8 sps:$4 sm:$0xff]  }
  0x79   : > { %2014 = vmatpush1.bf16.msra.mxu1 %v3080_v30  ;;  %v3169_v27 = vld [vmem:[%s3821_s5 + $0x554] ss:$8 sps:$4 sm:$0xff]   ;;  %v3167_v29 = vld [vmem:[%s3821_s5 + $0x550] ss:$8 sps:$4 sm:$0xff]   ;;  %v3172_v30 = vld [vmem:[%s3821_s5 + $0x164] ss:$8 sps:$4 sm:$0xff]  }
  0x7a   : > { %2178 = vmatpush1.bf16.msra.mxu0 %v3081_v31  ;;  %2015 = vmatprep.subr.bf16.mxu1 %v3082_v32  ;;  %v3175_v31 = vld [vmem:[%s3821_s5 + $0x564] ss:$8 sps:$4 sm:$0xff]   ;;  %v3190_v46 = vld [vmem:[%s3821_s5 + $0x194] ss:$8 sps:$4 sm:$0xff]   ;;  %v3188_v48 = vld [vmem:[%s3821_s5 + $0x190] ss:$8 sps:$4 sm:$0xff]  }
  0x7b   : > { %2179 = vmatprep.subr.bf16.mxu0 %v3084_v33  ;;  %v3917_v32 = vld [vmem:[#allocation2 + $0x8] sm:$0xff]  ;;  %s196_s23 = scalar_lea.vmem [#allocation7], %s2610_s18  ;;  %s2490_s12 = scalar_lea.sflag [#allocation4], %s3817_s24 }
  0x7c   : > { %v3170_v33 = vld [vmem:[%s3821_s5 + $0x160] ss:$8 sps:$4 sm:$0xff]   ;;  %s2506_s26 = sshll.u32 %s196_s23, 4  ;;  %p4244_p10 = scmp.ne.s32.totalorder %s4233_s21, 0  ;;  %s4174_s26 = int_to_ptr.vmem [resolvable:$true] %s2506_s26 }
  0x7d   : > { %2016 = vmatpush1.bf16.msra.mxu1 %v3086_v34  ;;  %v3173_v34 = vld [vmem:[%s3821_s5 + $0x560] ss:$8 sps:$4 sm:$0xff]   ;;  %s3550_s17 = scalar_lea.vmem %s4174_s26, 128  ;;  %s3643_s30 = smov [#allocation7]  }
  0x7e   : > { %2180 = vmatpush1.bf16.msra.mxu0 %v3087_v35  ;;  %2017 = vmatprep.subr.bf16.mxu1 %v3088_v36  ;;  %v2614_v35 = vcombine.high %v3917_v32, %v3917_v32  ;;  %v3923_v36 = vld [vmem:[#allocation2 + $0x28] sm:$0xff]  ;;  %p3551_p5 = scmp.ne.s32.totalorder %s4174_s26, %s3550_s17  ;;  %s3554_s27 = sshll.u32 %s3643_s30, 4  ;;  %s3555_s27 = int_to_ptr.vmem [resolvable:$false] %s3554_s27 }
  0x7f   : > { %2181 = vmatprep.subr.bf16.mxu0 %v3090_v37  ;;  %v3178_v37 = vld [vmem:[%s3821_s5 + $0x174] ss:$8 sps:$4 sm:$0xff]   ;;  %v3197_v53 = vld [vmem:[%s3821_s5 + $0x5a0] ss:$8 sps:$4 sm:$0xff]   ;;  %s3556_s6 = scalar_lea.vmem %s3555_s27, 256  ;;  %p3557_p0 = scmp.lt.s32.totalorder %s4174_s26, %s3555_s27 }
  0x80   : > { %p3552_p11 = pnand %p3551_p5, %p4244_p10  ;;  %p3558_p9 = scmp.lt.s32.totalorder %s3556_s6, %s3550_s17 }
  0x81   : > { %2018 = vmatpush1.bf16.msra.mxu1 %v3092_v38  ;;  %v2622_v38 = vcombine.high %v3923_v36, %v3923_v36 }
  0x82   : > { %2182 = vmatpush1.bf16.msra.mxu0 %v3093_v39  ;;  %2019 = vmatprep.subr.bf16.mxu1 %v3094_v40  ;;  %v3181_v39 = vld [vmem:[%s3821_s5 + $0x574] ss:$8 sps:$4 sm:$0xff]   ;;  %v3176_v40 = vld [vmem:[%s3821_s5 + $0x170] ss:$8 sps:$4 sm:$0xff]   ;;  %p3553_p1 = pneg %p3552_p11  ;;  %p3559_p3 = por %p3558_p9, %p3557_p0 }
  0x83   : > { %2183 = vmatprep.subr.bf16.mxu0 %v3096_v41  ;;  %v3179_v41 = vld [vmem:[%s3821_s5 + $0x570] ss:$8 sps:$4 sm:$0xff]  }
  0x84   : > { %p3560_p7 = pnand %p3559_p3, %p3553_p1 }
  0x85   : > { %2020 = vmatpush1.bf16.msra.mxu1 %v3098_v42  ;;  %v3184_v42 = vld [vmem:[%s3821_s5 + $0x184] ss:$8 sps:$4 sm:$0xff]  }
  0x86   : > { %2184 = vmatpush1.bf16.msra.mxu0 %v3099_v43  ;;  %2021 = vmatprep.subr.bf16.mxu1 %v3100_v44  ;;  %v3187_v43 = vld [vmem:[%s3821_s5 + $0x584] ss:$8 sps:$4 sm:$0xff]   ;;  %v3182_v44 = vld [vmem:[%s3821_s5 + $0x180] ss:$8 sps:$4 sm:$0xff]  }
  0x87   : > { %2185 = vmatprep.subr.bf16.mxu0 %v3102_v45  ;;  %v3185_v45 = vld [vmem:[%s3821_s5 + $0x580] ss:$8 sps:$4 sm:$0xff]  }
  0x89   : > { %2022 = vmatpush1.bf16.msra.mxu1 %v3104_v47  ;;  %v3193_v47 = vld [vmem:[%s3821_s5 + $0x594] ss:$8 sps:$4 sm:$0xff]  }
  0x8a   : > { %2186 = vmatpush1.bf16.msra.mxu0 %v3105_v49  ;;  %2023 = vmatprep.subr.bf16.mxu1 %v3106_v51  ;;  %v3191_v49 = vld [vmem:[%s3821_s5 + $0x590] ss:$8 sps:$4 sm:$0xff]   ;;  %v3199_v51 = vld [vmem:[%s3821_s5 + $0x5a4] ss:$8 sps:$4 sm:$0xff]  }
  0x8b   : > { %2187 = vmatprep.subr.bf16.mxu0 %v3108_v52  ;;  %v3194_v52 = vld [vmem:[%s3821_s5 + $0x1a0] ss:$8 sps:$4 sm:$0xff]  }
  0x8d   : > { %2024 = vmatpush1.bf16.msra.mxu1 %v3110_v54  ;;  %v3202_v54 = vld [vmem:[%s3821_s5 + $0x1b4] ss:$8 sps:$4 sm:$0xff]  }
  0x8e   : > { %2188 = vmatpush1.bf16.msra.mxu0 %v3111_v55  ;;  %2025 = vmatprep.subr.bf16.mxu1 %v3112_v56  ;;  %v3205_v55 = vld [vmem:[%s3821_s5 + $0x5b4] ss:$8 sps:$4 sm:$0xff]   ;;  %v3200_v56 = vld [vmem:[%s3821_s5 + $0x1b0] ss:$8 sps:$4 sm:$0xff]  }
  0x8f   : > { %2189 = vmatprep.subr.bf16.mxu0 %v3114_v57  ;;  %v3203_v57 = vld [vmem:[%s3821_s5 + $0x5b0] ss:$8 sps:$4 sm:$0xff]  }
  0x91   : > { %2026 = vmatpush1.bf16.msra.mxu1 %v3116_v58  ;;  %v3208_v58 = vld [vmem:[%s3821_s5 + $0x1c4] ss:$8 sps:$4 sm:$0xff]  }
  0x92   : > { %2190 = vmatpush1.bf16.msra.mxu0 %v3117_v59  ;;  %2027 = vmatprep.subr.bf16.mxu1 %v3118_v60  ;;  %v3211_v59 = vld [vmem:[%s3821_s5 + $0x5c4] ss:$8 sps:$4 sm:$0xff]   ;;  %v3206_v60 = vld [vmem:[%s3821_s5 + $0x1c0] ss:$8 sps:$4 sm:$0xff]  }
  0x93   : > { %2191 = vmatprep.subr.bf16.mxu0 %v3120_v61  ;;  %v3209_v61 = vld [vmem:[%s3821_s5 + $0x5c0] ss:$8 sps:$4 sm:$0xff]  }
  0x95   : > { %2028 = vmatpush1.bf16.msra.mxu1 %v3122_v62  ;;  %v3214_v62 = vld [vmem:[%s3821_s5 + $0x1d4] ss:$8 sps:$4 sm:$0xff]  }
  0x96   : > { %2192 = vmatpush1.bf16.msra.mxu0 %v3123_v63  ;;  %2029 = vmatprep.subr.bf16.mxu1 %v3124_v0  ;;  %v3217_v63 = vld [vmem:[%s3821_s5 + $0x5d4] ss:$8 sps:$4 sm:$0xff]   ;;  %v3212_v0 = vld [vmem:[%s3821_s5 + $0x1d0] ss:$8 sps:$4 sm:$0xff]  }
  0x97   : > { %2193 = vmatprep.subr.bf16.mxu0 %v3126_v1  ;;  %v3215_v1 = vld [vmem:[%s3821_s5 + $0x5d0] ss:$8 sps:$4 sm:$0xff]  }
  0x99   : > { %2030 = vmatpush1.bf16.msra.mxu1 %v3128_v2  ;;  %v3220_v2 = vld [vmem:[%s3821_s5 + $0x1e4] ss:$8 sps:$4 sm:$0xff]  }
  0x9a   : > { %2194 = vmatpush1.bf16.msra.mxu0 %v3129_v3  ;;  %2040 = vmatprep.subr.bf16.mxu1 %v3134_v4  ;;  %v3223_v3 = vld [vmem:[%s3821_s5 + $0x5e4] ss:$8 sps:$4 sm:$0xff]   ;;  %v3218_v4 = vld [vmem:[%s3821_s5 + $0x1e0] ss:$8 sps:$4 sm:$0xff]  }
  0x9b   : > { %2204 = vmatprep.subr.bf16.mxu0 %v3139_v5  ;;  %v3221_v5 = vld [vmem:[%s3821_s5 + $0x5e0] ss:$8 sps:$4 sm:$0xff]  }
  0x9c   : > { %2032 = vmatmul.mubr.bf16.vlgmr.msra.gmra.mrb[0].mxu1 %v2611_v6  ;;  %v3226_v6 = vld [vmem:[%s3821_s5 + $0x1f4] ss:$8 sps:$4 sm:$0xff]  }
  0x9d   : > { %2196 = vmatmul.mubr.bf16.vlgmr.msra.gmra.mrb[0].mxu0 %v2619_v7  ;;  %2041 = vmatpush1.bf16.msra.mxu1 %v3132_v8  ;;  %v3229_v7 = vld [vmem:[%s3821_s5 + $0x5f4] ss:$8 sps:$4 sm:$0xff]   ;;  %v3224_v8 = vld [vmem:[%s3821_s5 + $0x1f0] ss:$8 sps:$4 sm:$0xff]  }
  0x9e   : > { %2205 = vmatpush1.bf16.msra.mxu0 %v3137_v9  ;;  %2042 = vmatprep.subr.bf16.mxu1 %v3142_v10  ;;  %v3227_v9 = vld [vmem:[%s3821_s5 + $0x5f0] ss:$8 sps:$4 sm:$0xff]   ;;  %v3234_v10 = vld [vmem:[%s3821_s5 + $0x204] ss:$8 sps:$4 sm:$0xff]  }
  0x9f   : > { %2206 = vmatprep.subr.bf16.mxu0 %v3145_v11  ;;  %2072 = vmatprep.mubr.bf16.mxu1 %v2614_v35  ;;  %v3239_v11 = vld [vmem:[%s3821_s5 + $0x604] ss:$8 sps:$4 sm:$0xff]   ;;  %v3261_v35 = vld [vmem:[%s3821_s5 + $0x640] ss:$8 sps:$4 sm:$0xff]  }
  0xa0   : > { %2236 = vmatprep.mubr.bf16.mxu0 %v2622_v38  ;;  %v3264_v38 = vld [vmem:[%s3821_s5 + $0x250] ss:$8 sps:$4 sm:$0xff]  }
  0xa1   : > { %2043 = vmatpush1.bf16.msra.mxu1 %v3140_v12  ;;  %v2613_v12 = vcombine.low %v3917_v32, %v3917_v32  ;;  %v3260_v32 = vld [vmem:[%s3821_s5 + $0x244] ss:$8 sps:$4 sm:$0xff]  }
  0xa2   : > { %2207 = vmatpush1.bf16.msra.mxu0 %v3143_v13  ;;  %2044 = vmatprep.subr.bf16.mxu1 %v3148_v14  ;;  %v3232_v13 = vld [vmem:[%s3821_s5 + $0x200] ss:$8 sps:$4 sm:$0xff]   ;;  %v2621_v14 = vcombine.low %v3923_v36, %v3923_v36  ;;  %v3266_v36 = vld [vmem:[%s3821_s5 + $0x254] ss:$8 sps:$4 sm:$0xff]  }
  0xa3   : > { %2208 = vmatprep.subr.bf16.mxu0 %v3151_v15  ;;  %v3237_v15 = vld [vmem:[%s3821_s5 + $0x600] ss:$8 sps:$4 sm:$0xff]  }
  0xa5   : > { %2045 = vmatpush1.bf16.msra.mxu1 %v3146_v16  ;;  %v3242_v16 = vld [vmem:[%s3821_s5 + $0x214] ss:$8 sps:$4 sm:$0xff]  }
  0xa6   : > { %2209 = vmatpush1.bf16.msra.mxu0 %v3149_v17  ;;  %2046 = vmatprep.subr.bf16.mxu1 %v3154_v18  ;;  %v3245_v17 = vld [vmem:[%s3821_s5 + $0x614] ss:$8 sps:$4 sm:$0xff]   ;;  %v3973_v18 = vld [vmem:[#allocation2 + $0x10] sm:$0xff] }
  0xa7   : > { %2210 = vmatprep.subr.bf16.mxu0 %v3157_v19  ;;  %v2616_v19 = vcombine.high %v3973_v18, %v3973_v18 }
  0xa9   : > { %2047 = vmatpush1.bf16.msra.mxu1 %v3152_v20  ;;  %v3977_v20 = vld [vmem:[#allocation2 + $0x30] sm:$0xff] }
  0xaa   : > { %2211 = vmatpush1.bf16.msra.mxu0 %v3155_v21  ;;  %2048 = vmatprep.subr.bf16.mxu1 %v3160_v22  ;;  %v3240_v21 = vld [vmem:[%s3821_s5 + $0x210] ss:$8 sps:$4 sm:$0xff]  }
  0xab   : > { %2212 = vmatprep.subr.bf16.mxu0 %v3163_v23  ;;  %v3243_v22 = vld [vmem:[%s3821_s5 + $0x610] ss:$8 sps:$4 sm:$0xff]   ;;  %v2624_v23 = vcombine.high %v3977_v20, %v3977_v20 }
  0xad   : > { %2049 = vmatpush1.bf16.msra.mxu1 %v3158_v24  ;;  %v3248_v24 = vld [vmem:[%s3821_s5 + $0x224] ss:$8 sps:$4 sm:$0xff]  }
  0xae   : > { %2213 = vmatpush1.bf16.msra.mxu0 %v3161_v25  ;;  %2050 = vmatprep.subr.bf16.mxu1 %v3166_v26  ;;  %v3251_v25 = vld [vmem:[%s3821_s5 + $0x624] ss:$8 sps:$4 sm:$0xff]   ;;  %v3246_v26 = vld [vmem:[%s3821_s5 + $0x220] ss:$8 sps:$4 sm:$0xff]  }
  0xaf   : > { %2214 = vmatprep.subr.bf16.mxu0 %v3169_v27  ;;  %v3249_v27 = vld [vmem:[%s3821_s5 + $0x620] ss:$8 sps:$4 sm:$0xff]  }
  0xb1   : > { %2051 = vmatpush1.bf16.msra.mxu1 %v3164_v28  ;;  %v3254_v28 = vld [vmem:[%s3821_s5 + $0x234] ss:$8 sps:$4 sm:$0xff]  }
  0xb2   : > { %2215 = vmatpush1.bf16.msra.mxu0 %v3167_v29  ;;  %2052 = vmatprep.subr.bf16.mxu1 %v3172_v30  ;;  %v3257_v29 = vld [vmem:[%s3821_s5 + $0x634] ss:$8 sps:$4 sm:$0xff]   ;;  %v3252_v30 = vld [vmem:[%s3821_s5 + $0x230] ss:$8 sps:$4 sm:$0xff]  }
  0xb3   : > { %2216 = vmatprep.subr.bf16.mxu0 %v3175_v31  ;;  %v3255_v31 = vld [vmem:[%s3821_s5 + $0x630] ss:$8 sps:$4 sm:$0xff]  }
  0xb5   : > { %2053 = vmatpush1.bf16.msra.mxu1 %v3170_v33  ;;  %v3263_v33 = vld [vmem:[%s3821_s5 + $0x644] ss:$8 sps:$4 sm:$0xff]  }
  0xb6   : > { %2217 = vmatpush1.bf16.msra.mxu0 %v3173_v34  ;;  %2054 = vmatprep.subr.bf16.mxu1 %v3178_v37  ;;  %v3258_v34 = vld [vmem:[%s3821_s5 + $0x240] ss:$8 sps:$4 sm:$0xff]   ;;  %v3269_v37 = vld [vmem:[%s3821_s5 + $0x654] ss:$8 sps:$4 sm:$0xff]  }
  0xb7   : > { %2218 = vmatprep.subr.bf16.mxu0 %v3181_v39  ;;  %v3267_v39 = vld [vmem:[%s3821_s5 + $0x650] ss:$8 sps:$4 sm:$0xff]  }
  0xb9   : > { %2055 = vmatpush1.bf16.msra.mxu1 %v3176_v40  ;;  %v3272_v40 = vld [vmem:[%s3821_s5 + $0x264] ss:$8 sps:$4 sm:$0xff]  }
  0xba   : > { %2219 = vmatpush1.bf16.msra.mxu0 %v3179_v41  ;;  %2056 = vmatprep.subr.bf16.mxu1 %v3184_v42  ;;  %v3275_v41 = vld [vmem:[%s3821_s5 + $0x664] ss:$8 sps:$4 sm:$0xff]   ;;  %v3270_v42 = vld [vmem:[%s3821_s5 + $0x260] ss:$8 sps:$4 sm:$0xff]  }
  0xbb   : > { %2220 = vmatprep.subr.bf16.mxu0 %v3187_v43  ;;  %v3273_v43 = vld [vmem:[%s3821_s5 + $0x660] ss:$8 sps:$4 sm:$0xff]  }
  0xbd   : > { %2057 = vmatpush1.bf16.msra.mxu1 %v3182_v44  ;;  %v3278_v44 = vld [vmem:[%s3821_s5 + $0x274] ss:$8 sps:$4 sm:$0xff]  }
  0xbe   : > { %2221 = vmatpush1.bf16.msra.mxu0 %v3185_v45  ;;  %2058 = vmatprep.subr.bf16.mxu1 %v3190_v46  ;;  %v3281_v45 = vld [vmem:[%s3821_s5 + $0x674] ss:$8 sps:$4 sm:$0xff]   ;;  %v3276_v46 = vld [vmem:[%s3821_s5 + $0x270] ss:$8 sps:$4 sm:$0xff]  }
  0xbf   : > { %2222 = vmatprep.subr.bf16.mxu0 %v3193_v47  ;;  %v3279_v47 = vld [vmem:[%s3821_s5 + $0x670] ss:$8 sps:$4 sm:$0xff]  }
  0xc1   : > { %2059 = vmatpush1.bf16.msra.mxu1 %v3188_v48  ;;  %v3284_v48 = vld [vmem:[%s3821_s5 + $0x284] ss:$8 sps:$4 sm:$0xff]  }
  0xc2   : > { %2223 = vmatpush1.bf16.msra.mxu0 %v3191_v49  ;;  %2060 = vmatprep.subr.bf16.mxu1 %v3196_v50  ;;  %v3287_v49 = vld [vmem:[%s3821_s5 + $0x684] ss:$8 sps:$4 sm:$0xff]   ;;  %v3282_v50 = vld [vmem:[%s3821_s5 + $0x280] ss:$8 sps:$4 sm:$0xff]  }
  0xc3   : > { %2224 = vmatprep.subr.bf16.mxu0 %v3199_v51  ;;  %v3285_v51 = vld [vmem:[%s3821_s5 + $0x680] ss:$8 sps:$4 sm:$0xff]  }
  0xc5   : > { %2061 = vmatpush1.bf16.msra.mxu1 %v3194_v52  ;;  %v3290_v52 = vld [vmem:[%s3821_s5 + $0x294] ss:$8 sps:$4 sm:$0xff]  }
  0xc6   : > { %2225 = vmatpush1.bf16.msra.mxu0 %v3197_v53  ;;  %2062 = vmatprep.subr.bf16.mxu1 %v3202_v54  ;;  %v3293_v53 = vld [vmem:[%s3821_s5 + $0x694] ss:$8 sps:$4 sm:$0xff]   ;;  %v3288_v54 = vld [vmem:[%s3821_s5 + $0x290] ss:$8 sps:$4 sm:$0xff]  }
  0xc7   : > { %2226 = vmatprep.subr.bf16.mxu0 %v3205_v55  ;;  %v3291_v55 = vld [vmem:[%s3821_s5 + $0x690] ss:$8 sps:$4 sm:$0xff]  }
  0xc9   : > { %2063 = vmatpush1.bf16.msra.mxu1 %v3200_v56  ;;  %v3296_v56 = vld [vmem:[%s3821_s5 + $0x2a4] ss:$8 sps:$4 sm:$0xff]  }
  0xca   : > { %2227 = vmatpush1.bf16.msra.mxu0 %v3203_v57  ;;  %2064 = vmatprep.subr.bf16.mxu1 %v3208_v58  ;;  %v3299_v57 = vld [vmem:[%s3821_s5 + $0x6a4] ss:$8 sps:$4 sm:$0xff]   ;;  %v3294_v58 = vld [vmem:[%s3821_s5 + $0x2a0] ss:$8 sps:$4 sm:$0xff]  }
  0xcb   : > { %2228 = vmatprep.subr.bf16.mxu0 %v3211_v59  ;;  %v3297_v59 = vld [vmem:[%s3821_s5 + $0x6a0] ss:$8 sps:$4 sm:$0xff]  }
  0xcd   : > { %2065 = vmatpush1.bf16.msra.mxu1 %v3206_v60  ;;  %v3302_v60 = vld [vmem:[%s3821_s5 + $0x2b4] ss:$8 sps:$4 sm:$0xff]  }
  0xce   : > { %2229 = vmatpush1.bf16.msra.mxu0 %v3209_v61  ;;  %2066 = vmatprep.subr.bf16.mxu1 %v3214_v62  ;;  %v3305_v61 = vld [vmem:[%s3821_s5 + $0x6b4] ss:$8 sps:$4 sm:$0xff]   ;;  %v3300_v62 = vld [vmem:[%s3821_s5 + $0x2b0] ss:$8 sps:$4 sm:$0xff]  }
  0xcf   : > { %2230 = vmatprep.subr.bf16.mxu0 %v3217_v63  ;;  %v3303_v63 = vld [vmem:[%s3821_s5 + $0x6b0] ss:$8 sps:$4 sm:$0xff]  }
  0xd1   : > { %2067 = vmatpush1.bf16.msra.mxu1 %v3212_v0  ;;  %v3308_v0 = vld [vmem:[%s3821_s5 + $0x2c4] ss:$8 sps:$4 sm:$0xff]  }
  0xd2   : > { %2231 = vmatpush1.bf16.msra.mxu0 %v3215_v1  ;;  %2068 = vmatprep.subr.bf16.mxu1 %v3220_v2  ;;  %v3311_v1 = vld [vmem:[%s3821_s5 + $0x6c4] ss:$8 sps:$4 sm:$0xff]   ;;  %v3306_v2 = vld [vmem:[%s3821_s5 + $0x2c0] ss:$8 sps:$4 sm:$0xff]  }
  0xd3   : > { %2232 = vmatprep.subr.bf16.mxu0 %v3223_v3  ;;  %v3309_v3 = vld [vmem:[%s3821_s5 + $0x6c0] ss:$8 sps:$4 sm:$0xff]  }
  0xd5   : > { %2069 = vmatpush1.bf16.msra.mxu1 %v3218_v4  ;;  %v3314_v4 = vld [vmem:[%s3821_s5 + $0x2d4] ss:$8 sps:$4 sm:$0xff]  }
  0xd6   : > { %2233 = vmatpush1.bf16.msra.mxu0 %v3221_v5  ;;  %2070 = vmatprep.subr.bf16.mxu1 %v3226_v6  ;;  %v3317_v5 = vld [vmem:[%s3821_s5 + $0x6d4] ss:$8 sps:$4 sm:$0xff]   ;;  %v3312_v6 = vld [vmem:[%s3821_s5 + $0x2d0] ss:$8 sps:$4 sm:$0xff]  }
  0xd7   : > { %2234 = vmatprep.subr.bf16.mxu0 %v3229_v7  ;;  %v3315_v7 = vld [vmem:[%s3821_s5 + $0x6d0] ss:$8 sps:$4 sm:$0xff]  }
  0xd9   : > { %2071 = vmatpush1.bf16.msra.mxu1 %v3224_v8  ;;  %v3320_v8 = vld [vmem:[%s3821_s5 + $0x2e4] ss:$8 sps:$4 sm:$0xff]  }
  0xda   : > { %2235 = vmatpush1.bf16.msra.mxu0 %v3227_v9  ;;  %2081 = vmatprep.subr.bf16.mxu1 %v3234_v10  ;;  %v3323_v9 = vld [vmem:[%s3821_s5 + $0x6e4] ss:$8 sps:$4 sm:$0xff]   ;;  %v3318_v10 = vld [vmem:[%s3821_s5 + $0x2e0] ss:$8 sps:$4 sm:$0xff]  }
  0xdb   : > { %2245 = vmatprep.subr.bf16.mxu0 %v3239_v11  ;;  %v3321_v11 = vld [vmem:[%s3821_s5 + $0x6e0] ss:$8 sps:$4 sm:$0xff]  }
  0xdc   : > { %2073 = vmatmul.mubr.bf16.vlgmr.msra.gmra.mrb[0].mxu1 %v2613_v12  ;;  %v3326_v12 = vld [vmem:[%s3821_s5 + $0x2f4] ss:$8 sps:$4 sm:$0xff]  }
  0xdd   : > { %2237 = vmatmul.mubr.bf16.vlgmr.msra.gmra.mrb[0].mxu0 %v2621_v14  ;;  %2082 = vmatpush1.bf16.msra.mxu1 %v3232_v13  ;;  %v3329_v13 = vld [vmem:[%s3821_s5 + $0x6f4] ss:$8 sps:$4 sm:$0xff]   ;;  %v3324_v14 = vld [vmem:[%s3821_s5 + $0x2f0] ss:$8 sps:$4 sm:$0xff]  }
  0xde   : > { %2246 = vmatpush1.bf16.msra.mxu0 %v3237_v15  ;;  %2083 = vmatprep.subr.bf16.mxu1 %v3242_v16  ;;  %v3327_v15 = vld [vmem:[%s3821_s5 + $0x6f0] ss:$8 sps:$4 sm:$0xff]   ;;  %v3334_v16 = vld [vmem:[%s3821_s5 + $0x304] ss:$8 sps:$4 sm:$0xff]  }
  0xdf   : > { %2247 = vmatprep.subr.bf16.mxu0 %v3245_v17  ;;  %2113 = vmatprep.mubr.bf16.mxu1 %v2616_v19  ;;  %v3339_v17 = vld [vmem:[%s3821_s5 + $0x704] ss:$8 sps:$4 sm:$0xff]   ;;  %v3332_v19 = vld [vmem:[%s3821_s5 + $0x300] ss:$8 sps:$4 sm:$0xff]  }
  0xe0   : > { %2277 = vmatprep.mubr.bf16.mxu0 %v2624_v23  ;;  %v2623_v23 = vcombine.low %v3977_v20, %v3977_v20 }
  0xe1   : > { %2084 = vmatpush1.bf16.msra.mxu1 %v3240_v21  ;;  %v3337_v21 = vld [vmem:[%s3821_s5 + $0x700] ss:$8 sps:$4 sm:$0xff]  }
  0xe2   : > { %2248 = vmatpush1.bf16.msra.mxu0 %v3243_v22  ;;  %2085 = vmatprep.subr.bf16.mxu1 %v3248_v24  ;;  %v2615_v22 = vcombine.low %v3973_v18, %v3973_v18  ;;  %v4047_v24 = vld [vmem:[#allocation2 + $0x18] sm:$0xff] }
  0xe3   : > { %2249 = vmatprep.subr.bf16.mxu0 %v3251_v25  ;;  %v4049_v25 = vld [vmem:[#allocation2 + $0x38] sm:$0xff]  ;;  %v2618_v18 = vcombine.high %v4047_v24, %v4047_v24 }
  0xe4   : > { %v2626_v20 = vcombine.high %v4049_v25, %v4049_v25 }
  0xe5   : > { %2086 = vmatpush1.bf16.msra.mxu1 %v3246_v26  ;;  %v3342_v26 = vld [vmem:[%s3821_s5 + $0x314] ss:$8 sps:$4 sm:$0xff]  }
  0xe6   : > { %2250 = vmatpush1.bf16.msra.mxu0 %v3249_v27  ;;  %2087 = vmatprep.subr.bf16.mxu1 %v3254_v28  ;;  %v3345_v27 = vld [vmem:[%s3821_s5 + $0x714] ss:$8 sps:$4 sm:$0xff]   ;;  %v3340_v28 = vld [vmem:[%s3821_s5 + $0x310] ss:$8 sps:$4 sm:$0xff]  }
  0xe7   : > { %2251 = vmatprep.subr.bf16.mxu0 %v3257_v29  ;;  %v3343_v29 = vld [vmem:[%s3821_s5 + $0x710] ss:$8 sps:$4 sm:$0xff]  }
  0xe9   : > { %2088 = vmatpush1.bf16.msra.mxu1 %v3252_v30  ;;  %v3348_v30 = vld [vmem:[%s3821_s5 + $0x324] ss:$8 sps:$4 sm:$0xff]  }
  0xea   : > { %2252 = vmatpush1.bf16.msra.mxu0 %v3255_v31  ;;  %2089 = vmatprep.subr.bf16.mxu1 %v3260_v32  ;;  %v3351_v31 = vld [vmem:[%s3821_s5 + $0x724] ss:$8 sps:$4 sm:$0xff]   ;;  %v3346_v32 = vld [vmem:[%s3821_s5 + $0x320] ss:$8 sps:$4 sm:$0xff]  }
  0xeb   : > { %2253 = vmatprep.subr.bf16.mxu0 %v3263_v33  ;;  %v3349_v33 = vld [vmem:[%s3821_s5 + $0x720] ss:$8 sps:$4 sm:$0xff]  }
  0xed   : > { %2090 = vmatpush1.bf16.msra.mxu1 %v3258_v34  ;;  %v3354_v34 = vld [vmem:[%s3821_s5 + $0x334] ss:$8 sps:$4 sm:$0xff]  }
  0xee   : > { %2254 = vmatpush1.bf16.msra.mxu0 %v3261_v35  ;;  %2091 = vmatprep.subr.bf16.mxu1 %v3266_v36  ;;  %v3357_v35 = vld [vmem:[%s3821_s5 + $0x734] ss:$8 sps:$4 sm:$0xff]   ;;  %v3352_v36 = vld [vmem:[%s3821_s5 + $0x330] ss:$8 sps:$4 sm:$0xff]  }
  0xef   : > { %2255 = vmatprep.subr.bf16.mxu0 %v3269_v37  ;;  %v3355_v37 = vld [vmem:[%s3821_s5 + $0x730] ss:$8 sps:$4 sm:$0xff]  }
  0xf1   : > { %2092 = vmatpush1.bf16.msra.mxu1 %v3264_v38  ;;  %v3360_v38 = vld [vmem:[%s3821_s5 + $0x344] ss:$8 sps:$4 sm:$0xff]  }
  0xf2   : > { %2256 = vmatpush1.bf16.msra.mxu0 %v3267_v39  ;;  %2093 = vmatprep.subr.bf16.mxu1 %v3272_v40  ;;  %v3363_v39 = vld [vmem:[%s3821_s5 + $0x744] ss:$8 sps:$4 sm:$0xff]   ;;  %v3358_v40 = vld [vmem:[%s3821_s5 + $0x340] ss:$8 sps:$4 sm:$0xff]  }
  0xf3   : > { %2257 = vmatprep.subr.bf16.mxu0 %v3275_v41  ;;  %v3361_v41 = vld [vmem:[%s3821_s5 + $0x740] ss:$8 sps:$4 sm:$0xff]  }
  0xf5   : > { %2094 = vmatpush1.bf16.msra.mxu1 %v3270_v42  ;;  %v3366_v42 = vld [vmem:[%s3821_s5 + $0x354] ss:$8 sps:$4 sm:$0xff]  }
  0xf6   : > { %2258 = vmatpush1.bf16.msra.mxu0 %v3273_v43  ;;  %2095 = vmatprep.subr.bf16.mxu1 %v3278_v44  ;;  %v3369_v43 = vld [vmem:[%s3821_s5 + $0x754] ss:$8 sps:$4 sm:$0xff]   ;;  %v3364_v44 = vld [vmem:[%s3821_s5 + $0x350] ss:$8 sps:$4 sm:$0xff]  }
  0xf7   : > { %2259 = vmatprep.subr.bf16.mxu0 %v3281_v45  ;;  %v3367_v45 = vld [vmem:[%s3821_s5 + $0x750] ss:$8 sps:$4 sm:$0xff]  }
  0xf9   : > { %2096 = vmatpush1.bf16.msra.mxu1 %v3276_v46  ;;  %v3372_v46 = vld [vmem:[%s3821_s5 + $0x364] ss:$8 sps:$4 sm:$0xff]  }
  0xfa   : > { %2260 = vmatpush1.bf16.msra.mxu0 %v3279_v47  ;;  %2097 = vmatprep.subr.bf16.mxu1 %v3284_v48  ;;  %v3375_v47 = vld [vmem:[%s3821_s5 + $0x764] ss:$8 sps:$4 sm:$0xff]   ;;  %v3370_v48 = vld [vmem:[%s3821_s5 + $0x360] ss:$8 sps:$4 sm:$0xff]  }
  0xfb   : > { %2261 = vmatprep.subr.bf16.mxu0 %v3287_v49  ;;  %v3373_v49 = vld [vmem:[%s3821_s5 + $0x760] ss:$8 sps:$4 sm:$0xff]  }
  0xfd   : > { %2098 = vmatpush1.bf16.msra.mxu1 %v3282_v50  ;;  %v3378_v50 = vld [vmem:[%s3821_s5 + $0x374] ss:$8 sps:$4 sm:$0xff]  }
  0xfe   : > { %2262 = vmatpush1.bf16.msra.mxu0 %v3285_v51  ;;  %2099 = vmatprep.subr.bf16.mxu1 %v3290_v52  ;;  %v3381_v51 = vld [vmem:[%s3821_s5 + $0x774] ss:$8 sps:$4 sm:$0xff]   ;;  %v3376_v52 = vld [vmem:[%s3821_s5 + $0x370] ss:$8 sps:$4 sm:$0xff]  }
  0xff   : > { %2263 = vmatprep.subr.bf16.mxu0 %v3293_v53  ;;  %v3379_v53 = vld [vmem:[%s3821_s5 + $0x770] ss:$8 sps:$4 sm:$0xff]  }
 0x101   : > { %2100 = vmatpush1.bf16.msra.mxu1 %v3288_v54  ;;  %v3384_v54 = vld [vmem:[%s3821_s5 + $0x384] ss:$8 sps:$4 sm:$0xff]  }
 0x102   : > { %2264 = vmatpush1.bf16.msra.mxu0 %v3291_v55  ;;  %2101 = vmatprep.subr.bf16.mxu1 %v3296_v56  ;;  %v3387_v55 = vld [vmem:[%s3821_s5 + $0x784] ss:$8 sps:$4 sm:$0xff]   ;;  %v3382_v56 = vld [vmem:[%s3821_s5 + $0x380] ss:$8 sps:$4 sm:$0xff]  }
 0x103   : > { %2265 = vmatprep.subr.bf16.mxu0 %v3299_v57  ;;  %v3385_v57 = vld [vmem:[%s3821_s5 + $0x780] ss:$8 sps:$4 sm:$0xff]  }
 0x105   : > { %2102 = vmatpush1.bf16.msra.mxu1 %v3294_v58  ;;  %v3390_v58 = vld [vmem:[%s3821_s5 + $0x394] ss:$8 sps:$4 sm:$0xff]  }
 0x106   : > { %2266 = vmatpush1.bf16.msra.mxu0 %v3297_v59  ;;  %2103 = vmatprep.subr.bf16.mxu1 %v3302_v60  ;;  %v3393_v59 = vld [vmem:[%s3821_s5 + $0x794] ss:$8 sps:$4 sm:$0xff]   ;;  %v3388_v60 = vld [vmem:[%s3821_s5 + $0x390] ss:$8 sps:$4 sm:$0xff]  }
 0x107   : > { %2267 = vmatprep.subr.bf16.mxu0 %v3305_v61  ;;  %v3391_v61 = vld [vmem:[%s3821_s5 + $0x790] ss:$8 sps:$4 sm:$0xff]  }
 0x109   : > { %2104 = vmatpush1.bf16.msra.mxu1 %v3300_v62  ;;  %v3396_v62 = vld [vmem:[%s3821_s5 + $0x3a4] ss:$8 sps:$4 sm:$0xff]  }
 0x10a   : > { %2268 = vmatpush1.bf16.msra.mxu0 %v3303_v63  ;;  %2105 = vmatprep.subr.bf16.mxu1 %v3308_v0  ;;  %v3399_v63 = vld [vmem:[%s3821_s5 + $0x7a4] ss:$8 sps:$4 sm:$0xff]   ;;  %v3394_v0 = vld [vmem:[%s3821_s5 + $0x3a0] ss:$8 sps:$4 sm:$0xff]  }
 0x10b   : > { %2269 = vmatprep.subr.bf16.mxu0 %v3311_v1  ;;  %v3397_v1 = vld [vmem:[%s3821_s5 + $0x7a0] ss:$8 sps:$4 sm:$0xff]  }
 0x10d   : > { %2106 = vmatpush1.bf16.msra.mxu1 %v3306_v2  ;;  %v3402_v2 = vld [vmem:[%s3821_s5 + $0x3b4] ss:$8 sps:$4 sm:$0xff]  }
 0x10e   : > { %2270 = vmatpush1.bf16.msra.mxu0 %v3309_v3  ;;  %2107 = vmatprep.subr.bf16.mxu1 %v3314_v4  ;;  %v3405_v3 = vld [vmem:[%s3821_s5 + $0x7b4] ss:$8 sps:$4 sm:$0xff]   ;;  %v3400_v4 = vld [vmem:[%s3821_s5 + $0x3b0] ss:$8 sps:$4 sm:$0xff]  }
 0x10f   : > { %2271 = vmatprep.subr.bf16.mxu0 %v3317_v5  ;;  %v3403_v5 = vld [vmem:[%s3821_s5 + $0x7b0] ss:$8 sps:$4 sm:$0xff]  }
 0x111   : > { %2108 = vmatpush1.bf16.msra.mxu1 %v3312_v6  ;;  %v3408_v6 = vld [vmem:[%s3821_s5 + $0x3c4] ss:$8 sps:$4 sm:$0xff]  }
 0x112   : > { %2272 = vmatpush1.bf16.msra.mxu0 %v3315_v7  ;;  %2109 = vmatprep.subr.bf16.mxu1 %v3320_v8  ;;  %v3411_v7 = vld [vmem:[%s3821_s5 + $0x7c4] ss:$8 sps:$4 sm:$0xff]   ;;  %v3406_v8 = vld [vmem:[%s3821_s5 + $0x3c0] ss:$8 sps:$4 sm:$0xff]  }
 0x113   : > { %2273 = vmatprep.subr.bf16.mxu0 %v3323_v9  ;;  %v3409_v9 = vld [vmem:[%s3821_s5 + $0x7c0] ss:$8 sps:$4 sm:$0xff]  }
 0x115   : > { %2110 = vmatpush1.bf16.msra.mxu1 %v3318_v10  ;;  %v3414_v10 = vld [vmem:[%s3821_s5 + $0x3d4] ss:$8 sps:$4 sm:$0xff]  }
 0x116   : > { %2274 = vmatpush1.bf16.msra.mxu0 %v3321_v11  ;;  %2111 = vmatprep.subr.bf16.mxu1 %v3326_v12  ;;  %v3417_v11 = vld [vmem:[%s3821_s5 + $0x7d4] ss:$8 sps:$4 sm:$0xff]   ;;  %v3412_v12 = vld [vmem:[%s3821_s5 + $0x3d0] ss:$8 sps:$4 sm:$0xff]  }
 0x117   : > { %2275 = vmatprep.subr.bf16.mxu0 %v3329_v13  ;;  %v3415_v13 = vld [vmem:[%s3821_s5 + $0x7d0] ss:$8 sps:$4 sm:$0xff]  }
 0x119   : > { %2112 = vmatpush1.bf16.msra.mxu1 %v3324_v14  ;;  %v3420_v14 = vld [vmem:[%s3821_s5 + $0x3e4] ss:$8 sps:$4 sm:$0xff]  }
 0x11a   : > { %2276 = vmatpush1.bf16.msra.mxu0 %v3327_v15  ;;  %2122 = vmatprep.subr.bf16.mxu1 %v3334_v16  ;;  %v3423_v15 = vld [vmem:[%s3821_s5 + $0x7e4] ss:$8 sps:$4 sm:$0xff]   ;;  %v3418_v16 = vld [vmem:[%s3821_s5 + $0x3e0] ss:$8 sps:$4 sm:$0xff]  }
 0x11b   : > { %2286 = vmatprep.subr.bf16.mxu0 %v3339_v17  ;;  %v3421_v17 = vld [vmem:[%s3821_s5 + $0x7e0] ss:$8 sps:$4 sm:$0xff]  }
 0x11c   : > { %2114 = vmatmul.mubr.bf16.vlgmr.msra.gmra.mrb[0].mxu1 %v2615_v22  ;;  %v3424_v22 = vld [vmem:[%s3821_s5 + $0x3f0] ss:$8 sps:$4 sm:$0xff]  }
 0x11d   : > { %2278 = vmatmul.mubr.bf16.vlgmr.msra.gmra.mrb[0].mxu0 %v2623_v23  ;;  %2123 = vmatpush1.bf16.msra.mxu1 %v3332_v19  ;;  %v3426_v19 = vld [vmem:[%s3821_s5 + $0x3f4] ss:$8 sps:$4 sm:$0xff]   ;;  %v3427_v23 = vld [vmem:[%s3821_s5 + $0x7f0] ss:$8 sps:$4 sm:$0xff]  }
 0x11e   : > { %2287 = vmatpush1.bf16.msra.mxu0 %v3337_v21  ;;  %2124 = vmatprep.subr.bf16.mxu1 %v3342_v26  ;;  %v3429_v21 = vld [vmem:[%s3821_s5 + $0x7f4] ss:$8 sps:$4 sm:$0xff]   ;;  %v3436_v26 = vld [vmem:[%s3821_s5 + $0x804] ss:$8 sps:$4 sm:$0xff]  }
 0x11f   : > { %2288 = vmatprep.subr.bf16.mxu0 %v3345_v27  ;;  %2154 = vmatprep.mubr.bf16.mxu1 %v2618_v18  ;;  %v4116_v27 = vld [vmem:[#allocation2 + $0x40] sm:$0xff]  ;;  %v2617_v18 = vcombine.low %v4047_v24, %v4047_v24 }
 0x120   : > { %2318 = vmatprep.mubr.bf16.mxu0 %v2626_v20  ;;  %v2625_v20 = vcombine.low %v4049_v25, %v4049_v25  ;;  %v3437_v24 = vld [vmem:[%s3821_s5 + $0x810] ss:$8 sps:$4 sm:$0xff]   ;;  %v3442_v25 = vld [vmem:[%s3821_s5 + $0x824] ss:$8 sps:$4 sm:$0xff]  }
 0x121   : > { %2125 = vmatpush1.bf16.msra.mxu1 %v3340_v28  ;;  %v3434_v28 = vld [vmem:[%s3821_s5 + $0x800] ss:$8 sps:$4 sm:$0xff]  }
 0x122   : > { %2289 = vmatpush1.bf16.msra.mxu0 %v3343_v29  ;;  %2126 = vmatprep.subr.bf16.mxu1 %v3348_v30  ;;  %v2628_v29 = vcombine.high %v4116_v27, %v4116_v27  ;;  %v3439_v30 = vld [vmem:[%s3821_s5 + $0x814] ss:$8 sps:$4 sm:$0xff]  }
 0x123   : > { %2290 = vmatprep.subr.bf16.mxu0 %v3351_v31  ;;  %v3440_v31 = vld [vmem:[%s3821_s5 + $0x820] ss:$8 sps:$4 sm:$0xff]  }
 0x125   : > { %2127 = vmatpush1.bf16.msra.mxu1 %v3346_v32  ;;  %v3445_v32 = vld [vmem:[%s3821_s5 + $0x834] ss:$8 sps:$4 sm:$0xff]  }
 0x126   : > { %2291 = vmatpush1.bf16.msra.mxu0 %v3349_v33  ;;  %2128 = vmatprep.subr.bf16.mxu1 %v3354_v34  ;;  %v3443_v33 = vld [vmem:[%s3821_s5 + $0x830] ss:$8 sps:$4 sm:$0xff]   ;;  %v3448_v34 = vld [vmem:[%s3821_s5 + $0x844] ss:$8 sps:$4 sm:$0xff]  }
 0x127   : > { %2292 = vmatprep.subr.bf16.mxu0 %v3357_v35  ;;  %v3446_v35 = vld [vmem:[%s3821_s5 + $0x840] ss:$8 sps:$4 sm:$0xff]  }
 0x129   : > { %2129 = vmatpush1.bf16.msra.mxu1 %v3352_v36  ;;  %v3451_v36 = vld [vmem:[%s3821_s5 + $0x854] ss:$8 sps:$4 sm:$0xff]  }
 0x12a   : > { %2293 = vmatpush1.bf16.msra.mxu0 %v3355_v37  ;;  %2130 = vmatprep.subr.bf16.mxu1 %v3360_v38  ;;  %v3449_v37 = vld [vmem:[%s3821_s5 + $0x850] ss:$8 sps:$4 sm:$0xff]   ;;  %v3454_v38 = vld [vmem:[%s3821_s5 + $0x864] ss:$8 sps:$4 sm:$0xff]  }
 0x12b   : > { %2294 = vmatprep.subr.bf16.mxu0 %v3363_v39  ;;  %v3452_v39 = vld [vmem:[%s3821_s5 + $0x860] ss:$8 sps:$4 sm:$0xff]  }
 0x12d   : > { %2131 = vmatpush1.bf16.msra.mxu1 %v3358_v40  ;;  %v3457_v40 = vld [vmem:[%s3821_s5 + $0x874] ss:$8 sps:$4 sm:$0xff]  }
 0x12e   : > { %2295 = vmatpush1.bf16.msra.mxu0 %v3361_v41  ;;  %2132 = vmatprep.subr.bf16.mxu1 %v3366_v42  ;;  %v3455_v41 = vld [vmem:[%s3821_s5 + $0x870] ss:$8 sps:$4 sm:$0xff]   ;;  %v3460_v42 = vld [vmem:[%s3821_s5 + $0x884] ss:$8 sps:$4 sm:$0xff]  }
 0x12f   : > { %2296 = vmatprep.subr.bf16.mxu0 %v3369_v43  ;;  %v3458_v43 = vld [vmem:[%s3821_s5 + $0x880] ss:$8 sps:$4 sm:$0xff]  }
 0x131   : > { %2133 = vmatpush1.bf16.msra.mxu1 %v3364_v44  ;;  %v3463_v44 = vld [vmem:[%s3821_s5 + $0x894] ss:$8 sps:$4 sm:$0xff]  }
 0x132   : > { %2297 = vmatpush1.bf16.msra.mxu0 %v3367_v45  ;;  %2134 = vmatprep.subr.bf16.mxu1 %v3372_v46  ;;  %v3461_v45 = vld [vmem:[%s3821_s5 + $0x890] ss:$8 sps:$4 sm:$0xff]   ;;  %v3466_v46 = vld [vmem:[%s3821_s5 + $0x8a4] ss:$8 sps:$4 sm:$0xff]  }
 0x133   : > { %2298 = vmatprep.subr.bf16.mxu0 %v3375_v47  ;;  %v3464_v47 = vld [vmem:[%s3821_s5 + $0x8a0] ss:$8 sps:$4 sm:$0xff]  }
 0x135   : > { %2135 = vmatpush1.bf16.msra.mxu1 %v3370_v48  ;;  %v3469_v48 = vld [vmem:[%s3821_s5 + $0x8b4] ss:$8 sps:$4 sm:$0xff]  }
 0x136   : > { %2299 = vmatpush1.bf16.msra.mxu0 %v3373_v49  ;;  %2136 = vmatprep.subr.bf16.mxu1 %v3378_v50  ;;  %v3467_v49 = vld [vmem:[%s3821_s5 + $0x8b0] ss:$8 sps:$4 sm:$0xff]   ;;  %v3472_v50 = vld [vmem:[%s3821_s5 + $0x8c4] ss:$8 sps:$4 sm:$0xff]  }
 0x137   : > { %2300 = vmatprep.subr.bf16.mxu0 %v3381_v51  ;;  %v3470_v51 = vld [vmem:[%s3821_s5 + $0x8c0] ss:$8 sps:$4 sm:$0xff]  }
 0x139   : > { %2137 = vmatpush1.bf16.msra.mxu1 %v3376_v52  ;;  %v3475_v52 = vld [vmem:[%s3821_s5 + $0x8d4] ss:$8 sps:$4 sm:$0xff]  }
 0x13a   : > { %2301 = vmatpush1.bf16.msra.mxu0 %v3379_v53  ;;  %2138 = vmatprep.subr.bf16.mxu1 %v3384_v54  ;;  %v3473_v53 = vld [vmem:[%s3821_s5 + $0x8d0] ss:$8 sps:$4 sm:$0xff]   ;;  %v3478_v54 = vld [vmem:[%s3821_s5 + $0x8e4] ss:$8 sps:$4 sm:$0xff]  }
 0x13b   : > { %2302 = vmatprep.subr.bf16.mxu0 %v3387_v55  ;;  %v3476_v55 = vld [vmem:[%s3821_s5 + $0x8e0] ss:$8 sps:$4 sm:$0xff]  }
 0x13d   : > { %2139 = vmatpush1.bf16.msra.mxu1 %v3382_v56  ;;  %v3481_v56 = vld [vmem:[%s3821_s5 + $0x8f4] ss:$8 sps:$4 sm:$0xff]  }
 0x13e   : > { %2303 = vmatpush1.bf16.msra.mxu0 %v3385_v57  ;;  %2140 = vmatprep.subr.bf16.mxu1 %v3390_v58  ;;  %v3479_v57 = vld [vmem:[%s3821_s5 + $0x8f0] ss:$8 sps:$4 sm:$0xff]   ;;  %v2627_v58 = vcombine.low %v4116_v27, %v4116_v27 }
 0x13f   : > { %2304 = vmatprep.subr.bf16.mxu0 %v3393_v59 }
 0x141   : > { %2141 = vmatpush1.bf16.msra.mxu1 %v3388_v60 }
 0x142   : > { %2305 = vmatpush1.bf16.msra.mxu0 %v3391_v61  ;;  %2142 = vmatprep.subr.bf16.mxu1 %v3396_v62 }
 0x143   : > { %2306 = vmatprep.subr.bf16.mxu0 %v3399_v63 }
 0x145   : > { %2143 = vmatpush1.bf16.msra.mxu1 %v3394_v0 }
 0x146   : > { %2307 = vmatpush1.bf16.msra.mxu0 %v3397_v1  ;;  %2144 = vmatprep.subr.bf16.mxu1 %v3402_v2 }
 0x147   : > { %2308 = vmatprep.subr.bf16.mxu0 %v3405_v3 }
 0x149   : > { %2145 = vmatpush1.bf16.msra.mxu1 %v3400_v4 }
 0x14a   : > { %2309 = vmatpush1.bf16.msra.mxu0 %v3403_v5  ;;  %2146 = vmatprep.subr.bf16.mxu1 %v3408_v6 }
 0x14b   : > { %2310 = vmatprep.subr.bf16.mxu0 %v3411_v7 }
 0x14d   : > { %2147 = vmatpush1.bf16.msra.mxu1 %v3406_v8 }
 0x14e   : > { %2311 = vmatpush1.bf16.msra.mxu0 %v3409_v9  ;;  %2148 = vmatprep.subr.bf16.mxu1 %v3414_v10 }
 0x14f   : > { %2312 = vmatprep.subr.bf16.mxu0 %v3417_v11 }
 0x151   : > { %2149 = vmatpush1.bf16.msra.mxu1 %v3412_v12 }
 0x152   : > { %2313 = vmatpush1.bf16.msra.mxu0 %v3415_v13  ;;  %2150 = vmatprep.subr.bf16.mxu1 %v3420_v14 }
 0x153   : > { %2314 = vmatprep.subr.bf16.mxu0 %v3423_v15 }
 0x155   : > { %2151 = vmatpush1.bf16.msra.mxu1 %v3418_v16 }
 0x156   : > { %2315 = vmatpush1.bf16.msra.mxu0 %v3421_v17  ;;  %2152 = vmatprep.subr.bf16.mxu1 %v3426_v19 }
 0x157   : > { %2316 = vmatprep.subr.bf16.mxu0 %v3429_v21 }
 0x159   : > { %2153 = vmatpush1.bf16.msra.mxu1 %v3424_v22 }
 0x15a   : > { %2317 = vmatpush1.bf16.msra.mxu0 %v3427_v23 }
 0x15b   : > { %2327 = vmatprep.subr.bf16.mxu0 %v3436_v26 }
 0x15c   : > { %2155 = vmatmul.mubr.bf16.vlgmr.msra.gmra.mrb[0].mxu1 %v2617_v18 }
 0x15d   : > { %2319 = vmatmul.mubr.bf16.vlgmr.msra.gmra.mrb[0].mxu0 %v2625_v20 }
 0x15e   : > { %2328 = vmatpush1.bf16.msra.mxu0 %v3434_v28  ;;  %2359 = vmatprep.mubr.bf16.mxu0 %v2628_v29 }
 0x15f   : > { %2329 = vmatprep.subr.bf16.mxu0 %v3439_v30 }
 0x162   : > { %2330 = vmatpush1.bf16.msra.mxu0 %v3437_v24 }
 0x163   : > { %2331 = vmatprep.subr.bf16.mxu0 %v3442_v25 }
 0x166   : > { %2332 = vmatpush1.bf16.msra.mxu0 %v3440_v31 }
 0x167   : > { %2333 = vmatprep.subr.bf16.mxu0 %v3445_v32 }
 0x16a   : > { %2334 = vmatpush1.bf16.msra.mxu0 %v3443_v33 }
 0x16b   : > { %2335 = vmatprep.subr.bf16.mxu0 %v3448_v34 }
 0x16e   : > { %2336 = vmatpush1.bf16.msra.mxu0 %v3446_v35 }
 0x16f   : > { %2337 = vmatprep.subr.bf16.mxu0 %v3451_v36 }
 0x172   : > { %2338 = vmatpush1.bf16.msra.mxu0 %v3449_v37 }
 0x173   : > { %2339 = vmatprep.subr.bf16.mxu0 %v3454_v38 }
 0x176   : > { %2340 = vmatpush1.bf16.msra.mxu0 %v3452_v39 }
 0x177   : > { %2341 = vmatprep.subr.bf16.mxu0 %v3457_v40 }
 0x17a   : > { %2342 = vmatpush1.bf16.msra.mxu0 %v3455_v41 }
 0x17b   : > { %2343 = vmatprep.subr.bf16.mxu0 %v3460_v42 }
 0x17e   : > { %2344 = vmatpush1.bf16.msra.mxu0 %v3458_v43 }
 0x17f   : > { %2345 = vmatprep.subr.bf16.mxu0 %v3463_v44 }
 0x182   : > { %2346 = vmatpush1.bf16.msra.mxu0 %v3461_v45 }
 0x183   : > { %2347 = vmatprep.subr.bf16.mxu0 %v3466_v46 }
 0x186   : > { %2348 = vmatpush1.bf16.msra.mxu0 %v3464_v47 }
 0x187   : > { %2349 = vmatprep.subr.bf16.mxu0 %v3469_v48 }
 0x18a   : > { %2350 = vmatpush1.bf16.msra.mxu0 %v3467_v49 }
 0x18b   : > { %2351 = vmatprep.subr.bf16.mxu0 %v3472_v50 }
 0x18e   : > { %2352 = vmatpush1.bf16.msra.mxu0 %v3470_v51 }
 0x18f   : > { %2353 = vmatprep.subr.bf16.mxu0 %v3475_v52 }
 0x192   : > { %2354 = vmatpush1.bf16.msra.mxu0 %v3473_v53 }
 0x193   : > { %2355 = vmatprep.subr.bf16.mxu0 %v3478_v54 }
 0x196   : > { %2356 = vmatpush1.bf16.msra.mxu0 %v3476_v55 }
 0x197   : > { %2357 = vmatprep.subr.bf16.mxu0 %v3481_v56 }
 0x19a   : > { %2358 = vmatpush1.bf16.msra.mxu0 %v3479_v57 }
 0x19d   : > { %2360 = vmatmul.mubr.bf16.vlgmr.msra.gmra.mrb[0].mxu0 %v2627_v58 }
 0x22f   : > { %v2156_v59 = vpop.f32.mrb[0].mxu1 }
 0x230   : > { %v2158_v60 = vpop.f32.mrb[1].mxu1 }
 0x231   : > { %v2160_v61 = vpop.f32.mrb[2].mxu1 }
 0x232   : > { %v2161_v62 = vpop.f32.mrb[3].mxu1 }
 0x270   : > { %v2361_v63 = vpop.f32.mrb[0].mxu0 }
 0x271   : > { %v2926_v0 = vadd.f32 %v2361_v63, %v2156_v59  ;;  %v2363_v1 = vpop.f32.mrb[1].mxu0 }
 0x272   : > { %v2927_v2 = vadd.f32 %v2363_v1, %v2158_v60  ;;  %v2365_v3 = vpop.f32.mrb[2].mxu0 }
 0x273   : > { %v2369_v4 = vsel %vm2368_vm0, %v2926_v0, 0.0  ;;  %v2420_v5 = vrot.slane %v2926_v0, 4  ;;  %v2366_v6 = vpop.f32.mrb[3].mxu0 }
 0x274   : > { %v2370_v7 = vrot.slane %v2369_v4, 4  ;;  %v2376_v8 = vsel %vm2368_vm0, %v2927_v2, 0.0  ;;  %v2421_v9 = vrot.slane %v2927_v2, 4 }
 0x275   : > { %v2424_v10 = vsel %vm2368_vm0, %v2420_v5, 0.0  ;;  %v2377_v11 = vrot.slane %v2376_v8, 4 }
 0x276   : > { %v2371_v12 = vadd.f32 %v2370_v7, %v2369_v4  ;;  %v2425_v13 = vrot.slane %v2424_v10, 4  ;;  %v2431_v14 = vsel %vm2368_vm0, %v2421_v9, 0.0 }
 0x277   : > { %v2378_v15 = vadd.f32 %v2377_v11, %v2376_v8  ;;  %v2432_v16 = vrot.slane %v2431_v14, 4 }
 0x278   : > { %v2372_v17 = vrot.slane %v2371_v12, 2  ;;  %v2426_v19 = vadd.f32 %v2425_v13, %v2424_v10 }
 0x279   : > { %v2379_v21 = vrot.slane %v2378_v15, 2  ;;  %v2433_v22 = vadd.f32 %v2432_v16, %v2431_v14 }
 0x27a   : > { %v2373_v23 = vadd.f32 %v2372_v17, %v2371_v12  ;;  %v2427_v26 = vrot.slane %v2426_v19, 2 }
 0x27b   : > { %v2380_v27 = vadd.f32 %v2379_v21, %v2378_v15  ;;  %v2434_v18 = vrot.slane %v2433_v22, 2 }
 0x27c   : > { %v2374_v20 = vrot.slane %v2373_v23, 1  ;;  %v2428_v28 = vadd.f32 %v2427_v26, %v2426_v19 }
 0x27d   : > { %v2381_v29 = vrot.slane %v2380_v27, 1  ;;  %v2435_v30 = vadd.f32 %v2434_v18, %v2433_v22 }
 0x27e   : > { %v2375_v24 = vadd.f32 %v2374_v20, %v2373_v23  ;;  %v2429_v25 = vrot.slane %v2428_v28, 1 }
 0x27f   : > { %v2382_v31 = vadd.f32 %v2381_v29, %v2380_v27  ;;  %v2436_v32 = vrot.slane %v2435_v30, 1 }
 0x280   : > { %v2384_v33 = vmul.f32 0.25, %v2375_v24  ;;  %v2430_v34 = vadd.f32 %v2429_v25, %v2428_v28 }
 0x281   : > { %v2385_v35 = vmul.f32 0.25, %v2382_v31  ;;  %v2437_v36 = vadd.f32 %v2436_v32, %v2435_v30 }
 0x282   : > { %v2386_v37 = vsub.f32 %v2926_v0, %v2384_v33  ;;  %v2438_v38 = vmul.f32 0.25, %v2430_v34 }
 0x283   : > { %v2387_v39 = vsub.f32 %v2927_v2, %v2385_v35  ;;  %v2439_v40 = vmul.f32 0.25, %v2437_v36 }
 0x284   : > { %v2388_v41 = vmul.f32 %v2386_v37, %v2386_v37  ;;  %v2440_v42 = vsub.f32 %v2926_v0, %v2438_v38 }
 0x285   : > { %v2389_v43 = vmul.f32 %v2387_v39, %v2387_v39  ;;  %v2441_v44 = vsub.f32 %v2927_v2, %v2439_v40 }
 0x286   : > { %v2390_v45 = vsel %vm2368_vm0, %v2388_v41, 0.0  ;;  %v2442_v46 = vmul.f32 %v2440_v42, %v2440_v42 }
 0x287   : > { %v2391_v47 = vrot.slane %v2390_v45, 4  ;;  %v2397_v48 = vsel %vm2368_vm0, %v2389_v43, 0.0  ;;  %v2443_v49 = vmul.f32 %v2441_v44, %v2441_v44 }
 0x288   : > { %v2446_v50 = vrot.slane %v2442_v46, 4  ;;  %v2398_v51 = vrot.slane %v2397_v48, 4 }
 0x289   : > { %v2392_v52 = vadd.f32 %v2391_v47, %v2390_v45  ;;  %v2447_v53 = vrot.slane %v2443_v49, 4 }
 0x28a   : > { %v2450_v54 = vsel %vm2368_vm0, %v2446_v50, 0.0  ;;  %v2399_v55 = vadd.f32 %v2398_v51, %v2397_v48 }
 0x28b   : > { %v2393_v56 = vrot.slane %v2392_v52, 2  ;;  %v2451_v57 = vrot.slane %v2450_v54, 4  ;;  %v2457_v58 = vsel %vm2368_vm0, %v2447_v53, 0.0 }
 0x28c   : > { %v2400_v59 = vrot.slane %v2399_v55, 2  ;;  %v2458_v60 = vrot.slane %v2457_v58, 4 }
 0x28d   : > { %v2394_v61 = vadd.f32 %v2393_v56, %v2392_v52  ;;  %v2452_v62 = vadd.f32 %v2451_v57, %v2450_v54 }
 0x28e   : > { %v2401_v63 = vadd.f32 %v2400_v59, %v2399_v55  ;;  %v2459_v0 = vadd.f32 %v2458_v60, %v2457_v58 }
 0x28f   : > { %v2395_v1 = vrot.slane %v2394_v61, 1  ;;  %v2453_v2 = vrot.slane %v2452_v62, 2 }
 0x290   : > { %v2402_v3 = vrot.slane %v2401_v63, 1  ;;  %v2460_v4 = vrot.slane %v2459_v0, 2 }
 0x291   : > { %v2396_v5 = vadd.f32 %v2395_v1, %v2394_v61  ;;  %v2454_v6 = vadd.f32 %v2453_v2, %v2452_v62 }
 0x292   : > { %v2403_v7 = vadd.f32 %v2402_v3, %v2401_v63  ;;  %v2461_v8 = vadd.f32 %v2460_v4, %v2459_v0 }
 0x293   : > { %v2404_v9 = vmul.f32 0.25, %v2396_v5  ;;  %v2455_v10 = vrot.slane %v2454_v6, 1 }
 0x294   : > { %v2405_v11 = vmul.f32 0.25, %v2403_v7  ;;  %v2462_v12 = vrot.slane %v2461_v8, 1 }
 0x295   : > { %v2406_v13 = vadd.f32 1e-05, %v2404_v9  ;;  %v2456_v14 = vadd.f32 %v2455_v10, %v2454_v6 }
 0x296   : > { %v2407_v15 = vadd.f32 1e-05, %v2405_v11  ;;  %v2463_v16 = vadd.f32 %v2462_v12, %v2461_v8 }
 0x297   : > { %3484 = vrsqrt.f32 %v2406_v13  ;;  %v2464_v17 = vmul.f32 0.25, %v2456_v14 }
 0x298   : > { %3486 = vrsqrt.f32 %v2407_v15  ;;  %v2465_v19 = vmul.f32 0.25, %v2463_v16 }
 0x299   : > { %v2466_v21 = vadd.f32 1e-05, %v2464_v17 }
 0x29a   : > { %v2467_v22 = vadd.f32 1e-05, %v2465_v19 }
 0x29b   : > { %3488 = vrsqrt.f32 %v2466_v21 }
 0x29c   : > { %3490 = vrsqrt.f32 %v2467_v22 }
 0x2a1   : > { %v3485_v23 = vpop.eup %3484 }
 0x2a2   : > { %v3487_v26 = vpop.eup %3486  ;;  %v2410_v27 = vmul.f32 %v3485_v23, %v2386_v37 }
 0x2a3   : > { %v2411_v18 = vmul.f32 %v3487_v26, %v2387_v39 }
 0x2a4   : > { %v2414_v29 = vmul.f32 0.2, %v2410_v27  ;;  %vm2412_vm1 = vcmp.ge.f32.partialorder %v2410_v27, 0.0 }
 0x2a5   : > { %v3489_v20 = vpop.eup %3488  ;;  %v2415_v24 = vmul.f32 0.2, %v2411_v18  ;;  %vm2413_vm3 = vcmp.ge.f32.partialorder %v2411_v18, 0.0 }
 0x2a6   : > { %v3491_v28 = vpop.eup %3490  ;;  %v2470_v30 = vmul.f32 %v3489_v20, %v2440_v42  ;;  %v2416_v33 = vsel %vm2412_vm1, %v2410_v27, %v2414_v29 }
 0x2a7   : > { %v2471_v25 = vmul.f32 %v3491_v28, %v2441_v44  ;;  %v2417_v35 = vsel %vm2413_vm3, %v2411_v18, %v2415_v24 }
 0x2a8   : > { %vm2472_vm2 = vcmp.ge.f32.partialorder %v2470_v30, 0.0  ;;  %v2474_v31 = vmul.f32 0.2, %v2470_v30 }
 0x2a9   : > { %vm2473_vm4 = vcmp.ge.f32.partialorder %v2471_v25, 0.0  ;;  %v2475_v32 = vmul.f32 0.2, %v2471_v25 }
 0x2aa   : > { %v2476_v34 = vsel %vm2472_vm2, %v2470_v30, %v2474_v31 }
 0x2ab   : > { %v2477_v36 = vsel %vm2473_vm4, %v2471_v25, %v2475_v32  ;;  %v2478_v37 = vsel %vm2368_vm0, %v2416_v33, %v2476_v34 }
 0x2ac   : > { %v2479_v38 = vsel %vm2368_vm0, %v2417_v35, %v2477_v36 }
 0x2ad   : > { %v2924_v39 = vpack.c.bf16 %v2479_v38, %v2478_v37 }
 0x2af   : > { %2488 = vst [vmem:[%s196_s23] sm:$0xff] %v2924_v39 }
 0x2b0   : > { %3563 = shalt.err (!%p3560_p7)
}
 0x2b1   : > { %s3564_s8 = scalar_lea.hbm %s4172_s29, 128  ;;  %s3568_s24 = scalar_lea.hbm %s4223_s2, 256 }
 0x2b2   : > { %p3565_p13 = scmp.ne.s32.totalorder %s4172_s29, %s3564_s8  ;;  %p3569_p12 = scmp.lt.u32.totalorder %s4172_s29, %s4223_s2 }
 0x2b3   : > { %p3570_p4 = scmp.lt.u32.totalorder %s3568_s24, %s3564_s8  ;;  %p3572_p5 = scmp.lt.u32.totalorder %s3564_s8, %s4172_s29 }
 0x2b4   : > { %p3566_p2 = pnand %p3565_p13, %p4244_p10 }
 0x2b5   : > { %p3571_p8 = por %p3570_p4, %p3569_p12 }
 0x2b6   : > { %p3567_p6 = pneg %p3566_p2 }
 0x2b7   : > { %p3573_p11 = por %p3572_p5, %p3571_p8 }
 0x2b9   : > { %p3574_p1 = pnand %p3573_p11, %p3567_p6 }
 0x2bb   : > { %3577 = shalt.err (!%p3574_p1)
}
 0x2bc   : > { %2964 = dma.vmem_to_hbm [thread:$0]  (%p4244_p10), %s4174_s26, 128, %s4172_s29, %s2490_s12  }
 0x2bd PF: > { %s2518_s5 = sand.u32 1, %s3616_s9   ;;  %p4245_p0 = scmp.ne.s32.totalorder %s4234_s22, 0 }
 0x2be   : > { %p4246_p9 = scmp.ge.s32.totalorder %s3636_s14, 2  ;;  %s2519_s18 = scalar_lea.sflag [#allocation4], %s2518_s5 }
 0x2c0   : > { %p2975_p3 = pnand %p4246_p9, %p4245_p0 }
 0x2c2   : > { %3611 = dma.done.wait (!%p2975_p3), %s2519_s18, 128  }
 0x2c3   : > { %3613 = vsyncadd (!%p2975_p3), %s2519_s18, 4294967168  ;;  %s19_s14 = sadd.s32 1, %s3636_s14   ;;  %s4247_s9 = smov %s3620_s10 }
 0x2c4   : > { %p16_p7 = scmp.ge.s32.totalorder %s19_s14, 4   ;;  %s4248_s10 = smov %s3624_s11 }
 0x2c5   : > { %s4249_s11 = smov %s3778_s25  ;;  %s4250_s12 = smov %s3632_s13 }
 0x2c6   : > { %s4251_s13 = smov %s4253_s28  ;;  %18 = sbr.rel (!%p16_p7) target bundleno = 7 (0x7), region = 79 }
 0x2cd   :  { %2524 = vsyncpa [#allocation3], 1 }
 0x2ce   :  { %2526 = vsyncpa [#allocation3 + $0x1], 1 }
 0x2cf   :  { %2527 = vsyncpa [#allocation6], 1 }
 0x2d0   :  { %2529 = vsyncpa [#allocation6 + $0x1], 1 }
 0x2d1   :  { %2530 = vsyncpa [#allocation4], 1 }
 0x2d2   :  { %2532 = vsyncpa [#allocation4 + $0x1], 1 }

// kernel: discriminator_forward.9
= control target key start
LH: loop header
LB: loop body
LE: loop exit
PB: predicated region body
PF: predicated region fallthrough
CT: control target
= control target key end

     0   :  { %10 = vsyncpa [#allocation3], 0  ;;  %s17290_s0 = inlined_call_operand.hbm [shape: bf16[8,4608], index: 0, kind: input, shape index: {}]   ;;  %s17291_s1 = inlined_call_operand.hbm [shape: bf16[4608,512], index: 1, kind: input, shape index: {}]   ;;  %s17292_s2 = inlined_call_operand.hbm [shape: bf16[4608,128], index: 2, kind: input, shape index: {}]   ;;  %s17293_s3 = inlined_call_operand.hbm [shape: f32[72,8], index: 3, kind: input, shape index: {}]   ;;  %s17294_s4 = inlined_call_operand.hbm [shape: f32[1,128], index: 4, kind: input, shape index: {}]   ;;  %s17295_s5 = inlined_call_operand.hbm [shape: bf16[8,128], index: 5, kind: output, shape index: {}]  }
   0x1   :  { %11 = vsyncpa [#allocation6], 0 }
   0x2   :  { %12 = vsyncpa [#allocation9], 0 }
   0x3   :  { %13 = vsyncpa [#allocation4], 0  ;;  %s16883_s18 = smov [#allocation5]   ;;  %s16743_s22 = scalar_lea.hbm %s17291_s1, 147456 }
   0x4   :  { %s29_s19 = sshll.u32 %s16883_s18, 4  ;;  %p16744_p0 = scmp.ne.s32.totalorder %s17291_s1, %s16743_s22  ;;  %s30_s19 = int_to_ptr.vmem [resolvable:$true] %s29_s19 }
   0x5   :  { %p16747_p1 = scmp.lt.u32.totalorder %s16743_s22, %s17291_s1 }
   0x7   :  { %p16749_p2 = pnand %p16747_p1, %p16744_p0 }
   0x9   :  { %16752 = shalt.err (!%p16749_p2)
}
   0xa   :  { %s16753_s27 = scalar_lea.vmem %s30_s19, 147456  ;;  %p16758_p4 = scmp.lt.s32.totalorder %s30_s19, %s30_s19 }
   0xb   :  { %p16754_p3 = scmp.ne.s32.totalorder %s30_s19, %s16753_s27  ;;  %p16759_p5 = scmp.lt.s32.totalorder %s16753_s27, %s16753_s27 }
   0xd   :  { %p16760_p6 = por %p16759_p5, %p16758_p4 }
   0xf   :  { %p16761_p7 = pnand %p16760_p6, %p16754_p3 }
  0x11   :  { %16764 = shalt.err (!%p16761_p7)
}
  0x12   :  { %s16884_s28 = smov 256   ;;  %s16885_s29 = smov 16  }
  0x13   :  { %35 = dma.hbm_to_vmem [thread:$0]  %s17291_s1, 147456, %s30_s19, [#allocation6], %s16884_s28, %s16884_s28, %s16885_s29  }
  0x14   :  { %s16886_s7 = smov [#allocation8]   ;;  %s16765_s11 = scalar_lea.hbm %s17293_s3, 1152 }
  0x15   :  { %s53_s8 = sshll.u32 %s16886_s7, 4  ;;  %p16766_p8 = scmp.ne.s32.totalorder %s17293_s3, %s16765_s11  ;;  %s54_s8 = int_to_ptr.vmem [resolvable:$true] %s53_s8 }
  0x16   :  { %p16769_p9 = scmp.lt.u32.totalorder %s16765_s11, %s17293_s3 }
  0x18   :  { %p16771_p10 = pnand %p16769_p9, %p16766_p8 }
  0x1a   :  { %16774 = shalt.err (!%p16771_p10)
}
  0x1b   :  { %s16775_s16 = scalar_lea.vmem %s54_s8, 1152  ;;  %p16780_p12 = scmp.lt.s32.totalorder %s54_s8, %s54_s8 }
  0x1c   :  { %p16776_p11 = scmp.ne.s32.totalorder %s54_s8, %s16775_s16  ;;  %p16781_p13 = scmp.lt.s32.totalorder %s16775_s16, %s16775_s16 }
  0x1e   :  { %p16782_p0 = por %p16781_p13, %p16780_p12 }
  0x20   :  { %p16783_p1 = pnand %p16782_p0, %p16776_p11 }
  0x22   :  { %16786 = shalt.err (!%p16783_p1)
}
  0x23   :  { %s16887_s1 = smov 128   ;;  %s16888_s17 = smov 8  }
  0x24   :  { %59 = dma.hbm_to_vmem [thread:$0]  %s17293_s3, 1152, %s54_s8, [#allocation9], %s16887_s1, %s16887_s1, %s16888_s17  }
  0x25   :  { %s16889_s20 = smov [#allocation2]   ;;  %s16890_s22 = smov [#allocation7]  }
  0x26   :  { %s20_s21 = sshll.u32 %s16889_s20, 4  ;;  %s41_s23 = sshll.u32 %s16890_s22, 4  ;;  %s21_s21 = int_to_ptr.vmem [resolvable:$true] %s20_s21  ;;  %s16951_s23 = int_to_ptr.vmem [resolvable:$true] %s41_s23 }
  0x27   :  { %s16787_s26 = scalar_lea.hbm %s17290_s0, 2304 }
  0x28   :  { %p16788_p2 = scmp.ne.s32.totalorder %s17290_s0, %s16787_s26  ;;  %p16791_p3 = scmp.lt.u32.totalorder %s16787_s26, %s17290_s0 }
  0x2a   :  { %p16793_p4 = pnand %p16791_p3, %p16788_p2 }
  0x2c   :  { %16796 = shalt.err (!%p16793_p4)
}
  0x2d   :  { %s16797_s3 = scalar_lea.vmem %s21_s21, 2304  ;;  %p16802_p6 = scmp.lt.s32.totalorder %s21_s21, %s21_s21 }
  0x2e   :  { %p16798_p5 = scmp.ne.s32.totalorder %s21_s21, %s16797_s3  ;;  %p16803_p7 = scmp.lt.s32.totalorder %s16797_s3, %s16797_s3 }
  0x30   :  { %p16804_p8 = por %p16803_p7, %p16802_p6 }
  0x32   :  { %p16805_p9 = pnand %p16804_p8, %p16798_p5 }
  0x34   :  { %16808 = shalt.err (!%p16805_p9)
}
  0x35   :  { %23 = dma.hbm_to_vmem [thread:$0]  %s17290_s0, 2304, %s21_s21, [#allocation3]  }
  0x36   :  { %s16809_s10 = scalar_lea.hbm %s17292_s2, 36864 }
  0x37   :  { %p16810_p10 = scmp.ne.s32.totalorder %s17292_s2, %s16809_s10  ;;  %p16813_p11 = scmp.lt.u32.totalorder %s16809_s10, %s17292_s2 }
  0x39   :  { %p16815_p12 = pnand %p16813_p11, %p16810_p10 }
  0x3b   :  { %16818 = shalt.err (!%p16815_p12)
}
  0x3c   :  { %s16819_s15 = scalar_lea.vmem %s16951_s23, 36864  ;;  %p16824_p0 = scmp.lt.s32.totalorder %s16951_s23, %s16951_s23 }
  0x3d   :  { %p16820_p13 = scmp.ne.s32.totalorder %s16951_s23, %s16819_s15  ;;  %p16825_p1 = scmp.lt.s32.totalorder %s16819_s15, %s16819_s15 }
  0x3f   :  { %p16826_p2 = por %p16825_p1, %p16824_p0 }
  0x41   :  { %p16827_p3 = pnand %p16826_p2, %p16820_p13 }
  0x43   :  { %16830 = shalt.err (!%p16827_p3)
}
  0x44   :  { %s16891_s0 = smov 64   ;;  %s16892_s16 = smov 4  }
  0x45   :  { %47 = dma.hbm_to_vmem [thread:$0]  %s17292_s2, 36864, %s16951_s23, [#allocation6], %s16891_s0, %s16891_s0, %s16892_s16  }
  0x46   :  { %s16893_s18 = smov [#allocation10]   ;;  %s16831_s22 = scalar_lea.hbm %s17294_s4, 16 }
  0x47   :  { %s66_s19 = sshll.u32 %s16893_s18, 4  ;;  %p16832_p4 = scmp.ne.s32.totalorder %s17294_s4, %s16831_s22  ;;  %s67_s19 = int_to_ptr.vmem [resolvable:$true] %s66_s19 }
  0x48   :  { %p16835_p5 = scmp.lt.u32.totalorder %s16831_s22, %s17294_s4 }
  0x4a   :  { %p16837_p6 = pnand %p16835_p5, %p16832_p4 }
  0x4c   :  { %16840 = shalt.err (!%p16837_p6)
}
  0x4d   :  { %s16841_s28 = scalar_lea.vmem %s67_s19, 16  ;;  %s16845_s2 = scalar_lea.vmem %s67_s19, 32 }
  0x4e   :  { %p16842_p7 = scmp.ne.s32.totalorder %s67_s19, %s16841_s28  ;;  %p16846_p8 = scmp.lt.s32.totalorder %s67_s19, %s67_s19 }
  0x4f   :  { %p16847_p9 = scmp.lt.s32.totalorder %s16845_s2, %s16841_s28 }
  0x51   :  { %p16848_p10 = por %p16847_p9, %p16846_p8 }
  0x53   :  { %p16849_p11 = pnand %p16848_p10, %p16842_p7 }
  0x55   :  { %16852 = shalt.err (!%p16849_p11)
}
  0x56   :  { %69 = dma.hbm_to_vmem [thread:$0]  %s17294_s4, 16, %s67_s19, [#allocation9]  }
  0x57   :  { %16875 = dma.done.wait [#allocation3], 2304  }
  0x58   :  { %16876 = vsyncadd [#allocation3], 4294964992 }
  0x59   :  { %16877 = dma.done.wait [#allocation6], 184320  }
  0x5a   :  { %16878 = vsyncadd [#allocation6], 4294782976 }
  0x5b   :  { %16879 = dma.done.wait [#allocation9], 1168  }
  0x5c   :  { %16880 = vsyncadd [#allocation9], 4294966128  ;;  %v14671_v0 = vld [vmem:[#allocation5 + $0x4] ss:$16 sps:$4 sm:$0xff]   ;;  %v14673_v1 = vld [vmem:[#allocation5 + $0xc] ss:$16 sps:$4 sm:$0xff]  }
  0x5d   :  { %7142 = vmatprep.subr.bf16.mxu0 %v14671_v0  ;;  %v14675_v2 = vld [vmem:[#allocation5] ss:$16 sps:$4 sm:$0xff]   ;;  %v14676_v3 = vld [vmem:[#allocation5 + $0x8] ss:$16 sps:$4 sm:$0xff]   ;;  %7880 = vmatprep.subr.bf16.mxu1 %v14673_v1  ;;  %v14677_v4 = vld [vmem:[#allocation5 + $0x24] ss:$16 sps:$4 sm:$0xff]  }
  0x5e   :  { %7143 = vmatpush1.bf16.msra.mxu0 %v14675_v2  ;;  %7881 = vmatpush1.bf16.msra.mxu1 %v14676_v3  ;;  %v14679_v5 = vld [vmem:[#allocation5 + $0x2c] ss:$16 sps:$4 sm:$0xff]   ;;  %v14681_v6 = vld [vmem:[#allocation5 + $0x20] ss:$16 sps:$4 sm:$0xff]   ;;  %v14682_v7 = vld [vmem:[#allocation5 + $0x28] ss:$16 sps:$4 sm:$0xff]  }
  0x5f   :  { %7144 = vmatprep.subr.bf16.mxu0 %v14677_v4  ;;  %7882 = vmatprep.subr.bf16.mxu1 %v14679_v5  ;;  %v14683_v8 = vld [vmem:[#allocation5 + $0x44] ss:$16 sps:$4 sm:$0xff]   ;;  %v14685_v9 = vld [vmem:[#allocation5 + $0x4c] ss:$16 sps:$4 sm:$0xff]   ;;  %v14687_v10 = vld [vmem:[#allocation5 + $0x40] ss:$16 sps:$4 sm:$0xff]  }
  0x60   :  { %v14688_v11 = vld [vmem:[#allocation5 + $0x48] ss:$16 sps:$4 sm:$0xff]   ;;  %v14689_v12 = vld [vmem:[#allocation5 + $0x64] ss:$16 sps:$4 sm:$0xff]   ;;  %v14691_v13 = vld [vmem:[#allocation5 + $0x6c] ss:$16 sps:$4 sm:$0xff]  }
  0x61   :  { %v14693_v14 = vld [vmem:[#allocation5 + $0x60] ss:$16 sps:$4 sm:$0xff]   ;;  %v14694_v15 = vld [vmem:[#allocation5 + $0x68] ss:$16 sps:$4 sm:$0xff]   ;;  %v14695_v16 = vld [vmem:[#allocation5 + $0x84] ss:$16 sps:$4 sm:$0xff]  }
  0x62   :  { %7145 = vmatpush1.bf16.msra.mxu0 %v14681_v6  ;;  %7883 = vmatpush1.bf16.msra.mxu1 %v14682_v7  ;;  %v14697_v17 = vld [vmem:[#allocation5 + $0x8c] ss:$16 sps:$4 sm:$0xff]   ;;  %v14699_v18 = vld [vmem:[#allocation5 + $0x80] ss:$16 sps:$4 sm:$0xff]   ;;  %v14700_v19 = vld [vmem:[#allocation5 + $0x88] ss:$16 sps:$4 sm:$0xff]  }
  0x63   :  { %7146 = vmatprep.subr.bf16.mxu0 %v14683_v8  ;;  %7884 = vmatprep.subr.bf16.mxu1 %v14685_v9  ;;  %v14701_v20 = vld [vmem:[#allocation5 + $0xa4] ss:$16 sps:$4 sm:$0xff]   ;;  %v14703_v21 = vld [vmem:[#allocation5 + $0xac] ss:$16 sps:$4 sm:$0xff]   ;;  %v14705_v22 = vld [vmem:[#allocation5 + $0xa0] ss:$16 sps:$4 sm:$0xff]  }
  0x64   :  { %v14706_v23 = vld [vmem:[#allocation5 + $0xa8] ss:$16 sps:$4 sm:$0xff]   ;;  %v14707_v24 = vld [vmem:[#allocation5 + $0xc4] ss:$16 sps:$4 sm:$0xff]   ;;  %v14709_v25 = vld [vmem:[#allocation5 + $0xcc] ss:$16 sps:$4 sm:$0xff]  }
  0x65   :  { %v14711_v26 = vld [vmem:[#allocation5 + $0xc0] ss:$16 sps:$4 sm:$0xff]   ;;  %v14712_v27 = vld [vmem:[#allocation5 + $0xc8] ss:$16 sps:$4 sm:$0xff]   ;;  %v14713_v28 = vld [vmem:[#allocation5 + $0xe4] ss:$16 sps:$4 sm:$0xff]  }
  0x66   :  { %7147 = vmatpush1.bf16.msra.mxu0 %v14687_v10  ;;  %7885 = vmatpush1.bf16.msra.mxu1 %v14688_v11  ;;  %v14715_v29 = vld [vmem:[#allocation5 + $0xec] ss:$16 sps:$4 sm:$0xff]   ;;  %v14717_v30 = vld [vmem:[#allocation5 + $0xe0] ss:$16 sps:$4 sm:$0xff]   ;;  %v14718_v31 = vld [vmem:[#allocation5 + $0xe8] ss:$16 sps:$4 sm:$0xff]  }
  0x67   :  { %7148 = vmatprep.subr.bf16.mxu0 %v14689_v12  ;;  %7886 = vmatprep.subr.bf16.mxu1 %v14691_v13  ;;  %v14719_v32 = vld [vmem:[#allocation5 + $0x104] ss:$16 sps:$4 sm:$0xff]   ;;  %v14721_v33 = vld [vmem:[#allocation5 + $0x10c] ss:$16 sps:$4 sm:$0xff]   ;;  %v14723_v34 = vld [vmem:[#allocation5 + $0x100] ss:$16 sps:$4 sm:$0xff]  }
  0x68   :  { %v14724_v35 = vld [vmem:[#allocation5 + $0x108] ss:$16 sps:$4 sm:$0xff]   ;;  %v14725_v36 = vld [vmem:[#allocation5 + $0x124] ss:$16 sps:$4 sm:$0xff]   ;;  %v14727_v37 = vld [vmem:[#allocation5 + $0x12c] ss:$16 sps:$4 sm:$0xff]  }
  0x69   :  { %v14729_v38 = vld [vmem:[#allocation5 + $0x120] ss:$16 sps:$4 sm:$0xff]   ;;  %v14730_v39 = vld [vmem:[#allocation5 + $0x128] ss:$16 sps:$4 sm:$0xff]   ;;  %v14731_v40 = vld [vmem:[#allocation5 + $0x144] ss:$16 sps:$4 sm:$0xff]  }
  0x6a   :  { %7149 = vmatpush1.bf16.msra.mxu0 %v14693_v14  ;;  %7887 = vmatpush1.bf16.msra.mxu1 %v14694_v15  ;;  %v14733_v41 = vld [vmem:[#allocation5 + $0x14c] ss:$16 sps:$4 sm:$0xff]   ;;  %v14735_v42 = vld [vmem:[#allocation5 + $0x140] ss:$16 sps:$4 sm:$0xff]   ;;  %v14736_v43 = vld [vmem:[#allocation5 + $0x148] ss:$16 sps:$4 sm:$0xff]  }
  0x6b   :  { %7150 = vmatprep.subr.bf16.mxu0 %v14695_v16  ;;  %7888 = vmatprep.subr.bf16.mxu1 %v14697_v17  ;;  %v14737_v44 = vld [vmem:[#allocation5 + $0x164] ss:$16 sps:$4 sm:$0xff]   ;;  %v14739_v45 = vld [vmem:[#allocation5 + $0x16c] ss:$16 sps:$4 sm:$0xff]   ;;  %v14741_v47 = vld [vmem:[#allocation5 + $0x160] ss:$16 sps:$4 sm:$0xff]  }
  0x6c   :  { %v86_v46 = vld [vmem:[#allocation2] sm:$0xff]  ;;  %v14742_v49 = vld [vmem:[#allocation5 + $0x168] ss:$16 sps:$4 sm:$0xff]   ;;  %v14745_v51 = vld [vmem:[#allocation5 + $0x18c] ss:$16 sps:$4 sm:$0xff]   ;;  %vm8618_vm0 = vcmask 1043456  }
  0x6d   :  { %v12576_v48 = vcombine.high %v86_v46, %v86_v46  ;;  %v14743_v50 = vld [vmem:[#allocation5 + $0x184] ss:$16 sps:$4 sm:$0xff]   ;;  %v14747_v52 = vld [vmem:[#allocation5 + $0x180] ss:$16 sps:$4 sm:$0xff]   ;;  %v14748_v53 = vld [vmem:[#allocation5 + $0x188] ss:$16 sps:$4 sm:$0xff]   ;;  %v12575_v4 = vcombine.low %v86_v46, %v86_v46 }
  0x6e   :  { %7151 = vmatpush1.bf16.msra.mxu0 %v14699_v18  ;;  %7889 = vmatpush1.bf16.msra.mxu1 %v14700_v19  ;;  %v14749_v54 = vld [vmem:[#allocation5 + $0x1a4] ss:$16 sps:$4 sm:$0xff]   ;;  %v14751_v55 = vld [vmem:[#allocation5 + $0x1ac] ss:$16 sps:$4 sm:$0xff]   ;;  %v14753_v56 = vld [vmem:[#allocation5 + $0x1a0] ss:$16 sps:$4 sm:$0xff]  }
  0x6f   :  { %7152 = vmatprep.subr.bf16.mxu0 %v14701_v20  ;;  %7890 = vmatprep.subr.bf16.mxu1 %v14703_v21  ;;  %v14754_v57 = vld [vmem:[#allocation5 + $0x1a8] ss:$16 sps:$4 sm:$0xff]   ;;  %v14755_v58 = vld [vmem:[#allocation5 + $0x1c4] ss:$16 sps:$4 sm:$0xff]   ;;  %v14757_v59 = vld [vmem:[#allocation5 + $0x1cc] ss:$16 sps:$4 sm:$0xff]  }
  0x70   :  { %7174 = vmatprep.mubr.bf16.mxu0 %v12576_v48  ;;  %7912 = vmatprep.mubr.bf16.mxu1 %v12576_v48  ;;  %v14759_v60 = vld [vmem:[#allocation5 + $0x1c0] ss:$16 sps:$4 sm:$0xff]   ;;  %v14760_v61 = vld [vmem:[#allocation5 + $0x1c8] ss:$16 sps:$4 sm:$0xff]   ;;  %v14761_v62 = vld [vmem:[#allocation5 + $0x1e4] ss:$16 sps:$4 sm:$0xff]  }
  0x71   :  { %v14763_v63 = vld [vmem:[#allocation5 + $0x1ec] ss:$16 sps:$4 sm:$0xff]   ;;  %v14765_v0 = vld [vmem:[#allocation5 + $0x1e0] ss:$16 sps:$4 sm:$0xff]   ;;  %v14766_v1 = vld [vmem:[#allocation5 + $0x1e8] ss:$16 sps:$4 sm:$0xff]  }
  0x72   :  { %7153 = vmatpush1.bf16.msra.mxu0 %v14705_v22  ;;  %7891 = vmatpush1.bf16.msra.mxu1 %v14706_v23  ;;  %v14771_v2 = vld [vmem:[#allocation5 + $0x204] ss:$16 sps:$4 sm:$0xff]   ;;  %v14774_v3 = vld [vmem:[#allocation5 + $0x20c] ss:$16 sps:$4 sm:$0xff]   ;;  %v14769_v5 = vld [vmem:[#allocation5 + $0x200] ss:$16 sps:$4 sm:$0xff]  }
  0x73   :  { %7154 = vmatprep.subr.bf16.mxu0 %v14707_v24  ;;  %7892 = vmatprep.subr.bf16.mxu1 %v14709_v25  ;;  %v14772_v6 = vld [vmem:[#allocation5 + $0x208] ss:$16 sps:$4 sm:$0xff]   ;;  %v14777_v7 = vld [vmem:[#allocation5 + $0x224] ss:$16 sps:$4 sm:$0xff]   ;;  %v14780_v8 = vld [vmem:[#allocation5 + $0x22c] ss:$16 sps:$4 sm:$0xff]  }
  0x74   :  { %v14775_v9 = vld [vmem:[#allocation5 + $0x220] ss:$16 sps:$4 sm:$0xff]   ;;  %v14778_v10 = vld [vmem:[#allocation5 + $0x228] ss:$16 sps:$4 sm:$0xff]   ;;  %v14783_v11 = vld [vmem:[#allocation5 + $0x244] ss:$16 sps:$4 sm:$0xff]  }
  0x75   :  { %v14786_v12 = vld [vmem:[#allocation5 + $0x24c] ss:$16 sps:$4 sm:$0xff]   ;;  %v14781_v13 = vld [vmem:[#allocation5 + $0x240] ss:$16 sps:$4 sm:$0xff]   ;;  %v14784_v14 = vld [vmem:[#allocation5 + $0x248] ss:$16 sps:$4 sm:$0xff]  }
  0x76   :  { %7155 = vmatpush1.bf16.msra.mxu0 %v14711_v26  ;;  %7893 = vmatpush1.bf16.msra.mxu1 %v14712_v27  ;;  %v14789_v15 = vld [vmem:[#allocation5 + $0x264] ss:$16 sps:$4 sm:$0xff]   ;;  %v14792_v16 = vld [vmem:[#allocation5 + $0x26c] ss:$16 sps:$4 sm:$0xff]   ;;  %v14787_v17 = vld [vmem:[#allocation5 + $0x260] ss:$16 sps:$4 sm:$0xff]  }
  0x77   :  { %7156 = vmatprep.subr.bf16.mxu0 %v14713_v28  ;;  %7894 = vmatprep.subr.bf16.mxu1 %v14715_v29  ;;  %v14790_v18 = vld [vmem:[#allocation5 + $0x268] ss:$16 sps:$4 sm:$0xff]   ;;  %v14795_v19 = vld [vmem:[#allocation5 + $0x284] ss:$16 sps:$4 sm:$0xff]   ;;  %v14798_v20 = vld [vmem:[#allocation5 + $0x28c] ss:$16 sps:$4 sm:$0xff]  }
  0x78   :  { %v14793_v21 = vld [vmem:[#allocation5 + $0x280] ss:$16 sps:$4 sm:$0xff]   ;;  %v14796_v22 = vld [vmem:[#allocation5 + $0x288] ss:$16 sps:$4 sm:$0xff]   ;;  %v14801_v23 = vld [vmem:[#allocation5 + $0x2a4] ss:$16 sps:$4 sm:$0xff]  }
  0x79   :  { %v14804_v24 = vld [vmem:[#allocation5 + $0x2ac] ss:$16 sps:$4 sm:$0xff]   ;;  %v14799_v25 = vld [vmem:[#allocation5 + $0x2a0] ss:$16 sps:$4 sm:$0xff]   ;;  %v14802_v26 = vld [vmem:[#allocation5 + $0x2a8] ss:$16 sps:$4 sm:$0xff]  }
  0x7a   :  { %7157 = vmatpush1.bf16.msra.mxu0 %v14717_v30  ;;  %7895 = vmatpush1.bf16.msra.mxu1 %v14718_v31  ;;  %v14807_v27 = vld [vmem:[#allocation5 + $0x2c4] ss:$16 sps:$4 sm:$0xff]   ;;  %v14810_v28 = vld [vmem:[#allocation5 + $0x2cc] ss:$16 sps:$4 sm:$0xff]   ;;  %v14805_v31 = vld [vmem:[#allocation5 + $0x2c0] ss:$16 sps:$4 sm:$0xff]  }
  0x7b   :  { %7158 = vmatprep.subr.bf16.mxu0 %v14719_v32  ;;  %7896 = vmatprep.subr.bf16.mxu1 %v14721_v33  ;;  %v16994_v29 = vld [vmem:[#allocation2 + $0x8] sm:$0xff]  ;;  %v14813_v33 = vld [vmem:[#allocation5 + $0x2e4] ss:$16 sps:$4 sm:$0xff]   ;;  %vm16895_vm9 = vmmov 0   ;;  %vm9518_vm10 = vcmask 64512   ;;  %s16896_s4 = smov [#allocation11]  }
  0x7c   :  { %v12578_v30 = vcombine.high %v16994_v29, %v16994_v29  ;;  %v14808_v32 = vld [vmem:[#allocation5 + $0x2c8] ss:$16 sps:$4 sm:$0xff]   ;;  %v14834_v46 = vld [vmem:[#allocation5 + $0x34c] ss:$16 sps:$4 sm:$0xff]   ;;  %s12564_s30 = sshll.u32 %s16896_s4, 4  ;;  %s12565_s30 = int_to_ptr.vmem [resolvable:$true] %s12564_s30 }
  0x7d   :  { %v14832_v48 = vld [vmem:[#allocation5 + $0x348] ss:$16 sps:$4 sm:$0xff]   ;;  %s16853_s3 = scalar_lea.vmem %s12565_s30, 64  ;;  %p16858_p13 = scmp.lt.s32.totalorder %s12565_s30, %s12565_s30 }
  0x7e   :  { %7159 = vmatpush1.bf16.msra.mxu0 %v14723_v34  ;;  %7897 = vmatpush1.bf16.msra.mxu1 %v14724_v35  ;;  %v14816_v34 = vld [vmem:[#allocation5 + $0x2ec] ss:$16 sps:$4 sm:$0xff]   ;;  %v14811_v35 = vld [vmem:[#allocation5 + $0x2e0] ss:$16 sps:$4 sm:$0xff]   ;;  %p16854_p12 = scmp.ne.s32.totalorder %s12565_s30, %s16853_s3  ;;  %p16859_p0 = scmp.lt.s32.totalorder %s16853_s3, %s16853_s3 }
  0x7f   :  { %7160 = vmatprep.subr.bf16.mxu0 %v14725_v36  ;;  %7898 = vmatprep.subr.bf16.mxu1 %v14727_v37  ;;  %v14814_v36 = vld [vmem:[#allocation5 + $0x2e8] ss:$16 sps:$4 sm:$0xff]   ;;  %v14819_v37 = vld [vmem:[#allocation5 + $0x304] ss:$16 sps:$4 sm:$0xff]  }
  0x80   :  { %p16860_p1 = por %p16859_p0, %p16858_p13 }
  0x82   :  { %7161 = vmatpush1.bf16.msra.mxu0 %v14729_v38  ;;  %7899 = vmatpush1.bf16.msra.mxu1 %v14730_v39  ;;  %v14822_v38 = vld [vmem:[#allocation5 + $0x30c] ss:$16 sps:$4 sm:$0xff]   ;;  %v14817_v39 = vld [vmem:[#allocation5 + $0x300] ss:$16 sps:$4 sm:$0xff]   ;;  %p16861_p2 = pnand %p16860_p1, %p16854_p12 }
  0x83   :  { %7162 = vmatprep.subr.bf16.mxu0 %v14731_v40  ;;  %7900 = vmatprep.subr.bf16.mxu1 %v14733_v41  ;;  %v14820_v40 = vld [vmem:[#allocation5 + $0x308] ss:$16 sps:$4 sm:$0xff]   ;;  %v14825_v41 = vld [vmem:[#allocation5 + $0x324] ss:$16 sps:$4 sm:$0xff]  }
  0x86   :  { %7163 = vmatpush1.bf16.msra.mxu0 %v14735_v42  ;;  %7901 = vmatpush1.bf16.msra.mxu1 %v14736_v43  ;;  %v14828_v42 = vld [vmem:[#allocation5 + $0x32c] ss:$16 sps:$4 sm:$0xff]   ;;  %v14823_v43 = vld [vmem:[#allocation5 + $0x320] ss:$16 sps:$4 sm:$0xff]  }
  0x87   :  { %7164 = vmatprep.subr.bf16.mxu0 %v14737_v44  ;;  %7902 = vmatprep.subr.bf16.mxu1 %v14739_v45  ;;  %v14826_v44 = vld [vmem:[#allocation5 + $0x328] ss:$16 sps:$4 sm:$0xff]   ;;  %v14831_v45 = vld [vmem:[#allocation5 + $0x344] ss:$16 sps:$4 sm:$0xff]  }
  0x8a   :  { %7165 = vmatpush1.bf16.msra.mxu0 %v14741_v47  ;;  %7903 = vmatpush1.bf16.msra.mxu1 %v14742_v49  ;;  %v14829_v47 = vld [vmem:[#allocation5 + $0x340] ss:$16 sps:$4 sm:$0xff]   ;;  %v14837_v49 = vld [vmem:[#allocation5 + $0x364] ss:$16 sps:$4 sm:$0xff]  }
  0x8b   :  { %7166 = vmatprep.subr.bf16.mxu0 %v14743_v50  ;;  %7904 = vmatprep.subr.bf16.mxu1 %v14745_v51  ;;  %v14840_v50 = vld [vmem:[#allocation5 + $0x36c] ss:$16 sps:$4 sm:$0xff]   ;;  %v14835_v51 = vld [vmem:[#allocation5 + $0x360] ss:$16 sps:$4 sm:$0xff]  }
  0x8e   :  { %7167 = vmatpush1.bf16.msra.mxu0 %v14747_v52  ;;  %7905 = vmatpush1.bf16.msra.mxu1 %v14748_v53  ;;  %v14838_v52 = vld [vmem:[#allocation5 + $0x368] ss:$16 sps:$4 sm:$0xff]   ;;  %v14843_v53 = vld [vmem:[#allocation5 + $0x384] ss:$16 sps:$4 sm:$0xff]  }
  0x8f   :  { %7168 = vmatprep.subr.bf16.mxu0 %v14749_v54  ;;  %7906 = vmatprep.subr.bf16.mxu1 %v14751_v55  ;;  %v14846_v54 = vld [vmem:[#allocation5 + $0x38c] ss:$16 sps:$4 sm:$0xff]   ;;  %v14841_v55 = vld [vmem:[#allocation5 + $0x380] ss:$16 sps:$4 sm:$0xff]  }
  0x92   :  { %7169 = vmatpush1.bf16.msra.mxu0 %v14753_v56  ;;  %7907 = vmatpush1.bf16.msra.mxu1 %v14754_v57  ;;  %v14844_v56 = vld [vmem:[#allocation5 + $0x388] ss:$16 sps:$4 sm:$0xff]   ;;  %v14849_v57 = vld [vmem:[#allocation5 + $0x3a4] ss:$16 sps:$4 sm:$0xff]  }
  0x93   :  { %7170 = vmatprep.subr.bf16.mxu0 %v14755_v58  ;;  %7908 = vmatprep.subr.bf16.mxu1 %v14757_v59  ;;  %v14852_v58 = vld [vmem:[#allocation5 + $0x3ac] ss:$16 sps:$4 sm:$0xff]   ;;  %v14847_v59 = vld [vmem:[#allocation5 + $0x3a0] ss:$16 sps:$4 sm:$0xff]  }
  0x96   :  { %7171 = vmatpush1.bf16.msra.mxu0 %v14759_v60  ;;  %7909 = vmatpush1.bf16.msra.mxu1 %v14760_v61  ;;  %v14850_v60 = vld [vmem:[#allocation5 + $0x3a8] ss:$16 sps:$4 sm:$0xff]   ;;  %v14855_v61 = vld [vmem:[#allocation5 + $0x3c4] ss:$16 sps:$4 sm:$0xff]  }
  0x97   :  { %7172 = vmatprep.subr.bf16.mxu0 %v14761_v62  ;;  %7910 = vmatprep.subr.bf16.mxu1 %v14763_v63  ;;  %v14858_v62 = vld [vmem:[#allocation5 + $0x3cc] ss:$16 sps:$4 sm:$0xff]   ;;  %v14853_v63 = vld [vmem:[#allocation5 + $0x3c0] ss:$16 sps:$4 sm:$0xff]  }
  0x9a   :  { %7173 = vmatpush1.bf16.msra.mxu0 %v14765_v0  ;;  %7911 = vmatpush1.bf16.msra.mxu1 %v14766_v1  ;;  %v14856_v0 = vld [vmem:[#allocation5 + $0x3c8] ss:$16 sps:$4 sm:$0xff]   ;;  %v14861_v1 = vld [vmem:[#allocation5 + $0x3e4] ss:$16 sps:$4 sm:$0xff]  }
  0x9b   :  { %7183 = vmatprep.subr.bf16.mxu0 %v14771_v2  ;;  %7921 = vmatprep.subr.bf16.mxu1 %v14774_v3  ;;  %v14864_v2 = vld [vmem:[#allocation5 + $0x3ec] ss:$16 sps:$4 sm:$0xff]   ;;  %v14859_v3 = vld [vmem:[#allocation5 + $0x3e0] ss:$16 sps:$4 sm:$0xff]  }
  0x9d   :  { %7175 = vmatmul.mubr.bf16.vlgmr.msra.gmra.mrb[0].mxu0 %v12575_v4  ;;  %7913 = vmatmul.mubr.bf16.vlgmr.msra.gmra.mrb[0].mxu1 %v12575_v4  ;;  %v14862_v4 = vld [vmem:[#allocation5 + $0x3e8] ss:$16 sps:$4 sm:$0xff]  }
  0x9e   :  { %7184 = vmatpush1.bf16.msra.mxu0 %v14769_v5  ;;  %7922 = vmatpush1.bf16.msra.mxu1 %v14772_v6  ;;  %v14869_v5 = vld [vmem:[#allocation5 + $0x404] ss:$16 sps:$4 sm:$0xff]   ;;  %v14872_v6 = vld [vmem:[#allocation5 + $0x40c] ss:$16 sps:$4 sm:$0xff]  }
  0x9f   :  { %7185 = vmatprep.subr.bf16.mxu0 %v14777_v7  ;;  %7923 = vmatprep.subr.bf16.mxu1 %v14780_v8  ;;  %v12577_v7 = vcombine.low %v16994_v29, %v16994_v29  ;;  %v14867_v8 = vld [vmem:[#allocation5 + $0x400] ss:$16 sps:$4 sm:$0xff]   ;;  %v14902_v29 = vld [vmem:[#allocation5 + $0x4ac] ss:$16 sps:$4 sm:$0xff]  }
  0xa0   :  { %7215 = vmatprep.mubr.bf16.mxu0 %v12578_v30  ;;  %7953 = vmatprep.mubr.bf16.mxu1 %v12578_v30  ;;  %v14897_v30 = vld [vmem:[#allocation5 + $0x4a0] ss:$16 sps:$4 sm:$0xff]  }
  0xa2   :  { %7186 = vmatpush1.bf16.msra.mxu0 %v14775_v9  ;;  %7924 = vmatpush1.bf16.msra.mxu1 %v14778_v10  ;;  %v14870_v9 = vld [vmem:[#allocation5 + $0x408] ss:$16 sps:$4 sm:$0xff]   ;;  %v14875_v10 = vld [vmem:[#allocation5 + $0x424] ss:$16 sps:$4 sm:$0xff]  }
  0xa3   :  { %7187 = vmatprep.subr.bf16.mxu0 %v14783_v11  ;;  %7925 = vmatprep.subr.bf16.mxu1 %v14786_v12  ;;  %v17000_v11 = vld [vmem:[#allocation2 + $0x10] sm:$0xff]  ;;  %v14878_v12 = vld [vmem:[#allocation5 + $0x42c] ss:$16 sps:$4 sm:$0xff]  }
  0xa6   :  { %7188 = vmatpush1.bf16.msra.mxu0 %v14781_v13  ;;  %7926 = vmatpush1.bf16.msra.mxu1 %v14784_v14  ;;  %v12580_v13 = vcombine.high %v17000_v11, %v17000_v11  ;;  %v14873_v14 = vld [vmem:[#allocation5 + $0x420] ss:$16 sps:$4 sm:$0xff]  }
  0xa7   :  { %7189 = vmatprep.subr.bf16.mxu0 %v14789_v15  ;;  %7927 = vmatprep.subr.bf16.mxu1 %v14792_v16  ;;  %v14876_v15 = vld [vmem:[#allocation5 + $0x428] ss:$16 sps:$4 sm:$0xff]   ;;  %v14881_v16 = vld [vmem:[#allocation5 + $0x444] ss:$16 sps:$4 sm:$0xff]  }
  0xaa   :  { %7190 = vmatpush1.bf16.msra.mxu0 %v14787_v17  ;;  %7928 = vmatpush1.bf16.msra.mxu1 %v14790_v18  ;;  %v14884_v17 = vld [vmem:[#allocation5 + $0x44c] ss:$16 sps:$4 sm:$0xff]   ;;  %v14879_v18 = vld [vmem:[#allocation5 + $0x440] ss:$16 sps:$4 sm:$0xff]  }
  0xab   :  { %7191 = vmatprep.subr.bf16.mxu0 %v14795_v19  ;;  %7929 = vmatprep.subr.bf16.mxu1 %v14798_v20  ;;  %v14882_v19 = vld [vmem:[#allocation5 + $0x448] ss:$16 sps:$4 sm:$0xff]   ;;  %v14887_v20 = vld [vmem:[#allocation5 + $0x464] ss:$16 sps:$4 sm:$0xff]  }
  0xae   :  { %7192 = vmatpush1.bf16.msra.mxu0 %v14793_v21  ;;  %7930 = vmatpush1.bf16.msra.mxu1 %v14796_v22  ;;  %v14890_v21 = vld [vmem:[#allocation5 + $0x46c] ss:$16 sps:$4 sm:$0xff]   ;;  %v14885_v22 = vld [vmem:[#allocation5 + $0x460] ss:$16 sps:$4 sm:$0xff]  }
  0xaf   :  { %7193 = vmatprep.subr.bf16.mxu0 %v14801_v23  ;;  %7931 = vmatprep.subr.bf16.mxu1 %v14804_v24  ;;  %v14888_v23 = vld [vmem:[#allocation5 + $0x468] ss:$16 sps:$4 sm:$0xff]   ;;  %v14893_v24 = vld [vmem:[#allocation5 + $0x484] ss:$16 sps:$4 sm:$0xff]  }
  0xb2   :  { %7194 = vmatpush1.bf16.msra.mxu0 %v14799_v25  ;;  %7932 = vmatpush1.bf16.msra.mxu1 %v14802_v26  ;;  %v14896_v25 = vld [vmem:[#allocation5 + $0x48c] ss:$16 sps:$4 sm:$0xff]   ;;  %v14891_v26 = vld [vmem:[#allocation5 + $0x480] ss:$16 sps:$4 sm:$0xff]  }
  0xb3   :  { %7195 = vmatprep.subr.bf16.mxu0 %v14807_v27  ;;  %7933 = vmatprep.subr.bf16.mxu1 %v14810_v28  ;;  %v14894_v27 = vld [vmem:[#allocation5 + $0x488] ss:$16 sps:$4 sm:$0xff]   ;;  %v14899_v28 = vld [vmem:[#allocation5 + $0x4a4] ss:$16 sps:$4 sm:$0xff]  }
  0xb6   :  { %7196 = vmatpush1.bf16.msra.mxu0 %v14805_v31  ;;  %7934 = vmatpush1.bf16.msra.mxu1 %v14808_v32  ;;  %v14900_v31 = vld [vmem:[#allocation5 + $0x4a8] ss:$16 sps:$4 sm:$0xff]   ;;  %v14905_v32 = vld [vmem:[#allocation5 + $0x4c4] ss:$16 sps:$4 sm:$0xff]  }
  0xb7   :  { %7197 = vmatprep.subr.bf16.mxu0 %v14813_v33  ;;  %7935 = vmatprep.subr.bf16.mxu1 %v14816_v34  ;;  %v14908_v33 = vld [vmem:[#allocation5 + $0x4cc] ss:$16 sps:$4 sm:$0xff]   ;;  %v14903_v34 = vld [vmem:[#allocation5 + $0x4c0] ss:$16 sps:$4 sm:$0xff]  }
  0xba   :  { %7198 = vmatpush1.bf16.msra.mxu0 %v14811_v35  ;;  %7936 = vmatpush1.bf16.msra.mxu1 %v14814_v36  ;;  %v14906_v35 = vld [vmem:[#allocation5 + $0x4c8] ss:$16 sps:$4 sm:$0xff]   ;;  %v14911_v36 = vld [vmem:[#allocation5 + $0x4e4] ss:$16 sps:$4 sm:$0xff]  }
  0xbb   :  { %7199 = vmatprep.subr.bf16.mxu0 %v14819_v37  ;;  %7937 = vmatprep.subr.bf16.mxu1 %v14822_v38  ;;  %v14914_v37 = vld [vmem:[#allocation5 + $0x4ec] ss:$16 sps:$4 sm:$0xff]   ;;  %v14909_v38 = vld [vmem:[#allocation5 + $0x4e0] ss:$16 sps:$4 sm:$0xff]  }
  0xbe   :  { %7200 = vmatpush1.bf16.msra.mxu0 %v14817_v39  ;;  %7938 = vmatpush1.bf16.msra.mxu1 %v14820_v40  ;;  %v14912_v39 = vld [vmem:[#allocation5 + $0x4e8] ss:$16 sps:$4 sm:$0xff]   ;;  %v14917_v40 = vld [vmem:[#allocation5 + $0x504] ss:$16 sps:$4 sm:$0xff]  }
  0xbf   :  { %7201 = vmatprep.subr.bf16.mxu0 %v14825_v41  ;;  %7939 = vmatprep.subr.bf16.mxu1 %v14828_v42  ;;  %v14920_v41 = vld [vmem:[#allocation5 + $0x50c] ss:$16 sps:$4 sm:$0xff]   ;;  %v14915_v42 = vld [vmem:[#allocation5 + $0x500] ss:$16 sps:$4 sm:$0xff]  }
  0xc2   :  { %7202 = vmatpush1.bf16.msra.mxu0 %v14823_v43  ;;  %7940 = vmatpush1.bf16.msra.mxu1 %v14826_v44  ;;  %v14918_v43 = vld [vmem:[#allocation5 + $0x508] ss:$16 sps:$4 sm:$0xff]   ;;  %v14923_v44 = vld [vmem:[#allocation5 + $0x524] ss:$16 sps:$4 sm:$0xff]  }
  0xc3   :  { %7203 = vmatprep.subr.bf16.mxu0 %v14831_v45  ;;  %7941 = vmatprep.subr.bf16.mxu1 %v14834_v46  ;;  %v14926_v45 = vld [vmem:[#allocation5 + $0x52c] ss:$16 sps:$4 sm:$0xff]   ;;  %v14921_v46 = vld [vmem:[#allocation5 + $0x520] ss:$16 sps:$4 sm:$0xff]  }
  0xc6   :  { %7204 = vmatpush1.bf16.msra.mxu0 %v14829_v47  ;;  %7942 = vmatpush1.bf16.msra.mxu1 %v14832_v48  ;;  %v14924_v47 = vld [vmem:[#allocation5 + $0x528] ss:$16 sps:$4 sm:$0xff]   ;;  %v14929_v48 = vld [vmem:[#allocation5 + $0x544] ss:$16 sps:$4 sm:$0xff]  }
  0xc7   :  { %7205 = vmatprep.subr.bf16.mxu0 %v14837_v49  ;;  %7943 = vmatprep.subr.bf16.mxu1 %v14840_v50  ;;  %v14932_v49 = vld [vmem:[#allocation5 + $0x54c] ss:$16 sps:$4 sm:$0xff]   ;;  %v14927_v50 = vld [vmem:[#allocation5 + $0x540] ss:$16 sps:$4 sm:$0xff]  }
  0xca   :  { %7206 = vmatpush1.bf16.msra.mxu0 %v14835_v51  ;;  %7944 = vmatpush1.bf16.msra.mxu1 %v14838_v52  ;;  %v14930_v51 = vld [vmem:[#allocation5 + $0x548] ss:$16 sps:$4 sm:$0xff]   ;;  %v14935_v52 = vld [vmem:[#allocation5 + $0x564] ss:$16 sps:$4 sm:$0xff]  }
  0xcb   :  { %7207 = vmatprep.subr.bf16.mxu0 %v14843_v53  ;;  %7945 = vmatprep.subr.bf16.mxu1 %v14846_v54  ;;  %v14938_v53 = vld [vmem:[#allocation5 + $0x56c] ss:$16 sps:$4 sm:$0xff]   ;;  %v14933_v54 = vld [vmem:[#allocation5 + $0x560] ss:$16 sps:$4 sm:$0xff]  }
  0xce   :  { %7208 = vmatpush1.bf16.msra.mxu0 %v14841_v55  ;;  %7946 = vmatpush1.bf16.msra.mxu1 %v14844_v56  ;;  %v14936_v55 = vld [vmem:[#allocation5 + $0x568] ss:$16 sps:$4 sm:$0xff]   ;;  %v14941_v56 = vld [vmem:[#allocation5 + $0x584] ss:$16 sps:$4 sm:$0xff]  }
  0xcf   :  { %7209 = vmatprep.subr.bf16.mxu0 %v14849_v57  ;;  %7947 = vmatprep.subr.bf16.mxu1 %v14852_v58  ;;  %v14944_v57 = vld [vmem:[#allocation5 + $0x58c] ss:$16 sps:$4 sm:$0xff]   ;;  %v14939_v58 = vld [vmem:[#allocation5 + $0x580] ss:$16 sps:$4 sm:$0xff]  }
  0xd2   :  { %7210 = vmatpush1.bf16.msra.mxu0 %v14847_v59  ;;  %7948 = vmatpush1.bf16.msra.mxu1 %v14850_v60  ;;  %v14942_v59 = vld [vmem:[#allocation5 + $0x588] ss:$16 sps:$4 sm:$0xff]   ;;  %v14947_v60 = vld [vmem:[#allocation5 + $0x5a4] ss:$16 sps:$4 sm:$0xff]  }
  0xd3   :  { %7211 = vmatprep.subr.bf16.mxu0 %v14855_v61  ;;  %7949 = vmatprep.subr.bf16.mxu1 %v14858_v62  ;;  %v14950_v61 = vld [vmem:[#allocation5 + $0x5ac] ss:$16 sps:$4 sm:$0xff]   ;;  %v14945_v62 = vld [vmem:[#allocation5 + $0x5a0] ss:$16 sps:$4 sm:$0xff]  }
  0xd6   :  { %7212 = vmatpush1.bf16.msra.mxu0 %v14853_v63  ;;  %7950 = vmatpush1.bf16.msra.mxu1 %v14856_v0  ;;  %v14948_v63 = vld [vmem:[#allocation5 + $0x5a8] ss:$16 sps:$4 sm:$0xff]   ;;  %v14953_v0 = vld [vmem:[#allocation5 + $0x5c4] ss:$16 sps:$4 sm:$0xff]  }
  0xd7   :  { %7213 = vmatprep.subr.bf16.mxu0 %v14861_v1  ;;  %7951 = vmatprep.subr.bf16.mxu1 %v14864_v2  ;;  %v14956_v1 = vld [vmem:[#allocation5 + $0x5cc] ss:$16 sps:$4 sm:$0xff]   ;;  %v14951_v2 = vld [vmem:[#allocation5 + $0x5c0] ss:$16 sps:$4 sm:$0xff]  }
  0xda   :  { %7214 = vmatpush1.bf16.msra.mxu0 %v14859_v3  ;;  %7952 = vmatpush1.bf16.msra.mxu1 %v14862_v4  ;;  %v14954_v3 = vld [vmem:[#allocation5 + $0x5c8] ss:$16 sps:$4 sm:$0xff]   ;;  %v14959_v4 = vld [vmem:[#allocation5 + $0x5e4] ss:$16 sps:$4 sm:$0xff]  }
  0xdb   :  { %7224 = vmatprep.subr.bf16.mxu0 %v14869_v5  ;;  %7962 = vmatprep.subr.bf16.mxu1 %v14872_v6  ;;  %v14962_v5 = vld [vmem:[#allocation5 + $0x5ec] ss:$16 sps:$4 sm:$0xff]   ;;  %v14957_v6 = vld [vmem:[#allocation5 + $0x5e0] ss:$16 sps:$4 sm:$0xff]  }
  0xdd   :  { %7216 = vmatmul.mubr.bf16.vlgmr.msra.gmra.mrb[0].mxu0 %v12577_v7  ;;  %7954 = vmatmul.mubr.bf16.vlgmr.msra.gmra.mrb[0].mxu1 %v12577_v7  ;;  %v14960_v7 = vld [vmem:[#allocation5 + $0x5e8] ss:$16 sps:$4 sm:$0xff]  }
  0xde   :  { %7225 = vmatpush1.bf16.msra.mxu0 %v14867_v8  ;;  %7963 = vmatpush1.bf16.msra.mxu1 %v14870_v9  ;;  %v14967_v8 = vld [vmem:[#allocation5 + $0x604] ss:$16 sps:$4 sm:$0xff]   ;;  %v14970_v9 = vld [vmem:[#allocation5 + $0x60c] ss:$16 sps:$4 sm:$0xff]  }
  0xdf   :  { %7226 = vmatprep.subr.bf16.mxu0 %v14875_v10  ;;  %7964 = vmatprep.subr.bf16.mxu1 %v14878_v12  ;;  %v14965_v10 = vld [vmem:[#allocation5 + $0x600] ss:$16 sps:$4 sm:$0xff]   ;;  %v12579_v12 = vcombine.low %v17000_v11, %v17000_v11  ;;  %v14982_v11 = vld [vmem:[#allocation5 + $0x64c] ss:$16 sps:$4 sm:$0xff]  }
  0xe0   :  { %7256 = vmatprep.mubr.bf16.mxu0 %v12580_v13  ;;  %7994 = vmatprep.mubr.bf16.mxu1 %v12580_v13  ;;  %v14968_v13 = vld [vmem:[#allocation5 + $0x608] ss:$16 sps:$4 sm:$0xff]  }
  0xe2   :  { %7227 = vmatpush1.bf16.msra.mxu0 %v14873_v14  ;;  %7965 = vmatpush1.bf16.msra.mxu1 %v14876_v15  ;;  %v17006_v14 = vld [vmem:[#allocation2 + $0x18] sm:$0xff]  ;;  %v14973_v15 = vld [vmem:[#allocation5 + $0x624] ss:$16 sps:$4 sm:$0xff]  }
  0xe3   :  { %7228 = vmatprep.subr.bf16.mxu0 %v14881_v16  ;;  %7966 = vmatprep.subr.bf16.mxu1 %v14884_v17  ;;  %v14976_v16 = vld [vmem:[#allocation5 + $0x62c] ss:$16 sps:$4 sm:$0xff]   ;;  %v12582_v17 = vcombine.high %v17006_v14, %v17006_v14 }
  0xe6   :  { %7229 = vmatpush1.bf16.msra.mxu0 %v14879_v18  ;;  %7967 = vmatpush1.bf16.msra.mxu1 %v14882_v19  ;;  %v14971_v18 = vld [vmem:[#allocation5 + $0x620] ss:$16 sps:$4 sm:$0xff]   ;;  %v14974_v19 = vld [vmem:[#allocation5 + $0x628] ss:$16 sps:$4 sm:$0xff]  }
  0xe7   :  { %7230 = vmatprep.subr.bf16.mxu0 %v14887_v20  ;;  %7968 = vmatprep.subr.bf16.mxu1 %v14890_v21  ;;  %v14979_v20 = vld [vmem:[#allocation5 + $0x644] ss:$16 sps:$4 sm:$0xff]   ;;  %v14977_v21 = vld [vmem:[#allocation5 + $0x640] ss:$16 sps:$4 sm:$0xff]  }
  0xea   :  { %7231 = vmatpush1.bf16.msra.mxu0 %v14885_v22  ;;  %7969 = vmatpush1.bf16.msra.mxu1 %v14888_v23  ;;  %v14980_v22 = vld [vmem:[#allocation5 + $0x648] ss:$16 sps:$4 sm:$0xff]   ;;  %v14985_v23 = vld [vmem:[#allocation5 + $0x664] ss:$16 sps:$4 sm:$0xff]  }
  0xeb   :  { %7232 = vmatprep.subr.bf16.mxu0 %v14893_v24  ;;  %7970 = vmatprep.subr.bf16.mxu1 %v14896_v25  ;;  %v14988_v24 = vld [vmem:[#allocation5 + $0x66c] ss:$16 sps:$4 sm:$0xff]   ;;  %v14983_v25 = vld [vmem:[#allocation5 + $0x660] ss:$16 sps:$4 sm:$0xff]  }
  0xee   :  { %7233 = vmatpush1.bf16.msra.mxu0 %v14891_v26  ;;  %7971 = vmatpush1.bf16.msra.mxu1 %v14894_v27  ;;  %v14986_v26 = vld [vmem:[#allocation5 + $0x668] ss:$16 sps:$4 sm:$0xff]   ;;  %v14991_v27 = vld [vmem:[#allocation5 + $0x684] ss:$16 sps:$4 sm:$0xff]  }
  0xef   :  { %7234 = vmatprep.subr.bf16.mxu0 %v14899_v28  ;;  %7972 = vmatprep.subr.bf16.mxu1 %v14902_v29  ;;  %v14994_v28 = vld [vmem:[#allocation5 + $0x68c] ss:$16 sps:$4 sm:$0xff]   ;;  %v14989_v29 = vld [vmem:[#allocation5 + $0x680] ss:$16 sps:$4 sm:$0xff]  }
  0xf2   :  { %7235 = vmatpush1.bf16.msra.mxu0 %v14897_v30  ;;  %7973 = vmatpush1.bf16.msra.mxu1 %v14900_v31  ;;  %v14992_v30 = vld [vmem:[#allocation5 + $0x688] ss:$16 sps:$4 sm:$0xff]   ;;  %v14997_v31 = vld [vmem:[#allocation5 + $0x6a4] ss:$16 sps:$4 sm:$0xff]  }
  0xf3   :  { %7236 = vmatprep.subr.bf16.mxu0 %v14905_v32  ;;  %7974 = vmatprep.subr.bf16.mxu1 %v14908_v33  ;;  %v15000_v32 = vld [vmem:[#allocation5 + $0x6ac] ss:$16 sps:$4 sm:$0xff]   ;;  %v14995_v33 = vld [vmem:[#allocation5 + $0x6a0] ss:$16 sps:$4 sm:$0xff]  }
  0xf6   :  { %7237 = vmatpush1.bf16.msra.mxu0 %v14903_v34  ;;  %7975 = vmatpush1.bf16.msra.mxu1 %v14906_v35  ;;  %v14998_v34 = vld [vmem:[#allocation5 + $0x6a8] ss:$16 sps:$4 sm:$0xff]   ;;  %v15003_v35 = vld [vmem:[#allocation5 + $0x6c4] ss:$16 sps:$4 sm:$0xff]  }
  0xf7   :  { %7238 = vmatprep.subr.bf16.mxu0 %v14911_v36  ;;  %7976 = vmatprep.subr.bf16.mxu1 %v14914_v37  ;;  %v15006_v36 = vld [vmem:[#allocation5 + $0x6cc] ss:$16 sps:$4 sm:$0xff]   ;;  %v15001_v37 = vld [vmem:[#allocation5 + $0x6c0] ss:$16 sps:$4 sm:$0xff]  }
  0xfa   :  { %7239 = vmatpush1.bf16.msra.mxu0 %v14909_v38  ;;  %7977 = vmatpush1.bf16.msra.mxu1 %v14912_v39  ;;  %v15004_v38 = vld [vmem:[#allocation5 + $0x6c8] ss:$16 sps:$4 sm:$0xff]   ;;  %v15009_v39 = vld [vmem:[#allocation5 + $0x6e4] ss:$16 sps:$4 sm:$0xff]  }
  0xfb   :  { %7240 = vmatprep.subr.bf16.mxu0 %v14917_v40  ;;  %7978 = vmatprep.subr.bf16.mxu1 %v14920_v41  ;;  %v15012_v40 = vld [vmem:[#allocation5 + $0x6ec] ss:$16 sps:$4 sm:$0xff]   ;;  %v15007_v41 = vld [vmem:[#allocation5 + $0x6e0] ss:$16 sps:$4 sm:$0xff]  }
  0xfe   :  { %7241 = vmatpush1.bf16.msra.mxu0 %v14915_v42  ;;  %7979 = vmatpush1.bf16.msra.mxu1 %v14918_v43  ;;  %v15010_v42 = vld [vmem:[#allocation5 + $0x6e8] ss:$16 sps:$4 sm:$0xff]   ;;  %v15015_v43 = vld [vmem:[#allocation5 + $0x704] ss:$16 sps:$4 sm:$0xff]  }
  0xff   :  { %7242 = vmatprep.subr.bf16.mxu0 %v14923_v44  ;;  %7980 = vmatprep.subr.bf16.mxu1 %v14926_v45  ;;  %v15018_v44 = vld [vmem:[#allocation5 + $0x70c] ss:$16 sps:$4 sm:$0xff]   ;;  %v15013_v45 = vld [vmem:[#allocation5 + $0x700] ss:$16 sps:$4 sm:$0xff]  }
 0x102   :  { %7243 = vmatpush1.bf16.msra.mxu0 %v14921_v46  ;;  %7981 = vmatpush1.bf16.msra.mxu1 %v14924_v47  ;;  %v15016_v46 = vld [vmem:[#allocation5 + $0x708] ss:$16 sps:$4 sm:$0xff]   ;;  %v15021_v47 = vld [vmem:[#allocation5 + $0x724] ss:$16 sps:$4 sm:$0xff]  }
 0x103   :  { %7244 = vmatprep.subr.bf16.mxu0 %v14929_v48  ;;  %7982 = vmatprep.subr.bf16.mxu1 %v14932_v49  ;;  %v15024_v48 = vld [vmem:[#allocation5 + $0x72c] ss:$16 sps:$4 sm:$0xff]   ;;  %v15019_v49 = vld [vmem:[#allocation5 + $0x720] ss:$16 sps:$4 sm:$0xff]  }
 0x106   :  { %7245 = vmatpush1.bf16.msra.mxu0 %v14927_v50  ;;  %7983 = vmatpush1.bf16.msra.mxu1 %v14930_v51  ;;  %v15022_v50 = vld [vmem:[#allocation5 + $0x728] ss:$16 sps:$4 sm:$0xff]   ;;  %v15027_v51 = vld [vmem:[#allocation5 + $0x744] ss:$16 sps:$4 sm:$0xff]  }
 0x107   :  { %7246 = vmatprep.subr.bf16.mxu0 %v14935_v52  ;;  %7984 = vmatprep.subr.bf16.mxu1 %v14938_v53  ;;  %v15030_v52 = vld [vmem:[#allocation5 + $0x74c] ss:$16 sps:$4 sm:$0xff]   ;;  %v15025_v53 = vld [vmem:[#allocation5 + $0x740] ss:$16 sps:$4 sm:$0xff]  }
 0x10a   :  { %7247 = vmatpush1.bf16.msra.mxu0 %v14933_v54  ;;  %7985 = vmatpush1.bf16.msra.mxu1 %v14936_v55  ;;  %v15028_v54 = vld [vmem:[#allocation5 + $0x748] ss:$16 sps:$4 sm:$0xff]   ;;  %v15033_v55 = vld [vmem:[#allocation5 + $0x764] ss:$16 sps:$4 sm:$0xff]  }
 0x10b   :  { %7248 = vmatprep.subr.bf16.mxu0 %v14941_v56  ;;  %7986 = vmatprep.subr.bf16.mxu1 %v14944_v57  ;;  %v15036_v56 = vld [vmem:[#allocation5 + $0x76c] ss:$16 sps:$4 sm:$0xff]   ;;  %v15031_v57 = vld [vmem:[#allocation5 + $0x760] ss:$16 sps:$4 sm:$0xff]  }
 0x10e   :  { %7249 = vmatpush1.bf16.msra.mxu0 %v14939_v58  ;;  %7987 = vmatpush1.bf16.msra.mxu1 %v14942_v59  ;;  %v15034_v58 = vld [vmem:[#allocation5 + $0x768] ss:$16 sps:$4 sm:$0xff]   ;;  %v15039_v59 = vld [vmem:[#allocation5 + $0x784] ss:$16 sps:$4 sm:$0xff]  }
 0x10f   :  { %7250 = vmatprep.subr.bf16.mxu0 %v14947_v60  ;;  %7988 = vmatprep.subr.bf16.mxu1 %v14950_v61  ;;  %v15042_v60 = vld [vmem:[#allocation5 + $0x78c] ss:$16 sps:$4 sm:$0xff]   ;;  %v15037_v61 = vld [vmem:[#allocation5 + $0x780] ss:$16 sps:$4 sm:$0xff]  }
 0x112   :  { %7251 = vmatpush1.bf16.msra.mxu0 %v14945_v62  ;;  %7989 = vmatpush1.bf16.msra.mxu1 %v14948_v63  ;;  %v15040_v62 = vld [vmem:[#allocation5 + $0x788] ss:$16 sps:$4 sm:$0xff]   ;;  %v15045_v63 = vld [vmem:[#allocation5 + $0x7a4] ss:$16 sps:$4 sm:$0xff]  }
 0x113   :  { %7252 = vmatprep.subr.bf16.mxu0 %v14953_v0  ;;  %7990 = vmatprep.subr.bf16.mxu1 %v14956_v1  ;;  %v15048_v0 = vld [vmem:[#allocation5 + $0x7ac] ss:$16 sps:$4 sm:$0xff]   ;;  %v15043_v1 = vld [vmem:[#allocation5 + $0x7a0] ss:$16 sps:$4 sm:$0xff]  }
 0x116   :  { %7253 = vmatpush1.bf16.msra.mxu0 %v14951_v2  ;;  %7991 = vmatpush1.bf16.msra.mxu1 %v14954_v3  ;;  %v15046_v2 = vld [vmem:[#allocation5 + $0x7a8] ss:$16 sps:$4 sm:$0xff]   ;;  %v15051_v3 = vld [vmem:[#allocation5 + $0x7c4] ss:$16 sps:$4 sm:$0xff]  }
 0x117   :  { %7254 = vmatprep.subr.bf16.mxu0 %v14959_v4  ;;  %7992 = vmatprep.subr.bf16.mxu1 %v14962_v5  ;;  %v15054_v4 = vld [vmem:[#allocation5 + $0x7cc] ss:$16 sps:$4 sm:$0xff]   ;;  %v15049_v5 = vld [vmem:[#allocation5 + $0x7c0] ss:$16 sps:$4 sm:$0xff]  }
 0x11a   :  { %7255 = vmatpush1.bf16.msra.mxu0 %v14957_v6  ;;  %7993 = vmatpush1.bf16.msra.mxu1 %v14960_v7  ;;  %v15052_v6 = vld [vmem:[#allocation5 + $0x7c8] ss:$16 sps:$4 sm:$0xff]   ;;  %v15057_v7 = vld [vmem:[#allocation5 + $0x7e4] ss:$16 sps:$4 sm:$0xff]  }
 0x11b   :  { %7265 = vmatprep.subr.bf16.mxu0 %v14967_v8  ;;  %8003 = vmatprep.subr.bf16.mxu1 %v14970_v9  ;;  %v15060_v8 = vld [vmem:[#allocation5 + $0x7ec] ss:$16 sps:$4 sm:$0xff]   ;;  %v15055_v9 = vld [vmem:[#allocation5 + $0x7e0] ss:$16 sps:$4 sm:$0xff]  }
 0x11d   :  { %7257 = vmatmul.mubr.bf16.vlgmr.msra.gmra.mrb[0].mxu0 %v12579_v12  ;;  %7995 = vmatmul.mubr.bf16.vlgmr.msra.gmra.mrb[0].mxu1 %v12579_v12  ;;  %v15065_v12 = vld [vmem:[#allocation5 + $0x804] ss:$16 sps:$4 sm:$0xff]  }
 0x11e   :  { %7266 = vmatpush1.bf16.msra.mxu0 %v14965_v10  ;;  %8004 = vmatpush1.bf16.msra.mxu1 %v14968_v13  ;;  %v15058_v10 = vld [vmem:[#allocation5 + $0x7e8] ss:$16 sps:$4 sm:$0xff]   ;;  %v15068_v13 = vld [vmem:[#allocation5 + $0x80c] ss:$16 sps:$4 sm:$0xff]  }
 0x11f   :  { %7267 = vmatprep.subr.bf16.mxu0 %v14973_v15  ;;  %8005 = vmatprep.subr.bf16.mxu1 %v14976_v16  ;;  %v15063_v15 = vld [vmem:[#allocation5 + $0x800] ss:$16 sps:$4 sm:$0xff]   ;;  %v12581_v16 = vcombine.low %v17006_v14, %v17006_v14  ;;  %v15077_v14 = vld [vmem:[#allocation5 + $0x844] ss:$16 sps:$4 sm:$0xff]  }
 0x120   :  { %7297 = vmatprep.mubr.bf16.mxu0 %v12582_v17  ;;  %8035 = vmatprep.mubr.bf16.mxu1 %v12582_v17  ;;  %v17012_v17 = vld [vmem:[#allocation2 + $0x20] sm:$0xff] }
 0x122   :  { %7268 = vmatpush1.bf16.msra.mxu0 %v14971_v18  ;;  %8006 = vmatpush1.bf16.msra.mxu1 %v14974_v19  ;;  %v15066_v18 = vld [vmem:[#allocation5 + $0x808] ss:$16 sps:$4 sm:$0xff]   ;;  %v15071_v19 = vld [vmem:[#allocation5 + $0x824] ss:$16 sps:$4 sm:$0xff]  }
 0x123   :  { %7269 = vmatprep.subr.bf16.mxu0 %v14979_v20  ;;  %8007 = vmatprep.subr.bf16.mxu1 %v14982_v11  ;;  %v15074_v20 = vld [vmem:[#allocation5 + $0x82c] ss:$16 sps:$4 sm:$0xff]   ;;  %v12584_v11 = vcombine.high %v17012_v17, %v17012_v17 }
 0x126   :  { %7270 = vmatpush1.bf16.msra.mxu0 %v14977_v21  ;;  %8008 = vmatpush1.bf16.msra.mxu1 %v14980_v22  ;;  %v15069_v21 = vld [vmem:[#allocation5 + $0x820] ss:$16 sps:$4 sm:$0xff]   ;;  %v15072_v22 = vld [vmem:[#allocation5 + $0x828] ss:$16 sps:$4 sm:$0xff]  }
 0x127   :  { %7271 = vmatprep.subr.bf16.mxu0 %v14985_v23  ;;  %8009 = vmatprep.subr.bf16.mxu1 %v14988_v24  ;;  %v15080_v23 = vld [vmem:[#allocation5 + $0x84c] ss:$16 sps:$4 sm:$0xff]   ;;  %v15075_v24 = vld [vmem:[#allocation5 + $0x840] ss:$16 sps:$4 sm:$0xff]  }
 0x12a   :  { %7272 = vmatpush1.bf16.msra.mxu0 %v14983_v25  ;;  %8010 = vmatpush1.bf16.msra.mxu1 %v14986_v26  ;;  %v15078_v25 = vld [vmem:[#allocation5 + $0x848] ss:$16 sps:$4 sm:$0xff]   ;;  %v15083_v26 = vld [vmem:[#allocation5 + $0x864] ss:$16 sps:$4 sm:$0xff]  }
 0x12b   :  { %7273 = vmatprep.subr.bf16.mxu0 %v14991_v27  ;;  %8011 = vmatprep.subr.bf16.mxu1 %v14994_v28  ;;  %v15086_v27 = vld [vmem:[#allocation5 + $0x86c] ss:$16 sps:$4 sm:$0xff]   ;;  %v15081_v28 = vld [vmem:[#allocation5 + $0x860] ss:$16 sps:$4 sm:$0xff]  }
 0x12e   :  { %7274 = vmatpush1.bf16.msra.mxu0 %v14989_v29  ;;  %8012 = vmatpush1.bf16.msra.mxu1 %v14992_v30  ;;  %v15084_v29 = vld [vmem:[#allocation5 + $0x868] ss:$16 sps:$4 sm:$0xff]   ;;  %v15089_v30 = vld [vmem:[#allocation5 + $0x884] ss:$16 sps:$4 sm:$0xff]  }
 0x12f   :  { %7275 = vmatprep.subr.bf16.mxu0 %v14997_v31  ;;  %8013 = vmatprep.subr.bf16.mxu1 %v15000_v32  ;;  %v15092_v31 = vld [vmem:[#allocation5 + $0x88c] ss:$16 sps:$4 sm:$0xff]   ;;  %v15087_v32 = vld [vmem:[#allocation5 + $0x880] ss:$16 sps:$4 sm:$0xff]  }
 0x132   :  { %7276 = vmatpush1.bf16.msra.mxu0 %v14995_v33  ;;  %8014 = vmatpush1.bf16.msra.mxu1 %v14998_v34  ;;  %v15090_v33 = vld [vmem:[#allocation5 + $0x888] ss:$16 sps:$4 sm:$0xff]   ;;  %v15095_v34 = vld [vmem:[#allocation5 + $0x8a4] ss:$16 sps:$4 sm:$0xff]  }
 0x133   :  { %7277 = vmatprep.subr.bf16.mxu0 %v15003_v35  ;;  %8015 = vmatprep.subr.bf16.mxu1 %v15006_v36  ;;  %v15098_v35 = vld [vmem:[#allocation5 + $0x8ac] ss:$16 sps:$4 sm:$0xff]   ;;  %v15093_v36 = vld [vmem:[#allocation5 + $0x8a0] ss:$16 sps:$4 sm:$0xff]  }
 0x136   :  { %7278 = vmatpush1.bf16.msra.mxu0 %v15001_v37  ;;  %8016 = vmatpush1.bf16.msra.mxu1 %v15004_v38  ;;  %v15096_v37 = vld [vmem:[#allocation5 + $0x8a8] ss:$16 sps:$4 sm:$0xff]   ;;  %v15101_v38 = vld [vmem:[#allocation5 + $0x8c4] ss:$16 sps:$4 sm:$0xff]  }
 0x137   :  { %7279 = vmatprep.subr.bf16.mxu0 %v15009_v39  ;;  %8017 = vmatprep.subr.bf16.mxu1 %v15012_v40  ;;  %v15104_v39 = vld [vmem:[#allocation5 + $0x8cc] ss:$16 sps:$4 sm:$0xff]   ;;  %v15099_v40 = vld [vmem:[#allocation5 + $0x8c0] ss:$16 sps:$4 sm:$0xff]  }
 0x13a   :  { %7280 = vmatpush1.bf16.msra.mxu0 %v15007_v41  ;;  %8018 = vmatpush1.bf16.msra.mxu1 %v15010_v42  ;;  %v15102_v41 = vld [vmem:[#allocation5 + $0x8c8] ss:$16 sps:$4 sm:$0xff]   ;;  %v15107_v42 = vld [vmem:[#allocation5 + $0x8e4] ss:$16 sps:$4 sm:$0xff]  }
 0x13b   :  { %7281 = vmatprep.subr.bf16.mxu0 %v15015_v43  ;;  %8019 = vmatprep.subr.bf16.mxu1 %v15018_v44  ;;  %v15110_v43 = vld [vmem:[#allocation5 + $0x8ec] ss:$16 sps:$4 sm:$0xff]   ;;  %v15105_v44 = vld [vmem:[#allocation5 + $0x8e0] ss:$16 sps:$4 sm:$0xff]  }
 0x13e   :  { %7282 = vmatpush1.bf16.msra.mxu0 %v15013_v45  ;;  %8020 = vmatpush1.bf16.msra.mxu1 %v15016_v46  ;;  %v15108_v45 = vld [vmem:[#allocation5 + $0x8e8] ss:$16 sps:$4 sm:$0xff]   ;;  %v15113_v46 = vld [vmem:[#allocation5 + $0x904] ss:$16 sps:$4 sm:$0xff]  }
 0x13f   :  { %7283 = vmatprep.subr.bf16.mxu0 %v15021_v47  ;;  %8021 = vmatprep.subr.bf16.mxu1 %v15024_v48  ;;  %v15116_v47 = vld [vmem:[#allocation5 + $0x90c] ss:$16 sps:$4 sm:$0xff]   ;;  %v15111_v48 = vld [vmem:[#allocation5 + $0x900] ss:$16 sps:$4 sm:$0xff]  }
 0x142   :  { %7284 = vmatpush1.bf16.msra.mxu0 %v15019_v49  ;;  %8022 = vmatpush1.bf16.msra.mxu1 %v15022_v50  ;;  %v15114_v49 = vld [vmem:[#allocation5 + $0x908] ss:$16 sps:$4 sm:$0xff]   ;;  %v15119_v50 = vld [vmem:[#allocation5 + $0x924] ss:$16 sps:$4 sm:$0xff]  }
 0x143   :  { %7285 = vmatprep.subr.bf16.mxu0 %v15027_v51  ;;  %8023 = vmatprep.subr.bf16.mxu1 %v15030_v52  ;;  %v15122_v51 = vld [vmem:[#allocation5 + $0x92c] ss:$16 sps:$4 sm:$0xff]   ;;  %v15117_v52 = vld [vmem:[#allocation5 + $0x920] ss:$16 sps:$4 sm:$0xff]  }
 0x146   :  { %7286 = vmatpush1.bf16.msra.mxu0 %v15025_v53  ;;  %8024 = vmatpush1.bf16.msra.mxu1 %v15028_v54  ;;  %v15120_v53 = vld [vmem:[#allocation5 + $0x928] ss:$16 sps:$4 sm:$0xff]   ;;  %v15125_v54 = vld [vmem:[#allocation5 + $0x944] ss:$16 sps:$4 sm:$0xff]  }
 0x147   :  { %7287 = vmatprep.subr.bf16.mxu0 %v15033_v55  ;;  %8025 = vmatprep.subr.bf16.mxu1 %v15036_v56  ;;  %v15128_v55 = vld [vmem:[#allocation5 + $0x94c] ss:$16 sps:$4 sm:$0xff]   ;;  %v15123_v56 = vld [vmem:[#allocation5 + $0x940] ss:$16 sps:$4 sm:$0xff]  }
 0x14a   :  { %7288 = vmatpush1.bf16.msra.mxu0 %v15031_v57  ;;  %8026 = vmatpush1.bf16.msra.mxu1 %v15034_v58  ;;  %v15126_v57 = vld [vmem:[#allocation5 + $0x948] ss:$16 sps:$4 sm:$0xff]   ;;  %v15131_v58 = vld [vmem:[#allocation5 + $0x964] ss:$16 sps:$4 sm:$0xff]  }
 0x14b   :  { %7289 = vmatprep.subr.bf16.mxu0 %v15039_v59  ;;  %8027 = vmatprep.subr.bf16.mxu1 %v15042_v60  ;;  %v15134_v59 = vld [vmem:[#allocation5 + $0x96c] ss:$16 sps:$4 sm:$0xff]   ;;  %v15129_v60 = vld [vmem:[#allocation5 + $0x960] ss:$16 sps:$4 sm:$0xff]  }
 0x14e   :  { %7290 = vmatpush1.bf16.msra.mxu0 %v15037_v61  ;;  %8028 = vmatpush1.bf16.msra.mxu1 %v15040_v62  ;;  %v15132_v61 = vld [vmem:[#allocation5 + $0x968] ss:$16 sps:$4 sm:$0xff]   ;;  %v15137_v62 = vld [vmem:[#allocation5 + $0x984] ss:$16 sps:$4 sm:$0xff]  }
 0x14f   :  { %7291 = vmatprep.subr.bf16.mxu0 %v15045_v63  ;;  %8029 = vmatprep.subr.bf16.mxu1 %v15048_v0  ;;  %v15140_v63 = vld [vmem:[#allocation5 + $0x98c] ss:$16 sps:$4 sm:$0xff]   ;;  %v15135_v0 = vld [vmem:[#allocation5 + $0x980] ss:$16 sps:$4 sm:$0xff]  }
 0x152   :  { %7292 = vmatpush1.bf16.msra.mxu0 %v15043_v1  ;;  %8030 = vmatpush1.bf16.msra.mxu1 %v15046_v2  ;;  %v15138_v1 = vld [vmem:[#allocation5 + $0x988] ss:$16 sps:$4 sm:$0xff]   ;;  %v15143_v2 = vld [vmem:[#allocation5 + $0x9a4] ss:$16 sps:$4 sm:$0xff]  }
 0x153   :  { %7293 = vmatprep.subr.bf16.mxu0 %v15051_v3  ;;  %8031 = vmatprep.subr.bf16.mxu1 %v15054_v4  ;;  %v15146_v3 = vld [vmem:[#allocation5 + $0x9ac] ss:$16 sps:$4 sm:$0xff]   ;;  %v15141_v4 = vld [vmem:[#allocation5 + $0x9a0] ss:$16 sps:$4 sm:$0xff]  }
 0x156   :  { %7294 = vmatpush1.bf16.msra.mxu0 %v15049_v5  ;;  %8032 = vmatpush1.bf16.msra.mxu1 %v15052_v6  ;;  %v15144_v5 = vld [vmem:[#allocation5 + $0x9a8] ss:$16 sps:$4 sm:$0xff]   ;;  %v15149_v6 = vld [vmem:[#allocation5 + $0x9c4] ss:$16 sps:$4 sm:$0xff]  }
 0x157   :  { %7295 = vmatprep.subr.bf16.mxu0 %v15057_v7  ;;  %8033 = vmatprep.subr.bf16.mxu1 %v15060_v8  ;;  %v15152_v7 = vld [vmem:[#allocation5 + $0x9cc] ss:$16 sps:$4 sm:$0xff]   ;;  %v15147_v8 = vld [vmem:[#allocation5 + $0x9c0] ss:$16 sps:$4 sm:$0xff]  }
 0x15a   :  { %7296 = vmatpush1.bf16.msra.mxu0 %v15055_v9  ;;  %8034 = vmatpush1.bf16.msra.mxu1 %v15058_v10  ;;  %v15150_v9 = vld [vmem:[#allocation5 + $0x9c8] ss:$16 sps:$4 sm:$0xff]   ;;  %v15155_v10 = vld [vmem:[#allocation5 + $0x9e4] ss:$16 sps:$4 sm:$0xff]  }
 0x15b   :  { %7306 = vmatprep.subr.bf16.mxu0 %v15065_v12  ;;  %8044 = vmatprep.subr.bf16.mxu1 %v15068_v13  ;;  %v15158_v12 = vld [vmem:[#allocation5 + $0x9ec] ss:$16 sps:$4 sm:$0xff]   ;;  %v15153_v13 = vld [vmem:[#allocation5 + $0x9e0] ss:$16 sps:$4 sm:$0xff]  }
 0x15d   :  { %7298 = vmatmul.mubr.bf16.vlgmr.msra.gmra.mrb[0].mxu0 %v12581_v16  ;;  %8036 = vmatmul.mubr.bf16.vlgmr.msra.gmra.mrb[0].mxu1 %v12581_v16  ;;  %v15163_v16 = vld [vmem:[#allocation5 + $0xa04] ss:$16 sps:$4 sm:$0xff]  }
 0x15e   :  { %7307 = vmatpush1.bf16.msra.mxu0 %v15063_v15  ;;  %8045 = vmatpush1.bf16.msra.mxu1 %v15066_v18  ;;  %v15156_v15 = vld [vmem:[#allocation5 + $0x9e8] ss:$16 sps:$4 sm:$0xff]   ;;  %v15166_v18 = vld [vmem:[#allocation5 + $0xa0c] ss:$16 sps:$4 sm:$0xff]  }
 0x15f   :  { %7308 = vmatprep.subr.bf16.mxu0 %v15071_v19  ;;  %8046 = vmatprep.subr.bf16.mxu1 %v15074_v20  ;;  %v17016_v19 = vld [vmem:[#allocation2 + $0x28] sm:$0xff]  ;;  %v12583_v20 = vcombine.low %v17012_v17, %v17012_v17  ;;  %v15175_v17 = vld [vmem:[#allocation5 + $0xa44] ss:$16 sps:$4 sm:$0xff]  }
 0x160   :  { %7338 = vmatprep.mubr.bf16.mxu0 %v12584_v11  ;;  %8076 = vmatprep.mubr.bf16.mxu1 %v12584_v11  ;;  %v15161_v11 = vld [vmem:[#allocation5 + $0xa00] ss:$16 sps:$4 sm:$0xff]  }
 0x162   :  { %7309 = vmatpush1.bf16.msra.mxu0 %v15069_v21  ;;  %8047 = vmatpush1.bf16.msra.mxu1 %v15072_v22  ;;  %v15164_v21 = vld [vmem:[#allocation5 + $0xa08] ss:$16 sps:$4 sm:$0xff]   ;;  %v15169_v22 = vld [vmem:[#allocation5 + $0xa24] ss:$16 sps:$4 sm:$0xff]  }
 0x163   :  { %7310 = vmatprep.subr.bf16.mxu0 %v15077_v14  ;;  %8048 = vmatprep.subr.bf16.mxu1 %v15080_v23  ;;  %v15172_v14 = vld [vmem:[#allocation5 + $0xa2c] ss:$16 sps:$4 sm:$0xff]   ;;  %v12586_v23 = vcombine.high %v17016_v19, %v17016_v19 }
 0x166   :  { %7311 = vmatpush1.bf16.msra.mxu0 %v15075_v24  ;;  %8049 = vmatpush1.bf16.msra.mxu1 %v15078_v25  ;;  %v15167_v24 = vld [vmem:[#allocation5 + $0xa20] ss:$16 sps:$4 sm:$0xff]   ;;  %v15170_v25 = vld [vmem:[#allocation5 + $0xa28] ss:$16 sps:$4 sm:$0xff]  }
 0x167   :  { %7312 = vmatprep.subr.bf16.mxu0 %v15083_v26  ;;  %8050 = vmatprep.subr.bf16.mxu1 %v15086_v27  ;;  %v15178_v26 = vld [vmem:[#allocation5 + $0xa4c] ss:$16 sps:$4 sm:$0xff]   ;;  %v15173_v27 = vld [vmem:[#allocation5 + $0xa40] ss:$16 sps:$4 sm:$0xff]  }
 0x16a   :  { %7313 = vmatpush1.bf16.msra.mxu0 %v15081_v28  ;;  %8051 = vmatpush1.bf16.msra.mxu1 %v15084_v29  ;;  %v15176_v28 = vld [vmem:[#allocation5 + $0xa48] ss:$16 sps:$4 sm:$0xff]   ;;  %v15181_v29 = vld [vmem:[#allocation5 + $0xa64] ss:$16 sps:$4 sm:$0xff]  }
 0x16b   :  { %7314 = vmatprep.subr.bf16.mxu0 %v15089_v30  ;;  %8052 = vmatprep.subr.bf16.mxu1 %v15092_v31  ;;  %v15184_v30 = vld [vmem:[#allocation5 + $0xa6c] ss:$16 sps:$4 sm:$0xff]   ;;  %v15179_v31 = vld [vmem:[#allocation5 + $0xa60] ss:$16 sps:$4 sm:$0xff]  }
 0x16e   :  { %7315 = vmatpush1.bf16.msra.mxu0 %v15087_v32  ;;  %8053 = vmatpush1.bf16.msra.mxu1 %v15090_v33  ;;  %v15182_v32 = vld [vmem:[#allocation5 + $0xa68] ss:$16 sps:$4 sm:$0xff]   ;;  %v15187_v33 = vld [vmem:[#allocation5 + $0xa84] ss:$16 sps:$4 sm:$0xff]  }
 0x16f   :  { %7316 = vmatprep.subr.bf16.mxu0 %v15095_v34  ;;  %8054 = vmatprep.subr.bf16.mxu1 %v15098_v35  ;;  %v15190_v34 = vld [vmem:[#allocation5 + $0xa8c] ss:$16 sps:$4 sm:$0xff]   ;;  %v15185_v35 = vld [vmem:[#allocation5 + $0xa80] ss:$16 sps:$4 sm:$0xff]  }
 0x172   :  { %7317 = vmatpush1.bf16.msra.mxu0 %v15093_v36  ;;  %8055 = vmatpush1.bf16.msra.mxu1 %v15096_v37  ;;  %v15188_v36 = vld [vmem:[#allocation5 + $0xa88] ss:$16 sps:$4 sm:$0xff]   ;;  %v15193_v37 = vld [vmem:[#allocation5 + $0xaa4] ss:$16 sps:$4 sm:$0xff]  }
 0x173   :  { %7318 = vmatprep.subr.bf16.mxu0 %v15101_v38  ;;  %8056 = vmatprep.subr.bf16.mxu1 %v15104_v39  ;;  %v15196_v38 = vld [vmem:[#allocation5 + $0xaac] ss:$16 sps:$4 sm:$0xff]   ;;  %v15191_v39 = vld [vmem:[#allocation5 + $0xaa0] ss:$16 sps:$4 sm:$0xff]  }
 0x176   :  { %7319 = vmatpush1.bf16.msra.mxu0 %v15099_v40  ;;  %8057 = vmatpush1.bf16.msra.mxu1 %v15102_v41  ;;  %v15194_v40 = vld [vmem:[#allocation5 + $0xaa8] ss:$16 sps:$4 sm:$0xff]   ;;  %v15199_v41 = vld [vmem:[#allocation5 + $0xac4] ss:$16 sps:$4 sm:$0xff]  }
 0x177   :  { %7320 = vmatprep.subr.bf16.mxu0 %v15107_v42  ;;  %8058 = vmatprep.subr.bf16.mxu1 %v15110_v43  ;;  %v15202_v42 = vld [vmem:[#allocation5 + $0xacc] ss:$16 sps:$4 sm:$0xff]   ;;  %v15197_v43 = vld [vmem:[#allocation5 + $0xac0] ss:$16 sps:$4 sm:$0xff]  }
 0x17a   :  { %7321 = vmatpush1.bf16.msra.mxu0 %v15105_v44  ;;  %8059 = vmatpush1.bf16.msra.mxu1 %v15108_v45  ;;  %v15200_v44 = vld [vmem:[#allocation5 + $0xac8] ss:$16 sps:$4 sm:$0xff]   ;;  %v15205_v45 = vld [vmem:[#allocation5 + $0xae4] ss:$16 sps:$4 sm:$0xff]  }
 0x17b   :  { %7322 = vmatprep.subr.bf16.mxu0 %v15113_v46  ;;  %8060 = vmatprep.subr.bf16.mxu1 %v15116_v47  ;;  %v15208_v46 = vld [vmem:[#allocation5 + $0xaec] ss:$16 sps:$4 sm:$0xff]   ;;  %v15203_v47 = vld [vmem:[#allocation5 + $0xae0] ss:$16 sps:$4 sm:$0xff]  }
 0x17e   :  { %7323 = vmatpush1.bf16.msra.mxu0 %v15111_v48  ;;  %8061 = vmatpush1.bf16.msra.mxu1 %v15114_v49  ;;  %v15206_v48 = vld [vmem:[#allocation5 + $0xae8] ss:$16 sps:$4 sm:$0xff]   ;;  %v15211_v49 = vld [vmem:[#allocation5 + $0xb04] ss:$16 sps:$4 sm:$0xff]  }
 0x17f   :  { %7324 = vmatprep.subr.bf16.mxu0 %v15119_v50  ;;  %8062 = vmatprep.subr.bf16.mxu1 %v15122_v51  ;;  %v15214_v50 = vld [vmem:[#allocation5 + $0xb0c] ss:$16 sps:$4 sm:$0xff]   ;;  %v15209_v51 = vld [vmem:[#allocation5 + $0xb00] ss:$16 sps:$4 sm:$0xff]  }
 0x182   :  { %7325 = vmatpush1.bf16.msra.mxu0 %v15117_v52  ;;  %8063 = vmatpush1.bf16.msra.mxu1 %v15120_v53  ;;  %v15212_v52 = vld [vmem:[#allocation5 + $0xb08] ss:$16 sps:$4 sm:$0xff]   ;;  %v15217_v53 = vld [vmem:[#allocation5 + $0xb24] ss:$16 sps:$4 sm:$0xff]  }
 0x183   :  { %7326 = vmatprep.subr.bf16.mxu0 %v15125_v54  ;;  %8064 = vmatprep.subr.bf16.mxu1 %v15128_v55  ;;  %v15220_v54 = vld [vmem:[#allocation5 + $0xb2c] ss:$16 sps:$4 sm:$0xff]   ;;  %v15215_v55 = vld [vmem:[#allocation5 + $0xb20] ss:$16 sps:$4 sm:$0xff]  }
 0x186   :  { %7327 = vmatpush1.bf16.msra.mxu0 %v15123_v56  ;;  %8065 = vmatpush1.bf16.msra.mxu1 %v15126_v57  ;;  %v15218_v56 = vld [vmem:[#allocation5 + $0xb28] ss:$16 sps:$4 sm:$0xff]   ;;  %v15223_v57 = vld [vmem:[#allocation5 + $0xb44] ss:$16 sps:$4 sm:$0xff]  }
 0x187   :  { %7328 = vmatprep.subr.bf16.mxu0 %v15131_v58  ;;  %8066 = vmatprep.subr.bf16.mxu1 %v15134_v59  ;;  %v15226_v58 = vld [vmem:[#allocation5 + $0xb4c] ss:$16 sps:$4 sm:$0xff]   ;;  %v15221_v59 = vld [vmem:[#allocation5 + $0xb40] ss:$16 sps:$4 sm:$0xff]  }
 0x18a   :  { %7329 = vmatpush1.bf16.msra.mxu0 %v15129_v60  ;;  %8067 = vmatpush1.bf16.msra.mxu1 %v15132_v61  ;;  %v15224_v60 = vld [vmem:[#allocation5 + $0xb48] ss:$16 sps:$4 sm:$0xff]   ;;  %v15229_v61 = vld [vmem:[#allocation5 + $0xb64] ss:$16 sps:$4 sm:$0xff]  }
 0x18b   :  { %7330 = vmatprep.subr.bf16.mxu0 %v15137_v62  ;;  %8068 = vmatprep.subr.bf16.mxu1 %v15140_v63  ;;  %v15232_v62 = vld [vmem:[#allocation5 + $0xb6c] ss:$16 sps:$4 sm:$0xff]   ;;  %v15227_v63 = vld [vmem:[#allocation5 + $0xb60] ss:$16 sps:$4 sm:$0xff]  }
 0x18e   :  { %7331 = vmatpush1.bf16.msra.mxu0 %v15135_v0  ;;  %8069 = vmatpush1.bf16.msra.mxu1 %v15138_v1  ;;  %v15230_v0 = vld [vmem:[#allocation5 + $0xb68] ss:$16 sps:$4 sm:$0xff]   ;;  %v15235_v1 = vld [vmem:[#allocation5 + $0xb84] ss:$16 sps:$4 sm:$0xff]  }
 0x18f   :  { %7332 = vmatprep.subr.bf16.mxu0 %v15143_v2  ;;  %8070 = vmatprep.subr.bf16.mxu1 %v15146_v3  ;;  %v15238_v2 = vld [vmem:[#allocation5 + $0xb8c] ss:$16 sps:$4 sm:$0xff]   ;;  %v15233_v3 = vld [vmem:[#allocation5 + $0xb80] ss:$16 sps:$4 sm:$0xff]  }
 0x192   :  { %7333 = vmatpush1.bf16.msra.mxu0 %v15141_v4  ;;  %8071 = vmatpush1.bf16.msra.mxu1 %v15144_v5  ;;  %v15236_v4 = vld [vmem:[#allocation5 + $0xb88] ss:$16 sps:$4 sm:$0xff]   ;;  %v15241_v5 = vld [vmem:[#allocation5 + $0xba4] ss:$16 sps:$4 sm:$0xff]  }
 0x193   :  { %7334 = vmatprep.subr.bf16.mxu0 %v15149_v6  ;;  %8072 = vmatprep.subr.bf16.mxu1 %v15152_v7  ;;  %v15244_v6 = vld [vmem:[#allocation5 + $0xbac] ss:$16 sps:$4 sm:$0xff]   ;;  %v15239_v7 = vld [vmem:[#allocation5 + $0xba0] ss:$16 sps:$4 sm:$0xff]  }
 0x196   :  { %7335 = vmatpush1.bf16.msra.mxu0 %v15147_v8  ;;  %8073 = vmatpush1.bf16.msra.mxu1 %v15150_v9  ;;  %v15242_v8 = vld [vmem:[#allocation5 + $0xba8] ss:$16 sps:$4 sm:$0xff]   ;;  %v15247_v9 = vld [vmem:[#allocation5 + $0xbc4] ss:$16 sps:$4 sm:$0xff]  }
 0x197   :  { %7336 = vmatprep.subr.bf16.mxu0 %v15155_v10  ;;  %8074 = vmatprep.subr.bf16.mxu1 %v15158_v12  ;;  %v15250_v10 = vld [vmem:[#allocation5 + $0xbcc] ss:$16 sps:$4 sm:$0xff]   ;;  %v15245_v12 = vld [vmem:[#allocation5 + $0xbc0] ss:$16 sps:$4 sm:$0xff]  }
 0x19a   :  { %7337 = vmatpush1.bf16.msra.mxu0 %v15153_v13  ;;  %8075 = vmatpush1.bf16.msra.mxu1 %v15156_v15  ;;  %v15248_v13 = vld [vmem:[#allocation5 + $0xbc8] ss:$16 sps:$4 sm:$0xff]   ;;  %v15253_v15 = vld [vmem:[#allocation5 + $0xbe4] ss:$16 sps:$4 sm:$0xff]  }
 0x19b   :  { %7347 = vmatprep.subr.bf16.mxu0 %v15163_v16  ;;  %8085 = vmatprep.subr.bf16.mxu1 %v15166_v18  ;;  %v15256_v16 = vld [vmem:[#allocation5 + $0xbec] ss:$16 sps:$4 sm:$0xff]   ;;  %v15251_v18 = vld [vmem:[#allocation5 + $0xbe0] ss:$16 sps:$4 sm:$0xff]  }
 0x19d   :  { %7339 = vmatmul.mubr.bf16.vlgmr.msra.gmra.mrb[0].mxu0 %v12583_v20  ;;  %8077 = vmatmul.mubr.bf16.vlgmr.msra.gmra.mrb[0].mxu1 %v12583_v20  ;;  %v15254_v20 = vld [vmem:[#allocation5 + $0xbe8] ss:$16 sps:$4 sm:$0xff]  }
 0x19e   :  { %7348 = vmatpush1.bf16.msra.mxu0 %v15161_v11  ;;  %8086 = vmatpush1.bf16.msra.mxu1 %v15164_v21  ;;  %v15261_v11 = vld [vmem:[#allocation5 + $0xc04] ss:$16 sps:$4 sm:$0xff]   ;;  %v15264_v21 = vld [vmem:[#allocation5 + $0xc0c] ss:$16 sps:$4 sm:$0xff]  }
 0x19f   :  { %7349 = vmatprep.subr.bf16.mxu0 %v15169_v22  ;;  %8087 = vmatprep.subr.bf16.mxu1 %v15172_v14  ;;  %v17022_v22 = vld [vmem:[#allocation2 + $0x30] sm:$0xff]  ;;  %v12585_v14 = vcombine.low %v17016_v19, %v17016_v19 }
 0x1a0   :  { %7379 = vmatprep.mubr.bf16.mxu0 %v12586_v23  ;;  %8117 = vmatprep.mubr.bf16.mxu1 %v12586_v23  ;;  %v15259_v23 = vld [vmem:[#allocation5 + $0xc00] ss:$16 sps:$4 sm:$0xff]   ;;  %v15273_v19 = vld [vmem:[#allocation5 + $0xc44] ss:$16 sps:$4 sm:$0xff]  }
 0x1a2   :  { %7350 = vmatpush1.bf16.msra.mxu0 %v15167_v24  ;;  %8088 = vmatpush1.bf16.msra.mxu1 %v15170_v25  ;;  %v15262_v24 = vld [vmem:[#allocation5 + $0xc08] ss:$16 sps:$4 sm:$0xff]   ;;  %v15267_v25 = vld [vmem:[#allocation5 + $0xc24] ss:$16 sps:$4 sm:$0xff]  }
 0x1a3   :  { %7351 = vmatprep.subr.bf16.mxu0 %v15175_v17  ;;  %8089 = vmatprep.subr.bf16.mxu1 %v15178_v26  ;;  %v15270_v17 = vld [vmem:[#allocation5 + $0xc2c] ss:$16 sps:$4 sm:$0xff]   ;;  %v12588_v26 = vcombine.high %v17022_v22, %v17022_v22 }
 0x1a6   :  { %7352 = vmatpush1.bf16.msra.mxu0 %v15173_v27  ;;  %8090 = vmatpush1.bf16.msra.mxu1 %v15176_v28  ;;  %v15265_v27 = vld [vmem:[#allocation5 + $0xc20] ss:$16 sps:$4 sm:$0xff]   ;;  %v15268_v28 = vld [vmem:[#allocation5 + $0xc28] ss:$16 sps:$4 sm:$0xff]  }
 0x1a7   :  { %7353 = vmatprep.subr.bf16.mxu0 %v15181_v29  ;;  %8091 = vmatprep.subr.bf16.mxu1 %v15184_v30  ;;  %v15276_v29 = vld [vmem:[#allocation5 + $0xc4c] ss:$16 sps:$4 sm:$0xff]   ;;  %v15271_v30 = vld [vmem:[#allocation5 + $0xc40] ss:$16 sps:$4 sm:$0xff]  }
 0x1aa   :  { %7354 = vmatpush1.bf16.msra.mxu0 %v15179_v31  ;;  %8092 = vmatpush1.bf16.msra.mxu1 %v15182_v32  ;;  %v15274_v31 = vld [vmem:[#allocation5 + $0xc48] ss:$16 sps:$4 sm:$0xff]   ;;  %v15279_v32 = vld [vmem:[#allocation5 + $0xc64] ss:$16 sps:$4 sm:$0xff]  }
 0x1ab   :  { %7355 = vmatprep.subr.bf16.mxu0 %v15187_v33  ;;  %8093 = vmatprep.subr.bf16.mxu1 %v15190_v34  ;;  %v15282_v33 = vld [vmem:[#allocation5 + $0xc6c] ss:$16 sps:$4 sm:$0xff]   ;;  %v15277_v34 = vld [vmem:[#allocation5 + $0xc60] ss:$16 sps:$4 sm:$0xff]  }
 0x1ae   :  { %7356 = vmatpush1.bf16.msra.mxu0 %v15185_v35  ;;  %8094 = vmatpush1.bf16.msra.mxu1 %v15188_v36  ;;  %v15280_v35 = vld [vmem:[#allocation5 + $0xc68] ss:$16 sps:$4 sm:$0xff]   ;;  %v15285_v36 = vld [vmem:[#allocation5 + $0xc84] ss:$16 sps:$4 sm:$0xff]  }
 0x1af   :  { %7357 = vmatprep.subr.bf16.mxu0 %v15193_v37  ;;  %8095 = vmatprep.subr.bf16.mxu1 %v15196_v38  ;;  %v15288_v37 = vld [vmem:[#allocation5 + $0xc8c] ss:$16 sps:$4 sm:$0xff]   ;;  %v15283_v38 = vld [vmem:[#allocation5 + $0xc80] ss:$16 sps:$4 sm:$0xff]  }
 0x1b2   :  { %7358 = vmatpush1.bf16.msra.mxu0 %v15191_v39  ;;  %8096 = vmatpush1.bf16.msra.mxu1 %v15194_v40  ;;  %v15286_v39 = vld [vmem:[#allocation5 + $0xc88] ss:$16 sps:$4 sm:$0xff]   ;;  %v15291_v40 = vld [vmem:[#allocation5 + $0xca4] ss:$16 sps:$4 sm:$0xff]  }
 0x1b3   :  { %7359 = vmatprep.subr.bf16.mxu0 %v15199_v41  ;;  %8097 = vmatprep.subr.bf16.mxu1 %v15202_v42  ;;  %v15294_v41 = vld [vmem:[#allocation5 + $0xcac] ss:$16 sps:$4 sm:$0xff]   ;;  %v15289_v42 = vld [vmem:[#allocation5 + $0xca0] ss:$16 sps:$4 sm:$0xff]  }
 0x1b6   :  { %7360 = vmatpush1.bf16.msra.mxu0 %v15197_v43  ;;  %8098 = vmatpush1.bf16.msra.mxu1 %v15200_v44  ;;  %v15292_v43 = vld [vmem:[#allocation5 + $0xca8] ss:$16 sps:$4 sm:$0xff]   ;;  %v15297_v44 = vld [vmem:[#allocation5 + $0xcc4] ss:$16 sps:$4 sm:$0xff]  }
 0x1b7   :  { %7361 = vmatprep.subr.bf16.mxu0 %v15205_v45  ;;  %8099 = vmatprep.subr.bf16.mxu1 %v15208_v46  ;;  %v15300_v45 = vld [vmem:[#allocation5 + $0xccc] ss:$16 sps:$4 sm:$0xff]   ;;  %v15295_v46 = vld [vmem:[#allocation5 + $0xcc0] ss:$16 sps:$4 sm:$0xff]  }
 0x1ba   :  { %7362 = vmatpush1.bf16.msra.mxu0 %v15203_v47  ;;  %8100 = vmatpush1.bf16.msra.mxu1 %v15206_v48  ;;  %v15298_v47 = vld [vmem:[#allocation5 + $0xcc8] ss:$16 sps:$4 sm:$0xff]   ;;  %v15303_v48 = vld [vmem:[#allocation5 + $0xce4] ss:$16 sps:$4 sm:$0xff]  }
 0x1bb   :  { %7363 = vmatprep.subr.bf16.mxu0 %v15211_v49  ;;  %8101 = vmatprep.subr.bf16.mxu1 %v15214_v50  ;;  %v15306_v49 = vld [vmem:[#allocation5 + $0xcec] ss:$16 sps:$4 sm:$0xff]   ;;  %v15301_v50 = vld [vmem:[#allocation5 + $0xce0] ss:$16 sps:$4 sm:$0xff]  }
 0x1be   :  { %7364 = vmatpush1.bf16.msra.mxu0 %v15209_v51  ;;  %8102 = vmatpush1.bf16.msra.mxu1 %v15212_v52  ;;  %v15304_v51 = vld [vmem:[#allocation5 + $0xce8] ss:$16 sps:$4 sm:$0xff]   ;;  %v15309_v52 = vld [vmem:[#allocation5 + $0xd04] ss:$16 sps:$4 sm:$0xff]  }
 0x1bf   :  { %7365 = vmatprep.subr.bf16.mxu0 %v15217_v53  ;;  %8103 = vmatprep.subr.bf16.mxu1 %v15220_v54  ;;  %v15312_v53 = vld [vmem:[#allocation5 + $0xd0c] ss:$16 sps:$4 sm:$0xff]   ;;  %v15307_v54 = vld [vmem:[#allocation5 + $0xd00] ss:$16 sps:$4 sm:$0xff]  }
 0x1c2   :  { %7366 = vmatpush1.bf16.msra.mxu0 %v15215_v55  ;;  %8104 = vmatpush1.bf16.msra.mxu1 %v15218_v56  ;;  %v15310_v55 = vld [vmem:[#allocation5 + $0xd08] ss:$16 sps:$4 sm:$0xff]   ;;  %v15315_v56 = vld [vmem:[#allocation5 + $0xd24] ss:$16 sps:$4 sm:$0xff]  }
 0x1c3   :  { %7367 = vmatprep.subr.bf16.mxu0 %v15223_v57  ;;  %8105 = vmatprep.subr.bf16.mxu1 %v15226_v58  ;;  %v15318_v57 = vld [vmem:[#allocation5 + $0xd2c] ss:$16 sps:$4 sm:$0xff]   ;;  %v15313_v58 = vld [vmem:[#allocation5 + $0xd20] ss:$16 sps:$4 sm:$0xff]  }
 0x1c6   :  { %7368 = vmatpush1.bf16.msra.mxu0 %v15221_v59  ;;  %8106 = vmatpush1.bf16.msra.mxu1 %v15224_v60  ;;  %v15316_v59 = vld [vmem:[#allocation5 + $0xd28] ss:$16 sps:$4 sm:$0xff]   ;;  %v15321_v60 = vld [vmem:[#allocation5 + $0xd44] ss:$16 sps:$4 sm:$0xff]  }
 0x1c7   :  { %7369 = vmatprep.subr.bf16.mxu0 %v15229_v61  ;;  %8107 = vmatprep.subr.bf16.mxu1 %v15232_v62  ;;  %v15324_v61 = vld [vmem:[#allocation5 + $0xd4c] ss:$16 sps:$4 sm:$0xff]   ;;  %v15319_v62 = vld [vmem:[#allocation5 + $0xd40] ss:$16 sps:$4 sm:$0xff]  }
 0x1ca   :  { %7370 = vmatpush1.bf16.msra.mxu0 %v15227_v63  ;;  %8108 = vmatpush1.bf16.msra.mxu1 %v15230_v0  ;;  %v15322_v63 = vld [vmem:[#allocation5 + $0xd48] ss:$16 sps:$4 sm:$0xff]   ;;  %v15327_v0 = vld [vmem:[#allocation5 + $0xd64] ss:$16 sps:$4 sm:$0xff]  }
 0x1cb   :  { %7371 = vmatprep.subr.bf16.mxu0 %v15235_v1  ;;  %8109 = vmatprep.subr.bf16.mxu1 %v15238_v2  ;;  %v15330_v1 = vld [vmem:[#allocation5 + $0xd6c] ss:$16 sps:$4 sm:$0xff]   ;;  %v15325_v2 = vld [vmem:[#allocation5 + $0xd60] ss:$16 sps:$4 sm:$0xff]  }
 0x1ce   :  { %7372 = vmatpush1.bf16.msra.mxu0 %v15233_v3  ;;  %8110 = vmatpush1.bf16.msra.mxu1 %v15236_v4  ;;  %v15328_v3 = vld [vmem:[#allocation5 + $0xd68] ss:$16 sps:$4 sm:$0xff]   ;;  %v15333_v4 = vld [vmem:[#allocation5 + $0xd84] ss:$16 sps:$4 sm:$0xff]  }
 0x1cf   :  { %7373 = vmatprep.subr.bf16.mxu0 %v15241_v5  ;;  %8111 = vmatprep.subr.bf16.mxu1 %v15244_v6  ;;  %v15336_v5 = vld [vmem:[#allocation5 + $0xd8c] ss:$16 sps:$4 sm:$0xff]   ;;  %v15331_v6 = vld [vmem:[#allocation5 + $0xd80] ss:$16 sps:$4 sm:$0xff]  }
 0x1d2   :  { %7374 = vmatpush1.bf16.msra.mxu0 %v15239_v7  ;;  %8112 = vmatpush1.bf16.msra.mxu1 %v15242_v8  ;;  %v15334_v7 = vld [vmem:[#allocation5 + $0xd88] ss:$16 sps:$4 sm:$0xff]   ;;  %v15339_v8 = vld [vmem:[#allocation5 + $0xda4] ss:$16 sps:$4 sm:$0xff]  }
 0x1d3   :  { %7375 = vmatprep.subr.bf16.mxu0 %v15247_v9  ;;  %8113 = vmatprep.subr.bf16.mxu1 %v15250_v10  ;;  %v15342_v9 = vld [vmem:[#allocation5 + $0xdac] ss:$16 sps:$4 sm:$0xff]   ;;  %v15337_v10 = vld [vmem:[#allocation5 + $0xda0] ss:$16 sps:$4 sm:$0xff]  }
 0x1d6   :  { %7376 = vmatpush1.bf16.msra.mxu0 %v15245_v12  ;;  %8114 = vmatpush1.bf16.msra.mxu1 %v15248_v13  ;;  %v15340_v12 = vld [vmem:[#allocation5 + $0xda8] ss:$16 sps:$4 sm:$0xff]   ;;  %v15345_v13 = vld [vmem:[#allocation5 + $0xdc4] ss:$16 sps:$4 sm:$0xff]  }
 0x1d7   :  { %7377 = vmatprep.subr.bf16.mxu0 %v15253_v15  ;;  %8115 = vmatprep.subr.bf16.mxu1 %v15256_v16  ;;  %v15348_v15 = vld [vmem:[#allocation5 + $0xdcc] ss:$16 sps:$4 sm:$0xff]   ;;  %v15343_v16 = vld [vmem:[#allocation5 + $0xdc0] ss:$16 sps:$4 sm:$0xff]  }
 0x1da   :  { %7378 = vmatpush1.bf16.msra.mxu0 %v15251_v18  ;;  %8116 = vmatpush1.bf16.msra.mxu1 %v15254_v20  ;;  %v15346_v18 = vld [vmem:[#allocation5 + $0xdc8] ss:$16 sps:$4 sm:$0xff]   ;;  %v15351_v20 = vld [vmem:[#allocation5 + $0xde4] ss:$16 sps:$4 sm:$0xff]  }
 0x1db   :  { %7388 = vmatprep.subr.bf16.mxu0 %v15261_v11  ;;  %8126 = vmatprep.subr.bf16.mxu1 %v15264_v21  ;;  %v15354_v11 = vld [vmem:[#allocation5 + $0xdec] ss:$16 sps:$4 sm:$0xff]   ;;  %v15349_v21 = vld [vmem:[#allocation5 + $0xde0] ss:$16 sps:$4 sm:$0xff]  }
 0x1dd   :  { %7380 = vmatmul.mubr.bf16.vlgmr.msra.gmra.mrb[0].mxu0 %v12585_v14  ;;  %8118 = vmatmul.mubr.bf16.vlgmr.msra.gmra.mrb[0].mxu1 %v12585_v14  ;;  %v15352_v14 = vld [vmem:[#allocation5 + $0xde8] ss:$16 sps:$4 sm:$0xff]  }
 0x1de   :  { %7389 = vmatpush1.bf16.msra.mxu0 %v15259_v23  ;;  %8127 = vmatpush1.bf16.msra.mxu1 %v15262_v24  ;;  %v15359_v23 = vld [vmem:[#allocation5 + $0xe04] ss:$16 sps:$4 sm:$0xff]   ;;  %v15362_v24 = vld [vmem:[#allocation5 + $0xe0c] ss:$16 sps:$4 sm:$0xff]  }
 0x1df   :  { %7390 = vmatprep.subr.bf16.mxu0 %v15267_v25  ;;  %8128 = vmatprep.subr.bf16.mxu1 %v15270_v17  ;;  %v17028_v25 = vld [vmem:[#allocation2 + $0x38] sm:$0xff]  ;;  %v12587_v17 = vcombine.low %v17022_v22, %v17022_v22  ;;  %v15371_v22 = vld [vmem:[#allocation5 + $0xe44] ss:$16 sps:$4 sm:$0xff]  }
 0x1e0   :  { %7420 = vmatprep.mubr.bf16.mxu0 %v12588_v26  ;;  %8158 = vmatprep.mubr.bf16.mxu1 %v12588_v26  ;;  %v15357_v26 = vld [vmem:[#allocation5 + $0xe00] ss:$16 sps:$4 sm:$0xff]  }
 0x1e2   :  { %7391 = vmatpush1.bf16.msra.mxu0 %v15265_v27  ;;  %8129 = vmatpush1.bf16.msra.mxu1 %v15268_v28  ;;  %v15360_v27 = vld [vmem:[#allocation5 + $0xe08] ss:$16 sps:$4 sm:$0xff]   ;;  %v15365_v28 = vld [vmem:[#allocation5 + $0xe24] ss:$16 sps:$4 sm:$0xff]  }
 0x1e3   :  { %7392 = vmatprep.subr.bf16.mxu0 %v15273_v19  ;;  %8130 = vmatprep.subr.bf16.mxu1 %v15276_v29  ;;  %v15368_v19 = vld [vmem:[#allocation5 + $0xe2c] ss:$16 sps:$4 sm:$0xff]   ;;  %v12590_v29 = vcombine.high %v17028_v25, %v17028_v25 }
 0x1e6   :  { %7393 = vmatpush1.bf16.msra.mxu0 %v15271_v30  ;;  %8131 = vmatpush1.bf16.msra.mxu1 %v15274_v31  ;;  %v15363_v30 = vld [vmem:[#allocation5 + $0xe20] ss:$16 sps:$4 sm:$0xff]   ;;  %v15366_v31 = vld [vmem:[#allocation5 + $0xe28] ss:$16 sps:$4 sm:$0xff]  }
 0x1e7   :  { %7394 = vmatprep.subr.bf16.mxu0 %v15279_v32  ;;  %8132 = vmatprep.subr.bf16.mxu1 %v15282_v33  ;;  %v15374_v32 = vld [vmem:[#allocation5 + $0xe4c] ss:$16 sps:$4 sm:$0xff]   ;;  %v15369_v33 = vld [vmem:[#allocation5 + $0xe40] ss:$16 sps:$4 sm:$0xff]  }
 0x1ea   :  { %7395 = vmatpush1.bf16.msra.mxu0 %v15277_v34  ;;  %8133 = vmatpush1.bf16.msra.mxu1 %v15280_v35  ;;  %v15372_v34 = vld [vmem:[#allocation5 + $0xe48] ss:$16 sps:$4 sm:$0xff]   ;;  %v15377_v35 = vld [vmem:[#allocation5 + $0xe64] ss:$16 sps:$4 sm:$0xff]  }
 0x1eb   :  { %7396 = vmatprep.subr.bf16.mxu0 %v15285_v36  ;;  %8134 = vmatprep.subr.bf16.mxu1 %v15288_v37  ;;  %v15380_v36 = vld [vmem:[#allocation5 + $0xe6c] ss:$16 sps:$4 sm:$0xff]   ;;  %v15375_v37 = vld [vmem:[#allocation5 + $0xe60] ss:$16 sps:$4 sm:$0xff]  }
 0x1ee   :  { %7397 = vmatpush1.bf16.msra.mxu0 %v15283_v38  ;;  %8135 = vmatpush1.bf16.msra.mxu1 %v15286_v39  ;;  %v15378_v38 = vld [vmem:[#allocation5 + $0xe68] ss:$16 sps:$4 sm:$0xff]   ;;  %v15383_v39 = vld [vmem:[#allocation5 + $0xe84] ss:$16 sps:$4 sm:$0xff]  }
 0x1ef   :  { %7398 = vmatprep.subr.bf16.mxu0 %v15291_v40  ;;  %8136 = vmatprep.subr.bf16.mxu1 %v15294_v41  ;;  %v15386_v40 = vld [vmem:[#allocation5 + $0xe8c] ss:$16 sps:$4 sm:$0xff]   ;;  %v15381_v41 = vld [vmem:[#allocation5 + $0xe80] ss:$16 sps:$4 sm:$0xff]  }
 0x1f2   :  { %7399 = vmatpush1.bf16.msra.mxu0 %v15289_v42  ;;  %8137 = vmatpush1.bf16.msra.mxu1 %v15292_v43  ;;  %v15384_v42 = vld [vmem:[#allocation5 + $0xe88] ss:$16 sps:$4 sm:$0xff]   ;;  %v15389_v43 = vld [vmem:[#allocation5 + $0xea4] ss:$16 sps:$4 sm:$0xff]  }
 0x1f3   :  { %7400 = vmatprep.subr.bf16.mxu0 %v15297_v44  ;;  %8138 = vmatprep.subr.bf16.mxu1 %v15300_v45  ;;  %v15392_v44 = vld [vmem:[#allocation5 + $0xeac] ss:$16 sps:$4 sm:$0xff]   ;;  %v15387_v45 = vld [vmem:[#allocation5 + $0xea0] ss:$16 sps:$4 sm:$0xff]  }
 0x1f6   :  { %7401 = vmatpush1.bf16.msra.mxu0 %v15295_v46  ;;  %8139 = vmatpush1.bf16.msra.mxu1 %v15298_v47  ;;  %v15390_v46 = vld [vmem:[#allocation5 + $0xea8] ss:$16 sps:$4 sm:$0xff]   ;;  %v15395_v47 = vld [vmem:[#allocation5 + $0xec4] ss:$16 sps:$4 sm:$0xff]  }
 0x1f7   :  { %7402 = vmatprep.subr.bf16.mxu0 %v15303_v48  ;;  %8140 = vmatprep.subr.bf16.mxu1 %v15306_v49  ;;  %v15398_v48 = vld [vmem:[#allocation5 + $0xecc] ss:$16 sps:$4 sm:$0xff]   ;;  %v15393_v49 = vld [vmem:[#allocation5 + $0xec0] ss:$16 sps:$4 sm:$0xff]  }
 0x1fa   :  { %7403 = vmatpush1.bf16.msra.mxu0 %v15301_v50  ;;  %8141 = vmatpush1.bf16.msra.mxu1 %v15304_v51  ;;  %v15396_v50 = vld [vmem:[#allocation5 + $0xec8] ss:$16 sps:$4 sm:$0xff]   ;;  %v15401_v51 = vld [vmem:[#allocation5 + $0xee4] ss:$16 sps:$4 sm:$0xff]  }
 0x1fb   :  { %7404 = vmatprep.subr.bf16.mxu0 %v15309_v52  ;;  %8142 = vmatprep.subr.bf16.mxu1 %v15312_v53  ;;  %v15404_v52 = vld [vmem:[#allocation5 + $0xeec] ss:$16 sps:$4 sm:$0xff]   ;;  %v15399_v53 = vld [vmem:[#allocation5 + $0xee0] ss:$16 sps:$4 sm:$0xff]  }
 0x1fe   :  { %7405 = vmatpush1.bf16.msra.mxu0 %v15307_v54  ;;  %8143 = vmatpush1.bf16.msra.mxu1 %v15310_v55  ;;  %v15402_v54 = vld [vmem:[#allocation5 + $0xee8] ss:$16 sps:$4 sm:$0xff]   ;;  %v15407_v55 = vld [vmem:[#allocation5 + $0xf04] ss:$16 sps:$4 sm:$0xff]  }
 0x1ff   :  { %7406 = vmatprep.subr.bf16.mxu0 %v15315_v56  ;;  %8144 = vmatprep.subr.bf16.mxu1 %v15318_v57  ;;  %v15410_v56 = vld [vmem:[#allocation5 + $0xf0c] ss:$16 sps:$4 sm:$0xff]   ;;  %v15405_v57 = vld [vmem:[#allocation5 + $0xf00] ss:$16 sps:$4 sm:$0xff]  }
 0x202   :  { %7407 = vmatpush1.bf16.msra.mxu0 %v15313_v58  ;;  %8145 = vmatpush1.bf16.msra.mxu1 %v15316_v59  ;;  %v15408_v58 = vld [vmem:[#allocation5 + $0xf08] ss:$16 sps:$4 sm:$0xff]   ;;  %v15413_v59 = vld [vmem:[#allocation5 + $0xf24] ss:$16 sps:$4 sm:$0xff]  }
 0x203   :  { %7408 = vmatprep.subr.bf16.mxu0 %v15321_v60  ;;  %8146 = vmatprep.subr.bf16.mxu1 %v15324_v61  ;;  %v15416_v60 = vld [vmem:[#allocation5 + $0xf2c] ss:$16 sps:$4 sm:$0xff]   ;;  %v15411_v61 = vld [vmem:[#allocation5 + $0xf20] ss:$16 sps:$4 sm:$0xff]  }
 0x206   :  { %7409 = vmatpush1.bf16.msra.mxu0 %v15319_v62  ;;  %8147 = vmatpush1.bf16.msra.mxu1 %v15322_v63  ;;  %v15414_v62 = vld [vmem:[#allocation5 + $0xf28] ss:$16 sps:$4 sm:$0xff]   ;;  %v15419_v63 = vld [vmem:[#allocation5 + $0xf44] ss:$16 sps:$4 sm:$0xff]  }
 0x207   :  { %7410 = vmatprep.subr.bf16.mxu0 %v15327_v0  ;;  %8148 = vmatprep.subr.bf16.mxu1 %v15330_v1  ;;  %v15422_v0 = vld [vmem:[#allocation5 + $0xf4c] ss:$16 sps:$4 sm:$0xff]   ;;  %v15417_v1 = vld [vmem:[#allocation5 + $0xf40] ss:$16 sps:$4 sm:$0xff]  }
 0x20a   :  { %7411 = vmatpush1.bf16.msra.mxu0 %v15325_v2  ;;  %8149 = vmatpush1.bf16.msra.mxu1 %v15328_v3  ;;  %v15420_v2 = vld [vmem:[#allocation5 + $0xf48] ss:$16 sps:$4 sm:$0xff]   ;;  %v15425_v3 = vld [vmem:[#allocation5 + $0xf64] ss:$16 sps:$4 sm:$0xff]  }
 0x20b   :  { %7412 = vmatprep.subr.bf16.mxu0 %v15333_v4  ;;  %8150 = vmatprep.subr.bf16.mxu1 %v15336_v5  ;;  %v15428_v4 = vld [vmem:[#allocation5 + $0xf6c] ss:$16 sps:$4 sm:$0xff]   ;;  %v15423_v5 = vld [vmem:[#allocation5 + $0xf60] ss:$16 sps:$4 sm:$0xff]  }
 0x20e   :  { %7413 = vmatpush1.bf16.msra.mxu0 %v15331_v6  ;;  %8151 = vmatpush1.bf16.msra.mxu1 %v15334_v7  ;;  %v15426_v6 = vld [vmem:[#allocation5 + $0xf68] ss:$16 sps:$4 sm:$0xff]   ;;  %v15431_v7 = vld [vmem:[#allocation5 + $0xf84] ss:$16 sps:$4 sm:$0xff]  }
 0x20f   :  { %7414 = vmatprep.subr.bf16.mxu0 %v15339_v8  ;;  %8152 = vmatprep.subr.bf16.mxu1 %v15342_v9  ;;  %v15434_v8 = vld [vmem:[#allocation5 + $0xf8c] ss:$16 sps:$4 sm:$0xff]   ;;  %v15429_v9 = vld [vmem:[#allocation5 + $0xf80] ss:$16 sps:$4 sm:$0xff]  }
 0x212   :  { %7415 = vmatpush1.bf16.msra.mxu0 %v15337_v10  ;;  %8153 = vmatpush1.bf16.msra.mxu1 %v15340_v12  ;;  %v15432_v10 = vld [vmem:[#allocation5 + $0xf88] ss:$16 sps:$4 sm:$0xff]   ;;  %v15437_v12 = vld [vmem:[#allocation5 + $0xfa4] ss:$16 sps:$4 sm:$0xff]  }
 0x213   :  { %7416 = vmatprep.subr.bf16.mxu0 %v15345_v13  ;;  %8154 = vmatprep.subr.bf16.mxu1 %v15348_v15  ;;  %v15440_v13 = vld [vmem:[#allocation5 + $0xfac] ss:$16 sps:$4 sm:$0xff]   ;;  %v15435_v15 = vld [vmem:[#allocation5 + $0xfa0] ss:$16 sps:$4 sm:$0xff]  }
 0x216   :  { %7417 = vmatpush1.bf16.msra.mxu0 %v15343_v16  ;;  %8155 = vmatpush1.bf16.msra.mxu1 %v15346_v18  ;;  %v15438_v16 = vld [vmem:[#allocation5 + $0xfa8] ss:$16 sps:$4 sm:$0xff]   ;;  %v15443_v18 = vld [vmem:[#allocation5 + $0xfc4] ss:$16 sps:$4 sm:$0xff]  }
 0x217   :  { %7418 = vmatprep.subr.bf16.mxu0 %v15351_v20  ;;  %8156 = vmatprep.subr.bf16.mxu1 %v15354_v11  ;;  %v15446_v20 = vld [vmem:[#allocation5 + $0xfcc] ss:$16 sps:$4 sm:$0xff]   ;;  %v15441_v11 = vld [vmem:[#allocation5 + $0xfc0] ss:$16 sps:$4 sm:$0xff]  }
 0x21a   :  { %7419 = vmatpush1.bf16.msra.mxu0 %v15349_v21  ;;  %8157 = vmatpush1.bf16.msra.mxu1 %v15352_v14  ;;  %v15444_v21 = vld [vmem:[#allocation5 + $0xfc8] ss:$16 sps:$4 sm:$0xff]   ;;  %v15449_v14 = vld [vmem:[#allocation5 + $0xfe4] ss:$16 sps:$4 sm:$0xff]  }
 0x21b   :  { %7429 = vmatprep.subr.bf16.mxu0 %v15359_v23  ;;  %8167 = vmatprep.subr.bf16.mxu1 %v15362_v24  ;;  %v15452_v23 = vld [vmem:[#allocation5 + $0xfec] ss:$16 sps:$4 sm:$0xff]   ;;  %v15447_v24 = vld [vmem:[#allocation5 + $0xfe0] ss:$16 sps:$4 sm:$0xff]  }
 0x21d   :  { %7421 = vmatmul.mubr.bf16.vlgmr.msra.gmra.mrb[0].mxu0 %v12587_v17  ;;  %8159 = vmatmul.mubr.bf16.vlgmr.msra.gmra.mrb[0].mxu1 %v12587_v17  ;;  %v15450_v17 = vld [vmem:[#allocation5 + $0xfe8] ss:$16 sps:$4 sm:$0xff]  }
 0x21e   :  { %7430 = vmatpush1.bf16.msra.mxu0 %v15357_v26  ;;  %8168 = vmatpush1.bf16.msra.mxu1 %v15360_v27  ;;  %v15457_v26 = vld [vmem:[#allocation5 + $0x1004] ss:$16 sps:$4 sm:$0xff]   ;;  %v15460_v27 = vld [vmem:[#allocation5 + $0x100c] ss:$16 sps:$4 sm:$0xff]  }
 0x21f   :  { %7431 = vmatprep.subr.bf16.mxu0 %v15365_v28  ;;  %8169 = vmatprep.subr.bf16.mxu1 %v15368_v19  ;;  %v17034_v28 = vld [vmem:[#allocation2 + $0x40] sm:$0xff]  ;;  %v12589_v19 = vcombine.low %v17028_v25, %v17028_v25 }
 0x220   :  { %7461 = vmatprep.mubr.bf16.mxu0 %v12590_v29  ;;  %8199 = vmatprep.mubr.bf16.mxu1 %v12590_v29  ;;  %v15455_v29 = vld [vmem:[#allocation5 + $0x1000] ss:$16 sps:$4 sm:$0xff]   ;;  %v15469_v25 = vld [vmem:[#allocation5 + $0x1044] ss:$16 sps:$4 sm:$0xff]  }
 0x222   :  { %7432 = vmatpush1.bf16.msra.mxu0 %v15363_v30  ;;  %8170 = vmatpush1.bf16.msra.mxu1 %v15366_v31  ;;  %v15458_v30 = vld [vmem:[#allocation5 + $0x1008] ss:$16 sps:$4 sm:$0xff]   ;;  %v15463_v31 = vld [vmem:[#allocation5 + $0x1024] ss:$16 sps:$4 sm:$0xff]  }
 0x223   :  { %7433 = vmatprep.subr.bf16.mxu0 %v15371_v22  ;;  %8171 = vmatprep.subr.bf16.mxu1 %v15374_v32  ;;  %v15466_v22 = vld [vmem:[#allocation5 + $0x102c] ss:$16 sps:$4 sm:$0xff]   ;;  %v12592_v32 = vcombine.high %v17034_v28, %v17034_v28 }
 0x226   :  { %7434 = vmatpush1.bf16.msra.mxu0 %v15369_v33  ;;  %8172 = vmatpush1.bf16.msra.mxu1 %v15372_v34  ;;  %v15461_v33 = vld [vmem:[#allocation5 + $0x1020] ss:$16 sps:$4 sm:$0xff]   ;;  %v15464_v34 = vld [vmem:[#allocation5 + $0x1028] ss:$16 sps:$4 sm:$0xff]  }
 0x227   :  { %7435 = vmatprep.subr.bf16.mxu0 %v15377_v35  ;;  %8173 = vmatprep.subr.bf16.mxu1 %v15380_v36  ;;  %v15472_v35 = vld [vmem:[#allocation5 + $0x104c] ss:$16 sps:$4 sm:$0xff]   ;;  %v15467_v36 = vld [vmem:[#allocation5 + $0x1040] ss:$16 sps:$4 sm:$0xff]  }
 0x22a   :  { %7436 = vmatpush1.bf16.msra.mxu0 %v15375_v37  ;;  %8174 = vmatpush1.bf16.msra.mxu1 %v15378_v38  ;;  %v15470_v37 = vld [vmem:[#allocation5 + $0x1048] ss:$16 sps:$4 sm:$0xff]   ;;  %v15475_v38 = vld [vmem:[#allocation5 + $0x1064] ss:$16 sps:$4 sm:$0xff]  }
 0x22b   :  { %7437 = vmatprep.subr.bf16.mxu0 %v15383_v39  ;;  %8175 = vmatprep.subr.bf16.mxu1 %v15386_v40  ;;  %v15478_v39 = vld [vmem:[#allocation5 + $0x106c] ss:$16 sps:$4 sm:$0xff]   ;;  %v15473_v40 = vld [vmem:[#allocation5 + $0x1060] ss:$16 sps:$4 sm:$0xff]  }
 0x22e   :  { %7438 = vmatpush1.bf16.msra.mxu0 %v15381_v41  ;;  %8176 = vmatpush1.bf16.msra.mxu1 %v15384_v42  ;;  %v15476_v41 = vld [vmem:[#allocation5 + $0x1068] ss:$16 sps:$4 sm:$0xff]   ;;  %v15481_v42 = vld [vmem:[#allocation5 + $0x1084] ss:$16 sps:$4 sm:$0xff]  }
 0x22f   :  { %7439 = vmatprep.subr.bf16.mxu0 %v15389_v43  ;;  %8177 = vmatprep.subr.bf16.mxu1 %v15392_v44  ;;  %v15484_v43 = vld [vmem:[#allocation5 + $0x108c] ss:$16 sps:$4 sm:$0xff]   ;;  %v15479_v44 = vld [vmem:[#allocation5 + $0x1080] ss:$16 sps:$4 sm:$0xff]  }
 0x232   :  { %7440 = vmatpush1.bf16.msra.mxu0 %v15387_v45  ;;  %8178 = vmatpush1.bf16.msra.mxu1 %v15390_v46  ;;  %v15482_v45 = vld [vmem:[#allocation5 + $0x1088] ss:$16 sps:$4 sm:$0xff]   ;;  %v15487_v46 = vld [vmem:[#allocation5 + $0x10a4] ss:$16 sps:$4 sm:$0xff]  }
 0x233   :  { %7441 = vmatprep.subr.bf16.mxu0 %v15395_v47  ;;  %8179 = vmatprep.subr.bf16.mxu1 %v15398_v48  ;;  %v15490_v47 = vld [vmem:[#allocation5 + $0x10ac] ss:$16 sps:$4 sm:$0xff]   ;;  %v15485_v48 = vld [vmem:[#allocation5 + $0x10a0] ss:$16 sps:$4 sm:$0xff]  }
 0x236   :  { %7442 = vmatpush1.bf16.msra.mxu0 %v15393_v49  ;;  %8180 = vmatpush1.bf16.msra.mxu1 %v15396_v50  ;;  %v15488_v49 = vld [vmem:[#allocation5 + $0x10a8] ss:$16 sps:$4 sm:$0xff]   ;;  %v15493_v50 = vld [vmem:[#allocation5 + $0x10c4] ss:$16 sps:$4 sm:$0xff]  }
 0x237   :  { %7443 = vmatprep.subr.bf16.mxu0 %v15401_v51  ;;  %8181 = vmatprep.subr.bf16.mxu1 %v15404_v52  ;;  %v15496_v51 = vld [vmem:[#allocation5 + $0x10cc] ss:$16 sps:$4 sm:$0xff]   ;;  %v15491_v52 = vld [vmem:[#allocation5 + $0x10c0] ss:$16 sps:$4 sm:$0xff]  }
 0x23a   :  { %7444 = vmatpush1.bf16.msra.mxu0 %v15399_v53  ;;  %8182 = vmatpush1.bf16.msra.mxu1 %v15402_v54  ;;  %v15494_v53 = vld [vmem:[#allocation5 + $0x10c8] ss:$16 sps:$4 sm:$0xff]   ;;  %v15499_v54 = vld [vmem:[#allocation5 + $0x10e4] ss:$16 sps:$4 sm:$0xff]  }
 0x23b   :  { %7445 = vmatprep.subr.bf16.mxu0 %v15407_v55  ;;  %8183 = vmatprep.subr.bf16.mxu1 %v15410_v56  ;;  %v15502_v55 = vld [vmem:[#allocation5 + $0x10ec] ss:$16 sps:$4 sm:$0xff]   ;;  %v15497_v56 = vld [vmem:[#allocation5 + $0x10e0] ss:$16 sps:$4 sm:$0xff]  }
 0x23e   :  { %7446 = vmatpush1.bf16.msra.mxu0 %v15405_v57  ;;  %8184 = vmatpush1.bf16.msra.mxu1 %v15408_v58  ;;  %v15500_v57 = vld [vmem:[#allocation5 + $0x10e8] ss:$16 sps:$4 sm:$0xff]   ;;  %v15505_v58 = vld [vmem:[#allocation5 + $0x1104] ss:$16 sps:$4 sm:$0xff]  }
 0x23f   :  { %7447 = vmatprep.subr.bf16.mxu0 %v15413_v59  ;;  %8185 = vmatprep.subr.bf16.mxu1 %v15416_v60  ;;  %v15508_v59 = vld [vmem:[#allocation5 + $0x110c] ss:$16 sps:$4 sm:$0xff]   ;;  %v15503_v60 = vld [vmem:[#allocation5 + $0x1100] ss:$16 sps:$4 sm:$0xff]  }
 0x242   :  { %7448 = vmatpush1.bf16.msra.mxu0 %v15411_v61  ;;  %8186 = vmatpush1.bf16.msra.mxu1 %v15414_v62  ;;  %v15506_v61 = vld [vmem:[#allocation5 + $0x1108] ss:$16 sps:$4 sm:$0xff]   ;;  %v15511_v62 = vld [vmem:[#allocation5 + $0x1124] ss:$16 sps:$4 sm:$0xff]  }
 0x243   :  { %7449 = vmatprep.subr.bf16.mxu0 %v15419_v63  ;;  %8187 = vmatprep.subr.bf16.mxu1 %v15422_v0  ;;  %v15514_v63 = vld [vmem:[#allocation5 + $0x112c] ss:$16 sps:$4 sm:$0xff]   ;;  %v15509_v0 = vld [vmem:[#allocation5 + $0x1120] ss:$16 sps:$4 sm:$0xff]  }
 0x246   :  { %7450 = vmatpush1.bf16.msra.mxu0 %v15417_v1  ;;  %8188 = vmatpush1.bf16.msra.mxu1 %v15420_v2  ;;  %v15512_v1 = vld [vmem:[#allocation5 + $0x1128] ss:$16 sps:$4 sm:$0xff]   ;;  %v15517_v2 = vld [vmem:[#allocation5 + $0x1144] ss:$16 sps:$4 sm:$0xff]  }
 0x247   :  { %7451 = vmatprep.subr.bf16.mxu0 %v15425_v3  ;;  %8189 = vmatprep.subr.bf16.mxu1 %v15428_v4  ;;  %v15520_v3 = vld [vmem:[#allocation5 + $0x114c] ss:$16 sps:$4 sm:$0xff]   ;;  %v15515_v4 = vld [vmem:[#allocation5 + $0x1140] ss:$16 sps:$4 sm:$0xff]  }
 0x24a   :  { %7452 = vmatpush1.bf16.msra.mxu0 %v15423_v5  ;;  %8190 = vmatpush1.bf16.msra.mxu1 %v15426_v6  ;;  %v15518_v5 = vld [vmem:[#allocation5 + $0x1148] ss:$16 sps:$4 sm:$0xff]   ;;  %v15523_v6 = vld [vmem:[#allocation5 + $0x1164] ss:$16 sps:$4 sm:$0xff]  }
 0x24b   :  { %7453 = vmatprep.subr.bf16.mxu0 %v15431_v7  ;;  %8191 = vmatprep.subr.bf16.mxu1 %v15434_v8  ;;  %v15526_v7 = vld [vmem:[#allocation5 + $0x116c] ss:$16 sps:$4 sm:$0xff]   ;;  %v15521_v8 = vld [vmem:[#allocation5 + $0x1160] ss:$16 sps:$4 sm:$0xff]  }
 0x24e   :  { %7454 = vmatpush1.bf16.msra.mxu0 %v15429_v9  ;;  %8192 = vmatpush1.bf16.msra.mxu1 %v15432_v10  ;;  %v15524_v9 = vld [vmem:[#allocation5 + $0x1168] ss:$16 sps:$4 sm:$0xff]   ;;  %v15529_v10 = vld [vmem:[#allocation5 + $0x1184] ss:$16 sps:$4 sm:$0xff]  }
 0x24f   :  { %7455 = vmatprep.subr.bf16.mxu0 %v15437_v12  ;;  %8193 = vmatprep.subr.bf16.mxu1 %v15440_v13  ;;  %v15532_v12 = vld [vmem:[#allocation5 + $0x118c] ss:$16 sps:$4 sm:$0xff]   ;;  %v15527_v13 = vld [vmem:[#allocation5 + $0x1180] ss:$16 sps:$4 sm:$0xff]  }
 0x252   :  { %7456 = vmatpush1.bf16.msra.mxu0 %v15435_v15  ;;  %8194 = vmatpush1.bf16.msra.mxu1 %v15438_v16  ;;  %v15530_v15 = vld [vmem:[#allocation5 + $0x1188] ss:$16 sps:$4 sm:$0xff]   ;;  %v15535_v16 = vld [vmem:[#allocation5 + $0x11a4] ss:$16 sps:$4 sm:$0xff]  }
 0x253   :  { %7457 = vmatprep.subr.bf16.mxu0 %v15443_v18  ;;  %8195 = vmatprep.subr.bf16.mxu1 %v15446_v20  ;;  %v15538_v18 = vld [vmem:[#allocation5 + $0x11ac] ss:$16 sps:$4 sm:$0xff]   ;;  %v15533_v20 = vld [vmem:[#allocation5 + $0x11a0] ss:$16 sps:$4 sm:$0xff]  }
 0x256   :  { %7458 = vmatpush1.bf16.msra.mxu0 %v15441_v11  ;;  %8196 = vmatpush1.bf16.msra.mxu1 %v15444_v21  ;;  %v15536_v11 = vld [vmem:[#allocation5 + $0x11a8] ss:$16 sps:$4 sm:$0xff]   ;;  %v15541_v21 = vld [vmem:[#allocation5 + $0x11c4] ss:$16 sps:$4 sm:$0xff]  }
 0x257   :  { %7459 = vmatprep.subr.bf16.mxu0 %v15449_v14  ;;  %8197 = vmatprep.subr.bf16.mxu1 %v15452_v23  ;;  %v15544_v14 = vld [vmem:[#allocation5 + $0x11cc] ss:$16 sps:$4 sm:$0xff]   ;;  %v15539_v23 = vld [vmem:[#allocation5 + $0x11c0] ss:$16 sps:$4 sm:$0xff]  }
 0x25a   :  { %7460 = vmatpush1.bf16.msra.mxu0 %v15447_v24  ;;  %8198 = vmatpush1.bf16.msra.mxu1 %v15450_v17  ;;  %v15542_v24 = vld [vmem:[#allocation5 + $0x11c8] ss:$16 sps:$4 sm:$0xff]   ;;  %v15547_v17 = vld [vmem:[#allocation5 + $0x11e4] ss:$16 sps:$4 sm:$0xff]  }
 0x25b   :  { %7470 = vmatprep.subr.bf16.mxu0 %v15457_v26  ;;  %8208 = vmatprep.subr.bf16.mxu1 %v15460_v27  ;;  %v15550_v26 = vld [vmem:[#allocation5 + $0x11ec] ss:$16 sps:$4 sm:$0xff]   ;;  %v15545_v27 = vld [vmem:[#allocation5 + $0x11e0] ss:$16 sps:$4 sm:$0xff]  }
 0x25d   :  { %7462 = vmatmul.mubr.bf16.vlgmr.msra.gmra.mrb[0].mxu0 %v12589_v19  ;;  %8200 = vmatmul.mubr.bf16.vlgmr.msra.gmra.mrb[0].mxu1 %v12589_v19  ;;  %v15548_v19 = vld [vmem:[#allocation5 + $0x11e8] ss:$16 sps:$4 sm:$0xff]  }
 0x25e   :  { %7471 = vmatpush1.bf16.msra.mxu0 %v15455_v29  ;;  %8209 = vmatpush1.bf16.msra.mxu1 %v15458_v30  ;;  %v15555_v29 = vld [vmem:[#allocation5 + $0x1204] ss:$16 sps:$4 sm:$0xff]   ;;  %v15558_v30 = vld [vmem:[#allocation5 + $0x120c] ss:$16 sps:$4 sm:$0xff]  }
 0x25f   :  { %7472 = vmatprep.subr.bf16.mxu0 %v15463_v31  ;;  %8210 = vmatprep.subr.bf16.mxu1 %v15466_v22  ;;  %v17040_v31 = vld [vmem:[#allocation2 + $0x48] sm:$0xff]  ;;  %v12591_v22 = vcombine.low %v17034_v28, %v17034_v28  ;;  %v15567_v28 = vld [vmem:[#allocation5 + $0x1244] ss:$16 sps:$4 sm:$0xff]  }
 0x260   :  { %7502 = vmatprep.mubr.bf16.mxu0 %v12592_v32  ;;  %8240 = vmatprep.mubr.bf16.mxu1 %v12592_v32  ;;  %v15553_v32 = vld [vmem:[#allocation5 + $0x1200] ss:$16 sps:$4 sm:$0xff]  }
 0x262   :  { %7473 = vmatpush1.bf16.msra.mxu0 %v15461_v33  ;;  %8211 = vmatpush1.bf16.msra.mxu1 %v15464_v34  ;;  %v15556_v33 = vld [vmem:[#allocation5 + $0x1208] ss:$16 sps:$4 sm:$0xff]   ;;  %v15561_v34 = vld [vmem:[#allocation5 + $0x1224] ss:$16 sps:$4 sm:$0xff]  }
 0x263   :  { %7474 = vmatprep.subr.bf16.mxu0 %v15469_v25  ;;  %8212 = vmatprep.subr.bf16.mxu1 %v15472_v35  ;;  %v15564_v25 = vld [vmem:[#allocation5 + $0x122c] ss:$16 sps:$4 sm:$0xff]   ;;  %v12594_v35 = vcombine.high %v17040_v31, %v17040_v31 }
 0x266   :  { %7475 = vmatpush1.bf16.msra.mxu0 %v15467_v36  ;;  %8213 = vmatpush1.bf16.msra.mxu1 %v15470_v37  ;;  %v15559_v36 = vld [vmem:[#allocation5 + $0x1220] ss:$16 sps:$4 sm:$0xff]   ;;  %v15562_v37 = vld [vmem:[#allocation5 + $0x1228] ss:$16 sps:$4 sm:$0xff]  }
 0x267   :  { %7476 = vmatprep.subr.bf16.mxu0 %v15475_v38  ;;  %8214 = vmatprep.subr.bf16.mxu1 %v15478_v39  ;;  %v15570_v38 = vld [vmem:[#allocation5 + $0x124c] ss:$16 sps:$4 sm:$0xff]   ;;  %v15565_v39 = vld [vmem:[#allocation5 + $0x1240] ss:$16 sps:$4 sm:$0xff]  }
 0x26a   :  { %7477 = vmatpush1.bf16.msra.mxu0 %v15473_v40  ;;  %8215 = vmatpush1.bf16.msra.mxu1 %v15476_v41  ;;  %v15568_v40 = vld [vmem:[#allocation5 + $0x1248] ss:$16 sps:$4 sm:$0xff]   ;;  %v15573_v41 = vld [vmem:[#allocation5 + $0x1264] ss:$16 sps:$4 sm:$0xff]  }
 0x26b   :  { %7478 = vmatprep.subr.bf16.mxu0 %v15481_v42  ;;  %8216 = vmatprep.subr.bf16.mxu1 %v15484_v43  ;;  %v15576_v42 = vld [vmem:[#allocation5 + $0x126c] ss:$16 sps:$4 sm:$0xff]   ;;  %v15571_v43 = vld [vmem:[#allocation5 + $0x1260] ss:$16 sps:$4 sm:$0xff]  }
 0x26e   :  { %7479 = vmatpush1.bf16.msra.mxu0 %v15479_v44  ;;  %8217 = vmatpush1.bf16.msra.mxu1 %v15482_v45  ;;  %v15574_v44 = vld [vmem:[#allocation5 + $0x1268] ss:$16 sps:$4 sm:$0xff]   ;;  %v15579_v45 = vld [vmem:[#allocation5 + $0x1284] ss:$16 sps:$4 sm:$0xff]  }
 0x26f   :  { %7480 = vmatprep.subr.bf16.mxu0 %v15487_v46  ;;  %8218 = vmatprep.subr.bf16.mxu1 %v15490_v47  ;;  %v15582_v46 = vld [vmem:[#allocation5 + $0x128c] ss:$16 sps:$4 sm:$0xff]   ;;  %v15577_v47 = vld [vmem:[#allocation5 + $0x1280] ss:$16 sps:$4 sm:$0xff]  }
 0x272   :  { %7481 = vmatpush1.bf16.msra.mxu0 %v15485_v48  ;;  %8219 = vmatpush1.bf16.msra.mxu1 %v15488_v49  ;;  %v15580_v48 = vld [vmem:[#allocation5 + $0x1288] ss:$16 sps:$4 sm:$0xff]   ;;  %v15585_v49 = vld [vmem:[#allocation5 + $0x12a4] ss:$16 sps:$4 sm:$0xff]  }
 0x273   :  { %7482 = vmatprep.subr.bf16.mxu0 %v15493_v50  ;;  %8220 = vmatprep.subr.bf16.mxu1 %v15496_v51  ;;  %v15588_v50 = vld [vmem:[#allocation5 + $0x12ac] ss:$16 sps:$4 sm:$0xff]   ;;  %v15583_v51 = vld [vmem:[#allocation5 + $0x12a0] ss:$16 sps:$4 sm:$0xff]  }
 0x276   :  { %7483 = vmatpush1.bf16.msra.mxu0 %v15491_v52  ;;  %8221 = vmatpush1.bf16.msra.mxu1 %v15494_v53  ;;  %v15586_v52 = vld [vmem:[#allocation5 + $0x12a8] ss:$16 sps:$4 sm:$0xff]   ;;  %v15591_v53 = vld [vmem:[#allocation5 + $0x12c4] ss:$16 sps:$4 sm:$0xff]  }
 0x277   :  { %7484 = vmatprep.subr.bf16.mxu0 %v15499_v54  ;;  %8222 = vmatprep.subr.bf16.mxu1 %v15502_v55  ;;  %v15594_v54 = vld [vmem:[#allocation5 + $0x12cc] ss:$16 sps:$4 sm:$0xff]   ;;  %v15589_v55 = vld [vmem:[#allocation5 + $0x12c0] ss:$16 sps:$4 sm:$0xff]  }
 0x27a   :  { %7485 = vmatpush1.bf16.msra.mxu0 %v15497_v56  ;;  %8223 = vmatpush1.bf16.msra.mxu1 %v15500_v57  ;;  %v15592_v56 = vld [vmem:[#allocation5 + $0x12c8] ss:$16 sps:$4 sm:$0xff]   ;;  %v15597_v57 = vld [vmem:[#allocation5 + $0x12e4] ss:$16 sps:$4 sm:$0xff]  }
 0x27b   :  { %7486 = vmatprep.subr.bf16.mxu0 %v15505_v58  ;;  %8224 = vmatprep.subr.bf16.mxu1 %v15508_v59  ;;  %v15600_v58 = vld [vmem:[#allocation5 + $0x12ec] ss:$16 sps:$4 sm:$0xff]   ;;  %v15595_v59 = vld [vmem:[#allocation5 + $0x12e0] ss:$16 sps:$4 sm:$0xff]  }
 0x27e   :  { %7487 = vmatpush1.bf16.msra.mxu0 %v15503_v60  ;;  %8225 = vmatpush1.bf16.msra.mxu1 %v15506_v61  ;;  %v15598_v60 = vld [vmem:[#allocation5 + $0x12e8] ss:$16 sps:$4 sm:$0xff]   ;;  %v15603_v61 = vld [vmem:[#allocation5 + $0x1304] ss:$16 sps:$4 sm:$0xff]  }
 0x27f   :  { %7488 = vmatprep.subr.bf16.mxu0 %v15511_v62  ;;  %8226 = vmatprep.subr.bf16.mxu1 %v15514_v63  ;;  %v15606_v62 = vld [vmem:[#allocation5 + $0x130c] ss:$16 sps:$4 sm:$0xff]   ;;  %v15601_v63 = vld [vmem:[#allocation5 + $0x1300] ss:$16 sps:$4 sm:$0xff]  }
 0x282   :  { %7489 = vmatpush1.bf16.msra.mxu0 %v15509_v0  ;;  %8227 = vmatpush1.bf16.msra.mxu1 %v15512_v1  ;;  %v15604_v0 = vld [vmem:[#allocation5 + $0x1308] ss:$16 sps:$4 sm:$0xff]   ;;  %v15609_v1 = vld [vmem:[#allocation5 + $0x1324] ss:$16 sps:$4 sm:$0xff]  }
 0x283   :  { %7490 = vmatprep.subr.bf16.mxu0 %v15517_v2  ;;  %8228 = vmatprep.subr.bf16.mxu1 %v15520_v3  ;;  %v15612_v2 = vld [vmem:[#allocation5 + $0x132c] ss:$16 sps:$4 sm:$0xff]   ;;  %v15607_v3 = vld [vmem:[#allocation5 + $0x1320] ss:$16 sps:$4 sm:$0xff]  }
 0x286   :  { %7491 = vmatpush1.bf16.msra.mxu0 %v15515_v4  ;;  %8229 = vmatpush1.bf16.msra.mxu1 %v15518_v5  ;;  %v15610_v4 = vld [vmem:[#allocation5 + $0x1328] ss:$16 sps:$4 sm:$0xff]   ;;  %v15615_v5 = vld [vmem:[#allocation5 + $0x1344] ss:$16 sps:$4 sm:$0xff]  }
 0x287   :  { %7492 = vmatprep.subr.bf16.mxu0 %v15523_v6  ;;  %8230 = vmatprep.subr.bf16.mxu1 %v15526_v7  ;;  %v15618_v6 = vld [vmem:[#allocation5 + $0x134c] ss:$16 sps:$4 sm:$0xff]   ;;  %v15613_v7 = vld [vmem:[#allocation5 + $0x1340] ss:$16 sps:$4 sm:$0xff]  }
 0x28a   :  { %7493 = vmatpush1.bf16.msra.mxu0 %v15521_v8  ;;  %8231 = vmatpush1.bf16.msra.mxu1 %v15524_v9  ;;  %v15616_v8 = vld [vmem:[#allocation5 + $0x1348] ss:$16 sps:$4 sm:$0xff]   ;;  %v15621_v9 = vld [vmem:[#allocation5 + $0x1364] ss:$16 sps:$4 sm:$0xff]  }
 0x28b   :  { %7494 = vmatprep.subr.bf16.mxu0 %v15529_v10  ;;  %8232 = vmatprep.subr.bf16.mxu1 %v15532_v12  ;;  %v15624_v10 = vld [vmem:[#allocation5 + $0x136c] ss:$16 sps:$4 sm:$0xff]   ;;  %v15619_v12 = vld [vmem:[#allocation5 + $0x1360] ss:$16 sps:$4 sm:$0xff]  }
 0x28e   :  { %7495 = vmatpush1.bf16.msra.mxu0 %v15527_v13  ;;  %8233 = vmatpush1.bf16.msra.mxu1 %v15530_v15  ;;  %v15622_v13 = vld [vmem:[#allocation5 + $0x1368] ss:$16 sps:$4 sm:$0xff]   ;;  %v15627_v15 = vld [vmem:[#allocation5 + $0x1384] ss:$16 sps:$4 sm:$0xff]  }
 0x28f   :  { %7496 = vmatprep.subr.bf16.mxu0 %v15535_v16  ;;  %8234 = vmatprep.subr.bf16.mxu1 %v15538_v18  ;;  %v15630_v16 = vld [vmem:[#allocation5 + $0x138c] ss:$16 sps:$4 sm:$0xff]   ;;  %v15625_v18 = vld [vmem:[#allocation5 + $0x1380] ss:$16 sps:$4 sm:$0xff]  }
 0x292   :  { %7497 = vmatpush1.bf16.msra.mxu0 %v15533_v20  ;;  %8235 = vmatpush1.bf16.msra.mxu1 %v15536_v11  ;;  %v15628_v20 = vld [vmem:[#allocation5 + $0x1388] ss:$16 sps:$4 sm:$0xff]   ;;  %v15633_v11 = vld [vmem:[#allocation5 + $0x13a4] ss:$16 sps:$4 sm:$0xff]  }
 0x293   :  { %7498 = vmatprep.subr.bf16.mxu0 %v15541_v21  ;;  %8236 = vmatprep.subr.bf16.mxu1 %v15544_v14  ;;  %v15636_v21 = vld [vmem:[#allocation5 + $0x13ac] ss:$16 sps:$4 sm:$0xff]   ;;  %v15631_v14 = vld [vmem:[#allocation5 + $0x13a0] ss:$16 sps:$4 sm:$0xff]  }
 0x296   :  { %7499 = vmatpush1.bf16.msra.mxu0 %v15539_v23  ;;  %8237 = vmatpush1.bf16.msra.mxu1 %v15542_v24  ;;  %v15634_v23 = vld [vmem:[#allocation5 + $0x13a8] ss:$16 sps:$4 sm:$0xff]   ;;  %v15639_v24 = vld [vmem:[#allocation5 + $0x13c4] ss:$16 sps:$4 sm:$0xff]  }
 0x297   :  { %7500 = vmatprep.subr.bf16.mxu0 %v15547_v17  ;;  %8238 = vmatprep.subr.bf16.mxu1 %v15550_v26  ;;  %v15642_v17 = vld [vmem:[#allocation5 + $0x13cc] ss:$16 sps:$4 sm:$0xff]   ;;  %v15637_v26 = vld [vmem:[#allocation5 + $0x13c0] ss:$16 sps:$4 sm:$0xff]  }
 0x29a   :  { %7501 = vmatpush1.bf16.msra.mxu0 %v15545_v27  ;;  %8239 = vmatpush1.bf16.msra.mxu1 %v15548_v19  ;;  %v15640_v27 = vld [vmem:[#allocation5 + $0x13c8] ss:$16 sps:$4 sm:$0xff]   ;;  %v15645_v19 = vld [vmem:[#allocation5 + $0x13e4] ss:$16 sps:$4 sm:$0xff]  }
 0x29b   :  { %7511 = vmatprep.subr.bf16.mxu0 %v15555_v29  ;;  %8249 = vmatprep.subr.bf16.mxu1 %v15558_v30  ;;  %v15648_v29 = vld [vmem:[#allocation5 + $0x13ec] ss:$16 sps:$4 sm:$0xff]   ;;  %v15643_v30 = vld [vmem:[#allocation5 + $0x13e0] ss:$16 sps:$4 sm:$0xff]  }
 0x29d   :  { %7503 = vmatmul.mubr.bf16.vlgmr.msra.gmra.mrb[0].mxu0 %v12591_v22  ;;  %8241 = vmatmul.mubr.bf16.vlgmr.msra.gmra.mrb[0].mxu1 %v12591_v22  ;;  %v15646_v22 = vld [vmem:[#allocation5 + $0x13e8] ss:$16 sps:$4 sm:$0xff]  }
 0x29e   :  { %7512 = vmatpush1.bf16.msra.mxu0 %v15553_v32  ;;  %8250 = vmatpush1.bf16.msra.mxu1 %v15556_v33  ;;  %v15653_v32 = vld [vmem:[#allocation5 + $0x1404] ss:$16 sps:$4 sm:$0xff]   ;;  %v15656_v33 = vld [vmem:[#allocation5 + $0x140c] ss:$16 sps:$4 sm:$0xff]  }
 0x29f   :  { %7513 = vmatprep.subr.bf16.mxu0 %v15561_v34  ;;  %8251 = vmatprep.subr.bf16.mxu1 %v15564_v25  ;;  %v17046_v34 = vld [vmem:[#allocation2 + $0x50] sm:$0xff]  ;;  %v12593_v25 = vcombine.low %v17040_v31, %v17040_v31 }
 0x2a0   :  { %7543 = vmatprep.mubr.bf16.mxu0 %v12594_v35  ;;  %8281 = vmatprep.mubr.bf16.mxu1 %v12594_v35  ;;  %v15651_v35 = vld [vmem:[#allocation5 + $0x1400] ss:$16 sps:$4 sm:$0xff]   ;;  %v15665_v31 = vld [vmem:[#allocation5 + $0x1444] ss:$16 sps:$4 sm:$0xff]  }
 0x2a2   :  { %7514 = vmatpush1.bf16.msra.mxu0 %v15559_v36  ;;  %8252 = vmatpush1.bf16.msra.mxu1 %v15562_v37  ;;  %v15654_v36 = vld [vmem:[#allocation5 + $0x1408] ss:$16 sps:$4 sm:$0xff]   ;;  %v15659_v37 = vld [vmem:[#allocation5 + $0x1424] ss:$16 sps:$4 sm:$0xff]  }
 0x2a3   :  { %7515 = vmatprep.subr.bf16.mxu0 %v15567_v28  ;;  %8253 = vmatprep.subr.bf16.mxu1 %v15570_v38  ;;  %v15662_v28 = vld [vmem:[#allocation5 + $0x142c] ss:$16 sps:$4 sm:$0xff]   ;;  %v12596_v38 = vcombine.high %v17046_v34, %v17046_v34 }
 0x2a6   :  { %7516 = vmatpush1.bf16.msra.mxu0 %v15565_v39  ;;  %8254 = vmatpush1.bf16.msra.mxu1 %v15568_v40  ;;  %v15657_v39 = vld [vmem:[#allocation5 + $0x1420] ss:$16 sps:$4 sm:$0xff]   ;;  %v15660_v40 = vld [vmem:[#allocation5 + $0x1428] ss:$16 sps:$4 sm:$0xff]  }
 0x2a7   :  { %7517 = vmatprep.subr.bf16.mxu0 %v15573_v41  ;;  %8255 = vmatprep.subr.bf16.mxu1 %v15576_v42  ;;  %v15668_v41 = vld [vmem:[#allocation5 + $0x144c] ss:$16 sps:$4 sm:$0xff]   ;;  %v15663_v42 = vld [vmem:[#allocation5 + $0x1440] ss:$16 sps:$4 sm:$0xff]  }
 0x2aa   :  { %7518 = vmatpush1.bf16.msra.mxu0 %v15571_v43  ;;  %8256 = vmatpush1.bf16.msra.mxu1 %v15574_v44  ;;  %v15666_v43 = vld [vmem:[#allocation5 + $0x1448] ss:$16 sps:$4 sm:$0xff]   ;;  %v15671_v44 = vld [vmem:[#allocation5 + $0x1464] ss:$16 sps:$4 sm:$0xff]  }
 0x2ab   :  { %7519 = vmatprep.subr.bf16.mxu0 %v15579_v45  ;;  %8257 = vmatprep.subr.bf16.mxu1 %v15582_v46  ;;  %v15674_v45 = vld [vmem:[#allocation5 + $0x146c] ss:$16 sps:$4 sm:$0xff]   ;;  %v15669_v46 = vld [vmem:[#allocation5 + $0x1460] ss:$16 sps:$4 sm:$0xff]  }
 0x2ae   :  { %7520 = vmatpush1.bf16.msra.mxu0 %v15577_v47  ;;  %8258 = vmatpush1.bf16.msra.mxu1 %v15580_v48  ;;  %v15672_v47 = vld [vmem:[#allocation5 + $0x1468] ss:$16 sps:$4 sm:$0xff]   ;;  %v15677_v48 = vld [vmem:[#allocation5 + $0x1484] ss:$16 sps:$4 sm:$0xff]  }
 0x2af   :  { %7521 = vmatprep.subr.bf16.mxu0 %v15585_v49  ;;  %8259 = vmatprep.subr.bf16.mxu1 %v15588_v50  ;;  %v15680_v49 = vld [vmem:[#allocation5 + $0x148c] ss:$16 sps:$4 sm:$0xff]   ;;  %v15675_v50 = vld [vmem:[#allocation5 + $0x1480] ss:$16 sps:$4 sm:$0xff]  }
 0x2b2   :  { %7522 = vmatpush1.bf16.msra.mxu0 %v15583_v51  ;;  %8260 = vmatpush1.bf16.msra.mxu1 %v15586_v52  ;;  %v15678_v51 = vld [vmem:[#allocation5 + $0x1488] ss:$16 sps:$4 sm:$0xff]   ;;  %v15683_v52 = vld [vmem:[#allocation5 + $0x14a4] ss:$16 sps:$4 sm:$0xff]  }
 0x2b3   :  { %7523 = vmatprep.subr.bf16.mxu0 %v15591_v53  ;;  %8261 = vmatprep.subr.bf16.mxu1 %v15594_v54  ;;  %v15686_v53 = vld [vmem:[#allocation5 + $0x14ac] ss:$16 sps:$4 sm:$0xff]   ;;  %v15681_v54 = vld [vmem:[#allocation5 + $0x14a0] ss:$16 sps:$4 sm:$0xff]  }
 0x2b6   :  { %7524 = vmatpush1.bf16.msra.mxu0 %v15589_v55  ;;  %8262 = vmatpush1.bf16.msra.mxu1 %v15592_v56  ;;  %v15684_v55 = vld [vmem:[#allocation5 + $0x14a8] ss:$16 sps:$4 sm:$0xff]   ;;  %v15689_v56 = vld [vmem:[#allocation5 + $0x14c4] ss:$16 sps:$4 sm:$0xff]  }
 0x2b7   :  { %7525 = vmatprep.subr.bf16.mxu0 %v15597_v57  ;;  %8263 = vmatprep.subr.bf16.mxu1 %v15600_v58  ;;  %v15692_v57 = vld [vmem:[#allocation5 + $0x14cc] ss:$16 sps:$4 sm:$0xff]   ;;  %v15687_v58 = vld [vmem:[#allocation5 + $0x14c0] ss:$16 sps:$4 sm:$0xff]  }
 0x2ba   :  { %7526 = vmatpush1.bf16.msra.mxu0 %v15595_v59  ;;  %8264 = vmatpush1.bf16.msra.mxu1 %v15598_v60  ;;  %v15690_v59 = vld [vmem:[#allocation5 + $0x14c8] ss:$16 sps:$4 sm:$0xff]   ;;  %v15695_v60 = vld [vmem:[#allocation5 + $0x14e4] ss:$16 sps:$4 sm:$0xff]  }
 0x2bb   :  { %7527 = vmatprep.subr.bf16.mxu0 %v15603_v61  ;;  %8265 = vmatprep.subr.bf16.mxu1 %v15606_v62  ;;  %v15698_v61 = vld [vmem:[#allocation5 + $0x14ec] ss:$16 sps:$4 sm:$0xff]   ;;  %v15693_v62 = vld [vmem:[#allocation5 + $0x14e0] ss:$16 sps:$4 sm:$0xff]  }
 0x2be   :  { %7528 = vmatpush1.bf16.msra.mxu0 %v15601_v63  ;;  %8266 = vmatpush1.bf16.msra.mxu1 %v15604_v0  ;;  %v15696_v63 = vld [vmem:[#allocation5 + $0x14e8] ss:$16 sps:$4 sm:$0xff]   ;;  %v15701_v0 = vld [vmem:[#allocation5 + $0x1504] ss:$16 sps:$4 sm:$0xff]  }
 0x2bf   :  { %7529 = vmatprep.subr.bf16.mxu0 %v15609_v1  ;;  %8267 = vmatprep.subr.bf16.mxu1 %v15612_v2  ;;  %v15704_v1 = vld [vmem:[#allocation5 + $0x150c] ss:$16 sps:$4 sm:$0xff]   ;;  %v15699_v2 = vld [vmem:[#allocation5 + $0x1500] ss:$16 sps:$4 sm:$0xff]  }
 0x2c2   :  { %7530 = vmatpush1.bf16.msra.mxu0 %v15607_v3  ;;  %8268 = vmatpush1.bf16.msra.mxu1 %v15610_v4  ;;  %v15702_v3 = vld [vmem:[#allocation5 + $0x1508] ss:$16 sps:$4 sm:$0xff]   ;;  %v15707_v4 = vld [vmem:[#allocation5 + $0x1524] ss:$16 sps:$4 sm:$0xff]  }
 0x2c3   :  { %7531 = vmatprep.subr.bf16.mxu0 %v15615_v5  ;;  %8269 = vmatprep.subr.bf16.mxu1 %v15618_v6  ;;  %v15710_v5 = vld [vmem:[#allocation5 + $0x152c] ss:$16 sps:$4 sm:$0xff]   ;;  %v15705_v6 = vld [vmem:[#allocation5 + $0x1520] ss:$16 sps:$4 sm:$0xff]  }
 0x2c6   :  { %7532 = vmatpush1.bf16.msra.mxu0 %v15613_v7  ;;  %8270 = vmatpush1.bf16.msra.mxu1 %v15616_v8  ;;  %v15708_v7 = vld [vmem:[#allocation5 + $0x1528] ss:$16 sps:$4 sm:$0xff]   ;;  %v15713_v8 = vld [vmem:[#allocation5 + $0x1544] ss:$16 sps:$4 sm:$0xff]  }
 0x2c7   :  { %7533 = vmatprep.subr.bf16.mxu0 %v15621_v9  ;;  %8271 = vmatprep.subr.bf16.mxu1 %v15624_v10  ;;  %v15716_v9 = vld [vmem:[#allocation5 + $0x154c] ss:$16 sps:$4 sm:$0xff]   ;;  %v15711_v10 = vld [vmem:[#allocation5 + $0x1540] ss:$16 sps:$4 sm:$0xff]  }
 0x2ca   :  { %7534 = vmatpush1.bf16.msra.mxu0 %v15619_v12  ;;  %8272 = vmatpush1.bf16.msra.mxu1 %v15622_v13  ;;  %v15714_v12 = vld [vmem:[#allocation5 + $0x1548] ss:$16 sps:$4 sm:$0xff]   ;;  %v15719_v13 = vld [vmem:[#allocation5 + $0x1564] ss:$16 sps:$4 sm:$0xff]  }
 0x2cb   :  { %7535 = vmatprep.subr.bf16.mxu0 %v15627_v15  ;;  %8273 = vmatprep.subr.bf16.mxu1 %v15630_v16  ;;  %v15722_v15 = vld [vmem:[#allocation5 + $0x156c] ss:$16 sps:$4 sm:$0xff]   ;;  %v15717_v16 = vld [vmem:[#allocation5 + $0x1560] ss:$16 sps:$4 sm:$0xff]  }
 0x2ce   :  { %7536 = vmatpush1.bf16.msra.mxu0 %v15625_v18  ;;  %8274 = vmatpush1.bf16.msra.mxu1 %v15628_v20  ;;  %v15720_v18 = vld [vmem:[#allocation5 + $0x1568] ss:$16 sps:$4 sm:$0xff]   ;;  %v15725_v20 = vld [vmem:[#allocation5 + $0x1584] ss:$16 sps:$4 sm:$0xff]  }
 0x2cf   :  { %7537 = vmatprep.subr.bf16.mxu0 %v15633_v11  ;;  %8275 = vmatprep.subr.bf16.mxu1 %v15636_v21  ;;  %v15728_v11 = vld [vmem:[#allocation5 + $0x158c] ss:$16 sps:$4 sm:$0xff]   ;;  %v15723_v21 = vld [vmem:[#allocation5 + $0x1580] ss:$16 sps:$4 sm:$0xff]  }
 0x2d2   :  { %7538 = vmatpush1.bf16.msra.mxu0 %v15631_v14  ;;  %8276 = vmatpush1.bf16.msra.mxu1 %v15634_v23  ;;  %v15726_v14 = vld [vmem:[#allocation5 + $0x1588] ss:$16 sps:$4 sm:$0xff]   ;;  %v15731_v23 = vld [vmem:[#allocation5 + $0x15a4] ss:$16 sps:$4 sm:$0xff]  }
 0x2d3   :  { %7539 = vmatprep.subr.bf16.mxu0 %v15639_v24  ;;  %8277 = vmatprep.subr.bf16.mxu1 %v15642_v17  ;;  %v15734_v24 = vld [vmem:[#allocation5 + $0x15ac] ss:$16 sps:$4 sm:$0xff]   ;;  %v15729_v17 = vld [vmem:[#allocation5 + $0x15a0] ss:$16 sps:$4 sm:$0xff]  }
 0x2d6   :  { %7540 = vmatpush1.bf16.msra.mxu0 %v15637_v26  ;;  %8278 = vmatpush1.bf16.msra.mxu1 %v15640_v27  ;;  %v15732_v26 = vld [vmem:[#allocation5 + $0x15a8] ss:$16 sps:$4 sm:$0xff]   ;;  %v15737_v27 = vld [vmem:[#allocation5 + $0x15c4] ss:$16 sps:$4 sm:$0xff]  }
 0x2d7   :  { %7541 = vmatprep.subr.bf16.mxu0 %v15645_v19  ;;  %8279 = vmatprep.subr.bf16.mxu1 %v15648_v29  ;;  %v15740_v19 = vld [vmem:[#allocation5 + $0x15cc] ss:$16 sps:$4 sm:$0xff]   ;;  %v15735_v29 = vld [vmem:[#allocation5 + $0x15c0] ss:$16 sps:$4 sm:$0xff]  }
 0x2da   :  { %7542 = vmatpush1.bf16.msra.mxu0 %v15643_v30  ;;  %8280 = vmatpush1.bf16.msra.mxu1 %v15646_v22  ;;  %v15738_v30 = vld [vmem:[#allocation5 + $0x15c8] ss:$16 sps:$4 sm:$0xff]   ;;  %v15743_v22 = vld [vmem:[#allocation5 + $0x15e4] ss:$16 sps:$4 sm:$0xff]  }
 0x2db   :  { %7552 = vmatprep.subr.bf16.mxu0 %v15653_v32  ;;  %8290 = vmatprep.subr.bf16.mxu1 %v15656_v33  ;;  %v15746_v32 = vld [vmem:[#allocation5 + $0x15ec] ss:$16 sps:$4 sm:$0xff]   ;;  %v15741_v33 = vld [vmem:[#allocation5 + $0x15e0] ss:$16 sps:$4 sm:$0xff]  }
 0x2dd   :  { %7544 = vmatmul.mubr.bf16.vlgmr.msra.gmra.mrb[0].mxu0 %v12593_v25  ;;  %8282 = vmatmul.mubr.bf16.vlgmr.msra.gmra.mrb[0].mxu1 %v12593_v25  ;;  %v15744_v25 = vld [vmem:[#allocation5 + $0x15e8] ss:$16 sps:$4 sm:$0xff]  }
 0x2de   :  { %7553 = vmatpush1.bf16.msra.mxu0 %v15651_v35  ;;  %8291 = vmatpush1.bf16.msra.mxu1 %v15654_v36  ;;  %v15751_v35 = vld [vmem:[#allocation5 + $0x1604] ss:$16 sps:$4 sm:$0xff]   ;;  %v15754_v36 = vld [vmem:[#allocation5 + $0x160c] ss:$16 sps:$4 sm:$0xff]  }
 0x2df   :  { %7554 = vmatprep.subr.bf16.mxu0 %v15659_v37  ;;  %8292 = vmatprep.subr.bf16.mxu1 %v15662_v28  ;;  %v17052_v37 = vld [vmem:[#allocation2 + $0x58] sm:$0xff]  ;;  %v12595_v28 = vcombine.low %v17046_v34, %v17046_v34  ;;  %v15763_v34 = vld [vmem:[#allocation5 + $0x1644] ss:$16 sps:$4 sm:$0xff]  }
 0x2e0   :  { %7584 = vmatprep.mubr.bf16.mxu0 %v12596_v38  ;;  %8322 = vmatprep.mubr.bf16.mxu1 %v12596_v38  ;;  %v15749_v38 = vld [vmem:[#allocation5 + $0x1600] ss:$16 sps:$4 sm:$0xff]  }
 0x2e2   :  { %7555 = vmatpush1.bf16.msra.mxu0 %v15657_v39  ;;  %8293 = vmatpush1.bf16.msra.mxu1 %v15660_v40  ;;  %v15752_v39 = vld [vmem:[#allocation5 + $0x1608] ss:$16 sps:$4 sm:$0xff]   ;;  %v15757_v40 = vld [vmem:[#allocation5 + $0x1624] ss:$16 sps:$4 sm:$0xff]  }
 0x2e3   :  { %7556 = vmatprep.subr.bf16.mxu0 %v15665_v31  ;;  %8294 = vmatprep.subr.bf16.mxu1 %v15668_v41  ;;  %v15760_v31 = vld [vmem:[#allocation5 + $0x162c] ss:$16 sps:$4 sm:$0xff]   ;;  %v12598_v41 = vcombine.high %v17052_v37, %v17052_v37 }
 0x2e6   :  { %7557 = vmatpush1.bf16.msra.mxu0 %v15663_v42  ;;  %8295 = vmatpush1.bf16.msra.mxu1 %v15666_v43  ;;  %v15755_v42 = vld [vmem:[#allocation5 + $0x1620] ss:$16 sps:$4 sm:$0xff]   ;;  %v15758_v43 = vld [vmem:[#allocation5 + $0x1628] ss:$16 sps:$4 sm:$0xff]  }
 0x2e7   :  { %7558 = vmatprep.subr.bf16.mxu0 %v15671_v44  ;;  %8296 = vmatprep.subr.bf16.mxu1 %v15674_v45  ;;  %v15766_v44 = vld [vmem:[#allocation5 + $0x164c] ss:$16 sps:$4 sm:$0xff]   ;;  %v15761_v45 = vld [vmem:[#allocation5 + $0x1640] ss:$16 sps:$4 sm:$0xff]  }
 0x2ea   :  { %7559 = vmatpush1.bf16.msra.mxu0 %v15669_v46  ;;  %8297 = vmatpush1.bf16.msra.mxu1 %v15672_v47  ;;  %v15764_v46 = vld [vmem:[#allocation5 + $0x1648] ss:$16 sps:$4 sm:$0xff]   ;;  %v15769_v47 = vld [vmem:[#allocation5 + $0x1664] ss:$16 sps:$4 sm:$0xff]  }
 0x2eb   :  { %7560 = vmatprep.subr.bf16.mxu0 %v15677_v48  ;;  %8298 = vmatprep.subr.bf16.mxu1 %v15680_v49  ;;  %v15772_v48 = vld [vmem:[#allocation5 + $0x166c] ss:$16 sps:$4 sm:$0xff]   ;;  %v15767_v49 = vld [vmem:[#allocation5 + $0x1660] ss:$16 sps:$4 sm:$0xff]  }
 0x2ee   :  { %7561 = vmatpush1.bf16.msra.mxu0 %v15675_v50  ;;  %8299 = vmatpush1.bf16.msra.mxu1 %v15678_v51  ;;  %v15770_v50 = vld [vmem:[#allocation5 + $0x1668] ss:$16 sps:$4 sm:$0xff]   ;;  %v15775_v51 = vld [vmem:[#allocation5 + $0x1684] ss:$16 sps:$4 sm:$0xff]  }
 0x2ef   :  { %7562 = vmatprep.subr.bf16.mxu0 %v15683_v52  ;;  %8300 = vmatprep.subr.bf16.mxu1 %v15686_v53  ;;  %v15778_v52 = vld [vmem:[#allocation5 + $0x168c] ss:$16 sps:$4 sm:$0xff]   ;;  %v15773_v53 = vld [vmem:[#allocation5 + $0x1680] ss:$16 sps:$4 sm:$0xff]  }
 0x2f2   :  { %7563 = vmatpush1.bf16.msra.mxu0 %v15681_v54  ;;  %8301 = vmatpush1.bf16.msra.mxu1 %v15684_v55  ;;  %v15776_v54 = vld [vmem:[#allocation5 + $0x1688] ss:$16 sps:$4 sm:$0xff]   ;;  %v15781_v55 = vld [vmem:[#allocation5 + $0x16a4] ss:$16 sps:$4 sm:$0xff]  }
 0x2f3   :  { %7564 = vmatprep.subr.bf16.mxu0 %v15689_v56  ;;  %8302 = vmatprep.subr.bf16.mxu1 %v15692_v57  ;;  %v15784_v56 = vld [vmem:[#allocation5 + $0x16ac] ss:$16 sps:$4 sm:$0xff]   ;;  %v15779_v57 = vld [vmem:[#allocation5 + $0x16a0] ss:$16 sps:$4 sm:$0xff]  }
 0x2f6   :  { %7565 = vmatpush1.bf16.msra.mxu0 %v15687_v58  ;;  %8303 = vmatpush1.bf16.msra.mxu1 %v15690_v59  ;;  %v15782_v58 = vld [vmem:[#allocation5 + $0x16a8] ss:$16 sps:$4 sm:$0xff]   ;;  %v15787_v59 = vld [vmem:[#allocation5 + $0x16c4] ss:$16 sps:$4 sm:$0xff]  }
 0x2f7   :  { %7566 = vmatprep.subr.bf16.mxu0 %v15695_v60  ;;  %8304 = vmatprep.subr.bf16.mxu1 %v15698_v61  ;;  %v15790_v60 = vld [vmem:[#allocation5 + $0x16cc] ss:$16 sps:$4 sm:$0xff]   ;;  %v15785_v61 = vld [vmem:[#allocation5 + $0x16c0] ss:$16 sps:$4 sm:$0xff]  }
 0x2fa   :  { %7567 = vmatpush1.bf16.msra.mxu0 %v15693_v62  ;;  %8305 = vmatpush1.bf16.msra.mxu1 %v15696_v63  ;;  %v15788_v62 = vld [vmem:[#allocation5 + $0x16c8] ss:$16 sps:$4 sm:$0xff]   ;;  %v15793_v63 = vld [vmem:[#allocation5 + $0x16e4] ss:$16 sps:$4 sm:$0xff]  }
 0x2fb   :  { %7568 = vmatprep.subr.bf16.mxu0 %v15701_v0  ;;  %8306 = vmatprep.subr.bf16.mxu1 %v15704_v1  ;;  %v15796_v0 = vld [vmem:[#allocation5 + $0x16ec] ss:$16 sps:$4 sm:$0xff]   ;;  %v15791_v1 = vld [vmem:[#allocation5 + $0x16e0] ss:$16 sps:$4 sm:$0xff]  }
 0x2fe   :  { %7569 = vmatpush1.bf16.msra.mxu0 %v15699_v2  ;;  %8307 = vmatpush1.bf16.msra.mxu1 %v15702_v3  ;;  %v15794_v2 = vld [vmem:[#allocation5 + $0x16e8] ss:$16 sps:$4 sm:$0xff]   ;;  %v15799_v3 = vld [vmem:[#allocation5 + $0x1704] ss:$16 sps:$4 sm:$0xff]  }
 0x2ff   :  { %7570 = vmatprep.subr.bf16.mxu0 %v15707_v4  ;;  %8308 = vmatprep.subr.bf16.mxu1 %v15710_v5  ;;  %v15802_v4 = vld [vmem:[#allocation5 + $0x170c] ss:$16 sps:$4 sm:$0xff]   ;;  %v15797_v5 = vld [vmem:[#allocation5 + $0x1700] ss:$16 sps:$4 sm:$0xff]  }
 0x302   :  { %7571 = vmatpush1.bf16.msra.mxu0 %v15705_v6  ;;  %8309 = vmatpush1.bf16.msra.mxu1 %v15708_v7  ;;  %v15800_v6 = vld [vmem:[#allocation5 + $0x1708] ss:$16 sps:$4 sm:$0xff]   ;;  %v15805_v7 = vld [vmem:[#allocation5 + $0x1724] ss:$16 sps:$4 sm:$0xff]  }
 0x303   :  { %7572 = vmatprep.subr.bf16.mxu0 %v15713_v8  ;;  %8310 = vmatprep.subr.bf16.mxu1 %v15716_v9  ;;  %v15808_v8 = vld [vmem:[#allocation5 + $0x172c] ss:$16 sps:$4 sm:$0xff]   ;;  %v15803_v9 = vld [vmem:[#allocation5 + $0x1720] ss:$16 sps:$4 sm:$0xff]  }
 0x306   :  { %7573 = vmatpush1.bf16.msra.mxu0 %v15711_v10  ;;  %8311 = vmatpush1.bf16.msra.mxu1 %v15714_v12  ;;  %v15806_v10 = vld [vmem:[#allocation5 + $0x1728] ss:$16 sps:$4 sm:$0xff]   ;;  %v15811_v12 = vld [vmem:[#allocation5 + $0x1744] ss:$16 sps:$4 sm:$0xff]  }
 0x307   :  { %7574 = vmatprep.subr.bf16.mxu0 %v15719_v13  ;;  %8312 = vmatprep.subr.bf16.mxu1 %v15722_v15  ;;  %v15814_v13 = vld [vmem:[#allocation5 + $0x174c] ss:$16 sps:$4 sm:$0xff]   ;;  %v15809_v15 = vld [vmem:[#allocation5 + $0x1740] ss:$16 sps:$4 sm:$0xff]  }
 0x30a   :  { %7575 = vmatpush1.bf16.msra.mxu0 %v15717_v16  ;;  %8313 = vmatpush1.bf16.msra.mxu1 %v15720_v18  ;;  %v15812_v16 = vld [vmem:[#allocation5 + $0x1748] ss:$16 sps:$4 sm:$0xff]   ;;  %v15817_v18 = vld [vmem:[#allocation5 + $0x1764] ss:$16 sps:$4 sm:$0xff]  }
 0x30b   :  { %7576 = vmatprep.subr.bf16.mxu0 %v15725_v20  ;;  %8314 = vmatprep.subr.bf16.mxu1 %v15728_v11  ;;  %v15820_v20 = vld [vmem:[#allocation5 + $0x176c] ss:$16 sps:$4 sm:$0xff]   ;;  %v15815_v11 = vld [vmem:[#allocation5 + $0x1760] ss:$16 sps:$4 sm:$0xff]  }
 0x30e   :  { %7577 = vmatpush1.bf16.msra.mxu0 %v15723_v21  ;;  %8315 = vmatpush1.bf16.msra.mxu1 %v15726_v14  ;;  %v15818_v21 = vld [vmem:[#allocation5 + $0x1768] ss:$16 sps:$4 sm:$0xff]   ;;  %v15823_v14 = vld [vmem:[#allocation5 + $0x1784] ss:$16 sps:$4 sm:$0xff]  }
 0x30f   :  { %7578 = vmatprep.subr.bf16.mxu0 %v15731_v23  ;;  %8316 = vmatprep.subr.bf16.mxu1 %v15734_v24  ;;  %v15826_v23 = vld [vmem:[#allocation5 + $0x178c] ss:$16 sps:$4 sm:$0xff]   ;;  %v15821_v24 = vld [vmem:[#allocation5 + $0x1780] ss:$16 sps:$4 sm:$0xff]  }
 0x312   :  { %7579 = vmatpush1.bf16.msra.mxu0 %v15729_v17  ;;  %8317 = vmatpush1.bf16.msra.mxu1 %v15732_v26  ;;  %v15824_v17 = vld [vmem:[#allocation5 + $0x1788] ss:$16 sps:$4 sm:$0xff]   ;;  %v15829_v26 = vld [vmem:[#allocation5 + $0x17a4] ss:$16 sps:$4 sm:$0xff]  }
 0x313   :  { %7580 = vmatprep.subr.bf16.mxu0 %v15737_v27  ;;  %8318 = vmatprep.subr.bf16.mxu1 %v15740_v19  ;;  %v15832_v27 = vld [vmem:[#allocation5 + $0x17ac] ss:$16 sps:$4 sm:$0xff]   ;;  %v15827_v19 = vld [vmem:[#allocation5 + $0x17a0] ss:$16 sps:$4 sm:$0xff]  }
 0x316   :  { %7581 = vmatpush1.bf16.msra.mxu0 %v15735_v29  ;;  %8319 = vmatpush1.bf16.msra.mxu1 %v15738_v30  ;;  %v15830_v29 = vld [vmem:[#allocation5 + $0x17a8] ss:$16 sps:$4 sm:$0xff]   ;;  %v15835_v30 = vld [vmem:[#allocation5 + $0x17c4] ss:$16 sps:$4 sm:$0xff]  }
 0x317   :  { %7582 = vmatprep.subr.bf16.mxu0 %v15743_v22  ;;  %8320 = vmatprep.subr.bf16.mxu1 %v15746_v32  ;;  %v15838_v22 = vld [vmem:[#allocation5 + $0x17cc] ss:$16 sps:$4 sm:$0xff]   ;;  %v15833_v32 = vld [vmem:[#allocation5 + $0x17c0] ss:$16 sps:$4 sm:$0xff]  }
 0x31a   :  { %7583 = vmatpush1.bf16.msra.mxu0 %v15741_v33  ;;  %8321 = vmatpush1.bf16.msra.mxu1 %v15744_v25  ;;  %v15836_v33 = vld [vmem:[#allocation5 + $0x17c8] ss:$16 sps:$4 sm:$0xff]   ;;  %v15841_v25 = vld [vmem:[#allocation5 + $0x17e4] ss:$16 sps:$4 sm:$0xff]  }
 0x31b   :  { %7593 = vmatprep.subr.bf16.mxu0 %v15751_v35  ;;  %8331 = vmatprep.subr.bf16.mxu1 %v15754_v36  ;;  %v15844_v35 = vld [vmem:[#allocation5 + $0x17ec] ss:$16 sps:$4 sm:$0xff]   ;;  %v15839_v36 = vld [vmem:[#allocation5 + $0x17e0] ss:$16 sps:$4 sm:$0xff]  }
 0x31d   :  { %7585 = vmatmul.mubr.bf16.vlgmr.msra.gmra.mrb[0].mxu0 %v12595_v28  ;;  %8323 = vmatmul.mubr.bf16.vlgmr.msra.gmra.mrb[0].mxu1 %v12595_v28  ;;  %v15842_v28 = vld [vmem:[#allocation5 + $0x17e8] ss:$16 sps:$4 sm:$0xff]  }
 0x31e   :  { %7594 = vmatpush1.bf16.msra.mxu0 %v15749_v38  ;;  %8332 = vmatpush1.bf16.msra.mxu1 %v15752_v39  ;;  %v15849_v38 = vld [vmem:[#allocation5 + $0x1804] ss:$16 sps:$4 sm:$0xff]   ;;  %v15852_v39 = vld [vmem:[#allocation5 + $0x180c] ss:$16 sps:$4 sm:$0xff]  }
 0x31f   :  { %7595 = vmatprep.subr.bf16.mxu0 %v15757_v40  ;;  %8333 = vmatprep.subr.bf16.mxu1 %v15760_v31  ;;  %v17058_v40 = vld [vmem:[#allocation2 + $0x60] sm:$0xff]  ;;  %v12597_v31 = vcombine.low %v17052_v37, %v17052_v37 }
 0x320   :  { %7625 = vmatprep.mubr.bf16.mxu0 %v12598_v41  ;;  %8363 = vmatprep.mubr.bf16.mxu1 %v12598_v41  ;;  %v15847_v41 = vld [vmem:[#allocation5 + $0x1800] ss:$16 sps:$4 sm:$0xff]   ;;  %v15861_v37 = vld [vmem:[#allocation5 + $0x1844] ss:$16 sps:$4 sm:$0xff]  }
 0x322   :  { %7596 = vmatpush1.bf16.msra.mxu0 %v15755_v42  ;;  %8334 = vmatpush1.bf16.msra.mxu1 %v15758_v43  ;;  %v15850_v42 = vld [vmem:[#allocation5 + $0x1808] ss:$16 sps:$4 sm:$0xff]   ;;  %v15855_v43 = vld [vmem:[#allocation5 + $0x1824] ss:$16 sps:$4 sm:$0xff]  }
 0x323   :  { %7597 = vmatprep.subr.bf16.mxu0 %v15763_v34  ;;  %8335 = vmatprep.subr.bf16.mxu1 %v15766_v44  ;;  %v15858_v34 = vld [vmem:[#allocation5 + $0x182c] ss:$16 sps:$4 sm:$0xff]   ;;  %v12600_v44 = vcombine.high %v17058_v40, %v17058_v40 }
 0x326   :  { %7598 = vmatpush1.bf16.msra.mxu0 %v15761_v45  ;;  %8336 = vmatpush1.bf16.msra.mxu1 %v15764_v46  ;;  %v15853_v45 = vld [vmem:[#allocation5 + $0x1820] ss:$16 sps:$4 sm:$0xff]   ;;  %v15856_v46 = vld [vmem:[#allocation5 + $0x1828] ss:$16 sps:$4 sm:$0xff]  }
 0x327   :  { %7599 = vmatprep.subr.bf16.mxu0 %v15769_v47  ;;  %8337 = vmatprep.subr.bf16.mxu1 %v15772_v48  ;;  %v15864_v47 = vld [vmem:[#allocation5 + $0x184c] ss:$16 sps:$4 sm:$0xff]   ;;  %v15859_v48 = vld [vmem:[#allocation5 + $0x1840] ss:$16 sps:$4 sm:$0xff]  }
 0x32a   :  { %7600 = vmatpush1.bf16.msra.mxu0 %v15767_v49  ;;  %8338 = vmatpush1.bf16.msra.mxu1 %v15770_v50  ;;  %v15862_v49 = vld [vmem:[#allocation5 + $0x1848] ss:$16 sps:$4 sm:$0xff]   ;;  %v15867_v50 = vld [vmem:[#allocation5 + $0x1864] ss:$16 sps:$4 sm:$0xff]  }
 0x32b   :  { %7601 = vmatprep.subr.bf16.mxu0 %v15775_v51  ;;  %8339 = vmatprep.subr.bf16.mxu1 %v15778_v52  ;;  %v15870_v51 = vld [vmem:[#allocation5 + $0x186c] ss:$16 sps:$4 sm:$0xff]   ;;  %v15865_v52 = vld [vmem:[#allocation5 + $0x1860] ss:$16 sps:$4 sm:$0xff]  }
 0x32e   :  { %7602 = vmatpush1.bf16.msra.mxu0 %v15773_v53  ;;  %8340 = vmatpush1.bf16.msra.mxu1 %v15776_v54  ;;  %v15868_v53 = vld [vmem:[#allocation5 + $0x1868] ss:$16 sps:$4 sm:$0xff]   ;;  %v15873_v54 = vld [vmem:[#allocation5 + $0x1884] ss:$16 sps:$4 sm:$0xff]  }
 0x32f   :  { %7603 = vmatprep.subr.bf16.mxu0 %v15781_v55  ;;  %8341 = vmatprep.subr.bf16.mxu1 %v15784_v56  ;;  %v15876_v55 = vld [vmem:[#allocation5 + $0x188c] ss:$16 sps:$4 sm:$0xff]   ;;  %v15871_v56 = vld [vmem:[#allocation5 + $0x1880] ss:$16 sps:$4 sm:$0xff]  }
 0x332   :  { %7604 = vmatpush1.bf16.msra.mxu0 %v15779_v57  ;;  %8342 = vmatpush1.bf16.msra.mxu1 %v15782_v58  ;;  %v15874_v57 = vld [vmem:[#allocation5 + $0x1888] ss:$16 sps:$4 sm:$0xff]   ;;  %v15879_v58 = vld [vmem:[#allocation5 + $0x18a4] ss:$16 sps:$4 sm:$0xff]  }
 0x333   :  { %7605 = vmatprep.subr.bf16.mxu0 %v15787_v59  ;;  %8343 = vmatprep.subr.bf16.mxu1 %v15790_v60  ;;  %v15882_v59 = vld [vmem:[#allocation5 + $0x18ac] ss:$16 sps:$4 sm:$0xff]   ;;  %v15877_v60 = vld [vmem:[#allocation5 + $0x18a0] ss:$16 sps:$4 sm:$0xff]  }
 0x336   :  { %7606 = vmatpush1.bf16.msra.mxu0 %v15785_v61  ;;  %8344 = vmatpush1.bf16.msra.mxu1 %v15788_v62  ;;  %v15880_v61 = vld [vmem:[#allocation5 + $0x18a8] ss:$16 sps:$4 sm:$0xff]   ;;  %v15885_v62 = vld [vmem:[#allocation5 + $0x18c4] ss:$16 sps:$4 sm:$0xff]  }
 0x337   :  { %7607 = vmatprep.subr.bf16.mxu0 %v15793_v63  ;;  %8345 = vmatprep.subr.bf16.mxu1 %v15796_v0  ;;  %v15888_v63 = vld [vmem:[#allocation5 + $0x18cc] ss:$16 sps:$4 sm:$0xff]   ;;  %v15883_v0 = vld [vmem:[#allocation5 + $0x18c0] ss:$16 sps:$4 sm:$0xff]  }
 0x33a   :  { %7608 = vmatpush1.bf16.msra.mxu0 %v15791_v1  ;;  %8346 = vmatpush1.bf16.msra.mxu1 %v15794_v2  ;;  %v15886_v1 = vld [vmem:[#allocation5 + $0x18c8] ss:$16 sps:$4 sm:$0xff]   ;;  %v15891_v2 = vld [vmem:[#allocation5 + $0x18e4] ss:$16 sps:$4 sm:$0xff]  }
 0x33b   :  { %7609 = vmatprep.subr.bf16.mxu0 %v15799_v3  ;;  %8347 = vmatprep.subr.bf16.mxu1 %v15802_v4  ;;  %v15894_v3 = vld [vmem:[#allocation5 + $0x18ec] ss:$16 sps:$4 sm:$0xff]   ;;  %v15889_v4 = vld [vmem:[#allocation5 + $0x18e0] ss:$16 sps:$4 sm:$0xff]  }
 0x33e   :  { %7610 = vmatpush1.bf16.msra.mxu0 %v15797_v5  ;;  %8348 = vmatpush1.bf16.msra.mxu1 %v15800_v6  ;;  %v15892_v5 = vld [vmem:[#allocation5 + $0x18e8] ss:$16 sps:$4 sm:$0xff]   ;;  %v15897_v6 = vld [vmem:[#allocation5 + $0x1904] ss:$16 sps:$4 sm:$0xff]  }
 0x33f   :  { %7611 = vmatprep.subr.bf16.mxu0 %v15805_v7  ;;  %8349 = vmatprep.subr.bf16.mxu1 %v15808_v8  ;;  %v15900_v7 = vld [vmem:[#allocation5 + $0x190c] ss:$16 sps:$4 sm:$0xff]   ;;  %v15895_v8 = vld [vmem:[#allocation5 + $0x1900] ss:$16 sps:$4 sm:$0xff]  }
 0x342   :  { %7612 = vmatpush1.bf16.msra.mxu0 %v15803_v9  ;;  %8350 = vmatpush1.bf16.msra.mxu1 %v15806_v10  ;;  %v15898_v9 = vld [vmem:[#allocation5 + $0x1908] ss:$16 sps:$4 sm:$0xff]   ;;  %v15903_v10 = vld [vmem:[#allocation5 + $0x1924] ss:$16 sps:$4 sm:$0xff]  }
 0x343   :  { %7613 = vmatprep.subr.bf16.mxu0 %v15811_v12  ;;  %8351 = vmatprep.subr.bf16.mxu1 %v15814_v13  ;;  %v15906_v12 = vld [vmem:[#allocation5 + $0x192c] ss:$16 sps:$4 sm:$0xff]   ;;  %v15901_v13 = vld [vmem:[#allocation5 + $0x1920] ss:$16 sps:$4 sm:$0xff]  }
 0x346   :  { %7614 = vmatpush1.bf16.msra.mxu0 %v15809_v15  ;;  %8352 = vmatpush1.bf16.msra.mxu1 %v15812_v16  ;;  %v15904_v15 = vld [vmem:[#allocation5 + $0x1928] ss:$16 sps:$4 sm:$0xff]   ;;  %v15909_v16 = vld [vmem:[#allocation5 + $0x1944] ss:$16 sps:$4 sm:$0xff]  }
 0x347   :  { %7615 = vmatprep.subr.bf16.mxu0 %v15817_v18  ;;  %8353 = vmatprep.subr.bf16.mxu1 %v15820_v20  ;;  %v15912_v18 = vld [vmem:[#allocation5 + $0x194c] ss:$16 sps:$4 sm:$0xff]   ;;  %v15907_v20 = vld [vmem:[#allocation5 + $0x1940] ss:$16 sps:$4 sm:$0xff]  }
 0x34a   :  { %7616 = vmatpush1.bf16.msra.mxu0 %v15815_v11  ;;  %8354 = vmatpush1.bf16.msra.mxu1 %v15818_v21  ;;  %v15910_v11 = vld [vmem:[#allocation5 + $0x1948] ss:$16 sps:$4 sm:$0xff]   ;;  %v15915_v21 = vld [vmem:[#allocation5 + $0x1964] ss:$16 sps:$4 sm:$0xff]  }
 0x34b   :  { %7617 = vmatprep.subr.bf16.mxu0 %v15823_v14  ;;  %8355 = vmatprep.subr.bf16.mxu1 %v15826_v23  ;;  %v15918_v14 = vld [vmem:[#allocation5 + $0x196c] ss:$16 sps:$4 sm:$0xff]   ;;  %v15913_v23 = vld [vmem:[#allocation5 + $0x1960] ss:$16 sps:$4 sm:$0xff]  }
 0x34e   :  { %7618 = vmatpush1.bf16.msra.mxu0 %v15821_v24  ;;  %8356 = vmatpush1.bf16.msra.mxu1 %v15824_v17  ;;  %v15916_v24 = vld [vmem:[#allocation5 + $0x1968] ss:$16 sps:$4 sm:$0xff]   ;;  %v15921_v17 = vld [vmem:[#allocation5 + $0x1984] ss:$16 sps:$4 sm:$0xff]  }
 0x34f   :  { %7619 = vmatprep.subr.bf16.mxu0 %v15829_v26  ;;  %8357 = vmatprep.subr.bf16.mxu1 %v15832_v27  ;;  %v15924_v26 = vld [vmem:[#allocation5 + $0x198c] ss:$16 sps:$4 sm:$0xff]   ;;  %v15919_v27 = vld [vmem:[#allocation5 + $0x1980] ss:$16 sps:$4 sm:$0xff]  }
 0x352   :  { %7620 = vmatpush1.bf16.msra.mxu0 %v15827_v19  ;;  %8358 = vmatpush1.bf16.msra.mxu1 %v15830_v29  ;;  %v15922_v19 = vld [vmem:[#allocation5 + $0x1988] ss:$16 sps:$4 sm:$0xff]   ;;  %v15927_v29 = vld [vmem:[#allocation5 + $0x19a4] ss:$16 sps:$4 sm:$0xff]  }
 0x353   :  { %7621 = vmatprep.subr.bf16.mxu0 %v15835_v30  ;;  %8359 = vmatprep.subr.bf16.mxu1 %v15838_v22  ;;  %v15930_v30 = vld [vmem:[#allocation5 + $0x19ac] ss:$16 sps:$4 sm:$0xff]   ;;  %v15925_v22 = vld [vmem:[#allocation5 + $0x19a0] ss:$16 sps:$4 sm:$0xff]  }
 0x356   :  { %7622 = vmatpush1.bf16.msra.mxu0 %v15833_v32  ;;  %8360 = vmatpush1.bf16.msra.mxu1 %v15836_v33  ;;  %v15928_v32 = vld [vmem:[#allocation5 + $0x19a8] ss:$16 sps:$4 sm:$0xff]   ;;  %v15933_v33 = vld [vmem:[#allocation5 + $0x19c4] ss:$16 sps:$4 sm:$0xff]  }
 0x357   :  { %7623 = vmatprep.subr.bf16.mxu0 %v15841_v25  ;;  %8361 = vmatprep.subr.bf16.mxu1 %v15844_v35  ;;  %v15936_v25 = vld [vmem:[#allocation5 + $0x19cc] ss:$16 sps:$4 sm:$0xff]   ;;  %v15931_v35 = vld [vmem:[#allocation5 + $0x19c0] ss:$16 sps:$4 sm:$0xff]  }
 0x35a   :  { %7624 = vmatpush1.bf16.msra.mxu0 %v15839_v36  ;;  %8362 = vmatpush1.bf16.msra.mxu1 %v15842_v28  ;;  %v15934_v36 = vld [vmem:[#allocation5 + $0x19c8] ss:$16 sps:$4 sm:$0xff]   ;;  %v15939_v28 = vld [vmem:[#allocation5 + $0x19e4] ss:$16 sps:$4 sm:$0xff]  }
 0x35b   :  { %7634 = vmatprep.subr.bf16.mxu0 %v15849_v38  ;;  %8372 = vmatprep.subr.bf16.mxu1 %v15852_v39  ;;  %v15942_v38 = vld [vmem:[#allocation5 + $0x19ec] ss:$16 sps:$4 sm:$0xff]   ;;  %v15937_v39 = vld [vmem:[#allocation5 + $0x19e0] ss:$16 sps:$4 sm:$0xff]  }
 0x35d   :  { %7626 = vmatmul.mubr.bf16.vlgmr.msra.gmra.mrb[0].mxu0 %v12597_v31  ;;  %8364 = vmatmul.mubr.bf16.vlgmr.msra.gmra.mrb[0].mxu1 %v12597_v31  ;;  %v15940_v31 = vld [vmem:[#allocation5 + $0x19e8] ss:$16 sps:$4 sm:$0xff]  }
 0x35e   :  { %7635 = vmatpush1.bf16.msra.mxu0 %v15847_v41  ;;  %8373 = vmatpush1.bf16.msra.mxu1 %v15850_v42  ;;  %v15947_v41 = vld [vmem:[#allocation5 + $0x1a04] ss:$16 sps:$4 sm:$0xff]   ;;  %v15950_v42 = vld [vmem:[#allocation5 + $0x1a0c] ss:$16 sps:$4 sm:$0xff]  }
 0x35f   :  { %7636 = vmatprep.subr.bf16.mxu0 %v15855_v43  ;;  %8374 = vmatprep.subr.bf16.mxu1 %v15858_v34  ;;  %v17064_v43 = vld [vmem:[#allocation2 + $0x68] sm:$0xff]  ;;  %v12599_v34 = vcombine.low %v17058_v40, %v17058_v40  ;;  %v15959_v40 = vld [vmem:[#allocation5 + $0x1a44] ss:$16 sps:$4 sm:$0xff]  }
 0x360   :  { %7666 = vmatprep.mubr.bf16.mxu0 %v12600_v44  ;;  %8404 = vmatprep.mubr.bf16.mxu1 %v12600_v44  ;;  %v15945_v44 = vld [vmem:[#allocation5 + $0x1a00] ss:$16 sps:$4 sm:$0xff]  }
 0x362   :  { %7637 = vmatpush1.bf16.msra.mxu0 %v15853_v45  ;;  %8375 = vmatpush1.bf16.msra.mxu1 %v15856_v46  ;;  %v15948_v45 = vld [vmem:[#allocation5 + $0x1a08] ss:$16 sps:$4 sm:$0xff]   ;;  %v15953_v46 = vld [vmem:[#allocation5 + $0x1a24] ss:$16 sps:$4 sm:$0xff]  }
 0x363   :  { %7638 = vmatprep.subr.bf16.mxu0 %v15861_v37  ;;  %8376 = vmatprep.subr.bf16.mxu1 %v15864_v47  ;;  %v15956_v37 = vld [vmem:[#allocation5 + $0x1a2c] ss:$16 sps:$4 sm:$0xff]   ;;  %v12602_v47 = vcombine.high %v17064_v43, %v17064_v43 }
 0x366   :  { %7639 = vmatpush1.bf16.msra.mxu0 %v15859_v48  ;;  %8377 = vmatpush1.bf16.msra.mxu1 %v15862_v49  ;;  %v15951_v48 = vld [vmem:[#allocation5 + $0x1a20] ss:$16 sps:$4 sm:$0xff]   ;;  %v15954_v49 = vld [vmem:[#allocation5 + $0x1a28] ss:$16 sps:$4 sm:$0xff]  }
 0x367   :  { %7640 = vmatprep.subr.bf16.mxu0 %v15867_v50  ;;  %8378 = vmatprep.subr.bf16.mxu1 %v15870_v51  ;;  %v15962_v50 = vld [vmem:[#allocation5 + $0x1a4c] ss:$16 sps:$4 sm:$0xff]   ;;  %v15957_v51 = vld [vmem:[#allocation5 + $0x1a40] ss:$16 sps:$4 sm:$0xff]  }
 0x36a   :  { %7641 = vmatpush1.bf16.msra.mxu0 %v15865_v52  ;;  %8379 = vmatpush1.bf16.msra.mxu1 %v15868_v53  ;;  %v15960_v52 = vld [vmem:[#allocation5 + $0x1a48] ss:$16 sps:$4 sm:$0xff]   ;;  %v15965_v53 = vld [vmem:[#allocation5 + $0x1a64] ss:$16 sps:$4 sm:$0xff]  }
 0x36b   :  { %7642 = vmatprep.subr.bf16.mxu0 %v15873_v54  ;;  %8380 = vmatprep.subr.bf16.mxu1 %v15876_v55  ;;  %v15968_v54 = vld [vmem:[#allocation5 + $0x1a6c] ss:$16 sps:$4 sm:$0xff]   ;;  %v15963_v55 = vld [vmem:[#allocation5 + $0x1a60] ss:$16 sps:$4 sm:$0xff]  }
 0x36e   :  { %7643 = vmatpush1.bf16.msra.mxu0 %v15871_v56  ;;  %8381 = vmatpush1.bf16.msra.mxu1 %v15874_v57  ;;  %v15966_v56 = vld [vmem:[#allocation5 + $0x1a68] ss:$16 sps:$4 sm:$0xff]   ;;  %v15971_v57 = vld [vmem:[#allocation5 + $0x1a84] ss:$16 sps:$4 sm:$0xff]  }
 0x36f   :  { %7644 = vmatprep.subr.bf16.mxu0 %v15879_v58  ;;  %8382 = vmatprep.subr.bf16.mxu1 %v15882_v59  ;;  %v15974_v58 = vld [vmem:[#allocation5 + $0x1a8c] ss:$16 sps:$4 sm:$0xff]   ;;  %v15969_v59 = vld [vmem:[#allocation5 + $0x1a80] ss:$16 sps:$4 sm:$0xff]  }
 0x372   :  { %7645 = vmatpush1.bf16.msra.mxu0 %v15877_v60  ;;  %8383 = vmatpush1.bf16.msra.mxu1 %v15880_v61  ;;  %v15972_v60 = vld [vmem:[#allocation5 + $0x1a88] ss:$16 sps:$4 sm:$0xff]   ;;  %v15977_v61 = vld [vmem:[#allocation5 + $0x1aa4] ss:$16 sps:$4 sm:$0xff]  }
 0x373   :  { %7646 = vmatprep.subr.bf16.mxu0 %v15885_v62  ;;  %8384 = vmatprep.subr.bf16.mxu1 %v15888_v63  ;;  %v15980_v62 = vld [vmem:[#allocation5 + $0x1aac] ss:$16 sps:$4 sm:$0xff]   ;;  %v15975_v63 = vld [vmem:[#allocation5 + $0x1aa0] ss:$16 sps:$4 sm:$0xff]  }
 0x376   :  { %7647 = vmatpush1.bf16.msra.mxu0 %v15883_v0  ;;  %8385 = vmatpush1.bf16.msra.mxu1 %v15886_v1  ;;  %v15978_v0 = vld [vmem:[#allocation5 + $0x1aa8] ss:$16 sps:$4 sm:$0xff]   ;;  %v15983_v1 = vld [vmem:[#allocation5 + $0x1ac4] ss:$16 sps:$4 sm:$0xff]  }
 0x377   :  { %7648 = vmatprep.subr.bf16.mxu0 %v15891_v2  ;;  %8386 = vmatprep.subr.bf16.mxu1 %v15894_v3  ;;  %v15986_v2 = vld [vmem:[#allocation5 + $0x1acc] ss:$16 sps:$4 sm:$0xff]   ;;  %v15981_v3 = vld [vmem:[#allocation5 + $0x1ac0] ss:$16 sps:$4 sm:$0xff]  }
 0x37a   :  { %7649 = vmatpush1.bf16.msra.mxu0 %v15889_v4  ;;  %8387 = vmatpush1.bf16.msra.mxu1 %v15892_v5  ;;  %v15984_v4 = vld [vmem:[#allocation5 + $0x1ac8] ss:$16 sps:$4 sm:$0xff]   ;;  %v15989_v5 = vld [vmem:[#allocation5 + $0x1ae4] ss:$16 sps:$4 sm:$0xff]  }
 0x37b   :  { %7650 = vmatprep.subr.bf16.mxu0 %v15897_v6  ;;  %8388 = vmatprep.subr.bf16.mxu1 %v15900_v7  ;;  %v15992_v6 = vld [vmem:[#allocation5 + $0x1aec] ss:$16 sps:$4 sm:$0xff]   ;;  %v15987_v7 = vld [vmem:[#allocation5 + $0x1ae0] ss:$16 sps:$4 sm:$0xff]  }
 0x37e   :  { %7651 = vmatpush1.bf16.msra.mxu0 %v15895_v8  ;;  %8389 = vmatpush1.bf16.msra.mxu1 %v15898_v9  ;;  %v15990_v8 = vld [vmem:[#allocation5 + $0x1ae8] ss:$16 sps:$4 sm:$0xff]   ;;  %v15995_v9 = vld [vmem:[#allocation5 + $0x1b04] ss:$16 sps:$4 sm:$0xff]  }
 0x37f   :  { %7652 = vmatprep.subr.bf16.mxu0 %v15903_v10  ;;  %8390 = vmatprep.subr.bf16.mxu1 %v15906_v12  ;;  %v15998_v10 = vld [vmem:[#allocation5 + $0x1b0c] ss:$16 sps:$4 sm:$0xff]   ;;  %v15993_v12 = vld [vmem:[#allocation5 + $0x1b00] ss:$16 sps:$4 sm:$0xff]  }
 0x382   :  { %7653 = vmatpush1.bf16.msra.mxu0 %v15901_v13  ;;  %8391 = vmatpush1.bf16.msra.mxu1 %v15904_v15  ;;  %v15996_v13 = vld [vmem:[#allocation5 + $0x1b08] ss:$16 sps:$4 sm:$0xff]   ;;  %v16001_v15 = vld [vmem:[#allocation5 + $0x1b24] ss:$16 sps:$4 sm:$0xff]  }
 0x383   :  { %7654 = vmatprep.subr.bf16.mxu0 %v15909_v16  ;;  %8392 = vmatprep.subr.bf16.mxu1 %v15912_v18  ;;  %v16004_v16 = vld [vmem:[#allocation5 + $0x1b2c] ss:$16 sps:$4 sm:$0xff]   ;;  %v15999_v18 = vld [vmem:[#allocation5 + $0x1b20] ss:$16 sps:$4 sm:$0xff]  }
 0x386   :  { %7655 = vmatpush1.bf16.msra.mxu0 %v15907_v20  ;;  %8393 = vmatpush1.bf16.msra.mxu1 %v15910_v11  ;;  %v16002_v20 = vld [vmem:[#allocation5 + $0x1b28] ss:$16 sps:$4 sm:$0xff]   ;;  %v16007_v11 = vld [vmem:[#allocation5 + $0x1b44] ss:$16 sps:$4 sm:$0xff]  }
 0x387   :  { %7656 = vmatprep.subr.bf16.mxu0 %v15915_v21  ;;  %8394 = vmatprep.subr.bf16.mxu1 %v15918_v14  ;;  %v16010_v21 = vld [vmem:[#allocation5 + $0x1b4c] ss:$16 sps:$4 sm:$0xff]   ;;  %v16005_v14 = vld [vmem:[#allocation5 + $0x1b40] ss:$16 sps:$4 sm:$0xff]  }
 0x38a   :  { %7657 = vmatpush1.bf16.msra.mxu0 %v15913_v23  ;;  %8395 = vmatpush1.bf16.msra.mxu1 %v15916_v24  ;;  %v16008_v23 = vld [vmem:[#allocation5 + $0x1b48] ss:$16 sps:$4 sm:$0xff]   ;;  %v16013_v24 = vld [vmem:[#allocation5 + $0x1b64] ss:$16 sps:$4 sm:$0xff]  }
 0x38b   :  { %7658 = vmatprep.subr.bf16.mxu0 %v15921_v17  ;;  %8396 = vmatprep.subr.bf16.mxu1 %v15924_v26  ;;  %v16016_v17 = vld [vmem:[#allocation5 + $0x1b6c] ss:$16 sps:$4 sm:$0xff]   ;;  %v16011_v26 = vld [vmem:[#allocation5 + $0x1b60] ss:$16 sps:$4 sm:$0xff]  }
 0x38e   :  { %7659 = vmatpush1.bf16.msra.mxu0 %v15919_v27  ;;  %8397 = vmatpush1.bf16.msra.mxu1 %v15922_v19  ;;  %v16014_v27 = vld [vmem:[#allocation5 + $0x1b68] ss:$16 sps:$4 sm:$0xff]   ;;  %v16019_v19 = vld [vmem:[#allocation5 + $0x1b84] ss:$16 sps:$4 sm:$0xff]  }
 0x38f   :  { %7660 = vmatprep.subr.bf16.mxu0 %v15927_v29  ;;  %8398 = vmatprep.subr.bf16.mxu1 %v15930_v30  ;;  %v16022_v29 = vld [vmem:[#allocation5 + $0x1b8c] ss:$16 sps:$4 sm:$0xff]   ;;  %v16017_v30 = vld [vmem:[#allocation5 + $0x1b80] ss:$16 sps:$4 sm:$0xff]  }
 0x392   :  { %7661 = vmatpush1.bf16.msra.mxu0 %v15925_v22  ;;  %8399 = vmatpush1.bf16.msra.mxu1 %v15928_v32  ;;  %v16020_v22 = vld [vmem:[#allocation5 + $0x1b88] ss:$16 sps:$4 sm:$0xff]   ;;  %v16025_v32 = vld [vmem:[#allocation5 + $0x1ba4] ss:$16 sps:$4 sm:$0xff]  }
 0x393   :  { %7662 = vmatprep.subr.bf16.mxu0 %v15933_v33  ;;  %8400 = vmatprep.subr.bf16.mxu1 %v15936_v25  ;;  %v16028_v33 = vld [vmem:[#allocation5 + $0x1bac] ss:$16 sps:$4 sm:$0xff]   ;;  %v16023_v25 = vld [vmem:[#allocation5 + $0x1ba0] ss:$16 sps:$4 sm:$0xff]  }
 0x396   :  { %7663 = vmatpush1.bf16.msra.mxu0 %v15931_v35  ;;  %8401 = vmatpush1.bf16.msra.mxu1 %v15934_v36  ;;  %v16026_v35 = vld [vmem:[#allocation5 + $0x1ba8] ss:$16 sps:$4 sm:$0xff]   ;;  %v16031_v36 = vld [vmem:[#allocation5 + $0x1bc4] ss:$16 sps:$4 sm:$0xff]  }
 0x397   :  { %7664 = vmatprep.subr.bf16.mxu0 %v15939_v28  ;;  %8402 = vmatprep.subr.bf16.mxu1 %v15942_v38  ;;  %v16034_v28 = vld [vmem:[#allocation5 + $0x1bcc] ss:$16 sps:$4 sm:$0xff]   ;;  %v16029_v38 = vld [vmem:[#allocation5 + $0x1bc0] ss:$16 sps:$4 sm:$0xff]  }
 0x39a   :  { %7665 = vmatpush1.bf16.msra.mxu0 %v15937_v39  ;;  %8403 = vmatpush1.bf16.msra.mxu1 %v15940_v31  ;;  %v16032_v39 = vld [vmem:[#allocation5 + $0x1bc8] ss:$16 sps:$4 sm:$0xff]   ;;  %v16037_v31 = vld [vmem:[#allocation5 + $0x1be4] ss:$16 sps:$4 sm:$0xff]  }
 0x39b   :  { %7675 = vmatprep.subr.bf16.mxu0 %v15947_v41  ;;  %8413 = vmatprep.subr.bf16.mxu1 %v15950_v42  ;;  %v16040_v41 = vld [vmem:[#allocation5 + $0x1bec] ss:$16 sps:$4 sm:$0xff]   ;;  %v16035_v42 = vld [vmem:[#allocation5 + $0x1be0] ss:$16 sps:$4 sm:$0xff]  }
 0x39d   :  { %7667 = vmatmul.mubr.bf16.vlgmr.msra.gmra.mrb[0].mxu0 %v12599_v34  ;;  %8405 = vmatmul.mubr.bf16.vlgmr.msra.gmra.mrb[0].mxu1 %v12599_v34  ;;  %v16038_v34 = vld [vmem:[#allocation5 + $0x1be8] ss:$16 sps:$4 sm:$0xff]  }
 0x39e   :  { %7676 = vmatpush1.bf16.msra.mxu0 %v15945_v44  ;;  %8414 = vmatpush1.bf16.msra.mxu1 %v15948_v45  ;;  %v16045_v44 = vld [vmem:[#allocation5 + $0x1c04] ss:$16 sps:$4 sm:$0xff]   ;;  %v16048_v45 = vld [vmem:[#allocation5 + $0x1c0c] ss:$16 sps:$4 sm:$0xff]  }
 0x39f   :  { %7677 = vmatprep.subr.bf16.mxu0 %v15953_v46  ;;  %8415 = vmatprep.subr.bf16.mxu1 %v15956_v37  ;;  %v17070_v46 = vld [vmem:[#allocation2 + $0x70] sm:$0xff]  ;;  %v12601_v37 = vcombine.low %v17064_v43, %v17064_v43 }
 0x3a0   :  { %7707 = vmatprep.mubr.bf16.mxu0 %v12602_v47  ;;  %8445 = vmatprep.mubr.bf16.mxu1 %v12602_v47  ;;  %v16043_v47 = vld [vmem:[#allocation5 + $0x1c00] ss:$16 sps:$4 sm:$0xff]   ;;  %v16057_v43 = vld [vmem:[#allocation5 + $0x1c44] ss:$16 sps:$4 sm:$0xff]  }
 0x3a2   :  { %7678 = vmatpush1.bf16.msra.mxu0 %v15951_v48  ;;  %8416 = vmatpush1.bf16.msra.mxu1 %v15954_v49  ;;  %v16046_v48 = vld [vmem:[#allocation5 + $0x1c08] ss:$16 sps:$4 sm:$0xff]   ;;  %v16051_v49 = vld [vmem:[#allocation5 + $0x1c24] ss:$16 sps:$4 sm:$0xff]  }
 0x3a3   :  { %7679 = vmatprep.subr.bf16.mxu0 %v15959_v40  ;;  %8417 = vmatprep.subr.bf16.mxu1 %v15962_v50  ;;  %v16054_v40 = vld [vmem:[#allocation5 + $0x1c2c] ss:$16 sps:$4 sm:$0xff]   ;;  %v12604_v50 = vcombine.high %v17070_v46, %v17070_v46 }
 0x3a6   :  { %7680 = vmatpush1.bf16.msra.mxu0 %v15957_v51  ;;  %8418 = vmatpush1.bf16.msra.mxu1 %v15960_v52  ;;  %v16049_v51 = vld [vmem:[#allocation5 + $0x1c20] ss:$16 sps:$4 sm:$0xff]   ;;  %v16052_v52 = vld [vmem:[#allocation5 + $0x1c28] ss:$16 sps:$4 sm:$0xff]  }
 0x3a7   :  { %7681 = vmatprep.subr.bf16.mxu0 %v15965_v53  ;;  %8419 = vmatprep.subr.bf16.mxu1 %v15968_v54  ;;  %v16060_v53 = vld [vmem:[#allocation5 + $0x1c4c] ss:$16 sps:$4 sm:$0xff]   ;;  %v16055_v54 = vld [vmem:[#allocation5 + $0x1c40] ss:$16 sps:$4 sm:$0xff]  }
 0x3aa   :  { %7682 = vmatpush1.bf16.msra.mxu0 %v15963_v55  ;;  %8420 = vmatpush1.bf16.msra.mxu1 %v15966_v56  ;;  %v16058_v55 = vld [vmem:[#allocation5 + $0x1c48] ss:$16 sps:$4 sm:$0xff]   ;;  %v16063_v56 = vld [vmem:[#allocation5 + $0x1c64] ss:$16 sps:$4 sm:$0xff]  }
 0x3ab   :  { %7683 = vmatprep.subr.bf16.mxu0 %v15971_v57  ;;  %8421 = vmatprep.subr.bf16.mxu1 %v15974_v58  ;;  %v16066_v57 = vld [vmem:[#allocation5 + $0x1c6c] ss:$16 sps:$4 sm:$0xff]   ;;  %v16061_v58 = vld [vmem:[#allocation5 + $0x1c60] ss:$16 sps:$4 sm:$0xff]  }
 0x3ae   :  { %7684 = vmatpush1.bf16.msra.mxu0 %v15969_v59  ;;  %8422 = vmatpush1.bf16.msra.mxu1 %v15972_v60  ;;  %v16064_v59 = vld [vmem:[#allocation5 + $0x1c68] ss:$16 sps:$4 sm:$0xff]   ;;  %v16069_v60 = vld [vmem:[#allocation5 + $0x1c84] ss:$16 sps:$4 sm:$0xff]  }
 0x3af   :  { %7685 = vmatprep.subr.bf16.mxu0 %v15977_v61  ;;  %8423 = vmatprep.subr.bf16.mxu1 %v15980_v62  ;;  %v16072_v61 = vld [vmem:[#allocation5 + $0x1c8c] ss:$16 sps:$4 sm:$0xff]   ;;  %v16067_v62 = vld [vmem:[#allocation5 + $0x1c80] ss:$16 sps:$4 sm:$0xff]  }
 0x3b2   :  { %7686 = vmatpush1.bf16.msra.mxu0 %v15975_v63  ;;  %8424 = vmatpush1.bf16.msra.mxu1 %v15978_v0  ;;  %v16070_v63 = vld [vmem:[#allocation5 + $0x1c88] ss:$16 sps:$4 sm:$0xff]   ;;  %v16075_v0 = vld [vmem:[#allocation5 + $0x1ca4] ss:$16 sps:$4 sm:$0xff]  }
 0x3b3   :  { %7687 = vmatprep.subr.bf16.mxu0 %v15983_v1  ;;  %8425 = vmatprep.subr.bf16.mxu1 %v15986_v2  ;;  %v16078_v1 = vld [vmem:[#allocation5 + $0x1cac] ss:$16 sps:$4 sm:$0xff]   ;;  %v16073_v2 = vld [vmem:[#allocation5 + $0x1ca0] ss:$16 sps:$4 sm:$0xff]  }
 0x3b6   :  { %7688 = vmatpush1.bf16.msra.mxu0 %v15981_v3  ;;  %8426 = vmatpush1.bf16.msra.mxu1 %v15984_v4  ;;  %v16076_v3 = vld [vmem:[#allocation5 + $0x1ca8] ss:$16 sps:$4 sm:$0xff]   ;;  %v16081_v4 = vld [vmem:[#allocation5 + $0x1cc4] ss:$16 sps:$4 sm:$0xff]  }
 0x3b7   :  { %7689 = vmatprep.subr.bf16.mxu0 %v15989_v5  ;;  %8427 = vmatprep.subr.bf16.mxu1 %v15992_v6  ;;  %v16084_v5 = vld [vmem:[#allocation5 + $0x1ccc] ss:$16 sps:$4 sm:$0xff]   ;;  %v16079_v6 = vld [vmem:[#allocation5 + $0x1cc0] ss:$16 sps:$4 sm:$0xff]  }
 0x3ba   :  { %7690 = vmatpush1.bf16.msra.mxu0 %v15987_v7  ;;  %8428 = vmatpush1.bf16.msra.mxu1 %v15990_v8  ;;  %v16082_v7 = vld [vmem:[#allocation5 + $0x1cc8] ss:$16 sps:$4 sm:$0xff]   ;;  %v16087_v8 = vld [vmem:[#allocation5 + $0x1ce4] ss:$16 sps:$4 sm:$0xff]  }
 0x3bb   :  { %7691 = vmatprep.subr.bf16.mxu0 %v15995_v9  ;;  %8429 = vmatprep.subr.bf16.mxu1 %v15998_v10  ;;  %v16090_v9 = vld [vmem:[#allocation5 + $0x1cec] ss:$16 sps:$4 sm:$0xff]   ;;  %v16085_v10 = vld [vmem:[#allocation5 + $0x1ce0] ss:$16 sps:$4 sm:$0xff]  }
 0x3be   :  { %7692 = vmatpush1.bf16.msra.mxu0 %v15993_v12  ;;  %8430 = vmatpush1.bf16.msra.mxu1 %v15996_v13  ;;  %v16088_v12 = vld [vmem:[#allocation5 + $0x1ce8] ss:$16 sps:$4 sm:$0xff]   ;;  %v16093_v13 = vld [vmem:[#allocation5 + $0x1d04] ss:$16 sps:$4 sm:$0xff]  }
 0x3bf   :  { %7693 = vmatprep.subr.bf16.mxu0 %v16001_v15  ;;  %8431 = vmatprep.subr.bf16.mxu1 %v16004_v16  ;;  %v16096_v15 = vld [vmem:[#allocation5 + $0x1d0c] ss:$16 sps:$4 sm:$0xff]   ;;  %v16091_v16 = vld [vmem:[#allocation5 + $0x1d00] ss:$16 sps:$4 sm:$0xff]  }
 0x3c2   :  { %7694 = vmatpush1.bf16.msra.mxu0 %v15999_v18  ;;  %8432 = vmatpush1.bf16.msra.mxu1 %v16002_v20  ;;  %v16094_v18 = vld [vmem:[#allocation5 + $0x1d08] ss:$16 sps:$4 sm:$0xff]   ;;  %v16099_v20 = vld [vmem:[#allocation5 + $0x1d24] ss:$16 sps:$4 sm:$0xff]  }
 0x3c3   :  { %7695 = vmatprep.subr.bf16.mxu0 %v16007_v11  ;;  %8433 = vmatprep.subr.bf16.mxu1 %v16010_v21  ;;  %v16102_v11 = vld [vmem:[#allocation5 + $0x1d2c] ss:$16 sps:$4 sm:$0xff]   ;;  %v16097_v21 = vld [vmem:[#allocation5 + $0x1d20] ss:$16 sps:$4 sm:$0xff]  }
 0x3c6   :  { %7696 = vmatpush1.bf16.msra.mxu0 %v16005_v14  ;;  %8434 = vmatpush1.bf16.msra.mxu1 %v16008_v23  ;;  %v16100_v14 = vld [vmem:[#allocation5 + $0x1d28] ss:$16 sps:$4 sm:$0xff]   ;;  %v16105_v23 = vld [vmem:[#allocation5 + $0x1d44] ss:$16 sps:$4 sm:$0xff]  }
 0x3c7   :  { %7697 = vmatprep.subr.bf16.mxu0 %v16013_v24  ;;  %8435 = vmatprep.subr.bf16.mxu1 %v16016_v17  ;;  %v16108_v24 = vld [vmem:[#allocation5 + $0x1d4c] ss:$16 sps:$4 sm:$0xff]   ;;  %v16103_v17 = vld [vmem:[#allocation5 + $0x1d40] ss:$16 sps:$4 sm:$0xff]  }
 0x3ca   :  { %7698 = vmatpush1.bf16.msra.mxu0 %v16011_v26  ;;  %8436 = vmatpush1.bf16.msra.mxu1 %v16014_v27  ;;  %v16106_v26 = vld [vmem:[#allocation5 + $0x1d48] ss:$16 sps:$4 sm:$0xff]   ;;  %v16111_v27 = vld [vmem:[#allocation5 + $0x1d64] ss:$16 sps:$4 sm:$0xff]  }
 0x3cb   :  { %7699 = vmatprep.subr.bf16.mxu0 %v16019_v19  ;;  %8437 = vmatprep.subr.bf16.mxu1 %v16022_v29  ;;  %v16114_v19 = vld [vmem:[#allocation5 + $0x1d6c] ss:$16 sps:$4 sm:$0xff]   ;;  %v16109_v29 = vld [vmem:[#allocation5 + $0x1d60] ss:$16 sps:$4 sm:$0xff]  }
 0x3ce   :  { %7700 = vmatpush1.bf16.msra.mxu0 %v16017_v30  ;;  %8438 = vmatpush1.bf16.msra.mxu1 %v16020_v22  ;;  %v16112_v30 = vld [vmem:[#allocation5 + $0x1d68] ss:$16 sps:$4 sm:$0xff]   ;;  %v16117_v22 = vld [vmem:[#allocation5 + $0x1d84] ss:$16 sps:$4 sm:$0xff]  }
 0x3cf   :  { %7701 = vmatprep.subr.bf16.mxu0 %v16025_v32  ;;  %8439 = vmatprep.subr.bf16.mxu1 %v16028_v33  ;;  %v16120_v32 = vld [vmem:[#allocation5 + $0x1d8c] ss:$16 sps:$4 sm:$0xff]   ;;  %v16115_v33 = vld [vmem:[#allocation5 + $0x1d80] ss:$16 sps:$4 sm:$0xff]  }
 0x3d2   :  { %7702 = vmatpush1.bf16.msra.mxu0 %v16023_v25  ;;  %8440 = vmatpush1.bf16.msra.mxu1 %v16026_v35  ;;  %v16118_v25 = vld [vmem:[#allocation5 + $0x1d88] ss:$16 sps:$4 sm:$0xff]   ;;  %v16123_v35 = vld [vmem:[#allocation5 + $0x1da4] ss:$16 sps:$4 sm:$0xff]  }
 0x3d3   :  { %7703 = vmatprep.subr.bf16.mxu0 %v16031_v36  ;;  %8441 = vmatprep.subr.bf16.mxu1 %v16034_v28  ;;  %v16126_v36 = vld [vmem:[#allocation5 + $0x1dac] ss:$16 sps:$4 sm:$0xff]   ;;  %v16121_v28 = vld [vmem:[#allocation5 + $0x1da0] ss:$16 sps:$4 sm:$0xff]  }
 0x3d6   :  { %7704 = vmatpush1.bf16.msra.mxu0 %v16029_v38  ;;  %8442 = vmatpush1.bf16.msra.mxu1 %v16032_v39  ;;  %v16124_v38 = vld [vmem:[#allocation5 + $0x1da8] ss:$16 sps:$4 sm:$0xff]   ;;  %v16129_v39 = vld [vmem:[#allocation5 + $0x1dc4] ss:$16 sps:$4 sm:$0xff]  }
 0x3d7   :  { %7705 = vmatprep.subr.bf16.mxu0 %v16037_v31  ;;  %8443 = vmatprep.subr.bf16.mxu1 %v16040_v41  ;;  %v16132_v31 = vld [vmem:[#allocation5 + $0x1dcc] ss:$16 sps:$4 sm:$0xff]   ;;  %v16127_v41 = vld [vmem:[#allocation5 + $0x1dc0] ss:$16 sps:$4 sm:$0xff]  }
 0x3da   :  { %7706 = vmatpush1.bf16.msra.mxu0 %v16035_v42  ;;  %8444 = vmatpush1.bf16.msra.mxu1 %v16038_v34  ;;  %v16130_v42 = vld [vmem:[#allocation5 + $0x1dc8] ss:$16 sps:$4 sm:$0xff]   ;;  %v16135_v34 = vld [vmem:[#allocation5 + $0x1de4] ss:$16 sps:$4 sm:$0xff]  }
 0x3db   :  { %7716 = vmatprep.subr.bf16.mxu0 %v16045_v44  ;;  %8454 = vmatprep.subr.bf16.mxu1 %v16048_v45  ;;  %v16138_v44 = vld [vmem:[#allocation5 + $0x1dec] ss:$16 sps:$4 sm:$0xff]   ;;  %v16133_v45 = vld [vmem:[#allocation5 + $0x1de0] ss:$16 sps:$4 sm:$0xff]  }
 0x3dd   :  { %7708 = vmatmul.mubr.bf16.vlgmr.msra.gmra.mrb[0].mxu0 %v12601_v37  ;;  %8446 = vmatmul.mubr.bf16.vlgmr.msra.gmra.mrb[0].mxu1 %v12601_v37  ;;  %v16136_v37 = vld [vmem:[#allocation5 + $0x1de8] ss:$16 sps:$4 sm:$0xff]  }
 0x3de   :  { %7717 = vmatpush1.bf16.msra.mxu0 %v16043_v47  ;;  %8455 = vmatpush1.bf16.msra.mxu1 %v16046_v48  ;;  %v16143_v47 = vld [vmem:[#allocation5 + $0x1e04] ss:$16 sps:$4 sm:$0xff]   ;;  %v16146_v48 = vld [vmem:[#allocation5 + $0x1e0c] ss:$16 sps:$4 sm:$0xff]  }
 0x3df   :  { %7718 = vmatprep.subr.bf16.mxu0 %v16051_v49  ;;  %8456 = vmatprep.subr.bf16.mxu1 %v16054_v40  ;;  %v12603_v49 = vcombine.low %v17070_v46, %v17070_v46  ;;  %v17078_v40 = vld [vmem:[#allocation2 + $0x78] sm:$0xff]  ;;  %v16155_v46 = vld [vmem:[#allocation5 + $0x1e44] ss:$16 sps:$4 sm:$0xff]  }
 0x3e0   :  { %7748 = vmatprep.mubr.bf16.mxu0 %v12604_v50  ;;  %8486 = vmatprep.mubr.bf16.mxu1 %v12604_v50  ;;  %v16141_v50 = vld [vmem:[#allocation5 + $0x1e00] ss:$16 sps:$4 sm:$0xff]  }
 0x3e2   :  { %7719 = vmatpush1.bf16.msra.mxu0 %v16049_v51  ;;  %8457 = vmatpush1.bf16.msra.mxu1 %v16052_v52  ;;  %v16144_v51 = vld [vmem:[#allocation5 + $0x1e08] ss:$16 sps:$4 sm:$0xff]   ;;  %v16149_v52 = vld [vmem:[#allocation5 + $0x1e24] ss:$16 sps:$4 sm:$0xff]  }
 0x3e3   :  { %7720 = vmatprep.subr.bf16.mxu0 %v16057_v43  ;;  %8458 = vmatprep.subr.bf16.mxu1 %v16060_v53  ;;  %v16152_v43 = vld [vmem:[#allocation5 + $0x1e2c] ss:$16 sps:$4 sm:$0xff]   ;;  %v12606_v53 = vcombine.high %v17078_v40, %v17078_v40 }
 0x3e6   :  { %7721 = vmatpush1.bf16.msra.mxu0 %v16055_v54  ;;  %8459 = vmatpush1.bf16.msra.mxu1 %v16058_v55  ;;  %v16147_v54 = vld [vmem:[#allocation5 + $0x1e20] ss:$16 sps:$4 sm:$0xff]   ;;  %v16150_v55 = vld [vmem:[#allocation5 + $0x1e28] ss:$16 sps:$4 sm:$0xff]  }
 0x3e7   :  { %7722 = vmatprep.subr.bf16.mxu0 %v16063_v56  ;;  %8460 = vmatprep.subr.bf16.mxu1 %v16066_v57  ;;  %v16158_v56 = vld [vmem:[#allocation5 + $0x1e4c] ss:$16 sps:$4 sm:$0xff]   ;;  %v16153_v57 = vld [vmem:[#allocation5 + $0x1e40] ss:$16 sps:$4 sm:$0xff]  }
 0x3ea   :  { %7723 = vmatpush1.bf16.msra.mxu0 %v16061_v58  ;;  %8461 = vmatpush1.bf16.msra.mxu1 %v16064_v59  ;;  %v16156_v58 = vld [vmem:[#allocation5 + $0x1e48] ss:$16 sps:$4 sm:$0xff]   ;;  %v16161_v59 = vld [vmem:[#allocation5 + $0x1e64] ss:$16 sps:$4 sm:$0xff]  }
 0x3eb   :  { %7724 = vmatprep.subr.bf16.mxu0 %v16069_v60  ;;  %8462 = vmatprep.subr.bf16.mxu1 %v16072_v61  ;;  %v16164_v60 = vld [vmem:[#allocation5 + $0x1e6c] ss:$16 sps:$4 sm:$0xff]   ;;  %v16159_v61 = vld [vmem:[#allocation5 + $0x1e60] ss:$16 sps:$4 sm:$0xff]  }
 0x3ee   :  { %7725 = vmatpush1.bf16.msra.mxu0 %v16067_v62  ;;  %8463 = vmatpush1.bf16.msra.mxu1 %v16070_v63  ;;  %v16162_v62 = vld [vmem:[#allocation5 + $0x1e68] ss:$16 sps:$4 sm:$0xff]   ;;  %v16167_v63 = vld [vmem:[#allocation5 + $0x1e84] ss:$16 sps:$4 sm:$0xff]  }
 0x3ef   :  { %7726 = vmatprep.subr.bf16.mxu0 %v16075_v0  ;;  %8464 = vmatprep.subr.bf16.mxu1 %v16078_v1  ;;  %v16170_v0 = vld [vmem:[#allocation5 + $0x1e8c] ss:$16 sps:$4 sm:$0xff]   ;;  %v16165_v1 = vld [vmem:[#allocation5 + $0x1e80] ss:$16 sps:$4 sm:$0xff]  }
 0x3f2   :  { %7727 = vmatpush1.bf16.msra.mxu0 %v16073_v2  ;;  %8465 = vmatpush1.bf16.msra.mxu1 %v16076_v3  ;;  %v16168_v2 = vld [vmem:[#allocation5 + $0x1e88] ss:$16 sps:$4 sm:$0xff]   ;;  %v16173_v3 = vld [vmem:[#allocation5 + $0x1ea4] ss:$16 sps:$4 sm:$0xff]  }
 0x3f3   :  { %7728 = vmatprep.subr.bf16.mxu0 %v16081_v4  ;;  %8466 = vmatprep.subr.bf16.mxu1 %v16084_v5  ;;  %v16176_v4 = vld [vmem:[#allocation5 + $0x1eac] ss:$16 sps:$4 sm:$0xff]   ;;  %v16171_v5 = vld [vmem:[#allocation5 + $0x1ea0] ss:$16 sps:$4 sm:$0xff]  }
 0x3f6   :  { %7729 = vmatpush1.bf16.msra.mxu0 %v16079_v6  ;;  %8467 = vmatpush1.bf16.msra.mxu1 %v16082_v7  ;;  %v16174_v6 = vld [vmem:[#allocation5 + $0x1ea8] ss:$16 sps:$4 sm:$0xff]   ;;  %v16179_v7 = vld [vmem:[#allocation5 + $0x1ec4] ss:$16 sps:$4 sm:$0xff]  }
 0x3f7   :  { %7730 = vmatprep.subr.bf16.mxu0 %v16087_v8  ;;  %8468 = vmatprep.subr.bf16.mxu1 %v16090_v9  ;;  %v16182_v8 = vld [vmem:[#allocation5 + $0x1ecc] ss:$16 sps:$4 sm:$0xff]   ;;  %v16177_v9 = vld [vmem:[#allocation5 + $0x1ec0] ss:$16 sps:$4 sm:$0xff]  }
 0x3fa   :  { %7731 = vmatpush1.bf16.msra.mxu0 %v16085_v10  ;;  %8469 = vmatpush1.bf16.msra.mxu1 %v16088_v12  ;;  %v16180_v10 = vld [vmem:[#allocation5 + $0x1ec8] ss:$16 sps:$4 sm:$0xff]   ;;  %v16185_v12 = vld [vmem:[#allocation5 + $0x1ee4] ss:$16 sps:$4 sm:$0xff]  }
 0x3fb   :  { %7732 = vmatprep.subr.bf16.mxu0 %v16093_v13  ;;  %8470 = vmatprep.subr.bf16.mxu1 %v16096_v15  ;;  %v16188_v13 = vld [vmem:[#allocation5 + $0x1eec] ss:$16 sps:$4 sm:$0xff]   ;;  %v16183_v15 = vld [vmem:[#allocation5 + $0x1ee0] ss:$16 sps:$4 sm:$0xff]  }
 0x3fe   :  { %7733 = vmatpush1.bf16.msra.mxu0 %v16091_v16  ;;  %8471 = vmatpush1.bf16.msra.mxu1 %v16094_v18  ;;  %v16186_v16 = vld [vmem:[#allocation5 + $0x1ee8] ss:$16 sps:$4 sm:$0xff]   ;;  %v16191_v18 = vld [vmem:[#allocation5 + $0x1f04] ss:$16 sps:$4 sm:$0xff]  }
 0x3ff   :  { %7734 = vmatprep.subr.bf16.mxu0 %v16099_v20  ;;  %8472 = vmatprep.subr.bf16.mxu1 %v16102_v11  ;;  %v16194_v20 = vld [vmem:[#allocation5 + $0x1f0c] ss:$16 sps:$4 sm:$0xff]   ;;  %v16189_v11 = vld [vmem:[#allocation5 + $0x1f00] ss:$16 sps:$4 sm:$0xff]  }
 0x402   :  { %7735 = vmatpush1.bf16.msra.mxu0 %v16097_v21  ;;  %8473 = vmatpush1.bf16.msra.mxu1 %v16100_v14  ;;  %v16192_v21 = vld [vmem:[#allocation5 + $0x1f08] ss:$16 sps:$4 sm:$0xff]   ;;  %v16197_v14 = vld [vmem:[#allocation5 + $0x1f24] ss:$16 sps:$4 sm:$0xff]  }
 0x403   :  { %7736 = vmatprep.subr.bf16.mxu0 %v16105_v23  ;;  %8474 = vmatprep.subr.bf16.mxu1 %v16108_v24  ;;  %v16200_v23 = vld [vmem:[#allocation5 + $0x1f2c] ss:$16 sps:$4 sm:$0xff]   ;;  %v16195_v24 = vld [vmem:[#allocation5 + $0x1f20] ss:$16 sps:$4 sm:$0xff]  }
 0x406   :  { %7737 = vmatpush1.bf16.msra.mxu0 %v16103_v17  ;;  %8475 = vmatpush1.bf16.msra.mxu1 %v16106_v26  ;;  %v16198_v17 = vld [vmem:[#allocation5 + $0x1f28] ss:$16 sps:$4 sm:$0xff]   ;;  %v16203_v26 = vld [vmem:[#allocation5 + $0x1f44] ss:$16 sps:$4 sm:$0xff]  }
 0x407   :  { %7738 = vmatprep.subr.bf16.mxu0 %v16111_v27  ;;  %8476 = vmatprep.subr.bf16.mxu1 %v16114_v19  ;;  %v16206_v27 = vld [vmem:[#allocation5 + $0x1f4c] ss:$16 sps:$4 sm:$0xff]   ;;  %v16201_v19 = vld [vmem:[#allocation5 + $0x1f40] ss:$16 sps:$4 sm:$0xff]  }
 0x40a   :  { %7739 = vmatpush1.bf16.msra.mxu0 %v16109_v29  ;;  %8477 = vmatpush1.bf16.msra.mxu1 %v16112_v30  ;;  %v16204_v29 = vld [vmem:[#allocation5 + $0x1f48] ss:$16 sps:$4 sm:$0xff]   ;;  %v16209_v30 = vld [vmem:[#allocation5 + $0x1f64] ss:$16 sps:$4 sm:$0xff]  }
 0x40b   :  { %7740 = vmatprep.subr.bf16.mxu0 %v16117_v22  ;;  %8478 = vmatprep.subr.bf16.mxu1 %v16120_v32  ;;  %v16212_v22 = vld [vmem:[#allocation5 + $0x1f6c] ss:$16 sps:$4 sm:$0xff]   ;;  %v16207_v32 = vld [vmem:[#allocation5 + $0x1f60] ss:$16 sps:$4 sm:$0xff]  }
 0x40e   :  { %7741 = vmatpush1.bf16.msra.mxu0 %v16115_v33  ;;  %8479 = vmatpush1.bf16.msra.mxu1 %v16118_v25  ;;  %v16210_v33 = vld [vmem:[#allocation5 + $0x1f68] ss:$16 sps:$4 sm:$0xff]   ;;  %v16215_v25 = vld [vmem:[#allocation5 + $0x1f84] ss:$16 sps:$4 sm:$0xff]  }
 0x40f   :  { %7742 = vmatprep.subr.bf16.mxu0 %v16123_v35  ;;  %8480 = vmatprep.subr.bf16.mxu1 %v16126_v36  ;;  %v16218_v35 = vld [vmem:[#allocation5 + $0x1f8c] ss:$16 sps:$4 sm:$0xff]   ;;  %v16213_v36 = vld [vmem:[#allocation5 + $0x1f80] ss:$16 sps:$4 sm:$0xff]  }
 0x412   :  { %7743 = vmatpush1.bf16.msra.mxu0 %v16121_v28  ;;  %8481 = vmatpush1.bf16.msra.mxu1 %v16124_v38  ;;  %v16216_v28 = vld [vmem:[#allocation5 + $0x1f88] ss:$16 sps:$4 sm:$0xff]   ;;  %v16221_v38 = vld [vmem:[#allocation5 + $0x1fa4] ss:$16 sps:$4 sm:$0xff]  }
 0x413   :  { %7744 = vmatprep.subr.bf16.mxu0 %v16129_v39  ;;  %8482 = vmatprep.subr.bf16.mxu1 %v16132_v31  ;;  %v16224_v39 = vld [vmem:[#allocation5 + $0x1fac] ss:$16 sps:$4 sm:$0xff]   ;;  %v16219_v31 = vld [vmem:[#allocation5 + $0x1fa0] ss:$16 sps:$4 sm:$0xff]  }
 0x416   :  { %7745 = vmatpush1.bf16.msra.mxu0 %v16127_v41  ;;  %8483 = vmatpush1.bf16.msra.mxu1 %v16130_v42  ;;  %v16222_v41 = vld [vmem:[#allocation5 + $0x1fa8] ss:$16 sps:$4 sm:$0xff]   ;;  %v16227_v42 = vld [vmem:[#allocation5 + $0x1fc4] ss:$16 sps:$4 sm:$0xff]  }
 0x417   :  { %7746 = vmatprep.subr.bf16.mxu0 %v16135_v34  ;;  %8484 = vmatprep.subr.bf16.mxu1 %v16138_v44  ;;  %v16230_v34 = vld [vmem:[#allocation5 + $0x1fcc] ss:$16 sps:$4 sm:$0xff]   ;;  %v16225_v44 = vld [vmem:[#allocation5 + $0x1fc0] ss:$16 sps:$4 sm:$0xff]  }
 0x41a   :  { %7747 = vmatpush1.bf16.msra.mxu0 %v16133_v45  ;;  %8485 = vmatpush1.bf16.msra.mxu1 %v16136_v37  ;;  %v16228_v45 = vld [vmem:[#allocation5 + $0x1fc8] ss:$16 sps:$4 sm:$0xff]   ;;  %v16233_v37 = vld [vmem:[#allocation5 + $0x1fe4] ss:$16 sps:$4 sm:$0xff]  }
 0x41b   :  { %7757 = vmatprep.subr.bf16.mxu0 %v16143_v47  ;;  %8495 = vmatprep.subr.bf16.mxu1 %v16146_v48  ;;  %v16236_v47 = vld [vmem:[#allocation5 + $0x1fec] ss:$16 sps:$4 sm:$0xff]   ;;  %v16231_v48 = vld [vmem:[#allocation5 + $0x1fe0] ss:$16 sps:$4 sm:$0xff]  }
 0x41d   :  { %7749 = vmatmul.mubr.bf16.vlgmr.msra.gmra.mrb[0].mxu0 %v12603_v49  ;;  %8487 = vmatmul.mubr.bf16.vlgmr.msra.gmra.mrb[0].mxu1 %v12603_v49  ;;  %v16234_v49 = vld [vmem:[#allocation5 + $0x1fe8] ss:$16 sps:$4 sm:$0xff]  }
 0x41e   :  { %7758 = vmatpush1.bf16.msra.mxu0 %v16141_v50  ;;  %8496 = vmatpush1.bf16.msra.mxu1 %v16144_v51  ;;  %v16241_v50 = vld [vmem:[#allocation5 + $0x2004] ss:$16 sps:$4 sm:$0xff]   ;;  %v16244_v51 = vld [vmem:[#allocation5 + $0x200c] ss:$16 sps:$4 sm:$0xff]  }
 0x41f   :  { %7759 = vmatprep.subr.bf16.mxu0 %v16149_v52  ;;  %8497 = vmatprep.subr.bf16.mxu1 %v16152_v43  ;;  %v12605_v52 = vcombine.low %v17078_v40, %v17078_v40  ;;  %v17084_v43 = vld [vmem:[#allocation2 + $0x80] sm:$0xff] }
 0x420   :  { %7789 = vmatprep.mubr.bf16.mxu0 %v12606_v53  ;;  %8527 = vmatprep.mubr.bf16.mxu1 %v12606_v53  ;;  %v16239_v53 = vld [vmem:[#allocation5 + $0x2000] ss:$16 sps:$4 sm:$0xff]   ;;  %v16253_v40 = vld [vmem:[#allocation5 + $0x2044] ss:$16 sps:$4 sm:$0xff]  }
 0x422   :  { %7760 = vmatpush1.bf16.msra.mxu0 %v16147_v54  ;;  %8498 = vmatpush1.bf16.msra.mxu1 %v16150_v55  ;;  %v16242_v54 = vld [vmem:[#allocation5 + $0x2008] ss:$16 sps:$4 sm:$0xff]   ;;  %v16247_v55 = vld [vmem:[#allocation5 + $0x2024] ss:$16 sps:$4 sm:$0xff]  }
 0x423   :  { %7761 = vmatprep.subr.bf16.mxu0 %v16155_v46  ;;  %8499 = vmatprep.subr.bf16.mxu1 %v16158_v56  ;;  %v16250_v46 = vld [vmem:[#allocation5 + $0x202c] ss:$16 sps:$4 sm:$0xff]   ;;  %v12608_v56 = vcombine.high %v17084_v43, %v17084_v43 }
 0x426   :  { %7762 = vmatpush1.bf16.msra.mxu0 %v16153_v57  ;;  %8500 = vmatpush1.bf16.msra.mxu1 %v16156_v58  ;;  %v16245_v57 = vld [vmem:[#allocation5 + $0x2020] ss:$16 sps:$4 sm:$0xff]   ;;  %v16248_v58 = vld [vmem:[#allocation5 + $0x2028] ss:$16 sps:$4 sm:$0xff]  }
 0x427   :  { %7763 = vmatprep.subr.bf16.mxu0 %v16161_v59  ;;  %8501 = vmatprep.subr.bf16.mxu1 %v16164_v60  ;;  %v16256_v59 = vld [vmem:[#allocation5 + $0x204c] ss:$16 sps:$4 sm:$0xff]   ;;  %v16251_v60 = vld [vmem:[#allocation5 + $0x2040] ss:$16 sps:$4 sm:$0xff]  }
 0x42a   :  { %7764 = vmatpush1.bf16.msra.mxu0 %v16159_v61  ;;  %8502 = vmatpush1.bf16.msra.mxu1 %v16162_v62  ;;  %v16254_v61 = vld [vmem:[#allocation5 + $0x2048] ss:$16 sps:$4 sm:$0xff]   ;;  %v16259_v62 = vld [vmem:[#allocation5 + $0x2064] ss:$16 sps:$4 sm:$0xff]  }
 0x42b   :  { %7765 = vmatprep.subr.bf16.mxu0 %v16167_v63  ;;  %8503 = vmatprep.subr.bf16.mxu1 %v16170_v0  ;;  %v16262_v63 = vld [vmem:[#allocation5 + $0x206c] ss:$16 sps:$4 sm:$0xff]   ;;  %v16257_v0 = vld [vmem:[#allocation5 + $0x2060] ss:$16 sps:$4 sm:$0xff]  }
 0x42e   :  { %7766 = vmatpush1.bf16.msra.mxu0 %v16165_v1  ;;  %8504 = vmatpush1.bf16.msra.mxu1 %v16168_v2  ;;  %v16260_v1 = vld [vmem:[#allocation5 + $0x2068] ss:$16 sps:$4 sm:$0xff]   ;;  %v16265_v2 = vld [vmem:[#allocation5 + $0x2084] ss:$16 sps:$4 sm:$0xff]  }
 0x42f   :  { %7767 = vmatprep.subr.bf16.mxu0 %v16173_v3  ;;  %8505 = vmatprep.subr.bf16.mxu1 %v16176_v4  ;;  %v16268_v3 = vld [vmem:[#allocation5 + $0x208c] ss:$16 sps:$4 sm:$0xff]   ;;  %v16263_v4 = vld [vmem:[#allocation5 + $0x2080] ss:$16 sps:$4 sm:$0xff]  }
 0x432   :  { %7768 = vmatpush1.bf16.msra.mxu0 %v16171_v5  ;;  %8506 = vmatpush1.bf16.msra.mxu1 %v16174_v6  ;;  %v16266_v5 = vld [vmem:[#allocation5 + $0x2088] ss:$16 sps:$4 sm:$0xff]   ;;  %v16271_v6 = vld [vmem:[#allocation5 + $0x20a4] ss:$16 sps:$4 sm:$0xff]  }
 0x433   :  { %7769 = vmatprep.subr.bf16.mxu0 %v16179_v7  ;;  %8507 = vmatprep.subr.bf16.mxu1 %v16182_v8  ;;  %v16274_v7 = vld [vmem:[#allocation5 + $0x20ac] ss:$16 sps:$4 sm:$0xff]   ;;  %v16269_v8 = vld [vmem:[#allocation5 + $0x20a0] ss:$16 sps:$4 sm:$0xff]  }
 0x436   :  { %7770 = vmatpush1.bf16.msra.mxu0 %v16177_v9  ;;  %8508 = vmatpush1.bf16.msra.mxu1 %v16180_v10  ;;  %v16272_v9 = vld [vmem:[#allocation5 + $0x20a8] ss:$16 sps:$4 sm:$0xff]   ;;  %v16277_v10 = vld [vmem:[#allocation5 + $0x20c4] ss:$16 sps:$4 sm:$0xff]  }
 0x437   :  { %7771 = vmatprep.subr.bf16.mxu0 %v16185_v12  ;;  %8509 = vmatprep.subr.bf16.mxu1 %v16188_v13  ;;  %v16280_v12 = vld [vmem:[#allocation5 + $0x20cc] ss:$16 sps:$4 sm:$0xff]   ;;  %v16275_v13 = vld [vmem:[#allocation5 + $0x20c0] ss:$16 sps:$4 sm:$0xff]  }
 0x43a   :  { %7772 = vmatpush1.bf16.msra.mxu0 %v16183_v15  ;;  %8510 = vmatpush1.bf16.msra.mxu1 %v16186_v16  ;;  %v16278_v15 = vld [vmem:[#allocation5 + $0x20c8] ss:$16 sps:$4 sm:$0xff]   ;;  %v16283_v16 = vld [vmem:[#allocation5 + $0x20e4] ss:$16 sps:$4 sm:$0xff]  }
 0x43b   :  { %7773 = vmatprep.subr.bf16.mxu0 %v16191_v18  ;;  %8511 = vmatprep.subr.bf16.mxu1 %v16194_v20  ;;  %v16286_v18 = vld [vmem:[#allocation5 + $0x20ec] ss:$16 sps:$4 sm:$0xff]   ;;  %v16281_v20 = vld [vmem:[#allocation5 + $0x20e0] ss:$16 sps:$4 sm:$0xff]  }
 0x43e   :  { %7774 = vmatpush1.bf16.msra.mxu0 %v16189_v11  ;;  %8512 = vmatpush1.bf16.msra.mxu1 %v16192_v21  ;;  %v16284_v11 = vld [vmem:[#allocation5 + $0x20e8] ss:$16 sps:$4 sm:$0xff]   ;;  %v16289_v21 = vld [vmem:[#allocation5 + $0x2104] ss:$16 sps:$4 sm:$0xff]  }
 0x43f   :  { %7775 = vmatprep.subr.bf16.mxu0 %v16197_v14  ;;  %8513 = vmatprep.subr.bf16.mxu1 %v16200_v23  ;;  %v16292_v14 = vld [vmem:[#allocation5 + $0x210c] ss:$16 sps:$4 sm:$0xff]   ;;  %v16287_v23 = vld [vmem:[#allocation5 + $0x2100] ss:$16 sps:$4 sm:$0xff]  }
 0x442   :  { %7776 = vmatpush1.bf16.msra.mxu0 %v16195_v24  ;;  %8514 = vmatpush1.bf16.msra.mxu1 %v16198_v17  ;;  %v16290_v24 = vld [vmem:[#allocation5 + $0x2108] ss:$16 sps:$4 sm:$0xff]   ;;  %v16295_v17 = vld [vmem:[#allocation5 + $0x2124] ss:$16 sps:$4 sm:$0xff]  }
 0x443   :  { %7777 = vmatprep.subr.bf16.mxu0 %v16203_v26  ;;  %8515 = vmatprep.subr.bf16.mxu1 %v16206_v27  ;;  %v16298_v26 = vld [vmem:[#allocation5 + $0x212c] ss:$16 sps:$4 sm:$0xff]   ;;  %v16293_v27 = vld [vmem:[#allocation5 + $0x2120] ss:$16 sps:$4 sm:$0xff]  }
 0x446   :  { %7778 = vmatpush1.bf16.msra.mxu0 %v16201_v19  ;;  %8516 = vmatpush1.bf16.msra.mxu1 %v16204_v29  ;;  %v16296_v19 = vld [vmem:[#allocation5 + $0x2128] ss:$16 sps:$4 sm:$0xff]   ;;  %v16301_v29 = vld [vmem:[#allocation5 + $0x2144] ss:$16 sps:$4 sm:$0xff]  }
 0x447   :  { %7779 = vmatprep.subr.bf16.mxu0 %v16209_v30  ;;  %8517 = vmatprep.subr.bf16.mxu1 %v16212_v22  ;;  %v16304_v30 = vld [vmem:[#allocation5 + $0x214c] ss:$16 sps:$4 sm:$0xff]   ;;  %v16299_v22 = vld [vmem:[#allocation5 + $0x2140] ss:$16 sps:$4 sm:$0xff]  }
 0x44a   :  { %7780 = vmatpush1.bf16.msra.mxu0 %v16207_v32  ;;  %8518 = vmatpush1.bf16.msra.mxu1 %v16210_v33  ;;  %v16302_v32 = vld [vmem:[#allocation5 + $0x2148] ss:$16 sps:$4 sm:$0xff]   ;;  %v16307_v33 = vld [vmem:[#allocation5 + $0x2164] ss:$16 sps:$4 sm:$0xff]  }
 0x44b   :  { %7781 = vmatprep.subr.bf16.mxu0 %v16215_v25  ;;  %8519 = vmatprep.subr.bf16.mxu1 %v16218_v35  ;;  %v16310_v25 = vld [vmem:[#allocation5 + $0x216c] ss:$16 sps:$4 sm:$0xff]   ;;  %v16305_v35 = vld [vmem:[#allocation5 + $0x2160] ss:$16 sps:$4 sm:$0xff]  }
 0x44e   :  { %7782 = vmatpush1.bf16.msra.mxu0 %v16213_v36  ;;  %8520 = vmatpush1.bf16.msra.mxu1 %v16216_v28  ;;  %v16308_v36 = vld [vmem:[#allocation5 + $0x2168] ss:$16 sps:$4 sm:$0xff]   ;;  %v16313_v28 = vld [vmem:[#allocation5 + $0x2184] ss:$16 sps:$4 sm:$0xff]  }
 0x44f   :  { %7783 = vmatprep.subr.bf16.mxu0 %v16221_v38  ;;  %8521 = vmatprep.subr.bf16.mxu1 %v16224_v39  ;;  %v16316_v38 = vld [vmem:[#allocation5 + $0x218c] ss:$16 sps:$4 sm:$0xff]   ;;  %v16311_v39 = vld [vmem:[#allocation5 + $0x2180] ss:$16 sps:$4 sm:$0xff]  }
 0x452   :  { %7784 = vmatpush1.bf16.msra.mxu0 %v16219_v31  ;;  %8522 = vmatpush1.bf16.msra.mxu1 %v16222_v41  ;;  %v16314_v31 = vld [vmem:[#allocation5 + $0x2188] ss:$16 sps:$4 sm:$0xff]   ;;  %v16319_v41 = vld [vmem:[#allocation5 + $0x21a4] ss:$16 sps:$4 sm:$0xff]  }
 0x453   :  { %7785 = vmatprep.subr.bf16.mxu0 %v16227_v42  ;;  %8523 = vmatprep.subr.bf16.mxu1 %v16230_v34  ;;  %v16322_v42 = vld [vmem:[#allocation5 + $0x21ac] ss:$16 sps:$4 sm:$0xff]   ;;  %v16317_v34 = vld [vmem:[#allocation5 + $0x21a0] ss:$16 sps:$4 sm:$0xff]  }
 0x456   :  { %7786 = vmatpush1.bf16.msra.mxu0 %v16225_v44  ;;  %8524 = vmatpush1.bf16.msra.mxu1 %v16228_v45  ;;  %v16320_v44 = vld [vmem:[#allocation5 + $0x21a8] ss:$16 sps:$4 sm:$0xff]   ;;  %v16325_v45 = vld [vmem:[#allocation5 + $0x21c4] ss:$16 sps:$4 sm:$0xff]  }
 0x457   :  { %7787 = vmatprep.subr.bf16.mxu0 %v16233_v37  ;;  %8525 = vmatprep.subr.bf16.mxu1 %v16236_v47  ;;  %v16328_v37 = vld [vmem:[#allocation5 + $0x21cc] ss:$16 sps:$4 sm:$0xff]   ;;  %v16323_v47 = vld [vmem:[#allocation5 + $0x21c0] ss:$16 sps:$4 sm:$0xff]  }
 0x45a   :  { %7788 = vmatpush1.bf16.msra.mxu0 %v16231_v48  ;;  %8526 = vmatpush1.bf16.msra.mxu1 %v16234_v49  ;;  %v16326_v48 = vld [vmem:[#allocation5 + $0x21c8] ss:$16 sps:$4 sm:$0xff]   ;;  %v16331_v49 = vld [vmem:[#allocation5 + $0x21e4] ss:$16 sps:$4 sm:$0xff]  }
 0x45b   :  { %7798 = vmatprep.subr.bf16.mxu0 %v16241_v50  ;;  %8536 = vmatprep.subr.bf16.mxu1 %v16244_v51  ;;  %v16334_v50 = vld [vmem:[#allocation5 + $0x21ec] ss:$16 sps:$4 sm:$0xff]   ;;  %v16329_v51 = vld [vmem:[#allocation5 + $0x21e0] ss:$16 sps:$4 sm:$0xff]  }
 0x45d   :  { %7790 = vmatmul.mubr.bf16.vlgmr.msra.gmra.mrb[0].mxu0 %v12605_v52  ;;  %8528 = vmatmul.mubr.bf16.vlgmr.msra.gmra.mrb[0].mxu1 %v12605_v52  ;;  %v16332_v52 = vld [vmem:[#allocation5 + $0x21e8] ss:$16 sps:$4 sm:$0xff]  }
 0x45e   :  { %7799 = vmatpush1.bf16.msra.mxu0 %v16239_v53  ;;  %8537 = vmatpush1.bf16.msra.mxu1 %v16242_v54  ;;  %v16339_v53 = vld [vmem:[#allocation5 + $0x2204] ss:$16 sps:$4 sm:$0xff]   ;;  %v16342_v54 = vld [vmem:[#allocation5 + $0x220c] ss:$16 sps:$4 sm:$0xff]  }
 0x45f   :  { %7800 = vmatprep.subr.bf16.mxu0 %v16247_v55  ;;  %8538 = vmatprep.subr.bf16.mxu1 %v16250_v46  ;;  %v12607_v55 = vcombine.low %v17084_v43, %v17084_v43  ;;  %v17090_v46 = vld [vmem:[#allocation2 + $0x88] sm:$0xff]  ;;  %v16351_v43 = vld [vmem:[#allocation5 + $0x2244] ss:$16 sps:$4 sm:$0xff]  }
 0x460   :  { %7830 = vmatprep.mubr.bf16.mxu0 %v12608_v56  ;;  %8568 = vmatprep.mubr.bf16.mxu1 %v12608_v56  ;;  %v16337_v56 = vld [vmem:[#allocation5 + $0x2200] ss:$16 sps:$4 sm:$0xff]  }
 0x462   :  { %7801 = vmatpush1.bf16.msra.mxu0 %v16245_v57  ;;  %8539 = vmatpush1.bf16.msra.mxu1 %v16248_v58  ;;  %v16340_v57 = vld [vmem:[#allocation5 + $0x2208] ss:$16 sps:$4 sm:$0xff]   ;;  %v16345_v58 = vld [vmem:[#allocation5 + $0x2224] ss:$16 sps:$4 sm:$0xff]  }
 0x463   :  { %7802 = vmatprep.subr.bf16.mxu0 %v16253_v40  ;;  %8540 = vmatprep.subr.bf16.mxu1 %v16256_v59  ;;  %v16348_v40 = vld [vmem:[#allocation5 + $0x222c] ss:$16 sps:$4 sm:$0xff]   ;;  %v12610_v59 = vcombine.high %v17090_v46, %v17090_v46 }
 0x466   :  { %7803 = vmatpush1.bf16.msra.mxu0 %v16251_v60  ;;  %8541 = vmatpush1.bf16.msra.mxu1 %v16254_v61  ;;  %v16343_v60 = vld [vmem:[#allocation5 + $0x2220] ss:$16 sps:$4 sm:$0xff]   ;;  %v16346_v61 = vld [vmem:[#allocation5 + $0x2228] ss:$16 sps:$4 sm:$0xff]  }
 0x467   :  { %7804 = vmatprep.subr.bf16.mxu0 %v16259_v62  ;;  %8542 = vmatprep.subr.bf16.mxu1 %v16262_v63  ;;  %v16354_v62 = vld [vmem:[#allocation5 + $0x224c] ss:$16 sps:$4 sm:$0xff]   ;;  %v16349_v63 = vld [vmem:[#allocation5 + $0x2240] ss:$16 sps:$4 sm:$0xff]  }
 0x46a   :  { %7805 = vmatpush1.bf16.msra.mxu0 %v16257_v0  ;;  %8543 = vmatpush1.bf16.msra.mxu1 %v16260_v1  ;;  %v16352_v0 = vld [vmem:[#allocation5 + $0x2248] ss:$16 sps:$4 sm:$0xff]   ;;  %v16357_v1 = vld [vmem:[#allocation5 + $0x2264] ss:$16 sps:$4 sm:$0xff]  }
 0x46b   :  { %7806 = vmatprep.subr.bf16.mxu0 %v16265_v2  ;;  %8544 = vmatprep.subr.bf16.mxu1 %v16268_v3  ;;  %v16360_v2 = vld [vmem:[#allocation5 + $0x226c] ss:$16 sps:$4 sm:$0xff]   ;;  %v16355_v3 = vld [vmem:[#allocation5 + $0x2260] ss:$16 sps:$4 sm:$0xff]  }
 0x46e   :  { %7807 = vmatpush1.bf16.msra.mxu0 %v16263_v4  ;;  %8545 = vmatpush1.bf16.msra.mxu1 %v16266_v5  ;;  %v16358_v4 = vld [vmem:[#allocation5 + $0x2268] ss:$16 sps:$4 sm:$0xff]   ;;  %v16363_v5 = vld [vmem:[#allocation5 + $0x2284] ss:$16 sps:$4 sm:$0xff]  }
 0x46f   :  { %7808 = vmatprep.subr.bf16.mxu0 %v16271_v6  ;;  %8546 = vmatprep.subr.bf16.mxu1 %v16274_v7  ;;  %v16366_v6 = vld [vmem:[#allocation5 + $0x228c] ss:$16 sps:$4 sm:$0xff]   ;;  %v16361_v7 = vld [vmem:[#allocation5 + $0x2280] ss:$16 sps:$4 sm:$0xff]  }
 0x472   :  { %7809 = vmatpush1.bf16.msra.mxu0 %v16269_v8  ;;  %8547 = vmatpush1.bf16.msra.mxu1 %v16272_v9  ;;  %v16364_v8 = vld [vmem:[#allocation5 + $0x2288] ss:$16 sps:$4 sm:$0xff]   ;;  %v16369_v9 = vld [vmem:[#allocation5 + $0x22a4] ss:$16 sps:$4 sm:$0xff]  }
 0x473   :  { %7810 = vmatprep.subr.bf16.mxu0 %v16277_v10  ;;  %8548 = vmatprep.subr.bf16.mxu1 %v16280_v12  ;;  %v16372_v10 = vld [vmem:[#allocation5 + $0x22ac] ss:$16 sps:$4 sm:$0xff]   ;;  %v16367_v12 = vld [vmem:[#allocation5 + $0x22a0] ss:$16 sps:$4 sm:$0xff]  }
 0x476   :  { %7811 = vmatpush1.bf16.msra.mxu0 %v16275_v13  ;;  %8549 = vmatpush1.bf16.msra.mxu1 %v16278_v15  ;;  %v16370_v13 = vld [vmem:[#allocation5 + $0x22a8] ss:$16 sps:$4 sm:$0xff]   ;;  %v16375_v15 = vld [vmem:[#allocation5 + $0x22c4] ss:$16 sps:$4 sm:$0xff]  }
 0x477   :  { %7812 = vmatprep.subr.bf16.mxu0 %v16283_v16  ;;  %8550 = vmatprep.subr.bf16.mxu1 %v16286_v18  ;;  %v16378_v16 = vld [vmem:[#allocation5 + $0x22cc] ss:$16 sps:$4 sm:$0xff]   ;;  %v16373_v18 = vld [vmem:[#allocation5 + $0x22c0] ss:$16 sps:$4 sm:$0xff]  }
 0x47a   :  { %7813 = vmatpush1.bf16.msra.mxu0 %v16281_v20  ;;  %8551 = vmatpush1.bf16.msra.mxu1 %v16284_v11  ;;  %v16376_v20 = vld [vmem:[#allocation5 + $0x22c8] ss:$16 sps:$4 sm:$0xff]   ;;  %v16381_v11 = vld [vmem:[#allocation5 + $0x22e4] ss:$16 sps:$4 sm:$0xff]  }
 0x47b   :  { %7814 = vmatprep.subr.bf16.mxu0 %v16289_v21  ;;  %8552 = vmatprep.subr.bf16.mxu1 %v16292_v14  ;;  %v16384_v21 = vld [vmem:[#allocation5 + $0x22ec] ss:$16 sps:$4 sm:$0xff]   ;;  %v16379_v14 = vld [vmem:[#allocation5 + $0x22e0] ss:$16 sps:$4 sm:$0xff]  }
 0x47e   :  { %7815 = vmatpush1.bf16.msra.mxu0 %v16287_v23  ;;  %8553 = vmatpush1.bf16.msra.mxu1 %v16290_v24  ;;  %v16382_v23 = vld [vmem:[#allocation5 + $0x22e8] ss:$16 sps:$4 sm:$0xff]   ;;  %v16387_v24 = vld [vmem:[#allocation5 + $0x2304] ss:$16 sps:$4 sm:$0xff]  }
 0x47f   :  { %7816 = vmatprep.subr.bf16.mxu0 %v16295_v17  ;;  %8554 = vmatprep.subr.bf16.mxu1 %v16298_v26  ;;  %v16390_v17 = vld [vmem:[#allocation5 + $0x230c] ss:$16 sps:$4 sm:$0xff]   ;;  %v16385_v26 = vld [vmem:[#allocation5 + $0x2300] ss:$16 sps:$4 sm:$0xff]  }
 0x482   :  { %7817 = vmatpush1.bf16.msra.mxu0 %v16293_v27  ;;  %8555 = vmatpush1.bf16.msra.mxu1 %v16296_v19  ;;  %v16388_v27 = vld [vmem:[#allocation5 + $0x2308] ss:$16 sps:$4 sm:$0xff]   ;;  %v16393_v19 = vld [vmem:[#allocation5 + $0x2324] ss:$16 sps:$4 sm:$0xff]  }
 0x483   :  { %7818 = vmatprep.subr.bf16.mxu0 %v16301_v29  ;;  %8556 = vmatprep.subr.bf16.mxu1 %v16304_v30  ;;  %v16396_v29 = vld [vmem:[#allocation5 + $0x232c] ss:$16 sps:$4 sm:$0xff]   ;;  %v16391_v30 = vld [vmem:[#allocation5 + $0x2320] ss:$16 sps:$4 sm:$0xff]  }
 0x486   :  { %7819 = vmatpush1.bf16.msra.mxu0 %v16299_v22  ;;  %8557 = vmatpush1.bf16.msra.mxu1 %v16302_v32  ;;  %v16394_v22 = vld [vmem:[#allocation5 + $0x2328] ss:$16 sps:$4 sm:$0xff]   ;;  %v16399_v32 = vld [vmem:[#allocation5 + $0x2344] ss:$16 sps:$4 sm:$0xff]  }
 0x487   :  { %7820 = vmatprep.subr.bf16.mxu0 %v16307_v33  ;;  %8558 = vmatprep.subr.bf16.mxu1 %v16310_v25  ;;  %v16402_v33 = vld [vmem:[#allocation5 + $0x234c] ss:$16 sps:$4 sm:$0xff]   ;;  %v16397_v25 = vld [vmem:[#allocation5 + $0x2340] ss:$16 sps:$4 sm:$0xff]  }
 0x48a   :  { %7821 = vmatpush1.bf16.msra.mxu0 %v16305_v35  ;;  %8559 = vmatpush1.bf16.msra.mxu1 %v16308_v36  ;;  %v16400_v35 = vld [vmem:[#allocation5 + $0x2348] ss:$16 sps:$4 sm:$0xff]   ;;  %v16405_v36 = vld [vmem:[#allocation5 + $0x2364] ss:$16 sps:$4 sm:$0xff]  }
 0x48b   :  { %7822 = vmatprep.subr.bf16.mxu0 %v16313_v28  ;;  %8560 = vmatprep.subr.bf16.mxu1 %v16316_v38  ;;  %v16408_v28 = vld [vmem:[#allocation5 + $0x236c] ss:$16 sps:$4 sm:$0xff]   ;;  %v16403_v38 = vld [vmem:[#allocation5 + $0x2360] ss:$16 sps:$4 sm:$0xff]  }
 0x48e   :  { %7823 = vmatpush1.bf16.msra.mxu0 %v16311_v39  ;;  %8561 = vmatpush1.bf16.msra.mxu1 %v16314_v31  ;;  %v16406_v39 = vld [vmem:[#allocation5 + $0x2368] ss:$16 sps:$4 sm:$0xff]   ;;  %v16411_v31 = vld [vmem:[#allocation5 + $0x2384] ss:$16 sps:$4 sm:$0xff]  }
 0x48f   :  { %7824 = vmatprep.subr.bf16.mxu0 %v16319_v41  ;;  %8562 = vmatprep.subr.bf16.mxu1 %v16322_v42  ;;  %v16414_v41 = vld [vmem:[#allocation5 + $0x238c] ss:$16 sps:$4 sm:$0xff]   ;;  %v16409_v42 = vld [vmem:[#allocation5 + $0x2380] ss:$16 sps:$4 sm:$0xff]  }
 0x492   :  { %7825 = vmatpush1.bf16.msra.mxu0 %v16317_v34  ;;  %8563 = vmatpush1.bf16.msra.mxu1 %v16320_v44  ;;  %v16412_v34 = vld [vmem:[#allocation5 + $0x2388] ss:$16 sps:$4 sm:$0xff]   ;;  %v16417_v44 = vld [vmem:[#allocation5 + $0x23a4] ss:$16 sps:$4 sm:$0xff]  }
 0x493   :  { %7826 = vmatprep.subr.bf16.mxu0 %v16325_v45  ;;  %8564 = vmatprep.subr.bf16.mxu1 %v16328_v37  ;;  %v16420_v45 = vld [vmem:[#allocation5 + $0x23ac] ss:$16 sps:$4 sm:$0xff]   ;;  %v16415_v37 = vld [vmem:[#allocation5 + $0x23a0] ss:$16 sps:$4 sm:$0xff]  }
 0x496   :  { %7827 = vmatpush1.bf16.msra.mxu0 %v16323_v47  ;;  %8565 = vmatpush1.bf16.msra.mxu1 %v16326_v48  ;;  %v16418_v47 = vld [vmem:[#allocation5 + $0x23a8] ss:$16 sps:$4 sm:$0xff]   ;;  %v16423_v48 = vld [vmem:[#allocation5 + $0x23c4] ss:$16 sps:$4 sm:$0xff]  }
 0x497   :  { %7828 = vmatprep.subr.bf16.mxu0 %v16331_v49  ;;  %8566 = vmatprep.subr.bf16.mxu1 %v16334_v50  ;;  %v16426_v49 = vld [vmem:[#allocation5 + $0x23cc] ss:$16 sps:$4 sm:$0xff]   ;;  %v16421_v50 = vld [vmem:[#allocation5 + $0x23c0] ss:$16 sps:$4 sm:$0xff]  }
 0x49a   :  { %7829 = vmatpush1.bf16.msra.mxu0 %v16329_v51  ;;  %8567 = vmatpush1.bf16.msra.mxu1 %v16332_v52  ;;  %v16424_v51 = vld [vmem:[#allocation5 + $0x23c8] ss:$16 sps:$4 sm:$0xff]   ;;  %v16429_v52 = vld [vmem:[#allocation5 + $0x23e4] ss:$16 sps:$4 sm:$0xff]  }
 0x49b   :  { %7839 = vmatprep.subr.bf16.mxu0 %v16339_v53  ;;  %8577 = vmatprep.subr.bf16.mxu1 %v16342_v54  ;;  %v16432_v53 = vld [vmem:[#allocation5 + $0x23ec] ss:$16 sps:$4 sm:$0xff]   ;;  %v16427_v54 = vld [vmem:[#allocation5 + $0x23e0] ss:$16 sps:$4 sm:$0xff]  }
 0x49d   :  { %7831 = vmatmul.mubr.bf16.vlgmr.msra.gmra.mrb[0].mxu0 %v12607_v55  ;;  %8569 = vmatmul.mubr.bf16.vlgmr.msra.gmra.mrb[0].mxu1 %v12607_v55  ;;  %v16430_v55 = vld [vmem:[#allocation5 + $0x23e8] ss:$16 sps:$4 sm:$0xff]  }
 0x49e   :  { %7840 = vmatpush1.bf16.msra.mxu0 %v16337_v56  ;;  %8578 = vmatpush1.bf16.msra.mxu1 %v16340_v57  ;;  %v12609_v56 = vcombine.low %v17090_v46, %v17090_v46  ;;  %v16435_v57 = vld [vmem:[#allocation7 + $0x40] sm:$0xff]   ;;  %v16443_v46 = vld [vmem:[#allocation7 + $0x50] sm:$0xff]  }
 0x49f   :  { %7841 = vmatprep.subr.bf16.mxu0 %v16345_v58  ;;  %8579 = vmatprep.subr.bf16.mxu1 %v16348_v40  ;;  %v16436_v58 = vld [vmem:[#allocation7 + $0xc0] sm:$0xff]  }
 0x4a0   :  { %7871 = vmatprep.mubr.bf16.mxu0 %v12610_v59  ;;  %8609 = vmatprep.mubr.bf16.mxu1 %v12610_v59  ;;  %v16437_v40 = vld [vmem:[#allocation7] sm:$0xff]  }
 0x4a1   :  { %v16438_v59 = vld [vmem:[#allocation7 + $0x80] sm:$0xff]  }
 0x4a2   :  { %7842 = vmatpush1.bf16.msra.mxu0 %v16343_v60  ;;  %8580 = vmatpush1.bf16.msra.mxu1 %v16346_v61  ;;  %v16439_v60 = vld [vmem:[#allocation7 + $0x48] sm:$0xff]  }
 0x4a3   :  { %7843 = vmatprep.subr.bf16.mxu0 %v16351_v43  ;;  %8581 = vmatprep.subr.bf16.mxu1 %v16354_v62  ;;  %v16440_v61 = vld [vmem:[#allocation7 + $0xc8] sm:$0xff]  }
 0x4a4   :  { %v16441_v43 = vld [vmem:[#allocation7 + $0x8] sm:$0xff]  }
 0x4a5   :  { %v16442_v62 = vld [vmem:[#allocation7 + $0x88] sm:$0xff]  }
 0x4a6   :  { %7844 = vmatpush1.bf16.msra.mxu0 %v16349_v63  ;;  %8582 = vmatpush1.bf16.msra.mxu1 %v16352_v0  ;;  %v16444_v63 = vld [vmem:[#allocation7 + $0xd0] sm:$0xff]  }
 0x4a7   :  { %7845 = vmatprep.subr.bf16.mxu0 %v16357_v1  ;;  %8583 = vmatprep.subr.bf16.mxu1 %v16360_v2  ;;  %v16445_v0 = vld [vmem:[#allocation7 + $0x10] sm:$0xff]   ;;  %v16447_v2 = vld [vmem:[#allocation7 + $0x58] sm:$0xff]  }
 0x4a8   :  { %v16446_v1 = vld [vmem:[#allocation7 + $0x90] sm:$0xff]  }
 0x4aa   :  { %7846 = vmatpush1.bf16.msra.mxu0 %v16355_v3  ;;  %8584 = vmatpush1.bf16.msra.mxu1 %v16358_v4  ;;  %v16448_v3 = vld [vmem:[#allocation7 + $0xd8] sm:$0xff]  }
 0x4ab   :  { %7847 = vmatprep.subr.bf16.mxu0 %v16363_v5  ;;  %8585 = vmatprep.subr.bf16.mxu1 %v16366_v6  ;;  %v16449_v4 = vld [vmem:[#allocation7 + $0x18] sm:$0xff]   ;;  %v16451_v6 = vld [vmem:[#allocation7 + $0x60] sm:$0xff]  }
 0x4ac   :  { %v16450_v5 = vld [vmem:[#allocation7 + $0x98] sm:$0xff]  }
 0x4ae   :  { %7848 = vmatpush1.bf16.msra.mxu0 %v16361_v7  ;;  %8586 = vmatpush1.bf16.msra.mxu1 %v16364_v8  ;;  %v16452_v7 = vld [vmem:[#allocation7 + $0xe0] sm:$0xff]  }
 0x4af   :  { %7849 = vmatprep.subr.bf16.mxu0 %v16369_v9  ;;  %8587 = vmatprep.subr.bf16.mxu1 %v16372_v10  ;;  %v16453_v8 = vld [vmem:[#allocation7 + $0x20] sm:$0xff]   ;;  %v16455_v10 = vld [vmem:[#allocation7 + $0x68] sm:$0xff]  }
 0x4b0   :  { %v16454_v9 = vld [vmem:[#allocation7 + $0xa0] sm:$0xff]  }
 0x4b2   :  { %7850 = vmatpush1.bf16.msra.mxu0 %v16367_v12  ;;  %8588 = vmatpush1.bf16.msra.mxu1 %v16370_v13  ;;  %v16456_v12 = vld [vmem:[#allocation7 + $0xe8] sm:$0xff]  }
 0x4b3   :  { %7851 = vmatprep.subr.bf16.mxu0 %v16375_v15  ;;  %8589 = vmatprep.subr.bf16.mxu1 %v16378_v16  ;;  %v16457_v13 = vld [vmem:[#allocation7 + $0x28] sm:$0xff]   ;;  %v16459_v16 = vld [vmem:[#allocation7 + $0x70] sm:$0xff]  }
 0x4b4   :  { %v16458_v15 = vld [vmem:[#allocation7 + $0xa8] sm:$0xff]  }
 0x4b6   :  { %7852 = vmatpush1.bf16.msra.mxu0 %v16373_v18  ;;  %8590 = vmatpush1.bf16.msra.mxu1 %v16376_v20  ;;  %v16460_v18 = vld [vmem:[#allocation7 + $0xf0] sm:$0xff]  }
 0x4b7   :  { %7853 = vmatprep.subr.bf16.mxu0 %v16381_v11  ;;  %8591 = vmatprep.subr.bf16.mxu1 %v16384_v21  ;;  %v16461_v20 = vld [vmem:[#allocation7 + $0x30] sm:$0xff]   ;;  %v16463_v21 = vld [vmem:[#allocation7 + $0x78] sm:$0xff]  }
 0x4b8   :  { %v16462_v11 = vld [vmem:[#allocation7 + $0xb0] sm:$0xff]  }
 0x4ba   :  { %7854 = vmatpush1.bf16.msra.mxu0 %v16379_v14  ;;  %8592 = vmatpush1.bf16.msra.mxu1 %v16382_v23  ;;  %v16464_v14 = vld [vmem:[#allocation7 + $0xf8] sm:$0xff]  }
 0x4bb   :  { %7855 = vmatprep.subr.bf16.mxu0 %v16387_v24  ;;  %8593 = vmatprep.subr.bf16.mxu1 %v16390_v17  ;;  %v16465_v23 = vld [vmem:[#allocation7 + $0x38] sm:$0xff]   ;;  %v16467_v17 = vld [vmem:[#allocation7 + $0x140] sm:$0xff]  }
 0x4bc   :  { %v16466_v24 = vld [vmem:[#allocation7 + $0xb8] sm:$0xff]  }
 0x4be   :  { %7856 = vmatpush1.bf16.msra.mxu0 %v16385_v26  ;;  %8594 = vmatpush1.bf16.msra.mxu1 %v16388_v27  ;;  %v16468_v26 = vld [vmem:[#allocation7 + $0x1c0] sm:$0xff]  }
 0x4bf   :  { %7857 = vmatprep.subr.bf16.mxu0 %v16393_v19  ;;  %8595 = vmatprep.subr.bf16.mxu1 %v16396_v29 }
 0x4c2   :  { %7858 = vmatpush1.bf16.msra.mxu0 %v16391_v30  ;;  %8596 = vmatpush1.bf16.msra.mxu1 %v16394_v22 }
 0x4c3   :  { %7859 = vmatprep.subr.bf16.mxu0 %v16399_v32  ;;  %8597 = vmatprep.subr.bf16.mxu1 %v16402_v33 }
 0x4c6   :  { %7860 = vmatpush1.bf16.msra.mxu0 %v16397_v25  ;;  %8598 = vmatpush1.bf16.msra.mxu1 %v16400_v35 }
 0x4c7   :  { %7861 = vmatprep.subr.bf16.mxu0 %v16405_v36  ;;  %8599 = vmatprep.subr.bf16.mxu1 %v16408_v28 }
 0x4ca   :  { %7862 = vmatpush1.bf16.msra.mxu0 %v16403_v38  ;;  %8600 = vmatpush1.bf16.msra.mxu1 %v16406_v39 }
 0x4cb   :  { %7863 = vmatprep.subr.bf16.mxu0 %v16411_v31  ;;  %8601 = vmatprep.subr.bf16.mxu1 %v16414_v41 }
 0x4ce   :  { %7864 = vmatpush1.bf16.msra.mxu0 %v16409_v42  ;;  %8602 = vmatpush1.bf16.msra.mxu1 %v16412_v34 }
 0x4cf   :  { %7865 = vmatprep.subr.bf16.mxu0 %v16417_v44  ;;  %8603 = vmatprep.subr.bf16.mxu1 %v16420_v45 }
 0x4d2   :  { %7866 = vmatpush1.bf16.msra.mxu0 %v16415_v37  ;;  %8604 = vmatpush1.bf16.msra.mxu1 %v16418_v47 }
 0x4d3   :  { %7867 = vmatprep.subr.bf16.mxu0 %v16423_v48  ;;  %8605 = vmatprep.subr.bf16.mxu1 %v16426_v49 }
 0x4d6   :  { %7868 = vmatpush1.bf16.msra.mxu0 %v16421_v50  ;;  %8606 = vmatpush1.bf16.msra.mxu1 %v16424_v51 }
 0x4d7   :  { %7869 = vmatprep.subr.bf16.mxu0 %v16429_v52  ;;  %8607 = vmatprep.subr.bf16.mxu1 %v16432_v53 }
 0x4da   :  { %7870 = vmatpush1.bf16.msra.mxu0 %v16427_v54  ;;  %8608 = vmatpush1.bf16.msra.mxu1 %v16430_v55 }
 0x4db   :  { %14062 = vmatprep.subr.bf16.mxu0 %v16435_v57  ;;  %14084 = vmatprep.subr.bf16.mxu1 %v16436_v58 }
 0x4dd   :  { %7872 = vmatmul.mubr.bf16.vlgmr.msra.gmra.mrb[0].mxu0 %v12609_v56  ;;  %8610 = vmatmul.mubr.bf16.vlgmr.msra.gmra.mrb[0].mxu1 %v12609_v56 }
 0x4de   :  { %14063 = vmatpush3.bf16.msra.mxu0 %v16437_v40  ;;  %14085 = vmatpush3.bf16.msra.mxu1 %v16438_v59 }
 0x4df   :  { %14064 = vmatprep.subr.bf16.mxu0 %v16439_v60  ;;  %14086 = vmatprep.subr.bf16.mxu1 %v16440_v61 }
 0x4e2   :  { %14065 = vmatpush3.bf16.msra.mxu0 %v16441_v43  ;;  %14087 = vmatpush3.bf16.msra.mxu1 %v16442_v62 }
 0x4e3   :  { %14066 = vmatprep.subr.bf16.mxu0 %v16443_v46  ;;  %14088 = vmatprep.subr.bf16.mxu1 %v16444_v63 }
 0x4e6   :  { %14067 = vmatpush3.bf16.msra.mxu0 %v16445_v0  ;;  %14089 = vmatpush3.bf16.msra.mxu1 %v16446_v1 }
 0x4e7   :  { %14068 = vmatprep.subr.bf16.mxu0 %v16447_v2  ;;  %14090 = vmatprep.subr.bf16.mxu1 %v16448_v3 }
 0x4ea   :  { %14069 = vmatpush3.bf16.msra.mxu0 %v16449_v4  ;;  %14091 = vmatpush3.bf16.msra.mxu1 %v16450_v5 }
 0x4eb   :  { %14070 = vmatprep.subr.bf16.mxu0 %v16451_v6  ;;  %14092 = vmatprep.subr.bf16.mxu1 %v16452_v7 }
 0x4ee   :  { %14071 = vmatpush3.bf16.msra.mxu0 %v16453_v8  ;;  %14093 = vmatpush3.bf16.msra.mxu1 %v16454_v9 }
 0x4ef   :  { %14072 = vmatprep.subr.bf16.mxu0 %v16455_v10  ;;  %14094 = vmatprep.subr.bf16.mxu1 %v16456_v12 }
 0x4f2   :  { %14073 = vmatpush3.bf16.msra.mxu0 %v16457_v13  ;;  %14095 = vmatpush3.bf16.msra.mxu1 %v16458_v15 }
 0x4f3   :  { %14074 = vmatprep.subr.bf16.mxu0 %v16459_v16  ;;  %14096 = vmatprep.subr.bf16.mxu1 %v16460_v18 }
 0x4f6   :  { %14075 = vmatpush3.bf16.msra.mxu0 %v16461_v20  ;;  %14097 = vmatpush3.bf16.msra.mxu1 %v16462_v11 }
 0x4f7   :  { %14076 = vmatprep.subr.bf16.mxu0 %v16463_v21  ;;  %14098 = vmatprep.subr.bf16.mxu1 %v16464_v14 }
 0x4fa   :  { %14077 = vmatpush3.bf16.msra.mxu0 %v16465_v23  ;;  %14099 = vmatpush3.bf16.msra.mxu1 %v16466_v24 }
 0x4fb   :  { %14106 = vmatprep.subr.bf16.mxu0 %v16467_v17  ;;  %14128 = vmatprep.subr.bf16.mxu1 %v16468_v26 }
 0x5b0   :  { %v17096_v27 = vpop.f32.mrb[0].mxu0  ;;  %v17098_v19 = vpop.f32.mrb[0].mxu1 }
 0x5b1   :  { %v8619_v29 = vsel %vm8618_vm0, %v17096_v27, 0.0  ;;  %v8720_v30 = vrot.slane %v17096_v27, 4  ;;  %v8633_v22 = vsel %vm8618_vm0, %v17098_v19, 0.0  ;;  %v8722_v32 = vrot.slane %v17098_v19, 4  ;;  %v17106_v33 = vpop.f32.mrb[1].mxu0  ;;  %v17108_v25 = vpop.f32.mrb[1].mxu1 }
 0x5b2   :  { %v8620_v35 = vrot.slane %v8619_v29, 4  ;;  %v8634_v36 = vrot.slane %v8633_v22, 4  ;;  %v8626_v28 = vsel %vm8618_vm0, %v17106_v33, 0.0  ;;  %v8721_v38 = vrot.slane %v17106_v33, 4  ;;  %v7877_v39 = vpop.f32.mrb[2].mxu0  ;;  %v8615_v31 = vpop.f32.mrb[2].mxu1 }
 0x5b3   :  { %v8728_v41 = vsel %vm8618_vm0, %v8720_v30, 0.0  ;;  %v8742_v42 = vsel %vm8618_vm0, %v8722_v32, 0.0  ;;  %v8627_v34 = vrot.slane %v8626_v28, 4  ;;  %v8640_v44 = vsel %vm8618_vm0, %v17108_v25, 0.0  ;;  %v7878_v45 = vpop.f32.mrb[3].mxu0  ;;  %v8616_v37 = vpop.f32.mrb[3].mxu1 }
 0x5b4   :  { %v8621_v47 = vadd.f32 %v8620_v35, %v8619_v29  ;;  %v8729_v48 = vrot.slane %v8728_v41, 4  ;;  %v8635_v49 = vadd.f32 %v8634_v36, %v8633_v22  ;;  %v8743_v50 = vrot.slane %v8742_v42, 4 }
 0x5b5   :  { %v8628_v51 = vadd.f32 %v8627_v34, %v8626_v28  ;;  %v8735_v52 = vsel %vm8618_vm0, %v8721_v38, 0.0  ;;  %v8641_v53 = vrot.slane %v8640_v44, 4  ;;  %v8723_v54 = vrot.slane %v17108_v25, 4 }
 0x5b6   :  { %v8622_v55 = vrot.slane %v8621_v47, 2  ;;  %v8730_v56 = vadd.f32 %v8729_v48, %v8728_v41  ;;  %v8636_v57 = vrot.slane %v8635_v49, 2  ;;  %v8744_v58 = vadd.f32 %v8743_v50, %v8742_v42 }
 0x5b7   :  { %v8629_v40 = vrot.slane %v8628_v51, 2  ;;  %v8736_v59 = vrot.slane %v8735_v52, 4  ;;  %v8642_v60 = vadd.f32 %v8641_v53, %v8640_v44  ;;  %v8749_v61 = vsel %vm8618_vm0, %v8723_v54, 0.0 }
 0x5b8   :  { %v8623_v43 = vadd.f32 %v8622_v55, %v8621_v47  ;;  %v8731_v62 = vrot.slane %v8730_v56, 2  ;;  %v8637_v46 = vadd.f32 %v8636_v57, %v8635_v49  ;;  %v8745_v63 = vrot.slane %v8744_v58, 2 }
 0x5b9   :  { %v8630_v0 = vadd.f32 %v8629_v40, %v8628_v51  ;;  %v8737_v1 = vadd.f32 %v8736_v59, %v8735_v52  ;;  %v8643_v2 = vrot.slane %v8642_v60, 2  ;;  %v8750_v3 = vrot.slane %v8749_v61, 4 }
 0x5ba   :  { %v8624_v4 = vrot.slane %v8623_v43, 1  ;;  %v8732_v5 = vadd.f32 %v8731_v62, %v8730_v56  ;;  %v8638_v6 = vrot.slane %v8637_v46, 1  ;;  %v8746_v7 = vadd.f32 %v8745_v63, %v8744_v58 }
 0x5bb   :  { %v8631_v8 = vrot.slane %v8630_v0, 1  ;;  %v8738_v9 = vrot.slane %v8737_v1, 2  ;;  %v8644_v10 = vadd.f32 %v8643_v2, %v8642_v60  ;;  %v8751_v12 = vadd.f32 %v8750_v3, %v8749_v61 }
 0x5bc   :  { %v8625_v13 = vadd.f32 %v8624_v4, %v8623_v43  ;;  %v8733_v15 = vrot.slane %v8732_v5, 1  ;;  %v8639_v16 = vadd.f32 %v8638_v6, %v8637_v46  ;;  %v8747_v18 = vrot.slane %v8746_v7, 1 }
 0x5bd   :  { %v8632_v20 = vadd.f32 %v8631_v8, %v8630_v0  ;;  %v8739_v11 = vadd.f32 %v8738_v9, %v8737_v1  ;;  %v8645_v21 = vrot.slane %v8644_v10, 1  ;;  %v8752_v14 = vrot.slane %v8751_v12, 2 }
 0x5be   :  { %v8648_v23 = vmul.f32 0.25, %v8625_v13  ;;  %v8734_v24 = vadd.f32 %v8733_v15, %v8732_v5  ;;  %v8650_v17 = vmul.f32 0.25, %v8639_v16  ;;  %v8748_v26 = vadd.f32 %v8747_v18, %v8746_v7 }
 0x5bf   :  { %v8649_v29 = vmul.f32 0.25, %v8632_v20  ;;  %v8740_v30 = vrot.slane %v8739_v11, 1  ;;  %v8646_v22 = vadd.f32 %v8645_v21, %v8644_v10  ;;  %v8753_v32 = vadd.f32 %v8752_v14, %v8751_v12 }
 0x5c0   :  { %v17121_v35 = vsub.f32 %v17096_v27, %v8648_v23  ;;  %v8756_v36 = vmul.f32 0.25, %v8734_v24  ;;  %v17124_v28 = vsub.f32 %v17098_v19, %v8650_v17  ;;  %v8758_v38 = vmul.f32 0.25, %v8748_v26 }
 0x5c1   :  { %v17127_v39 = vsub.f32 %v17106_v33, %v8649_v29  ;;  %v8741_v31 = vadd.f32 %v8740_v30, %v8739_v11  ;;  %v8651_v41 = vmul.f32 0.25, %v8646_v22  ;;  %v8754_v42 = vrot.slane %v8753_v32, 1 }
 0x5c2   :  { %v8656_v34 = vmul.f32 %v17121_v35, %v17121_v35  ;;  %v17132_v44 = vsub.f32 %v17096_v27, %v8756_v36  ;;  %v8658_v45 = vmul.f32 %v17124_v28, %v17124_v28  ;;  %v17137_v37 = vsub.f32 %v17098_v19, %v8758_v38 }
 0x5c3   :  { %v8657_v47 = vmul.f32 %v17127_v39, %v17127_v39  ;;  %v8757_v48 = vmul.f32 0.25, %v8741_v31  ;;  %v17142_v49 = vsub.f32 %v17108_v25, %v8651_v41  ;;  %v8755_v50 = vadd.f32 %v8754_v42, %v8753_v32 }
 0x5c4   :  { %v8660_v51 = vsel %vm8618_vm0, %v8656_v34, 0.0  ;;  %v8764_v27 = vmul.f32 %v17132_v44, %v17132_v44  ;;  %v8674_v52 = vsel %vm8618_vm0, %v8658_v45, 0.0  ;;  %v8766_v53 = vmul.f32 %v17137_v37, %v17137_v37 }
 0x5c5   :  { %v8661_v19 = vrot.slane %v8660_v51, 4  ;;  %v8675_v54 = vrot.slane %v8674_v52, 4  ;;  %v8667_v55 = vsel %vm8618_vm0, %v8657_v47, 0.0  ;;  %v17152_v56 = vsub.f32 %v17106_v33, %v8757_v48 }
 0x5c6   :  { %v8772_v57 = vrot.slane %v8764_v27, 4  ;;  %v8774_v58 = vrot.slane %v8766_v53, 4  ;;  %v8668_v40 = vrot.slane %v8667_v55, 4  ;;  %v8659_v59 = vmul.f32 %v17142_v49, %v17142_v49 }
 0x5c7   :  { %v8662_v60 = vadd.f32 %v8661_v19, %v8660_v51  ;;  %v8676_v61 = vadd.f32 %v8675_v54, %v8674_v52  ;;  %v8765_v43 = vmul.f32 %v17152_v56, %v17152_v56  ;;  %v8759_v62 = vmul.f32 0.25, %v8755_v50 }
 0x5c8   :  { %v8780_v46 = vsel %vm8618_vm0, %v8772_v57, 0.0  ;;  %v8794_v63 = vsel %vm8618_vm0, %v8774_v58, 0.0  ;;  %v8669_v0 = vadd.f32 %v8668_v40, %v8667_v55  ;;  %v8681_v33 = vsel %vm8618_vm0, %v8659_v59, 0.0 }
 0x5c9   :  { %v8663_v1 = vrot.slane %v8662_v60, 2  ;;  %v8781_v2 = vrot.slane %v8780_v46, 4  ;;  %v8677_v3 = vrot.slane %v8676_v61, 2  ;;  %v8795_v4 = vrot.slane %v8794_v63, 4 }
 0x5ca   :  { %v8670_v5 = vrot.slane %v8669_v0, 2  ;;  %v8773_v6 = vrot.slane %v8765_v43, 4  ;;  %v8682_v7 = vrot.slane %v8681_v33, 4  ;;  %v17162_v8 = vsub.f32 %v17108_v25, %v8759_v62 }
 0x5cb   :  { %v8664_v9 = vadd.f32 %v8663_v1, %v8662_v60  ;;  %v8782_v10 = vadd.f32 %v8781_v2, %v8780_v46  ;;  %v8678_v12 = vadd.f32 %v8677_v3, %v8676_v61  ;;  %v8796_v13 = vadd.f32 %v8795_v4, %v8794_v63 }
 0x5cc   :  { %v8671_v15 = vadd.f32 %v8670_v5, %v8669_v0  ;;  %v8787_v16 = vsel %vm8618_vm0, %v8773_v6, 0.0  ;;  %v8683_v18 = vadd.f32 %v8682_v7, %v8681_v33  ;;  %v8767_v20 = vmul.f32 %v17162_v8, %v17162_v8 }
 0x5cd   :  { %v8665_v11 = vrot.slane %v8664_v9, 1  ;;  %v8783_v21 = vrot.slane %v8782_v10, 2  ;;  %v8679_v14 = vrot.slane %v8678_v12, 1  ;;  %v8797_v23 = vrot.slane %v8796_v13, 2 }
 0x5ce   :  { %v8672_v24 = vrot.slane %v8671_v15, 1  ;;  %v8788_v17 = vrot.slane %v8787_v16, 4  ;;  %v8684_v26 = vrot.slane %v8683_v18, 2  ;;  %v8775_v25 = vrot.slane %v8767_v20, 4 }
 0x5cf   :  { %v8666_v29 = vadd.f32 %v8665_v11, %v8664_v9  ;;  %v8784_v30 = vadd.f32 %v8783_v21, %v8782_v10  ;;  %v8680_v22 = vadd.f32 %v8679_v14, %v8678_v12  ;;  %v8798_v32 = vadd.f32 %v8797_v23, %v8796_v13 }
 0x5d0   :  { %v8673_v36 = vadd.f32 %v8672_v24, %v8671_v15  ;;  %v8789_v38 = vadd.f32 %v8788_v17, %v8787_v16  ;;  %v8685_v31 = vadd.f32 %v8684_v26, %v8683_v18  ;;  %v8801_v41 = vsel %vm8618_vm0, %v8775_v25, 0.0 }
 0x5d1   :  { %v8688_v42 = vmul.f32 0.25, %v8666_v29  ;;  %v8785_v34 = vrot.slane %v8784_v30, 1  ;;  %v8799_v45 = vrot.slane %v8798_v32, 1  ;;  %v8802_v51 = vrot.slane %v8801_v41, 4 }
 0x5d2   :  { %v8689_v47 = vmul.f32 0.25, %v8673_v36  ;;  %v8790_v48 = vrot.slane %v8789_v38, 2  ;;  %v8686_v50 = vrot.slane %v8685_v31, 1  ;;  %v8690_v53 = vmul.f32 0.25, %v8680_v22 }
 0x5d3   :  { %v8692_v27 = vadd.f32 1e-05, %v8688_v42  ;;  %v8786_v52 = vadd.f32 %v8785_v34, %v8784_v30  ;;  %v8800_v19 = vadd.f32 %v8799_v45, %v8798_v32  ;;  %v8803_v58 = vadd.f32 %v8802_v51, %v8801_v41  ;;  %v16469_v34 = vld [vmem:[#allocation7 + $0x100] sm:$0xff]  }
 0x5d4   :  { %v8693_v54 = vadd.f32 1e-05, %v8689_v47  ;;  %v8791_v55 = vadd.f32 %v8790_v48, %v8789_v38  ;;  %v8687_v57 = vadd.f32 %v8686_v50, %v8685_v31  ;;  %v8694_v46 = vadd.f32 1e-05, %v8690_v53  ;;  %v16471_v48 = vld [vmem:[#allocation7 + $0x148] sm:$0xff]   ;;  %v16470_v53 = vld [vmem:[#allocation7 + $0x180] sm:$0xff]  }
 0x5d5   :  { %v8808_v40 = vmul.f32 0.25, %v8786_v52  ;;  %v8810_v59 = vmul.f32 0.25, %v8800_v19  ;;  %16723 = vrsqrt.f32 %v8692_v27  ;;  %v8804_v43 = vrot.slane %v8803_v58, 2 }
 0x5d6   :  { %v8792_v60 = vrot.slane %v8791_v55, 1  ;;  %v8691_v61 = vmul.f32 0.25, %v8687_v57  ;;  %16725 = vrsqrt.f32 %v8693_v54  ;;  %v16472_v54 = vld [vmem:[#allocation7 + $0x1c8] sm:$0xff]   ;;  %v16475_v57 = vld [vmem:[#allocation7 + $0x150] sm:$0xff]  }
 0x5d7   :  { %v8812_v62 = vadd.f32 1e-05, %v8808_v40  ;;  %v8814_v63 = vadd.f32 1e-05, %v8810_v59  ;;  %v8805_v1 = vadd.f32 %v8804_v43, %v8803_v58  ;;  %v16474_v58 = vld [vmem:[#allocation7 + $0x188] sm:$0xff]   ;;  %v16476_v40 = vld [vmem:[#allocation7 + $0x1d0] sm:$0xff]  }
 0x5d8   :  { %v8793_v0 = vadd.f32 %v8792_v60, %v8791_v55  ;;  %v8695_v33 = vadd.f32 1e-05, %v8691_v61  ;;  %v16473_v55 = vld [vmem:[#allocation7 + $0x108] sm:$0xff]   ;;  %v16477_v59 = vld [vmem:[#allocation7 + $0x110] sm:$0xff]   ;;  %v16479_v60 = vld [vmem:[#allocation7 + $0x158] sm:$0xff]  }
 0x5d9   :  { %16727 = vrsqrt.f32 %v8812_v62  ;;  %v8806_v3 = vrot.slane %v8805_v1, 1  ;;  %v16478_v61 = vld [vmem:[#allocation7 + $0x190] sm:$0xff]   ;;  %v16480_v43 = vld [vmem:[#allocation7 + $0x1d8] sm:$0xff]  }
 0x5da   :  { %16729 = vrsqrt.f32 %v8814_v63  ;;  %v8809_v2 = vmul.f32 0.25, %v8793_v0  ;;  %v16481_v62 = vld [vmem:[#allocation7 + $0x118] sm:$0xff]   ;;  %v16484_v0 = vld [vmem:[#allocation7 + $0x1e0] sm:$0xff]  }
 0x5db   :  { %16731 = vrsqrt.f32 %v8694_v46  ;;  %v8807_v5 = vadd.f32 %v8806_v3, %v8805_v1  ;;  %v16483_v46 = vld [vmem:[#allocation7 + $0x160] sm:$0xff]   ;;  %v16482_v63 = vld [vmem:[#allocation7 + $0x198] sm:$0xff]   ;;  %v16487_v1 = vld [vmem:[#allocation7 + $0x168] sm:$0xff]  }
 0x5dc   :  { %v8813_v4 = vadd.f32 1e-05, %v8809_v2  ;;  %16733 = vrsqrt.f32 %v8695_v33  ;;  %v16485_v33 = vld [vmem:[#allocation7 + $0x120] sm:$0xff]   ;;  %v16488_v3 = vld [vmem:[#allocation7 + $0x1e8] sm:$0xff]  }
 0x5dd   :  { %v8811_v6 = vmul.f32 0.25, %v8807_v5  ;;  %v16486_v2 = vld [vmem:[#allocation7 + $0x1a0] sm:$0xff]   ;;  %v16491_v5 = vld [vmem:[#allocation7 + $0x170] sm:$0xff]  }
 0x5de   :  { %16735 = vrsqrt.f32 %v8813_v4  ;;  %v16489_v4 = vld [vmem:[#allocation7 + $0x128] sm:$0xff]  }
 0x5df   :  { %v16724_v7 = vpop.eup %16723  ;;  %v8815_v9 = vadd.f32 1e-05, %v8811_v6  ;;  %v16490_v6 = vld [vmem:[#allocation7 + $0x1a8] sm:$0xff]  }
 0x5e0   :  { %v16726_v10 = vpop.eup %16725  ;;  %v8700_v15 = vmul.f32 %v16724_v7, %v17121_v35  ;;  %v16492_v7 = vld [vmem:[#allocation7 + $0x1f0] sm:$0xff]  }
 0x5e1   :  { %16737 = vrsqrt.f32 %v8815_v9  ;;  %v8701_v18 = vmul.f32 %v16726_v10, %v17127_v39  ;;  %v16493_v9 = vld [vmem:[#allocation7 + $0x130] sm:$0xff]   ;;  %v16495_v10 = vld [vmem:[#allocation7 + $0x178] sm:$0xff]  }
 0x5e2   :  { %v8708_v24 = vmul.f32 0.2, %v8700_v15  ;;  %vm8704_vm2 = vcmp.ge.f32.partialorder %v8700_v15, 0.0 }
 0x5e3   :  { %v16728_v12 = vpop.eup %16727  ;;  %v8709_v26 = vmul.f32 0.2, %v8701_v18  ;;  %vm8705_vm3 = vcmp.ge.f32.partialorder %v8701_v18, 0.0 }
 0x5e4   :  { %v16730_v13 = vpop.eup %16729  ;;  %v8820_v16 = vmul.f32 %v16728_v12, %v17132_v44  ;;  %v8712_v22 = vsel %vm8704_vm2, %v8700_v15, %v8708_v24  ;;  %v16494_v12 = vld [vmem:[#allocation7 + $0x1b0] sm:$0xff]   ;;  %v16497_v15 = vld [vmem:[#allocation7 + $0x138] sm:$0xff]  }
 0x5e5   :  { %v16732_v20 = vpop.eup %16731  ;;  %v8822_v14 = vmul.f32 %v16730_v13, %v17137_v37  ;;  %v8713_v32 = vsel %vm8705_vm3, %v8701_v18, %v8709_v26  ;;  %v16496_v13 = vld [vmem:[#allocation7 + $0x1f8] sm:$0xff]   ;;  %v16894_v18 = vmov 0.0  }
 0x5e6   :  { %v16734_v11 = vpop.eup %16733  ;;  %v8828_v21 = vmul.f32 0.2, %v8820_v16  ;;  %vm8824_vm1 = vcmp.ge.f32.partialorder %v8820_v16, 0.0  ;;  %v8702_v17 = vmul.f32 %v16732_v20, %v17124_v28 }
 0x5e7   :  { %v8703_v35 = vmul.f32 %v16734_v11, %v17142_v49  ;;  %v8830_v29 = vmul.f32 0.2, %v8822_v14  ;;  %vm8826_vm4 = vcmp.ge.f32.partialorder %v8822_v14, 0.0 }
 0x5e8   :  { %v16736_v23 = vpop.eup %16735  ;;  %v8832_v44 = vsel %vm8824_vm1, %v8820_v16, %v8828_v21  ;;  %vm8706_vm6 = vcmp.ge.f32.partialorder %v8702_v17, 0.0  ;;  %v8710_v37 = vmul.f32 0.2, %v8702_v17  ;;  %v16498_v16 = vld [vmem:[#allocation7 + $0x1b8] sm:$0xff]  }
 0x5e9   :  { %v8821_v25 = vmul.f32 %v16736_v23, %v17152_v56  ;;  %v8836_v36 = vsel %vm8618_vm0, %v8712_v22, %v8832_v44  ;;  %v8711_v38 = vmul.f32 0.2, %v8703_v35  ;;  %v8834_v41 = vsel %vm8826_vm4, %v8822_v14, %v8830_v29  ;;  %v16499_v44 = vld [vmem:[#allocation7 + $0x2c0] sm:$0xff]   ;;  %v16501_v22 = vld [vmem:[#allocation7 + $0x2c8] sm:$0xff]  }
 0x5ea   :  { %vm8707_vm7 = vcmp.ge.f32.partialorder %v8703_v35, 0.0  ;;  %v17180_v45 = vpack.c.bf16 %v8836_v36, %v8836_v36  ;;  %v8714_v47 = vsel %vm8706_vm6, %v8702_v17, %v8710_v37  ;;  %v16502_v37 = vld [vmem:[#allocation7 + $0x288] sm:$0xff]   ;;  %v16504_v36 = vld [vmem:[#allocation7 + $0x290] sm:$0xff]  }
 0x5eb   :  { %vm8825_vm5 = vcmp.ge.f32.partialorder %v8821_v25, 0.0  ;;  %v8829_v39 = vmul.f32 0.2, %v8821_v25  ;;  %v16738_v30 = vpop.eup %16737  ;;  %v8838_v50 = vsel %vm8618_vm0, %v8714_v47, %v8834_v41  ;;  %v8715_v51 = vsel %vm8707_vm7, %v8703_v35, %v8711_v38  ;;  %v16506_v38 = vld [vmem:[#allocation7 + $0x298] sm:$0xff]   ;;  %v16508_v41 = vld [vmem:[#allocation7 + $0x2a0] sm:$0xff]   ;;  %v16512_v47 = vld [vmem:[#allocation7 + $0x2b0] sm:$0xff]  }
 0x5ec   :  { %v8823_v31 = vmul.f32 %v16738_v30, %v17162_v8  ;;  %v17189_v19 = vpack.c.bf16 %v8838_v50, %v8838_v50  ;;  %v16500_v30 = vld [vmem:[#allocation7 + $0x280] sm:$0xff]   ;;  %v16513_v50 = vld [vmem:[#allocation7 + $0x2f8] sm:$0xff]  }
 0x5ed   :  { %v8833_v28 = vsel %vm8825_vm5, %v8821_v25, %v8829_v39  ;;  %v9180_v39 = vld [vmem:[#allocation8] sm:$0xff] }
 0x5ee   :  { %v8837_v56 = vsel %vm8618_vm0, %v8713_v32, %v8833_v28  ;;  %vm8827_vm8 = vcmp.ge.f32.partialorder %v8823_v31, 0.0  ;;  %v8831_v42 = vmul.f32 0.2, %v8823_v31  ;;  %v16503_v32 = vld [vmem:[#allocation7 + $0x2d0] sm:$0xff]   ;;  %v16505_v28 = vld [vmem:[#allocation7 + $0x2d8] sm:$0xff]  }
 0x5ef   :  { %v17178_v49 = vpack.c.bf16 %v8837_v56, %v8837_v56  ;;  %v16509_v56 = vld [vmem:[#allocation7 + $0x2e8] sm:$0xff]  }
 0x5f0   :  { %v8835_v27 = vsel %vm8827_vm8, %v8823_v31, %v8831_v42  ;;  %v16507_v31 = vld [vmem:[#allocation7 + $0x2e0] sm:$0xff]   ;;  %v16510_v42 = vld [vmem:[#allocation7 + $0x2a8] sm:$0xff]  }
 0x5f1   :  { %9132 = vmatprep.mubr.bf16.mxu0 %v17178_v49  ;;  %v8839_v8 = vsel %vm8618_vm0, %v8715_v51, %v8835_v27 }
 0x5f2   :  { %9133 = vmatmul.mubr.bf16.vlgmr.msra.gmra.mrb[4].mxu0 %v17180_v45  ;;  %v17186_v52 = vpack.c.bf16 %v8839_v8, %v8839_v8 }
 0x5f3   :  { %14107 = vmatpush3.bf16.msra.mxu0 %v16469_v34  ;;  %9469 = vmatprep.mubr.bf16.mxu0 %v17178_v49  ;;  %v16511_v34 = vld [vmem:[#allocation7 + $0x2f0] sm:$0xff]  }
 0x5f4   :  { %14108 = vmatprep.subr.bf16.mxu0 %v16471_v48  ;;  %9172 = vmatprep.mubr.bf16.mxu1 %v17186_v52 }
 0x5f5   :  { %9173 = vmatmul.mubr.bf16.vlgmr.msra.gmra.mrb[4].mxu1 %v17189_v19 }
 0x5f6   :  { %14129 = vmatpush3.bf16.msra.mxu1 %v16470_v53  ;;  %9509 = vmatprep.mubr.bf16.mxu1 %v17186_v52 }
 0x5f7   :  { %14130 = vmatprep.subr.bf16.mxu1 %v16472_v54  ;;  %14109 = vmatpush3.bf16.msra.mxu0 %v16473_v55  ;;  %v16514_v55 = vld [vmem:[#allocation7 + $0x2b8] sm:$0xff]  }
 0x5f8   :  { %14110 = vmatprep.subr.bf16.mxu0 %v16475_v57 }
 0x5fa   :  { %14131 = vmatpush3.bf16.msra.mxu1 %v16474_v58  ;;  %v16517_v58 = vld [vmem:[#allocation7 + $0x340] sm:$0xff]  }
 0x5fb   :  { %14132 = vmatprep.subr.bf16.mxu1 %v16476_v40  ;;  %14111 = vmatpush3.bf16.msra.mxu0 %v16477_v59 }
 0x5fc   :  { %14112 = vmatprep.subr.bf16.mxu0 %v16479_v60 }
 0x5fe   :  { %14133 = vmatpush3.bf16.msra.mxu1 %v16478_v61  ;;  %v16515_v61 = vld [vmem:[#allocation7 + $0x240] sm:$0xff]  }
 0x5ff   :  { %14134 = vmatprep.subr.bf16.mxu1 %v16480_v43  ;;  %14113 = vmatpush3.bf16.msra.mxu0 %v16481_v62  ;;  %v9517_v62 = vld [vmem:[#allocation8 + $0x8] sm:$0xff] }
 0x600   :  { %14114 = vmatprep.subr.bf16.mxu0 %v16483_v46  ;;  %v16516_v46 = vld [vmem:[#allocation7 + $0x200] sm:$0xff]  }
 0x602   :  { %14135 = vmatpush3.bf16.msra.mxu1 %v16482_v63  ;;  %v16519_v63 = vld [vmem:[#allocation7 + $0x248] sm:$0xff]  }
 0x603   :  { %14136 = vmatprep.subr.bf16.mxu1 %v16484_v0  ;;  %14115 = vmatpush3.bf16.msra.mxu0 %v16485_v33  ;;  %v16518_v0 = vld [vmem:[#allocation7 + $0x300] sm:$0xff]   ;;  %v16521_v33 = vld [vmem:[#allocation7 + $0x348] sm:$0xff]  }
 0x604   :  { %14116 = vmatprep.subr.bf16.mxu0 %v16487_v1  ;;  %v16520_v1 = vld [vmem:[#allocation7 + $0x208] sm:$0xff]  }
 0x606   :  { %14137 = vmatpush3.bf16.msra.mxu1 %v16486_v2  ;;  %v16523_v2 = vld [vmem:[#allocation7 + $0x250] sm:$0xff]  }
 0x607   :  { %14138 = vmatprep.subr.bf16.mxu1 %v16488_v3  ;;  %14117 = vmatpush3.bf16.msra.mxu0 %v16489_v4  ;;  %v16522_v3 = vld [vmem:[#allocation7 + $0x308] sm:$0xff]   ;;  %v16525_v4 = vld [vmem:[#allocation7 + $0x350] sm:$0xff]  }
 0x608   :  { %14118 = vmatprep.subr.bf16.mxu0 %v16491_v5  ;;  %v16524_v5 = vld [vmem:[#allocation7 + $0x210] sm:$0xff]  }
 0x60a   :  { %14139 = vmatpush3.bf16.msra.mxu1 %v16490_v6  ;;  %v16527_v6 = vld [vmem:[#allocation7 + $0x258] sm:$0xff]  }
 0x60b   :  { %14140 = vmatprep.subr.bf16.mxu1 %v16492_v7  ;;  %14119 = vmatpush3.bf16.msra.mxu0 %v16493_v9  ;;  %v16526_v7 = vld [vmem:[#allocation7 + $0x310] sm:$0xff]   ;;  %v16529_v9 = vld [vmem:[#allocation7 + $0x358] sm:$0xff]  }
 0x60c   :  { %14120 = vmatprep.subr.bf16.mxu0 %v16495_v10  ;;  %v16528_v10 = vld [vmem:[#allocation7 + $0x218] sm:$0xff]  }
 0x60e   :  { %14141 = vmatpush3.bf16.msra.mxu1 %v16494_v12  ;;  %v16531_v12 = vld [vmem:[#allocation7 + $0x260] sm:$0xff]  }
 0x60f   :  { %14142 = vmatprep.subr.bf16.mxu1 %v16496_v13  ;;  %14121 = vmatpush3.bf16.msra.mxu0 %v16497_v15  ;;  %v16530_v13 = vld [vmem:[#allocation7 + $0x318] sm:$0xff]   ;;  %v16533_v15 = vld [vmem:[#allocation7 + $0x360] sm:$0xff]  }
 0x610   :  { %14476 = vmatprep.subr.mxu0 %v16894_v18 }
 0x612   :  { %14143 = vmatpush3.bf16.msra.mxu1 %v16498_v16  ;;  %9470 = vmatmul.mubr.bf16.vlgmr.msra.gmra.mrb[8].mxu0 %v17180_v45  ;;  %v16532_v16 = vld [vmem:[#allocation7 + $0x220] sm:$0xff]  }
 0x613   :  { %14481 = vmatprep.subr.mxu1 %v16894_v18  ;;  %14478 = vmatprep.mubr.msk.f32.mxu0 %vm16895_vm9, %v16894_v18 }
 0x615   :  { %9510 = vmatmul.mubr.bf16.vlgmr.msra.gmra.mrb[8].mxu1 %v17189_v19 }
 0x616   :  { %14483 = vmatprep.mubr.msk.f32.mxu1 %vm16895_vm9, %v16894_v18 }
 0x6c5   :  { %v14078_v20 = vpop.f32.mrb[4].mxu0 }
 0x6c6   :  { %v14079_v11 = vpop.f32.mrb[5].mxu0 }
 0x6c7   :  { %v14080_v21 = vadd.f32 %v14079_v11, %v14078_v20  ;;  %v14081_v14 = vpop.f32.mrb[6].mxu0  ;;  %v16535_v20 = vld [vmem:[#allocation7 + $0x268] sm:$0xff]   ;;  %v16534_v11 = vld [vmem:[#allocation7 + $0x320] sm:$0xff]  }
 0x6c8   :  { %v14082_v23 = vpop.f32.mrb[7].mxu0  ;;  %v14100_v24 = vpop.f32.mrb[4].mxu1  ;;  %v16536_v14 = vld [vmem:[#allocation7 + $0x228] sm:$0xff]  }
 0x6c9   :  { %v14101_v17 = vpop.f32.mrb[5].mxu1  ;;  %v16539_v23 = vld [vmem:[#allocation7 + $0x270] sm:$0xff]  }
 0x6ca   :  { %v14102_v26 = vadd.f32 %v14101_v17, %v14100_v24  ;;  %v14103_v25 = vpop.f32.mrb[6].mxu1  ;;  %v16538_v24 = vld [vmem:[#allocation7 + $0x328] sm:$0xff]   ;;  %v16541_v17 = vld [vmem:[#allocation7 + $0x370] sm:$0xff]  }
 0x6cb   :  { %v14104_v35 = vpop.f32.mrb[7].mxu1  ;;  %v16543_v25 = vld [vmem:[#allocation7 + $0x278] sm:$0xff]  }
 0x6cc   :  { %v9175_v29 = vadd.f32 %v14102_v26, %v14080_v21  ;;  %v16537_v21 = vld [vmem:[#allocation7 + $0x368] sm:$0xff]   ;;  %v16540_v26 = vld [vmem:[#allocation7 + $0x230] sm:$0xff]  }
 0x6cd   :  { %v16542_v35 = vld [vmem:[#allocation7 + $0x330] sm:$0xff]  }
 0x6ce   :  { %14482 = vmatpush3.msra.mxu1 %v9175_v29  ;;  %v16544_v29 = vld [vmem:[#allocation7 + $0x238] sm:$0xff]  }
 0x6cf   :  { %14484 = vmatmul.mubr.msk.f32.vlgmr.msra.gmra.mrb[12].mxu1 %vm9518_vm10, %v9180_v39  ;;  %14176 = vmatprep.subr.bf16.mxu1 %v16499_v44  ;;  %v16545_v44 = vld [vmem:[#allocation7 + $0x378] sm:$0xff]  }
 0x6d0   :  { %14177 = vmatpush3.bf16.msra.mxu1 %v16500_v30  ;;  %9993 = vmatprep.mubr.bf16.mxu1 %v17186_v52  ;;  %v16546_v39 = vld [vmem:[#allocation7 + $0x338] sm:$0xff]  }
 0x6d1   :  { %14178 = vmatprep.subr.bf16.mxu1 %v16501_v22 }
 0x6d4   :  { %14179 = vmatpush3.bf16.msra.mxu1 %v16502_v37 }
 0x6d5   :  { %14180 = vmatprep.subr.bf16.mxu1 %v16503_v32 }
 0x6d8   :  { %14181 = vmatpush3.bf16.msra.mxu1 %v16504_v36 }
 0x6d9   :  { %14182 = vmatprep.subr.bf16.mxu1 %v16505_v28 }
 0x6dc   :  { %14183 = vmatpush3.bf16.msra.mxu1 %v16506_v38 }
 0x6dd   :  { %14184 = vmatprep.subr.bf16.mxu1 %v16507_v31 }
 0x6e0   :  { %14185 = vmatpush3.bf16.msra.mxu1 %v16508_v41 }
 0x6e1   :  { %14186 = vmatprep.subr.bf16.mxu1 %v16509_v56 }
 0x6e4   :  { %14187 = vmatpush3.bf16.msra.mxu1 %v16510_v42 }
 0x6e5   :  { %v14122_v48 = vpop.f32.mrb[8].mxu0  ;;  %14188 = vmatprep.subr.bf16.mxu1 %v16511_v34 }
 0x6e6   :  { %v14123_v51 = vpop.f32.mrb[9].mxu0 }
 0x6e7   :  { %v14124_v27 = vadd.f32 %v14123_v51, %v14122_v48  ;;  %v14125_v8 = vpop.f32.mrb[10].mxu0 }
 0x6e8   :  { %v14144_v53 = vpop.f32.mrb[8].mxu1  ;;  %14189 = vmatpush3.bf16.msra.mxu1 %v16512_v47  ;;  %v14126_v54 = vpop.f32.mrb[11].mxu0  ;;  %v16547_v8 = vld [vmem:[#allocation7 + $0x3c0] sm:$0xff]  }
 0x6e9   :  { %v14145_v57 = vpop.f32.mrb[9].mxu1  ;;  %14190 = vmatprep.subr.bf16.mxu1 %v16513_v50 }
 0x6ea   :  { %v14146_v40 = vadd.f32 %v14145_v57, %v14144_v53  ;;  %v14147_v59 = vpop.f32.mrb[10].mxu1  ;;  %v10001_v57 = vld [vmem:[#allocation8 + $0x10] sm:$0xff] }
 0x6eb   :  { %v14148_v60 = vpop.f32.mrb[11].mxu1  ;;  %v16549_v59 = vld [vmem:[#allocation7 + $0x3c8] sm:$0xff]  }
 0x6ec   :  { %v9512_v43 = vadd.f32 %v14146_v40, %v14124_v27  ;;  %14191 = vmatpush3.bf16.msra.mxu1 %v16514_v55  ;;  %v16550_v60 = vld [vmem:[#allocation7 + $0x388] sm:$0xff]  }
 0x6ed   :  { %14200 = vmatprep.subr.bf16.mxu1 %v16517_v58  ;;  %v16548_v58 = vld [vmem:[#allocation7 + $0x380] sm:$0xff]  }
 0x6ee   :  { %14477 = vmatpush3.msra.mxu0 %v9512_v43  ;;  %v16552_v43 = vld [vmem:[#allocation7 + $0x390] sm:$0xff]  }
 0x6ef   :  { %14479 = vmatmul.mubr.msk.f32.vlgmr.msra.gmra.mrb[12].mxu0 %vm9518_vm10, %v9517_v62  ;;  %14154 = vmatprep.subr.bf16.mxu0 %v16515_v61  ;;  %v16551_v61 = vld [vmem:[#allocation7 + $0x3d0] sm:$0xff]   ;;  %v16553_v62 = vld [vmem:[#allocation7 + $0x3d8] sm:$0xff]  }
 0x6f0   :  { %14155 = vmatpush3.bf16.msra.mxu0 %v16516_v46  ;;  %9953 = vmatprep.mubr.bf16.mxu0 %v17178_v49  ;;  %v16554_v46 = vld [vmem:[#allocation7 + $0x398] sm:$0xff]  }
 0x6f1   :  { %9994 = vmatmul.mubr.bf16.vlgmr.msra.gmra.mrb[16].mxu1 %v17189_v19  ;;  %14156 = vmatprep.subr.bf16.mxu0 %v16519_v63  ;;  %v16555_v63 = vld [vmem:[#allocation7 + $0x3e0] sm:$0xff]  }
 0x6f2   :  { %14201 = vmatpush3.bf16.msra.mxu1 %v16518_v0  ;;  %10364 = vmatprep.mubr.bf16.mxu1 %v17178_v49  ;;  %v16556_v0 = vld [vmem:[#allocation7 + $0x3a0] sm:$0xff]  }
 0x6f3   :  { %14202 = vmatprep.subr.bf16.mxu1 %v16521_v33  ;;  %v16557_v33 = vld [vmem:[#allocation7 + $0x3e8] sm:$0xff]  }
 0x6f4   :  { %14157 = vmatpush3.bf16.msra.mxu0 %v16520_v1  ;;  %v16558_v1 = vld [vmem:[#allocation7 + $0x3a8] sm:$0xff]  }
 0x6f5   :  { %14158 = vmatprep.subr.bf16.mxu0 %v16523_v2  ;;  %v16559_v2 = vld [vmem:[#allocation7 + $0x3f0] sm:$0xff]  }
 0x6f6   :  { %14203 = vmatpush3.bf16.msra.mxu1 %v16522_v3  ;;  %v16560_v3 = vld [vmem:[#allocation7 + $0x3b0] sm:$0xff]  }
 0x6f7   :  { %14204 = vmatprep.subr.bf16.mxu1 %v16525_v4  ;;  %v16561_v4 = vld [vmem:[#allocation7 + $0x3f8] sm:$0xff]  }
 0x6f8   :  { %14159 = vmatpush3.bf16.msra.mxu0 %v16524_v5  ;;  %v16562_v5 = vld [vmem:[#allocation7 + $0x3b8] sm:$0xff]  }
 0x6f9   :  { %14160 = vmatprep.subr.bf16.mxu0 %v16527_v6  ;;  %v16563_v6 = vld [vmem:[#allocation7 + $0x440] sm:$0xff]  }
 0x6fa   :  { %14205 = vmatpush3.bf16.msra.mxu1 %v16526_v7  ;;  %v16564_v7 = vld [vmem:[#allocation7 + $0x400] sm:$0xff]  }
 0x6fb   :  { %14206 = vmatprep.subr.bf16.mxu1 %v16529_v9  ;;  %v16565_v9 = vld [vmem:[#allocation7 + $0x448] sm:$0xff]  }
 0x6fc   :  { %14161 = vmatpush3.bf16.msra.mxu0 %v16528_v10  ;;  %v16566_v10 = vld [vmem:[#allocation7 + $0x408] sm:$0xff]  }
 0x6fd   :  { %14162 = vmatprep.subr.bf16.mxu0 %v16531_v12  ;;  %v16567_v12 = vld [vmem:[#allocation7 + $0x450] sm:$0xff]  }
 0x6fe   :  { %14207 = vmatpush3.bf16.msra.mxu1 %v16530_v13  ;;  %v16568_v13 = vld [vmem:[#allocation7 + $0x410] sm:$0xff]  }
 0x6ff   :  { %14208 = vmatprep.subr.bf16.mxu1 %v16533_v15  ;;  %v16569_v15 = vld [vmem:[#allocation7 + $0x458] sm:$0xff]  }
 0x700   :  { %14163 = vmatpush3.bf16.msra.mxu0 %v16532_v16  ;;  %v16570_v16 = vld [vmem:[#allocation7 + $0x418] sm:$0xff]  }
 0x701   :  { %14164 = vmatprep.subr.bf16.mxu0 %v16535_v20  ;;  %v16571_v20 = vld [vmem:[#allocation7 + $0x460] sm:$0xff]  }
 0x702   :  { %14209 = vmatpush3.bf16.msra.mxu1 %v16534_v11  ;;  %v16572_v11 = vld [vmem:[#allocation7 + $0x420] sm:$0xff]  }
 0x703   :  { %14210 = vmatprep.subr.bf16.mxu1 %v16537_v21  ;;  %v16573_v21 = vld [vmem:[#allocation7 + $0x468] sm:$0xff]  }
 0x704   :  { %14165 = vmatpush3.bf16.msra.mxu0 %v16536_v14  ;;  %v16574_v14 = vld [vmem:[#allocation7 + $0x428] sm:$0xff]  }
 0x705   :  { %14166 = vmatprep.subr.bf16.mxu0 %v16539_v23  ;;  %v16575_v23 = vld [vmem:[#allocation7 + $0x470] sm:$0xff]  }
 0x706   :  { %14211 = vmatpush3.bf16.msra.mxu1 %v16538_v24  ;;  %v16576_v24 = vld [vmem:[#allocation7 + $0x430] sm:$0xff]  }
 0x707   :  { %14212 = vmatprep.subr.bf16.mxu1 %v16541_v17  ;;  %v16577_v17 = vld [vmem:[#allocation7 + $0x478] sm:$0xff]  }
 0x708   :  { %14167 = vmatpush3.bf16.msra.mxu0 %v16540_v26  ;;  %v16578_v26 = vld [vmem:[#allocation7 + $0x438] sm:$0xff]  }
 0x709   :  { %14168 = vmatprep.subr.bf16.mxu0 %v16543_v25 }
 0x70a   :  { %14213 = vmatpush3.bf16.msra.mxu1 %v16542_v35 }
 0x70b   :  { %14214 = vmatprep.subr.bf16.mxu1 %v16545_v44 }
 0x70c   :  { %14169 = vmatpush3.bf16.msra.mxu0 %v16544_v29 }
 0x70d   :  { %14486 = vmatprep.subr.mxu0 %v16894_v18 }
 0x70e   :  { %14215 = vmatpush3.bf16.msra.mxu1 %v16546_v39 }
 0x70f   :  { %9954 = vmatmul.mubr.bf16.vlgmr.msra.gmra.mrb[16].mxu0 %v17180_v45  ;;  %14491 = vmatprep.subr.mxu1 %v16894_v18 }
 0x710   :  { %14488 = vmatprep.mubr.msk.f32.mxu0 %vm16895_vm9, %v16894_v18 }
 0x711   :  { %10365 = vmatmul.mubr.bf16.vlgmr.msra.gmra.mrb[20].mxu1 %v17180_v45 }
 0x712   :  { %14493 = vmatprep.mubr.msk.f32.mxu1 %vm16895_vm9, %v16894_v18 }
 0x7a2   :  { %v9661_v30 = vpop.f32.mrb[12].mxu1 }
 0x7a3   :  { %v14485_v22 = vpop.f32.mrb[13].mxu1 }
 0x7c2   :  { %v9588_v37 = vpop.f32.mrb[12].mxu0 }
 0x7c3   :  { %v17216_v32 = vadd.f32 %v9661_v30, %v9588_v37  ;;  %v14480_v36 = vpop.f32.mrb[13].mxu0 }
 0x7c4   :  { %v14192_v28 = vpop.f32.mrb[16].mxu1  ;;  %v16579_v36 = vld [vmem:[#allocation7 + $0x4c0] sm:$0xff]  }
 0x7c5   :  { %v14193_v38 = vpop.f32.mrb[17].mxu1 }
 0x7c6   :  { %v14194_v31 = vadd.f32 %v14193_v38, %v14192_v28  ;;  %v14195_v41 = vpop.f32.mrb[18].mxu1  ;;  %v10412_v38 = vld [vmem:[#allocation8 + $0x18] sm:$0xff] }
 0x7c7   :  { %v14196_v56 = vpop.f32.mrb[19].mxu1  ;;  %v16581_v41 = vld [vmem:[#allocation7 + $0x4c8] sm:$0xff]  }
 0x7c8   :  { %v16583_v56 = vld [vmem:[#allocation7 + $0x4d0] sm:$0xff]  }
 0x7e2   :  { %v14170_v42 = vpop.f32.mrb[16].mxu0 }
 0x7e3   :  { %v14171_v34 = vpop.f32.mrb[17].mxu0 }
 0x7e4   :  { %v14172_v47 = vadd.f32 %v14171_v34, %v14170_v42  ;;  %v14216_v48 = vpop.f32.mrb[20].mxu1  ;;  %v14173_v50 = vpop.f32.mrb[18].mxu0  ;;  %v16584_v42 = vld [vmem:[#allocation7 + $0x490] sm:$0xff]   ;;  %v16585_v34 = vld [vmem:[#allocation7 + $0x4d8] sm:$0xff]  }
 0x7e5   :  { %v14217_v51 = vpop.f32.mrb[21].mxu1  ;;  %v14174_v27 = vpop.f32.mrb[19].mxu0  ;;  %v16588_v50 = vld [vmem:[#allocation7 + $0x4a0] sm:$0xff]  }
 0x7e6   :  { %v9996_v53 = vadd.f32 %v14194_v31, %v14172_v47  ;;  %v17218_v54 = vadd.f32 %v14217_v51, %v14216_v48  ;;  %v14219_v55 = vpop.f32.mrb[22].mxu1  ;;  %v16580_v31 = vld [vmem:[#allocation7 + $0x480] sm:$0xff]   ;;  %v16586_v47 = vld [vmem:[#allocation7 + $0x498] sm:$0xff]   ;;  %v16589_v51 = vld [vmem:[#allocation7 + $0x4e8] sm:$0xff]  }
 0x7e7   :  { %v14220_v40 = vpop.f32.mrb[23].mxu1  ;;  %v16587_v48 = vld [vmem:[#allocation7 + $0x4e0] sm:$0xff]   ;;  %v16590_v27 = vld [vmem:[#allocation7 + $0x4a8] sm:$0xff]  }
 0x7e8   :  { %14487 = vmatpush3.msra.mxu0 %v9996_v53  ;;  %v16592_v53 = vld [vmem:[#allocation7 + $0x4b0] sm:$0xff]   ;;  %v16595_v40 = vld [vmem:[#allocation7 + $0x540] sm:$0xff]  }
 0x7e9   :  { %14489 = vmatmul.mubr.msk.f32.vlgmr.msra.gmra.mrb[14].mxu0 %vm9518_vm10, %v10001_v57  ;;  %14222 = vmatprep.subr.bf16.mxu0 %v16547_v8  ;;  %v16591_v8 = vld [vmem:[#allocation7 + $0x4f0] sm:$0xff]   ;;  %v16594_v57 = vld [vmem:[#allocation7 + $0x4b8] sm:$0xff]  }
 0x7ea   :  { %14223 = vmatpush3.bf16.msra.mxu0 %v16548_v58  ;;  %10404 = vmatprep.mubr.bf16.mxu0 %v17186_v52 }
 0x7eb   :  { %14224 = vmatprep.subr.bf16.mxu0 %v16549_v59 }
 0x7ee   :  { %14225 = vmatpush3.bf16.msra.mxu0 %v16550_v60 }
 0x7ef   :  { %14226 = vmatprep.subr.bf16.mxu0 %v16551_v61 }
 0x7f2   :  { %14227 = vmatpush3.bf16.msra.mxu0 %v16552_v43  ;;  %v16596_v43 = vld [vmem:[#allocation7 + $0x500] sm:$0xff]  }
 0x7f3   :  { %14228 = vmatprep.subr.bf16.mxu0 %v16553_v62  ;;  %v16597_v62 = vld [vmem:[#allocation7 + $0x548] sm:$0xff]  }
 0x7f6   :  { %14229 = vmatpush3.bf16.msra.mxu0 %v16554_v46  ;;  %v16598_v46 = vld [vmem:[#allocation7 + $0x508] sm:$0xff]  }
 0x7f7   :  { %14230 = vmatprep.subr.bf16.mxu0 %v16555_v63  ;;  %v16599_v63 = vld [vmem:[#allocation7 + $0x550] sm:$0xff]  }
 0x7fa   :  { %14231 = vmatpush3.bf16.msra.mxu0 %v16556_v0  ;;  %v16600_v0 = vld [vmem:[#allocation7 + $0x510] sm:$0xff]  }
 0x7fb   :  { %14232 = vmatprep.subr.bf16.mxu0 %v16557_v33  ;;  %v16601_v33 = vld [vmem:[#allocation7 + $0x558] sm:$0xff]  }
 0x7fe   :  { %14233 = vmatpush3.bf16.msra.mxu0 %v16558_v1  ;;  %v16602_v1 = vld [vmem:[#allocation7 + $0x518] sm:$0xff]  }
 0x7ff   :  { %14234 = vmatprep.subr.bf16.mxu0 %v16559_v2  ;;  %v16603_v2 = vld [vmem:[#allocation7 + $0x560] sm:$0xff]  }
 0x802   :  { %14235 = vmatpush3.bf16.msra.mxu0 %v16560_v3  ;;  %v16604_v3 = vld [vmem:[#allocation7 + $0x520] sm:$0xff]  }
 0x803   :  { %14236 = vmatprep.subr.bf16.mxu0 %v16561_v4  ;;  %v16605_v4 = vld [vmem:[#allocation7 + $0x568] sm:$0xff]  }
 0x806   :  { %14237 = vmatpush3.bf16.msra.mxu0 %v16562_v5  ;;  %v16606_v5 = vld [vmem:[#allocation7 + $0x528] sm:$0xff]  }
 0x807   :  { %14246 = vmatprep.subr.bf16.mxu0 %v16563_v6  ;;  %v16607_v6 = vld [vmem:[#allocation7 + $0x570] sm:$0xff]  }
 0x809   :  { %10405 = vmatmul.mubr.bf16.vlgmr.msra.gmra.mrb[20].mxu0 %v17189_v19 }
 0x80a   :  { %14247 = vmatpush3.bf16.msra.mxu0 %v16564_v7  ;;  %10775 = vmatprep.mubr.bf16.mxu0 %v17178_v49  ;;  %v16608_v7 = vld [vmem:[#allocation7 + $0x530] sm:$0xff]  }
 0x80b   :  { %14248 = vmatprep.subr.bf16.mxu0 %v16565_v9  ;;  %v16609_v9 = vld [vmem:[#allocation7 + $0x578] sm:$0xff]  }
 0x80e   :  { %14249 = vmatpush3.bf16.msra.mxu0 %v16566_v10  ;;  %v16610_v10 = vld [vmem:[#allocation7 + $0x538] sm:$0xff]  }
 0x80f   :  { %14250 = vmatprep.subr.bf16.mxu0 %v16567_v12 }
 0x812   :  { %14251 = vmatpush3.bf16.msra.mxu0 %v16568_v13 }
 0x813   :  { %14252 = vmatprep.subr.bf16.mxu0 %v16569_v15 }
 0x816   :  { %14253 = vmatpush3.bf16.msra.mxu0 %v16570_v16 }
 0x817   :  { %14254 = vmatprep.subr.bf16.mxu0 %v16571_v20 }
 0x81a   :  { %14255 = vmatpush3.bf16.msra.mxu0 %v16572_v11 }
 0x81b   :  { %14256 = vmatprep.subr.bf16.mxu0 %v16573_v21 }
 0x81e   :  { %14257 = vmatpush3.bf16.msra.mxu0 %v16574_v14 }
 0x81f   :  { %14258 = vmatprep.subr.bf16.mxu0 %v16575_v23  ;;  %v16611_v23 = vld [vmem:[#allocation7 + $0x5c0] sm:$0xff]  }
 0x822   :  { %14259 = vmatpush3.bf16.msra.mxu0 %v16576_v24 }
 0x823   :  { %14260 = vmatprep.subr.bf16.mxu0 %v16577_v17  ;;  %v10823_v17 = vld [vmem:[#allocation8 + $0x20] sm:$0xff] }
 0x826   :  { %14261 = vmatpush3.bf16.msra.mxu0 %v16578_v26  ;;  %v16612_v26 = vld [vmem:[#allocation7 + $0x580] sm:$0xff]  }
 0x827   :  { %14496 = vmatprep.subr.mxu0 %v16894_v18 }
 0x829   :  { %10776 = vmatmul.mubr.bf16.vlgmr.msra.gmra.mrb[24].mxu0 %v17180_v45 }
 0x82a   :  { %14498 = vmatprep.mubr.msk.f32.mxu0 %vm16895_vm9, %v16894_v18 }
 0x8bc   :  { %v10071_v25 = vpop.f32.mrb[14].mxu0 }
 0x8bd   :  { %v17229_v35 = vadd.f32 %v10071_v25, %v17216_v32  ;;  %v14490_v44 = vpop.f32.mrb[15].mxu0  ;;  %v16582_v32 = vld [vmem:[#allocation7 + $0x488] sm:$0xff]  }
 0x8be   :  { %v16613_v25 = vld [vmem:[#allocation7 + $0x5c8] sm:$0xff]   ;;  %v16615_v44 = vld [vmem:[#allocation7 + $0x5d0] sm:$0xff]  }
 0x8dc   :  { %v14238_v29 = vpop.f32.mrb[20].mxu0 }
 0x8dd   :  { %v14239_v39 = vpop.f32.mrb[21].mxu0 }
 0x8de   :  { %v14240_v30 = vadd.f32 %v14239_v39, %v14238_v29  ;;  %v14241_v22 = vpop.f32.mrb[22].mxu0  ;;  %v16616_v29 = vld [vmem:[#allocation7 + $0x590] sm:$0xff]   ;;  %v16617_v39 = vld [vmem:[#allocation7 + $0x5d8] sm:$0xff]  }
 0x8df   :  { %v14242_v37 = vpop.f32.mrb[23].mxu0  ;;  %v16619_v22 = vld [vmem:[#allocation7 + $0x5e0] sm:$0xff]  }
 0x8e0   :  { %v10407_v28 = vadd.f32 %v14240_v30, %v17218_v54  ;;  %v16593_v54 = vld [vmem:[#allocation7 + $0x4f8] sm:$0xff]   ;;  %v16620_v37 = vld [vmem:[#allocation7 + $0x5a0] sm:$0xff]  }
 0x8e1   :  { %v16618_v30 = vld [vmem:[#allocation7 + $0x598] sm:$0xff]  }
 0x8e2   :  { %14492 = vmatpush3.msra.mxu1 %v10407_v28  ;;  %v16622_v28 = vld [vmem:[#allocation7 + $0x5a8] sm:$0xff]  }
 0x8e3   :  { %14494 = vmatmul.mubr.msk.f32.vlgmr.msra.gmra.mrb[14].mxu1 %vm9518_vm10, %v10412_v38  ;;  %14268 = vmatprep.subr.bf16.mxu1 %v16579_v36  ;;  %v16621_v36 = vld [vmem:[#allocation7 + $0x5e8] sm:$0xff]   ;;  %v16623_v38 = vld [vmem:[#allocation7 + $0x5f0] sm:$0xff]  }
 0x8e4   :  { %14269 = vmatpush3.bf16.msra.mxu1 %v16580_v31  ;;  %10815 = vmatprep.mubr.bf16.mxu1 %v17186_v52  ;;  %v16624_v31 = vld [vmem:[#allocation7 + $0x5b0] sm:$0xff]  }
 0x8e5   :  { %14270 = vmatprep.subr.bf16.mxu1 %v16581_v41  ;;  %v16625_v41 = vld [vmem:[#allocation7 + $0x5f8] sm:$0xff]  }
 0x8e8   :  { %14271 = vmatpush3.bf16.msra.mxu1 %v16582_v32 }
 0x8e9   :  { %14272 = vmatprep.subr.bf16.mxu1 %v16583_v56  ;;  %v16626_v56 = vld [vmem:[#allocation7 + $0x5b8] sm:$0xff]  }
 0x8ec   :  { %14273 = vmatpush3.bf16.msra.mxu1 %v16584_v42 }
 0x8ed   :  { %14274 = vmatprep.subr.bf16.mxu1 %v16585_v34  ;;  %v16627_v34 = vld [vmem:[#allocation7 + $0x640] sm:$0xff]  }
 0x8f0   :  { %14275 = vmatpush3.bf16.msra.mxu1 %v16586_v47 }
 0x8f1   :  { %14276 = vmatprep.subr.bf16.mxu1 %v16587_v48 }
 0x8f4   :  { %14277 = vmatpush3.bf16.msra.mxu1 %v16588_v50 }
 0x8f5   :  { %14278 = vmatprep.subr.bf16.mxu1 %v16589_v51  ;;  %v16628_v51 = vld [vmem:[#allocation7 + $0x600] sm:$0xff]  }
 0x8f8   :  { %14279 = vmatpush3.bf16.msra.mxu1 %v16590_v27  ;;  %v16629_v27 = vld [vmem:[#allocation7 + $0x648] sm:$0xff]  }
 0x8f9   :  { %14280 = vmatprep.subr.bf16.mxu1 %v16591_v8  ;;  %v16630_v8 = vld [vmem:[#allocation7 + $0x608] sm:$0xff]  }
 0x8fc   :  { %v14262_v55 = vpop.f32.mrb[24].mxu0  ;;  %14281 = vmatpush3.bf16.msra.mxu1 %v16592_v53  ;;  %v16631_v53 = vld [vmem:[#allocation7 + $0x650] sm:$0xff]  }
 0x8fd   :  { %v14263_v58 = vpop.f32.mrb[25].mxu0  ;;  %14282 = vmatprep.subr.bf16.mxu1 %v16593_v54  ;;  %v16632_v54 = vld [vmem:[#allocation7 + $0x610] sm:$0xff]  }
 0x8fe   :  { %v14264_v59 = vadd.f32 %v14263_v58, %v14262_v55  ;;  %v14265_v60 = vpop.f32.mrb[26].mxu0  ;;  %v16633_v55 = vld [vmem:[#allocation7 + $0x658] sm:$0xff]   ;;  %v16635_v58 = vld [vmem:[#allocation7 + $0x660] sm:$0xff]  }
 0x8ff   :  { %v14266_v61 = vpop.f32.mrb[27].mxu0  ;;  %v16638_v60 = vld [vmem:[#allocation7 + $0x628] sm:$0xff]  }
 0x900   :  { %14283 = vmatpush3.bf16.msra.mxu1 %v16594_v57  ;;  %v16634_v57 = vld [vmem:[#allocation7 + $0x618] sm:$0xff]   ;;  %v16639_v61 = vld [vmem:[#allocation7 + $0x670] sm:$0xff]  }
 0x901   :  { %14292 = vmatprep.subr.bf16.mxu1 %v16595_v40  ;;  %v16636_v40 = vld [vmem:[#allocation7 + $0x620] sm:$0xff]  }
 0x903   :  { %10816 = vmatmul.mubr.bf16.vlgmr.msra.gmra.mrb[24].mxu1 %v17189_v19 }
 0x904   :  { %14293 = vmatpush3.bf16.msra.mxu1 %v16596_v43  ;;  %11186 = vmatprep.mubr.bf16.mxu1 %v17178_v49  ;;  %v16640_v43 = vld [vmem:[#allocation7 + $0x630] sm:$0xff]  }
 0x905   :  { %14294 = vmatprep.subr.bf16.mxu1 %v16597_v62  ;;  %v16641_v62 = vld [vmem:[#allocation7 + $0x678] sm:$0xff]  }
 0x908   :  { %14295 = vmatpush3.bf16.msra.mxu1 %v16598_v46  ;;  %v16642_v46 = vld [vmem:[#allocation7 + $0x638] sm:$0xff]  }
 0x909   :  { %14296 = vmatprep.subr.bf16.mxu1 %v16599_v63 }
 0x90c   :  { %14297 = vmatpush3.bf16.msra.mxu1 %v16600_v0 }
 0x90d   :  { %14298 = vmatprep.subr.bf16.mxu1 %v16601_v33 }
 0x910   :  { %14299 = vmatpush3.bf16.msra.mxu1 %v16602_v1 }
 0x911   :  { %14300 = vmatprep.subr.bf16.mxu1 %v16603_v2 }
 0x914   :  { %14301 = vmatpush3.bf16.msra.mxu1 %v16604_v3 }
 0x915   :  { %14302 = vmatprep.subr.bf16.mxu1 %v16605_v4 }
 0x918   :  { %14303 = vmatpush3.bf16.msra.mxu1 %v16606_v5 }
 0x919   :  { %14304 = vmatprep.subr.bf16.mxu1 %v16607_v6  ;;  %v16643_v6 = vld [vmem:[#allocation7 + $0x6c0] sm:$0xff]  }
 0x91c   :  { %14305 = vmatpush3.bf16.msra.mxu1 %v16608_v7 }
 0x91d   :  { %14306 = vmatprep.subr.bf16.mxu1 %v16609_v9  ;;  %v11234_v9 = vld [vmem:[#allocation8 + $0x28] sm:$0xff] }
 0x920   :  { %14307 = vmatpush3.bf16.msra.mxu1 %v16610_v10  ;;  %v16644_v10 = vld [vmem:[#allocation7 + $0x680] sm:$0xff]  }
 0x921   :  { %14501 = vmatprep.subr.mxu1 %v16894_v18 }
 0x923   :  { %11187 = vmatmul.mubr.bf16.vlgmr.msra.gmra.mrb[28].mxu1 %v17180_v45 }
 0x924   :  { %14503 = vmatprep.mubr.msk.f32.mxu1 %vm16895_vm9, %v16894_v18 }
 0x9b6   :  { %v10482_v12 = vpop.f32.mrb[14].mxu1 }
 0x9b7   :  { %v17241_v13 = vadd.f32 %v10482_v12, %v17229_v35  ;;  %v14495_v15 = vpop.f32.mrb[15].mxu1  ;;  %v16614_v35 = vld [vmem:[#allocation7 + $0x588] sm:$0xff]  }
 0x9b8   :  { %v16645_v12 = vld [vmem:[#allocation7 + $0x6c8] sm:$0xff]   ;;  %v16647_v15 = vld [vmem:[#allocation7 + $0x6d0] sm:$0xff]  }
 0x9d6   :  { %v14284_v16 = vpop.f32.mrb[24].mxu1 }
 0x9d7   :  { %v14285_v20 = vpop.f32.mrb[25].mxu1 }
 0x9d8   :  { %v14286_v11 = vadd.f32 %v14285_v20, %v14284_v16  ;;  %v14287_v21 = vpop.f32.mrb[26].mxu1  ;;  %v16648_v16 = vld [vmem:[#allocation7 + $0x690] sm:$0xff]   ;;  %v16649_v20 = vld [vmem:[#allocation7 + $0x6d8] sm:$0xff]  }
 0x9d9   :  { %v14288_v14 = vpop.f32.mrb[27].mxu1  ;;  %v16651_v21 = vld [vmem:[#allocation7 + $0x6e0] sm:$0xff]  }
 0x9da   :  { %v10818_v24 = vadd.f32 %v14286_v11, %v14264_v59  ;;  %v16637_v59 = vld [vmem:[#allocation7 + $0x668] sm:$0xff]   ;;  %v16650_v11 = vld [vmem:[#allocation7 + $0x698] sm:$0xff]   ;;  %v16652_v14 = vld [vmem:[#allocation7 + $0x6a0] sm:$0xff]  }
 0x9dc   :  { %14497 = vmatpush3.msra.mxu0 %v10818_v24  ;;  %v16654_v24 = vld [vmem:[#allocation7 + $0x6a8] sm:$0xff]  }
 0x9dd   :  { %14499 = vmatmul.mubr.msk.f32.vlgmr.msra.gmra.mrb[28].mxu0 %vm9518_vm10, %v10823_v17  ;;  %14314 = vmatprep.subr.bf16.mxu0 %v16611_v23  ;;  %v16653_v23 = vld [vmem:[#allocation7 + $0x6e8] sm:$0xff]   ;;  %v16655_v17 = vld [vmem:[#allocation7 + $0x6f0] sm:$0xff]  }
 0x9de   :  { %14315 = vmatpush3.bf16.msra.mxu0 %v16612_v26  ;;  %11226 = vmatprep.mubr.bf16.mxu0 %v17186_v52  ;;  %v16656_v26 = vld [vmem:[#allocation7 + $0x6b0] sm:$0xff]  }
 0x9df   :  { %14316 = vmatprep.subr.bf16.mxu0 %v16613_v25  ;;  %v16657_v25 = vld [vmem:[#allocation7 + $0x6f8] sm:$0xff]  }
 0x9e2   :  { %14317 = vmatpush3.bf16.msra.mxu0 %v16614_v35 }
 0x9e3   :  { %14318 = vmatprep.subr.bf16.mxu0 %v16615_v44  ;;  %v16658_v44 = vld [vmem:[#allocation7 + $0x6b8] sm:$0xff]  }
 0x9e6   :  { %14319 = vmatpush3.bf16.msra.mxu0 %v16616_v29 }
 0x9e7   :  { %14320 = vmatprep.subr.bf16.mxu0 %v16617_v39  ;;  %v16659_v39 = vld [vmem:[#allocation7 + $0x740] sm:$0xff]  }
 0x9ea   :  { %14321 = vmatpush3.bf16.msra.mxu0 %v16618_v30 }
 0x9eb   :  { %14322 = vmatprep.subr.bf16.mxu0 %v16619_v22 }
 0x9ee   :  { %14323 = vmatpush3.bf16.msra.mxu0 %v16620_v37 }
 0x9ef   :  { %14324 = vmatprep.subr.bf16.mxu0 %v16621_v36  ;;  %v16660_v36 = vld [vmem:[#allocation7 + $0x700] sm:$0xff]  }
 0x9f2   :  { %14325 = vmatpush3.bf16.msra.mxu0 %v16622_v28  ;;  %v16661_v28 = vld [vmem:[#allocation7 + $0x748] sm:$0xff]  }
 0x9f3   :  { %14326 = vmatprep.subr.bf16.mxu0 %v16623_v38  ;;  %v16662_v38 = vld [vmem:[#allocation7 + $0x708] sm:$0xff]  }
 0x9f6   :  { %v14308_v32 = vpop.f32.mrb[28].mxu1  ;;  %14327 = vmatpush3.bf16.msra.mxu0 %v16624_v31  ;;  %v16663_v31 = vld [vmem:[#allocation7 + $0x750] sm:$0xff]  }
 0x9f7   :  { %v14309_v42 = vpop.f32.mrb[29].mxu1  ;;  %14328 = vmatprep.subr.bf16.mxu0 %v16625_v41  ;;  %v16664_v41 = vld [vmem:[#allocation7 + $0x710] sm:$0xff]  }
 0x9f8   :  { %v14310_v47 = vadd.f32 %v14309_v42, %v14308_v32  ;;  %v14311_v48 = vpop.f32.mrb[30].mxu1  ;;  %v16665_v32 = vld [vmem:[#allocation7 + $0x758] sm:$0xff]   ;;  %v16667_v42 = vld [vmem:[#allocation7 + $0x760] sm:$0xff]  }
 0x9f9   :  { %v14312_v50 = vpop.f32.mrb[31].mxu1  ;;  %v16670_v48 = vld [vmem:[#allocation7 + $0x728] sm:$0xff]  }
 0x9fa   :  { %14329 = vmatpush3.bf16.msra.mxu0 %v16626_v56  ;;  %v16666_v56 = vld [vmem:[#allocation7 + $0x718] sm:$0xff]   ;;  %v16671_v50 = vld [vmem:[#allocation7 + $0x770] sm:$0xff]  }
 0x9fb   :  { %14338 = vmatprep.subr.bf16.mxu0 %v16627_v34  ;;  %v16668_v34 = vld [vmem:[#allocation7 + $0x720] sm:$0xff]  }
 0x9fd   :  { %11227 = vmatmul.mubr.bf16.vlgmr.msra.gmra.mrb[32].mxu0 %v17189_v19 }
 0x9fe   :  { %14339 = vmatpush3.bf16.msra.mxu0 %v16628_v51  ;;  %11597 = vmatprep.mubr.bf16.mxu0 %v17178_v49  ;;  %v16672_v51 = vld [vmem:[#allocation7 + $0x730] sm:$0xff]  }
 0x9ff   :  { %14340 = vmatprep.subr.bf16.mxu0 %v16629_v27  ;;  %v16673_v27 = vld [vmem:[#allocation7 + $0x778] sm:$0xff]  }
 0xa02   :  { %14341 = vmatpush3.bf16.msra.mxu0 %v16630_v8  ;;  %v16674_v8 = vld [vmem:[#allocation7 + $0x738] sm:$0xff]  }
 0xa03   :  { %14342 = vmatprep.subr.bf16.mxu0 %v16631_v53 }
 0xa06   :  { %14343 = vmatpush3.bf16.msra.mxu0 %v16632_v54 }
 0xa07   :  { %14344 = vmatprep.subr.bf16.mxu0 %v16633_v55 }
 0xa0a   :  { %14345 = vmatpush3.bf16.msra.mxu0 %v16634_v57 }
 0xa0b   :  { %14346 = vmatprep.subr.bf16.mxu0 %v16635_v58 }
 0xa0e   :  { %14347 = vmatpush3.bf16.msra.mxu0 %v16636_v40 }
 0xa0f   :  { %14348 = vmatprep.subr.bf16.mxu0 %v16637_v59 }
 0xa12   :  { %14349 = vmatpush3.bf16.msra.mxu0 %v16638_v60 }
 0xa13   :  { %14350 = vmatprep.subr.bf16.mxu0 %v16639_v61  ;;  %v16675_v61 = vld [vmem:[#allocation7 + $0x7c0] sm:$0xff]  }
 0xa16   :  { %14351 = vmatpush3.bf16.msra.mxu0 %v16640_v43 }
 0xa17   :  { %14352 = vmatprep.subr.bf16.mxu0 %v16641_v62  ;;  %v11645_v62 = vld [vmem:[#allocation8 + $0x30] sm:$0xff] }
 0xa1a   :  { %14353 = vmatpush3.bf16.msra.mxu0 %v16642_v46  ;;  %v16676_v46 = vld [vmem:[#allocation7 + $0x780] sm:$0xff]  }
 0xa1b   :  { %14506 = vmatprep.subr.mxu0 %v16894_v18 }
 0xa1d   :  { %11598 = vmatmul.mubr.bf16.vlgmr.msra.gmra.mrb[36].mxu0 %v17180_v45 }
 0xa1e   :  { %14508 = vmatprep.mubr.msk.f32.mxu0 %vm16895_vm9, %v16894_v18 }
 0xab0   :  { %v10893_v63 = vpop.f32.mrb[28].mxu0 }
 0xab1   :  { %v17252_v0 = vadd.f32 %v10893_v63, %v17241_v13  ;;  %v14500_v33 = vpop.f32.mrb[29].mxu0  ;;  %v16646_v13 = vld [vmem:[#allocation7 + $0x688] sm:$0xff]  }
 0xab2   :  { %v16677_v63 = vld [vmem:[#allocation7 + $0x7c8] sm:$0xff]   ;;  %v16679_v33 = vld [vmem:[#allocation7 + $0x7d0] sm:$0xff]  }
 0xad0   :  { %v14330_v1 = vpop.f32.mrb[32].mxu0 }
 0xad1   :  { %v14331_v2 = vpop.f32.mrb[33].mxu0 }
 0xad2   :  { %v14332_v3 = vadd.f32 %v14331_v2, %v14330_v1  ;;  %v14333_v4 = vpop.f32.mrb[34].mxu0  ;;  %v16680_v1 = vld [vmem:[#allocation7 + $0x790] sm:$0xff]   ;;  %v16681_v2 = vld [vmem:[#allocation7 + $0x7d8] sm:$0xff]  }
 0xad3   :  { %v14334_v5 = vpop.f32.mrb[35].mxu0  ;;  %v16683_v4 = vld [vmem:[#allocation7 + $0x7e0] sm:$0xff]  }
 0xad4   :  { %v11229_v7 = vadd.f32 %v14332_v3, %v14310_v47  ;;  %v16669_v47 = vld [vmem:[#allocation7 + $0x768] sm:$0xff]   ;;  %v16682_v3 = vld [vmem:[#allocation7 + $0x798] sm:$0xff]   ;;  %v16684_v5 = vld [vmem:[#allocation7 + $0x7a0] sm:$0xff]  }
 0xad6   :  { %14502 = vmatpush3.msra.mxu1 %v11229_v7  ;;  %v16686_v7 = vld [vmem:[#allocation7 + $0x7a8] sm:$0xff]  }
 0xad7   :  { %14504 = vmatmul.mubr.msk.f32.vlgmr.msra.gmra.mrb[32].mxu1 %vm9518_vm10, %v11234_v9  ;;  %14360 = vmatprep.subr.bf16.mxu1 %v16643_v6  ;;  %v16685_v6 = vld [vmem:[#allocation7 + $0x7e8] sm:$0xff]   ;;  %v16687_v9 = vld [vmem:[#allocation7 + $0x7f0] sm:$0xff]  }
 0xad8   :  { %14361 = vmatpush3.bf16.msra.mxu1 %v16644_v10  ;;  %11637 = vmatprep.mubr.bf16.mxu1 %v17186_v52  ;;  %v16688_v10 = vld [vmem:[#allocation7 + $0x7b0] sm:$0xff]  }
 0xad9   :  { %14362 = vmatprep.subr.bf16.mxu1 %v16645_v12  ;;  %v16689_v12 = vld [vmem:[#allocation7 + $0x7f8] sm:$0xff]  }
 0xadc   :  { %14363 = vmatpush3.bf16.msra.mxu1 %v16646_v13 }
 0xadd   :  { %14364 = vmatprep.subr.bf16.mxu1 %v16647_v15  ;;  %v16690_v15 = vld [vmem:[#allocation7 + $0x7b8] sm:$0xff]  }
 0xae0   :  { %14365 = vmatpush3.bf16.msra.mxu1 %v16648_v16 }
 0xae1   :  { %14366 = vmatprep.subr.bf16.mxu1 %v16649_v20  ;;  %v16691_v20 = vld [vmem:[#allocation7 + $0x840] sm:$0xff]  }
 0xae4   :  { %14367 = vmatpush3.bf16.msra.mxu1 %v16650_v11 }
 0xae5   :  { %14368 = vmatprep.subr.bf16.mxu1 %v16651_v21 }
 0xae8   :  { %14369 = vmatpush3.bf16.msra.mxu1 %v16652_v14 }
 0xae9   :  { %14370 = vmatprep.subr.bf16.mxu1 %v16653_v23  ;;  %v16692_v23 = vld [vmem:[#allocation7 + $0x800] sm:$0xff]  }
 0xaec   :  { %14371 = vmatpush3.bf16.msra.mxu1 %v16654_v24  ;;  %v16693_v24 = vld [vmem:[#allocation7 + $0x848] sm:$0xff]  }
 0xaed   :  { %14372 = vmatprep.subr.bf16.mxu1 %v16655_v17  ;;  %v16694_v17 = vld [vmem:[#allocation7 + $0x808] sm:$0xff]  }
 0xaf0   :  { %v14354_v35 = vpop.f32.mrb[36].mxu0  ;;  %14373 = vmatpush3.bf16.msra.mxu1 %v16656_v26  ;;  %v16695_v26 = vld [vmem:[#allocation7 + $0x850] sm:$0xff]  }
 0xaf1   :  { %v14355_v29 = vpop.f32.mrb[37].mxu0  ;;  %14374 = vmatprep.subr.bf16.mxu1 %v16657_v25  ;;  %v16696_v25 = vld [vmem:[#allocation7 + $0x810] sm:$0xff]  }
 0xaf2   :  { %v14356_v30 = vadd.f32 %v14355_v29, %v14354_v35  ;;  %v14357_v22 = vpop.f32.mrb[38].mxu0  ;;  %v16697_v35 = vld [vmem:[#allocation7 + $0x858] sm:$0xff]   ;;  %v16699_v29 = vld [vmem:[#allocation7 + $0x860] sm:$0xff]  }
 0xaf3   :  { %v14358_v37 = vpop.f32.mrb[39].mxu0  ;;  %v16702_v22 = vld [vmem:[#allocation7 + $0x828] sm:$0xff]  }
 0xaf4   :  { %14375 = vmatpush3.bf16.msra.mxu1 %v16658_v44  ;;  %v16698_v44 = vld [vmem:[#allocation7 + $0x818] sm:$0xff]   ;;  %v16703_v37 = vld [vmem:[#allocation7 + $0x870] sm:$0xff]  }
 0xaf5   :  { %14384 = vmatprep.subr.bf16.mxu1 %v16659_v39  ;;  %v16700_v39 = vld [vmem:[#allocation7 + $0x820] sm:$0xff]  }
 0xaf7   :  { %11638 = vmatmul.mubr.bf16.vlgmr.msra.gmra.mrb[36].mxu1 %v17189_v19 }
 0xaf8   :  { %14385 = vmatpush3.bf16.msra.mxu1 %v16660_v36  ;;  %12008 = vmatprep.mubr.bf16.mxu1 %v17178_v49  ;;  %v16705_v36 = vld [vmem:[#allocation7 + $0x878] sm:$0xff]  }
 0xaf9   :  { %14386 = vmatprep.subr.bf16.mxu1 %v16661_v28  ;;  %v16706_v28 = vld [vmem:[#allocation7 + $0x838] sm:$0xff]  }
 0xafc   :  { %14387 = vmatpush3.bf16.msra.mxu1 %v16662_v38 }
 0xafd   :  { %14388 = vmatprep.subr.bf16.mxu1 %v16663_v31 }
 0xb00   :  { %14389 = vmatpush3.bf16.msra.mxu1 %v16664_v41 }
 0xb01   :  { %14390 = vmatprep.subr.bf16.mxu1 %v16665_v32 }
 0xb04   :  { %14391 = vmatpush3.bf16.msra.mxu1 %v16666_v56 }
 0xb05   :  { %14392 = vmatprep.subr.bf16.mxu1 %v16667_v42 }
 0xb08   :  { %14393 = vmatpush3.bf16.msra.mxu1 %v16668_v34 }
 0xb09   :  { %14394 = vmatprep.subr.bf16.mxu1 %v16669_v47 }
 0xb0c   :  { %14395 = vmatpush3.bf16.msra.mxu1 %v16670_v48  ;;  %v16707_v48 = vld [vmem:[#allocation7 + $0x8c0] sm:$0xff]  }
 0xb0d   :  { %14396 = vmatprep.subr.bf16.mxu1 %v16671_v50 }
 0xb10   :  { %14397 = vmatpush3.bf16.msra.mxu1 %v16672_v51  ;;  %v12056_v51 = vld [vmem:[#allocation8 + $0x38] sm:$0xff] }
 0xb11   :  { %14398 = vmatprep.subr.bf16.mxu1 %v16673_v27  ;;  %v16708_v27 = vld [vmem:[#allocation7 + $0x880] sm:$0xff]  }
 0xb14   :  { %14399 = vmatpush3.bf16.msra.mxu1 %v16674_v8  ;;  %v16709_v8 = vld [vmem:[#allocation7 + $0x8c8] sm:$0xff]  }
 0xb15   :  { %14511 = vmatprep.subr.mxu1 %v16894_v18 }
 0xb17   :  { %12009 = vmatmul.mubr.bf16.vlgmr.msra.gmra.mrb[40].mxu1 %v17180_v45 }
 0xb18   :  { %14513 = vmatprep.mubr.msk.f32.mxu1 %vm16895_vm9, %v16894_v18 }
 0xbaa   :  { %v11304_v53 = vpop.f32.mrb[32].mxu1 }
 0xbab   :  { %v17263_v54 = vadd.f32 %v11304_v53, %v17252_v0  ;;  %v14505_v55 = vpop.f32.mrb[33].mxu1  ;;  %v16678_v0 = vld [vmem:[#allocation7 + $0x788] sm:$0xff]   ;;  %v16712_v53 = vld [vmem:[#allocation7 + $0x890] sm:$0xff]  }
 0xbac   :  { %v16714_v55 = vld [vmem:[#allocation7 + $0x898] sm:$0xff]  }
 0xbca   :  { %v14376_v57 = vpop.f32.mrb[36].mxu1 }
 0xbcb   :  { %v14377_v58 = vpop.f32.mrb[37].mxu1 }
 0xbcc   :  { %v14378_v40 = vadd.f32 %v14377_v58, %v14376_v57  ;;  %v14379_v59 = vpop.f32.mrb[38].mxu1  ;;  %v16715_v57 = vld [vmem:[#allocation7 + $0x8e0] sm:$0xff]  }
 0xbcd   :  { %v14380_v60 = vpop.f32.mrb[39].mxu1  ;;  %v16716_v58 = vld [vmem:[#allocation7 + $0x8a0] sm:$0xff]   ;;  %v16718_v59 = vld [vmem:[#allocation7 + $0x8a8] sm:$0xff]  }
 0xbce   :  { %v11640_v43 = vadd.f32 %v14378_v40, %v14356_v30  ;;  %v16701_v30 = vld [vmem:[#allocation7 + $0x868] sm:$0xff]   ;;  %v16719_v60 = vld [vmem:[#allocation7 + $0x8f0] sm:$0xff]  }
 0xbcf   :  { %v16717_v40 = vld [vmem:[#allocation7 + $0x8e8] sm:$0xff]  }
 0xbd0   :  { %14507 = vmatpush3.msra.mxu0 %v11640_v43 }
 0xbd1   :  { %14509 = vmatmul.mubr.msk.f32.vlgmr.msra.gmra.mrb[30].mxu0 %vm9518_vm10, %v11645_v62  ;;  %14406 = vmatprep.subr.bf16.mxu0 %v16675_v61  ;;  %v16721_v61 = vld [vmem:[#allocation7 + $0x8f8] sm:$0xff]  }
 0xbd2   :  { %14407 = vmatpush3.bf16.msra.mxu0 %v16676_v46  ;;  %12048 = vmatprep.mubr.bf16.mxu0 %v17186_v52  ;;  %v16722_v62 = vld [vmem:[#allocation7 + $0x8b8] sm:$0xff]  }
 0xbd3   :  { %14408 = vmatprep.subr.bf16.mxu0 %v16677_v63 }
 0xbd6   :  { %14409 = vmatpush3.bf16.msra.mxu0 %v16678_v0 }
 0xbd7   :  { %14410 = vmatprep.subr.bf16.mxu0 %v16679_v33 }
 0xbda   :  { %14411 = vmatpush3.bf16.msra.mxu0 %v16680_v1 }
 0xbdb   :  { %14412 = vmatprep.subr.bf16.mxu0 %v16681_v2 }
 0xbde   :  { %14413 = vmatpush3.bf16.msra.mxu0 %v16682_v3 }
 0xbdf   :  { %14414 = vmatprep.subr.bf16.mxu0 %v16683_v4 }
 0xbe2   :  { %14415 = vmatpush3.bf16.msra.mxu0 %v16684_v5 }
 0xbe3   :  { %14416 = vmatprep.subr.bf16.mxu0 %v16685_v6 }
 0xbe6   :  { %14417 = vmatpush3.bf16.msra.mxu0 %v16686_v7 }
 0xbe7   :  { %14418 = vmatprep.subr.bf16.mxu0 %v16687_v9 }
 0xbea   :  { %v14400_v13 = vpop.f32.mrb[40].mxu1  ;;  %14419 = vmatpush3.bf16.msra.mxu0 %v16688_v10 }
 0xbeb   :  { %v14401_v16 = vpop.f32.mrb[41].mxu1  ;;  %14420 = vmatprep.subr.bf16.mxu0 %v16689_v12  ;;  %v12467_v12 = vld [vmem:[#allocation8 + $0x40] sm:$0xff] }
 0xbec   :  { %v14402_v11 = vadd.f32 %v14401_v16, %v14400_v13  ;;  %v14403_v21 = vpop.f32.mrb[42].mxu1 }
 0xbed   :  { %v14404_v14 = vpop.f32.mrb[43].mxu1 }
 0xbee   :  { %14421 = vmatpush3.bf16.msra.mxu0 %v16690_v15  ;;  %v14060_v15 = vld [vmem:[#allocation10] ss:$0 sm:$0xff] }
 0xbef   :  { %14430 = vmatprep.subr.bf16.mxu0 %v16691_v20 }
 0xbf1   :  { %12049 = vmatmul.mubr.bf16.vlgmr.msra.gmra.mrb[40].mxu0 %v17189_v19 }
 0xbf2   :  { %14431 = vmatpush3.bf16.msra.mxu0 %v16692_v23  ;;  %12419 = vmatprep.mubr.bf16.mxu0 %v17178_v49  ;;  %v16704_v49 = vld [vmem:[#allocation7 + $0x830] sm:$0xff]  }
 0xbf3   :  { %14432 = vmatprep.subr.bf16.mxu0 %v16693_v24 }
 0xbf6   :  { %14433 = vmatpush3.bf16.msra.mxu0 %v16694_v17 }
 0xbf7   :  { %14434 = vmatprep.subr.bf16.mxu0 %v16695_v26 }
 0xbfa   :  { %14435 = vmatpush3.bf16.msra.mxu0 %v16696_v25 }
 0xbfb   :  { %14436 = vmatprep.subr.bf16.mxu0 %v16697_v35 }
 0xbfe   :  { %14437 = vmatpush3.bf16.msra.mxu0 %v16698_v44 }
 0xbff   :  { %14438 = vmatprep.subr.bf16.mxu0 %v16699_v29 }
 0xc02   :  { %14439 = vmatpush3.bf16.msra.mxu0 %v16700_v39 }
 0xc03   :  { %14440 = vmatprep.subr.bf16.mxu0 %v16701_v30 }
 0xc06   :  { %14441 = vmatpush3.bf16.msra.mxu0 %v16702_v22 }
 0xc07   :  { %14442 = vmatprep.subr.bf16.mxu0 %v16703_v37 }
 0xc0a   :  { %14443 = vmatpush3.bf16.msra.mxu0 %v16704_v49 }
 0xc0b   :  { %14444 = vmatprep.subr.bf16.mxu0 %v16705_v36 }
 0xc0e   :  { %14445 = vmatpush3.bf16.msra.mxu0 %v16706_v28 }
 0xc0f   :  { %14516 = vmatprep.subr.mxu0 %v16894_v18 }
 0xc11   :  { %12420 = vmatmul.mubr.bf16.vlgmr.msra.gmra.mrb[44].mxu0 %v17180_v45  ;;  %v16710_v45 = vld [vmem:[#allocation7 + $0x888] sm:$0xff]  }
 0xc12   :  { %14518 = vmatprep.mubr.msk.f32.mxu0 %vm16895_vm9, %v16894_v18  ;;  %v16711_v18 = vld [vmem:[#allocation7 + $0x8d0] sm:$0xff]  }
 0xca4   :  { %v11715_v38 = vpop.f32.mrb[30].mxu0 }
 0xca5   :  { %v11719_v31 = vadd.f32 %v11715_v38, %v17263_v54  ;;  %v14510_v41 = vpop.f32.mrb[31].mxu0  ;;  %v16713_v54 = vld [vmem:[#allocation7 + $0x8d8] sm:$0xff]  }
 0xcc4   :  { %v14422_v32 = vpop.f32.mrb[40].mxu0 }
 0xcc5   :  { %v14423_v56 = vpop.f32.mrb[41].mxu0 }
 0xcc6   :  { %v14424_v42 = vadd.f32 %v14423_v56, %v14422_v32  ;;  %v14425_v34 = vpop.f32.mrb[42].mxu0 }
 0xcc7   :  { %v14426_v47 = vpop.f32.mrb[43].mxu0 }
 0xcc8   :  { %v12051_v50 = vadd.f32 %v14424_v42, %v14402_v11 }
 0xcca   :  { %14512 = vmatpush3.msra.mxu1 %v12051_v50 }
 0xccb   :  { %14514 = vmatmul.mubr.msk.f32.vlgmr.msra.gmra.mrb[34].mxu1 %vm9518_vm10, %v12056_v51  ;;  %14452 = vmatprep.subr.bf16.mxu1 %v16707_v48 }
 0xccc   :  { %14453 = vmatpush3.bf16.msra.mxu1 %v16708_v27  ;;  %12459 = vmatprep.mubr.bf16.mxu1 %v17186_v52  ;;  %v16720_v52 = vld [vmem:[#allocation7 + $0x8b0] sm:$0xff]  }
 0xccd   :  { %14454 = vmatprep.subr.bf16.mxu1 %v16709_v8 }
 0xcd0   :  { %14455 = vmatpush3.bf16.msra.mxu1 %v16710_v45 }
 0xcd1   :  { %14456 = vmatprep.subr.bf16.mxu1 %v16711_v18 }
 0xcd4   :  { %14457 = vmatpush3.bf16.msra.mxu1 %v16712_v53 }
 0xcd5   :  { %14458 = vmatprep.subr.bf16.mxu1 %v16713_v54 }
 0xcd8   :  { %14459 = vmatpush3.bf16.msra.mxu1 %v16714_v55 }
 0xcd9   :  { %14460 = vmatprep.subr.bf16.mxu1 %v16715_v57 }
 0xcdc   :  { %14461 = vmatpush3.bf16.msra.mxu1 %v16716_v58 }
 0xcdd   :  { %14462 = vmatprep.subr.bf16.mxu1 %v16717_v40 }
 0xce0   :  { %14463 = vmatpush3.bf16.msra.mxu1 %v16718_v59 }
 0xce1   :  { %14464 = vmatprep.subr.bf16.mxu1 %v16719_v60 }
 0xce4   :  { %v14446_v43 = vpop.f32.mrb[44].mxu0  ;;  %14465 = vmatpush3.bf16.msra.mxu1 %v16720_v52 }
 0xce5   :  { %v14447_v46 = vpop.f32.mrb[45].mxu0  ;;  %14466 = vmatprep.subr.bf16.mxu1 %v16721_v61 }
 0xce6   :  { %v14448_v63 = vadd.f32 %v14447_v46, %v14446_v43  ;;  %v14449_v0 = vpop.f32.mrb[46].mxu0 }
 0xce7   :  { %v14450_v33 = vpop.f32.mrb[47].mxu0 }
 0xce8   :  { %14467 = vmatpush3.bf16.msra.mxu1 %v16722_v62 }
 0xceb   :  { %12460 = vmatmul.mubr.bf16.vlgmr.msra.gmra.mrb[44].mxu1 %v17189_v19 }
 0xd9e   :  { %v12126_v1 = vpop.f32.mrb[34].mxu1 }
 0xd9f   :  { %v12130_v2 = vadd.f32 %v12126_v1, %v11719_v31  ;;  %v14515_v3 = vpop.f32.mrb[35].mxu1 }
 0xdbe   :  { %v14468_v4 = vpop.f32.mrb[44].mxu1 }
 0xdbf   :  { %v14469_v5 = vpop.f32.mrb[45].mxu1 }
 0xdc0   :  { %v14470_v6 = vadd.f32 %v14469_v5, %v14468_v4  ;;  %v14471_v7 = vpop.f32.mrb[46].mxu1 }
 0xdc1   :  { %v14472_v9 = vpop.f32.mrb[47].mxu1 }
 0xdc2   :  { %v12462_v10 = vadd.f32 %v14470_v6, %v14448_v63 }
 0xdc4   :  { %14517 = vmatpush3.msra.mxu0 %v12462_v10 }
 0xdc5   :  { %14519 = vmatmul.mubr.msk.f32.vlgmr.msra.gmra.mrb[48].mxu0 %vm9518_vm10, %v12467_v12 }
 0xe98   :  { %v12537_v13 = vpop.f32.mrb[48].mxu0 }
 0xe99   :  { %v12541_v16 = vadd.f32 %v12537_v13, %v12130_v2  ;;  %v14520_v20 = vpop.f32.mrb[49].mxu0 }
 0xe9b   :  { %v12549_v11 = vadd.f32 %v14060_v15, %v12541_v16 }
 0xe9d   :  { %v14061_v21 = vmul.f32 -1.442695, %v12549_v11 }
 0xe9f   :  { %16739 = vpow2.f32 %v14061_v21 }
 0xea9   :  { %v16740_v19 = vpop.eup %16739 }
 0xeaa   :  { %v12553_v14 = vadd.f32 1.0, %v16740_v19 }
 0xeac   :  { %16741 = vrcp.f32 %v12553_v14 }
 0xeb6   :  { %v16742_v23 = vpop.eup %16741 }
 0xeb7   :  { %v12556_v24 = vpack.c.bf16 %v16742_v23, %v16742_v23 }
 0xeb9   :  { %12557 = vst [vmem:[#allocation11] sm:$0xf] %v12556_v24 }
 0xeba   :  { %16864 = shalt.err (!%p16861_p2)
}
 0xebb   :  { %s16865_s8 = scalar_lea.hbm %s17295_s5, 64 }
 0xebc   :  { %p16866_p3 = scmp.ne.s32.totalorder %s17295_s5, %s16865_s8  ;;  %p16869_p4 = scmp.lt.u32.totalorder %s16865_s8, %s17295_s5 }
 0xebe   :  { %p16871_p5 = pnand %p16869_p4, %p16866_p3 }
 0xec0   :  { %16874 = shalt.err (!%p16871_p5)
}
 0xec1   :  { %12567 = dma.vmem_to_hbm [thread:$0]  %s12565_s30, 64, %s17295_s5, [#allocation4]  }
 0xec2   :  { %16881 = dma.done.wait [#allocation4], 64  }
 0xec3   :  { %16882 = vsyncadd [#allocation4], 4294967232 }
 0xec4   :  { %12571 = vsyncpa [#allocation3], 1 }
 0xec5   :  { %12572 = vsyncpa [#allocation6], 1 }
 0xec6   :  { %12573 = vsyncpa [#allocation9], 1 }
 0xec7   :  { %12574 = vsyncpa [#allocation4], 1 }

</bundles_post_ra>
